<compile_context>
chip_gen: v6e
topology: v6e:2x2x1
jax: 0.10.0
libtpu: 0.0.40
codegen_flags: <defaults>
</compile_context>

<pallas_src>
import functools

import jax
import jax.numpy as jnp
from jax.experimental import pallas as pl
from jax.experimental.pallas import tpu as pltpu

CP = 128  # padded channel width (lane dimension)


# ------------------------------ Pallas kernel ------------------------------- #

def _interleave2x2(p00, p01, p10, p11):
    # y[2a+ry, 2b+rx, :] = p{ry}{rx}[a, b, :]
    H, W, C = p00.shape
    top = jnp.concatenate([p00.reshape(H, W, 1, C), p01.reshape(H, W, 1, C)], axis=2)
    bot = jnp.concatenate([p10.reshape(H, W, 1, C), p11.reshape(H, W, 1, C)], axis=2)
    top = top.reshape(H, 2 * W, C)
    bot = bot.reshape(H, 2 * W, C)
    y = jnp.concatenate(
        [top.reshape(H, 1, 2 * W, C), bot.reshape(H, 1, 2 * W, C)], axis=1)
    return y.reshape(2 * H, 2 * W, C)


def _deconv_stage(x, w_ref, b_ref, pad_ref):
    # x: (H, W, CP).  ConvTranspose2d(k=4, s=2, p=1) with fused preceding ReLU,
    # realized as 4 polyphase 2x2 convolutions; the 4 taps are fused into K = 4*CP.
    H, W, _ = x.shape
    pad_ref[...] = jnp.zeros(pad_ref.shape, pad_ref.dtype)
    pad_ref[1:H + 1, 1:W + 1, :] = jnp.maximum(x, 0.0)
    phases = []
    for ry in range(2):
        for rx in range(2):
            taps = [pad_ref[ry + ty:ry + ty + H, rx + tx:rx + tx + W, :]
                    for ty in range(2) for tx in range(2)]
            patches = jnp.concatenate(taps, axis=-1)              # (H, W, 4*CP)
            ph = jnp.einsum("hwk,kd->hwd", patches, w_ref[2 * ry + rx],
                            preferred_element_type=jnp.float32)   # (H, W, CP)
            phases.append(ph)
    return _interleave2x2(*phases) + b_ref[...]                    # (2H, 2W, CP)


def _decoder_kernel(z_ref, fcw_ref, fcb_ref,
                    w1_ref, b1_ref, w2_ref, b2_ref, w3_ref, b3_ref,
                    wc_ref, bc_ref, o_ref,
                    pad1, pad2, pad3, pad4, *, bh, bw):
    n = pl.program_id(0)

    # ---- fc prologue: (1, L) @ (L, F) + b, rearranged into NHWC (bh, bw, 128) ----
    z_row = z_ref[pl.ds(n, 1), :]
    fc = jnp.dot(z_row, fcw_ref[...],
                 preferred_element_type=jnp.float32) + fcb_ref[...]   # (1, F)
    rows = []
    for h in range(bh):
        cols = [fc[:, (h * bw + w) * CP:(h * bw + w + 1) * CP] for w in range(bw)]
        rows.append(jnp.concatenate(cols, axis=0).reshape(1, bw, CP))
    x = jnp.concatenate(rows, axis=0)                                 # (bh, bw, CP)

    # ---- three ConvTranspose2d stages (128 -> 128 -> 64 -> 32, zero-padded to 128) ----
    x = _deconv_stage(x, w1_ref, b1_ref, pad1)
    x = _deconv_stage(x, w2_ref, b2_ref, pad2)
    x = _deconv_stage(x, w3_ref, b3_ref, pad3)

    # ---- final ReLU + Conv2d(32 -> C_out, 3, padding=1), taps fused into K = 9*CP ----
    H, W, _ = x.shape
    pad4[...] = jnp.zeros(pad4.shape, pad4.dtype)
    pad4[1:H + 1, 1:W + 1, :] = jnp.maximum(x, 0.0)
    taps = [pad4[ky:ky + H, kx:kx + W, :] for ky in range(3) for kx in range(3)]
    patches = jnp.concatenate(taps, axis=-1)                          # (H, W, 9*CP)
    y = jnp.einsum("hwk,kd->hwd", patches, wc_ref[...],
                   preferred_element_type=jnp.float32) + bc_ref[...]
    o_ref[0] = y                                                      # lane-dense NHWC(128)


def conv_decoder_forward(z, kparams, output_shape):
    C_out, Hout, Wout = output_shape
    bh, bw = Hout // 8, Wout // 8
    B, L = z.shape
    F = bh * bw * CP

    kernel = functools.partial(_decoder_kernel, bh=bh, bw=bw)
    out = pl.pallas_call(
        kernel,
        out_shape=jax.ShapeDtypeStruct((B, Hout, Wout, CP), jnp.float32),
        grid_spec=pltpu.PrefetchScalarGridSpec(
            num_scalar_prefetch=0,
            grid=(B,),
            in_specs=[
                pl.BlockSpec((B, L), lambda n: (0, 0)),                # z (full)
                pl.BlockSpec((L, F), lambda n: (0, 0)),                # fc weight (permuted)
                pl.BlockSpec((1, F), lambda n: (0, 0)),                # fc bias
                pl.BlockSpec((4, 4 * CP, CP), lambda n: (0, 0, 0)),    # d1 phase weights
                pl.BlockSpec((1, CP), lambda n: (0, 0)),               # d1 bias
                pl.BlockSpec((4, 4 * CP, CP), lambda n: (0, 0, 0)),    # d2
                pl.BlockSpec((1, CP), lambda n: (0, 0)),
                pl.BlockSpec((4, 4 * CP, CP), lambda n: (0, 0, 0)),    # d3
                pl.BlockSpec((1, CP), lambda n: (0, 0)),
                pl.BlockSpec((9 * CP, CP), lambda n: (0, 0)),          # final conv weight
                pl.BlockSpec((1, CP), lambda n: (0, 0)),               # final conv bias
            ],
            out_specs=pl.BlockSpec((1, Hout, Wout, CP), lambda n: (n, 0, 0, 0)),
            scratch_shapes=[
                pltpu.VMEM((bh + 2, bw + 2, CP), jnp.float32),
                pltpu.VMEM((2 * bh + 2, 2 * bw + 2, CP), jnp.float32),
                pltpu.VMEM((4 * bh + 2, 4 * bw + 2, CP), jnp.float32),
                pltpu.VMEM((8 * bh + 2, 8 * bw + 2, CP), jnp.float32),
            ],
        ),
        compiler_params=pltpu.CompilerParams(
            dimension_semantics=("parallel",),
            vmem_limit_bytes=32 * 1024 * 1024),
    )(z, kparams["fc_w"], kparams["fc_b"],
      kparams["d1_w"], kparams["d1_b"],
      kparams["d2_w"], kparams["d2_b"],
      kparams["d3_w"], kparams["d3_b"],
      kparams["c_w"], kparams["c_b"])

    # Trim the channel padding and go NHWC -> NCHW with one tiny XLA op.
    return out[..., :C_out].transpose(0, 3, 1, 2)


# -------------------- PyTorch-layout params -> kernel layout ------------------ #

def prepare_kernel_params(raw, output_shape):
    C_out, Hout, Wout = output_shape
    bh, bw = Hout // 8, Wout // 8
    F = bh * bw * CP
    L = raw["fc_w"].shape[1]

    # fc: Linear weight (F, L) with output order (c, h, w); permute to (h, w, c) so the
    # kernel's 128-lane blocks are already NHWC, then transpose to (L, F).
    fc_w = raw["fc_w"].reshape(CP, bh, bw, L).transpose(1, 2, 0, 3).reshape(F, L).T
    fc_b = raw["fc_b"].reshape(CP, bh, bw).transpose(1, 2, 0).reshape(1, F)

    def deconv_phase_weight(wt):
        # wt: ConvTranspose2d weight (Cin, Cout, 4, 4) -> (4 phases, 4*CP, CP).
        # Phase (ry, rx), tap (ty, tx) uses kernel element (3-ry-2*ty, 3-rx-2*tx).
        cin, cout = wt.shape[0], wt.shape[1]
        w = jnp.zeros((2, 2, 2, 2, CP, CP), jnp.float32)
        for ry in range(2):
            for rx in range(2):
                for ty in range(2):
                    for tx in range(2):
                        w = w.at[ry, rx, ty, tx, :cin, :cout].set(
                            wt[:, :, 3 - ry - 2 * ty, 3 - rx - 2 * tx])
        return w.reshape(4, 4 * CP, CP)

    def conv_weight(wc):
        # wc: Conv2d weight (Cout, Cin, 3, 3) -> (9*CP, CP), taps (ky, kx) major.
        cout, cin = wc.shape[0], wc.shape[1]
        w = jnp.zeros((9, CP, CP), jnp.float32)
        w = w.at[:, :cin, :cout].set(wc.transpose(2, 3, 1, 0).reshape(9, cin, cout))
        return w.reshape(9 * CP, CP)

    def pad_bias(b):
        return jnp.zeros((1, CP), jnp.float32).at[0, :b.shape[0]].set(b)

    return dict(
        fc_w=fc_w, fc_b=fc_b,
        d1_w=deconv_phase_weight(raw["d1_w"]), d1_b=pad_bias(raw["d1_b"]),
        d2_w=deconv_phase_weight(raw["d2_w"]), d2_b=pad_bias(raw["d2_b"]),
        d3_w=deconv_phase_weight(raw["d3_w"]), d3_b=pad_bias(raw["d3_b"]),
        c_w=conv_weight(raw["c_w"]), c_b=pad_bias(raw["c_b"]),
    )


# ------------------- pure-JAX reference (mirrors PyTorch math) ----------------- #

def conv_decoder_reference(z, raw, output_shape):
    C_out, Hout, Wout = output_shape
    bh, bw = Hout // 8, Wout // 8
    B = z.shape[0]

    out = z @ raw["fc_w"].T + raw["fc_b"]
    x = out.reshape(B, 128, bh, bw).transpose(0, 2, 3, 1)          # NHWC

    def tconv(x, wt, b):
        # ConvTranspose2d(k=4, s=2, p=1) = zero-insert + pad(k-1-p) + flipped-weight conv.
        B_, H, W, _ = x.shape
        cout = wt.shape[1]
        xu = jnp.zeros((B_, 2 * H - 1, 2 * W - 1, x.shape[-1]), x.dtype)
        xu = xu.at[:, ::2, ::2, :].set(x)
        xp = jnp.pad(xu, ((0, 0), (2, 2), (2, 2), (0, 0)))
        wf = jnp.flip(wt, axis=(2, 3)).transpose(2, 3, 0, 1)       # (k, k, Cin, Cout)
        acc = jnp.zeros((B_, 2 * H, 2 * W, cout), jnp.float32)
        for ky in range(4):
            for kx in range(4):
                acc = acc + jnp.einsum(
                    "bhwc,cd->bhwd", xp[:, ky:ky + 2 * H, kx:kx + 2 * W, :], wf[ky, kx])
        return acc + b

    def conv3(x, wc, b):
        B_, H, W, _ = x.shape
        xp = jnp.pad(x, ((0, 0), (1, 1), (1, 1), (0, 0)))
        wm = wc.transpose(2, 3, 1, 0)
        acc = jnp.zeros((B_, H, W, wc.shape[0]), jnp.float32)
        for ky in range(3):
            for kx in range(3):
                acc = acc + jnp.einsum(
                    "bhwc,cd->bhwd", xp[:, ky:ky + H, kx:kx + W, :], wm[ky, kx])
        return acc + b

    x = tconv(jnp.maximum(x, 0.0), raw["d1_w"], raw["d1_b"])
    x = tconv(jnp.maximum(x, 0.0), raw["d2_w"], raw["d2_b"])
    x = tconv(jnp.maximum(x, 0.0), raw["d3_w"], raw["d3_b"])
    y = conv3(jnp.maximum(x, 0.0), raw["c_w"], raw["c_b"])
    return y.transpose(0, 3, 1, 2)                                  # NCHW


# -------------------------------- parameter init -------------------------------- #

def init_raw_params(key, latent_dim, output_shape):
    C_out, Hout, Wout = output_shape
    bh, bw = Hout // 8, Wout // 8
    F = 128 * bh * bw
    ks = jax.random.split(key, 10)

    def rnd(k, shape, scale=0.05):
        return jax.random.normal(k, shape, jnp.float32) * scale

    return dict(
        fc_w=rnd(ks[0], (F, latent_dim)),        # Linear: (out_features, in_features)
        fc_b=rnd(ks[1], (F,)),
        d1_w=rnd(ks[2], (128, 128, 4, 4)),       # ConvTranspose2d: (Cin, Cout, kH, kW)
        d1_b=rnd(ks[3], (128,)),
        d2_w=rnd(ks[4], (128, 64, 4, 4)),
        d2_b=rnd(ks[5], (64,)),
        d3_w=rnd(ks[6], (64, 32, 4, 4)),
        d3_b=rnd(ks[7], (32,)),
        c_w=rnd(ks[8], (C_out, 32, 3, 3)),       # Conv2d: (Cout, Cin, kH, kW)
        c_b=rnd(ks[9], (C_out,)),
    )


# ------------------------------------- main ------------------------------------- #

if __name__ == "__main__":
    latent_dim = 32
    output_shape = (4, 16, 16)    # (C, H, W); base grid = (128, 2, 2)
    batch = 2

    key = jax.random.PRNGKey(0)
    kz, kp = jax.random.split(key)
    z = jax.random.normal(kz, (batch, latent_dim), jnp.float32)
    raw = init_raw_params(kp, latent_dim, output_shape)
    kparams = prepare_kernel_params(raw, output_shape)

    fwd = jax.jit(functools.partial(conv_decoder_forward, output_shape=output_shape))
    y = jax.block_until_ready(fwd(z, kparams))
    assert y.shape == (batch, *output_shape), y.shape

    y_ref = conv_decoder_reference(z, raw, output_shape)
    err = float(jnp.max(jnp.abs(y - y_ref)))
    assert err < 2e-3, f"mismatch vs pure-JAX reference: {err}"

    print("KERNEL_OK")
</pallas_src>

<mosaic_0001>
module attributes {stable_mosaic.version = 11 : i64} {
  func.func @_decoder_kernel(%arg0: i32, %arg1: memref<2x32xf32, #tpu.memory_space<vmem>>, %arg2: memref<32x512xf32, #tpu.memory_space<vmem>>, %arg3: memref<1x512xf32, #tpu.memory_space<vmem>>, %arg4: memref<4x512x128xf32, #tpu.memory_space<vmem>>, %arg5: memref<1x128xf32, #tpu.memory_space<vmem>>, %arg6: memref<4x512x128xf32, #tpu.memory_space<vmem>>, %arg7: memref<1x128xf32, #tpu.memory_space<vmem>>, %arg8: memref<4x512x128xf32, #tpu.memory_space<vmem>>, %arg9: memref<1x128xf32, #tpu.memory_space<vmem>>, %arg10: memref<1152x128xf32, #tpu.memory_space<vmem>>, %arg11: memref<1x128xf32, #tpu.memory_space<vmem>>, %arg12: memref<1x16x16x128xf32, #tpu.memory_space<vmem>>, %arg13: memref<4x4x128xf32, #tpu.memory_space<vmem>>, %arg14: memref<6x6x128xf32, #tpu.memory_space<vmem>>, %arg15: memref<10x10x128xf32, #tpu.memory_space<vmem>>, %arg16: memref<18x18x128xf32, #tpu.memory_space<vmem>>) attributes {dimension_semantics = [#tpu.dimension_semantics<parallel>], iteration_bounds = array<i64: 2>, scalar_prefetch = 0 : i64, scratch_operands = 4 : i64, tpu.core_type = #tpu.core_type<tc>, window_params = [{pipeline_mode = #tpu.pipeline_mode<synchronous>, transform_indices = @transform_0, window_bounds = array<i64: 2, 32>}, {pipeline_mode = #tpu.pipeline_mode<synchronous>, transform_indices = @transform_1, window_bounds = array<i64: 32, 512>}, {pipeline_mode = #tpu.pipeline_mode<synchronous>, transform_indices = @transform_2, window_bounds = array<i64: 1, 512>}, {pipeline_mode = #tpu.pipeline_mode<synchronous>, transform_indices = @transform_3, window_bounds = array<i64: 4, 512, 128>}, {pipeline_mode = #tpu.pipeline_mode<synchronous>, transform_indices = @transform_4, window_bounds = array<i64: 1, 128>}, {pipeline_mode = #tpu.pipeline_mode<synchronous>, transform_indices = @transform_5, window_bounds = array<i64: 4, 512, 128>}, {pipeline_mode = #tpu.pipeline_mode<synchronous>, transform_indices = @transform_6, window_bounds = array<i64: 1, 128>}, {pipeline_mode = #tpu.pipeline_mode<synchronous>, transform_indices = @transform_7, window_bounds = array<i64: 4, 512, 128>}, {pipeline_mode = #tpu.pipeline_mode<synchronous>, transform_indices = @transform_8, window_bounds = array<i64: 1, 128>}, {pipeline_mode = #tpu.pipeline_mode<synchronous>, transform_indices = @transform_9, window_bounds = array<i64: 1152, 128>}, {pipeline_mode = #tpu.pipeline_mode<synchronous>, transform_indices = @transform_10, window_bounds = array<i64: 1, 128>}, {transform_indices = @transform_11, window_bounds = array<i64: 1, 16, 16, 128>}]} {
    %0 = arith.index_cast %arg0 : i32 to index
    %c0 = arith.constant 0 : index
    %1 = vector.load %arg1[%0, %c0] : memref<2x32xf32, #tpu.memory_space<vmem>>, vector<1x32xf32>
    %c0_0 = arith.constant 0 : index
    %c0_1 = arith.constant 0 : index
    %2 = vector.load %arg2[%c0_0, %c0_1] : memref<32x512xf32, #tpu.memory_space<vmem>>, vector<32x512xf32>
    %cst = arith.constant dense<0.000000e+00> : vector<1x512xf32>
    %3 = tpu.matmul %1, %2, %cst {dimension_numbers = #tpu.dot_dimension_numbers<[1], [0], [0], [1], [0, 0, 1, 1], [], []>} : vector<1x32xf32>, vector<32x512xf32>, vector<1x512xf32> -> vector<1x512xf32>
    %c0_2 = arith.constant 0 : index
    %c0_3 = arith.constant 0 : index
    %4 = vector.load %arg3[%c0_2, %c0_3] : memref<1x512xf32, #tpu.memory_space<vmem>>, vector<1x512xf32>
    %5 = arith.addf %3, %4 : vector<1x512xf32>
    %6 = vector.extract_strided_slice %5 {offsets = [0, 0], sizes = [1, 128], strides = [1, 1]} : vector<1x512xf32> to vector<1x128xf32>
    %7 = vector.extract_strided_slice %5 {offsets = [0, 128], sizes = [1, 128], strides = [1, 1]} : vector<1x512xf32> to vector<1x128xf32>
    %8 = tpu.concatenate %6, %7 in 0 : vector<1x128xf32>, vector<1x128xf32> -> vector<2x128xf32>
    %9 = vector.shape_cast %8 : vector<2x128xf32> to vector<1x2x128xf32>
    %10 = vector.extract_strided_slice %5 {offsets = [0, 256], sizes = [1, 128], strides = [1, 1]} : vector<1x512xf32> to vector<1x128xf32>
    %11 = vector.extract_strided_slice %5 {offsets = [0, 384], sizes = [1, 128], strides = [1, 1]} : vector<1x512xf32> to vector<1x128xf32>
    %12 = tpu.concatenate %10, %11 in 0 : vector<1x128xf32>, vector<1x128xf32> -> vector<2x128xf32>
    %13 = vector.shape_cast %12 : vector<2x128xf32> to vector<1x2x128xf32>
    %14 = tpu.concatenate %9, %13 in 0 : vector<1x2x128xf32>, vector<1x2x128xf32> -> vector<2x2x128xf32>
    %cst_4 = arith.constant 0.000000e+00 : f32
    %15 = vector.broadcast %cst_4 : f32 to vector<4x4x128xf32>
    %c0_5 = arith.constant 0 : index
    %c0_6 = arith.constant 0 : index
    %c0_7 = arith.constant 0 : index
    %16 = vector.load %arg13[%c0_5, %c0_6, %c0_7] : memref<4x4x128xf32, #tpu.memory_space<vmem>>, vector<4x4x128xf32>
    tpu.vector_store %arg13[%c0_5, %c0_6, %c0_7], %15 {strides = array<i32>} : memref<4x4x128xf32, #tpu.memory_space<vmem>>, vector<4x4x128xf32>,
    %cst_8 = arith.constant 0.000000e+00 : f32
    %17 = vector.broadcast %cst_8 : f32 to vector<2x2x128xf32>
    %18 = arith.maximumf %14, %17 : vector<2x2x128xf32>
    %c1 = arith.constant 1 : index
    %c1_9 = arith.constant 1 : index
    %c0_10 = arith.constant 0 : index
    %19 = vector.load %arg13[%c1, %c1_9, %c0_10] : memref<4x4x128xf32, #tpu.memory_space<vmem>>, vector<2x2x128xf32>
    tpu.vector_store %arg13[%c1, %c1_9, %c0_10], %18 {strides = array<i32>} : memref<4x4x128xf32, #tpu.memory_space<vmem>>, vector<2x2x128xf32>,
    %c0_11 = arith.constant 0 : index
    %c0_12 = arith.constant 0 : index
    %c0_13 = arith.constant 0 : index
    %20 = vector.load %arg13[%c0_11, %c0_12, %c0_13] : memref<4x4x128xf32, #tpu.memory_space<vmem>>, vector<2x2x128xf32>
    %c0_14 = arith.constant 0 : index
    %c1_15 = arith.constant 1 : index
    %c0_16 = arith.constant 0 : index
    %21 = vector.load %arg13[%c0_14, %c1_15, %c0_16] : memref<4x4x128xf32, #tpu.memory_space<vmem>>, vector<2x2x128xf32>
    %c1_17 = arith.constant 1 : index
    %c0_18 = arith.constant 0 : index
    %c0_19 = arith.constant 0 : index
    %22 = vector.load %arg13[%c1_17, %c0_18, %c0_19] : memref<4x4x128xf32, #tpu.memory_space<vmem>>, vector<2x2x128xf32>
    %c1_20 = arith.constant 1 : index
    %c1_21 = arith.constant 1 : index
    %c0_22 = arith.constant 0 : index
    %23 = vector.load %arg13[%c1_20, %c1_21, %c0_22] : memref<4x4x128xf32, #tpu.memory_space<vmem>>, vector<2x2x128xf32>
    %24 = tpu.concatenate %20, %21, %22, %23 in 2 : vector<2x2x128xf32>, vector<2x2x128xf32>, vector<2x2x128xf32>, vector<2x2x128xf32> -> vector<2x2x512xf32>
    %c0_23 = arith.constant 0 : index
    %c0_24 = arith.constant 0 : index
    %c0_25 = arith.constant 0 : index
    %25 = vector.load %arg4[%c0_23, %c0_24, %c0_25] : memref<4x512x128xf32, #tpu.memory_space<vmem>>, vector<1x512x128xf32>
    %26 = vector.shape_cast %25 : vector<1x512x128xf32> to vector<512x128xf32>
    "tpu.trace_start"() <{level = 10 : i32, message = "hwk,kd->hwd"}> : () -> ()
    %cst_26 = arith.constant dense<0.000000e+00> : vector<2x2x128xf32>
    %27 = tpu.matmul %24, %26, %cst_26 {dimension_numbers = #tpu.dot_dimension_numbers<[2], [0], [0, 1], [1], [0, 0, 0, 1, 1, 1], [], []>} : vector<2x2x512xf32>, vector<512x128xf32>, vector<2x2x128xf32> -> vector<2x2x128xf32>
    "tpu.trace_stop"() : () -> ()
    %c0_27 = arith.constant 0 : index
    %c1_28 = arith.constant 1 : index
    %c0_29 = arith.constant 0 : index
    %28 = vector.load %arg13[%c0_27, %c1_28, %c0_29] : memref<4x4x128xf32, #tpu.memory_space<vmem>>, vector<2x2x128xf32>
    %c0_30 = arith.constant 0 : index
    %c2 = arith.constant 2 : index
    %c0_31 = arith.constant 0 : index
    %29 = vector.load %arg13[%c0_30, %c2, %c0_31] : memref<4x4x128xf32, #tpu.memory_space<vmem>>, vector<2x2x128xf32>
    %c1_32 = arith.constant 1 : index
    %c1_33 = arith.constant 1 : index
    %c0_34 = arith.constant 0 : index
    %30 = vector.load %arg13[%c1_32, %c1_33, %c0_34] : memref<4x4x128xf32, #tpu.memory_space<vmem>>, vector<2x2x128xf32>
    %c1_35 = arith.constant 1 : index
    %c2_36 = arith.constant 2 : index
    %c0_37 = arith.constant 0 : index
    %31 = vector.load %arg13[%c1_35, %c2_36, %c0_37] : memref<4x4x128xf32, #tpu.memory_space<vmem>>, vector<2x2x128xf32>
    %32 = tpu.concatenate %28, %29, %30, %31 in 2 : vector<2x2x128xf32>, vector<2x2x128xf32>, vector<2x2x128xf32>, vector<2x2x128xf32> -> vector<2x2x512xf32>
    %c1_38 = arith.constant 1 : index
    %c0_39 = arith.constant 0 : index
    %c0_40 = arith.constant 0 : index
    %33 = vector.load %arg4[%c1_38, %c0_39, %c0_40] : memref<4x512x128xf32, #tpu.memory_space<vmem>>, vector<1x512x128xf32>
    %34 = vector.shape_cast %33 : vector<1x512x128xf32> to vector<512x128xf32>
    "tpu.trace_start"() <{level = 10 : i32, message = "hwk,kd->hwd"}> : () -> ()
    %cst_41 = arith.constant dense<0.000000e+00> : vector<2x2x128xf32>
    %35 = tpu.matmul %32, %34, %cst_41 {dimension_numbers = #tpu.dot_dimension_numbers<[2], [0], [0, 1], [1], [0, 0, 0, 1, 1, 1], [], []>} : vector<2x2x512xf32>, vector<512x128xf32>, vector<2x2x128xf32> -> vector<2x2x128xf32>
    "tpu.trace_stop"() : () -> ()
    %c1_42 = arith.constant 1 : index
    %c0_43 = arith.constant 0 : index
    %c0_44 = arith.constant 0 : index
    %36 = vector.load %arg13[%c1_42, %c0_43, %c0_44] : memref<4x4x128xf32, #tpu.memory_space<vmem>>, vector<2x2x128xf32>
    %c1_45 = arith.constant 1 : index
    %c1_46 = arith.constant 1 : index
    %c0_47 = arith.constant 0 : index
    %37 = vector.load %arg13[%c1_45, %c1_46, %c0_47] : memref<4x4x128xf32, #tpu.memory_space<vmem>>, vector<2x2x128xf32>
    %c2_48 = arith.constant 2 : index
    %c0_49 = arith.constant 0 : index
    %c0_50 = arith.constant 0 : index
    %38 = vector.load %arg13[%c2_48, %c0_49, %c0_50] : memref<4x4x128xf32, #tpu.memory_space<vmem>>, vector<2x2x128xf32>
    %c2_51 = arith.constant 2 : index
    %c1_52 = arith.constant 1 : index
    %c0_53 = arith.constant 0 : index
    %39 = vector.load %arg13[%c2_51, %c1_52, %c0_53] : memref<4x4x128xf32, #tpu.memory_space<vmem>>, vector<2x2x128xf32>
    %40 = tpu.concatenate %36, %37, %38, %39 in 2 : vector<2x2x128xf32>, vector<2x2x128xf32>, vector<2x2x128xf32>, vector<2x2x128xf32> -> vector<2x2x512xf32>
    %c2_54 = arith.constant 2 : index
    %c0_55 = arith.constant 0 : index
    %c0_56 = arith.constant 0 : index
    %41 = vector.load %arg4[%c2_54, %c0_55, %c0_56] : memref<4x512x128xf32, #tpu.memory_space<vmem>>, vector<1x512x128xf32>
    %42 = vector.shape_cast %41 : vector<1x512x128xf32> to vector<512x128xf32>
    "tpu.trace_start"() <{level = 10 : i32, message = "hwk,kd->hwd"}> : () -> ()
    %cst_57 = arith.constant dense<0.000000e+00> : vector<2x2x128xf32>
    %43 = tpu.matmul %40, %42, %cst_57 {dimension_numbers = #tpu.dot_dimension_numbers<[2], [0], [0, 1], [1], [0, 0, 0, 1, 1, 1], [], []>} : vector<2x2x512xf32>, vector<512x128xf32>, vector<2x2x128xf32> -> vector<2x2x128xf32>
    "tpu.trace_stop"() : () -> ()
    %c1_58 = arith.constant 1 : index
    %c1_59 = arith.constant 1 : index
    %c0_60 = arith.constant 0 : index
    %44 = vector.load %arg13[%c1_58, %c1_59, %c0_60] : memref<4x4x128xf32, #tpu.memory_space<vmem>>, vector<2x2x128xf32>
    %c1_61 = arith.constant 1 : index
    %c2_62 = arith.constant 2 : index
    %c0_63 = arith.constant 0 : index
    %45 = vector.load %arg13[%c1_61, %c2_62, %c0_63] : memref<4x4x128xf32, #tpu.memory_space<vmem>>, vector<2x2x128xf32>
    %c2_64 = arith.constant 2 : index
    %c1_65 = arith.constant 1 : index
    %c0_66 = arith.constant 0 : index
    %46 = vector.load %arg13[%c2_64, %c1_65, %c0_66] : memref<4x4x128xf32, #tpu.memory_space<vmem>>, vector<2x2x128xf32>
    %c2_67 = arith.constant 2 : index
    %c2_68 = arith.constant 2 : index
    %c0_69 = arith.constant 0 : index
    %47 = vector.load %arg13[%c2_67, %c2_68, %c0_69] : memref<4x4x128xf32, #tpu.memory_space<vmem>>, vector<2x2x128xf32>
    %48 = tpu.concatenate %44, %45, %46, %47 in 2 : vector<2x2x128xf32>, vector<2x2x128xf32>, vector<2x2x128xf32>, vector<2x2x128xf32> -> vector<2x2x512xf32>
    %c3 = arith.constant 3 : index
    %c0_70 = arith.constant 0 : index
    %c0_71 = arith.constant 0 : index
    %49 = vector.load %arg4[%c3, %c0_70, %c0_71] : memref<4x512x128xf32, #tpu.memory_space<vmem>>, vector<1x512x128xf32>
    %50 = vector.shape_cast %49 : vector<1x512x128xf32> to vector<512x128xf32>
    "tpu.trace_start"() <{level = 10 : i32, message = "hwk,kd->hwd"}> : () -> ()
    %cst_72 = arith.constant dense<0.000000e+00> : vector<2x2x128xf32>
    %51 = tpu.matmul %48, %50, %cst_72 {dimension_numbers = #tpu.dot_dimension_numbers<[2], [0], [0, 1], [1], [0, 0, 0, 1, 1, 1], [], []>} : vector<2x2x512xf32>, vector<512x128xf32>, vector<2x2x128xf32> -> vector<2x2x128xf32>
    "tpu.trace_stop"() : () -> ()
    %52 = vector.shape_cast %27 : vector<2x2x128xf32> to vector<2x2x1x128xf32>
    %53 = vector.shape_cast %35 : vector<2x2x128xf32> to vector<2x2x1x128xf32>
    %54 = tpu.concatenate %52, %53 in 2 : vector<2x2x1x128xf32>, vector<2x2x1x128xf32> -> vector<2x2x2x128xf32>
    %55 = vector.shape_cast %43 : vector<2x2x128xf32> to vector<2x2x1x128xf32>
    %56 = vector.shape_cast %51 : vector<2x2x128xf32> to vector<2x2x1x128xf32>
    %57 = tpu.concatenate %55, %56 in 2 : vector<2x2x1x128xf32>, vector<2x2x1x128xf32> -> vector<2x2x2x128xf32>
    %58 = vector.shape_cast %54 : vector<2x2x2x128xf32> to vector<2x4x128xf32>
    %59 = vector.shape_cast %57 : vector<2x2x2x128xf32> to vector<2x4x128xf32>
    %60 = vector.shape_cast %58 : vector<2x4x128xf32> to vector<2x1x4x128xf32>
    %61 = vector.shape_cast %59 : vector<2x4x128xf32> to vector<2x1x4x128xf32>
    %62 = tpu.concatenate %60, %61 in 1 : vector<2x1x4x128xf32>, vector<2x1x4x128xf32> -> vector<2x2x4x128xf32>
    %63 = vector.shape_cast %62 : vector<2x2x4x128xf32> to vector<4x4x128xf32>
    %c0_73 = arith.constant 0 : index
    %c0_74 = arith.constant 0 : index
    %64 = vector.load %arg5[%c0_73, %c0_74] : memref<1x128xf32, #tpu.memory_space<vmem>>, vector<1x128xf32>
    %65 = vector.shape_cast %64 : vector<1x128xf32> to vector<1x1x128xf32>
    %66 = vector.broadcast %65 : vector<1x1x128xf32> to vector<4x4x128xf32>
    %67 = arith.addf %63, %66 : vector<4x4x128xf32>
    %cst_75 = arith.constant 0.000000e+00 : f32
    %68 = vector.broadcast %cst_75 : f32 to vector<6x6x128xf32>
    %c0_76 = arith.constant 0 : index
    %c0_77 = arith.constant 0 : index
    %c0_78 = arith.constant 0 : index
    %69 = vector.load %arg14[%c0_76, %c0_77, %c0_78] : memref<6x6x128xf32, #tpu.memory_space<vmem>>, vector<6x6x128xf32>
    tpu.vector_store %arg14[%c0_76, %c0_77, %c0_78], %68 {strides = array<i32>} : memref<6x6x128xf32, #tpu.memory_space<vmem>>, vector<6x6x128xf32>,
    %cst_79 = arith.constant 0.000000e+00 : f32
    %70 = vector.broadcast %cst_79 : f32 to vector<4x4x128xf32>
    %71 = arith.maximumf %67, %70 : vector<4x4x128xf32>
    %c1_80 = arith.constant 1 : index
    %c1_81 = arith.constant 1 : index
    %c0_82 = arith.constant 0 : index
    %72 = vector.load %arg14[%c1_80, %c1_81, %c0_82] : memref<6x6x128xf32, #tpu.memory_space<vmem>>, vector<4x4x128xf32>
    tpu.vector_store %arg14[%c1_80, %c1_81, %c0_82], %71 {strides = array<i32>} : memref<6x6x128xf32, #tpu.memory_space<vmem>>, vector<4x4x128xf32>,
    %c0_83 = arith.constant 0 : index
    %c0_84 = arith.constant 0 : index
    %c0_85 = arith.constant 0 : index
    %73 = vector.load %arg14[%c0_83, %c0_84, %c0_85] : memref<6x6x128xf32, #tpu.memory_space<vmem>>, vector<4x4x128xf32>
    %c0_86 = arith.constant 0 : index
    %c1_87 = arith.constant 1 : index
    %c0_88 = arith.constant 0 : index
    %74 = vector.load %arg14[%c0_86, %c1_87, %c0_88] : memref<6x6x128xf32, #tpu.memory_space<vmem>>, vector<4x4x128xf32>
    %c1_89 = arith.constant 1 : index
    %c0_90 = arith.constant 0 : index
    %c0_91 = arith.constant 0 : index
    %75 = vector.load %arg14[%c1_89, %c0_90, %c0_91] : memref<6x6x128xf32, #tpu.memory_space<vmem>>, vector<4x4x128xf32>
    %c1_92 = arith.constant 1 : index
    %c1_93 = arith.constant 1 : index
    %c0_94 = arith.constant 0 : index
    %76 = vector.load %arg14[%c1_92, %c1_93, %c0_94] : memref<6x6x128xf32, #tpu.memory_space<vmem>>, vector<4x4x128xf32>
    %77 = tpu.concatenate %73, %74, %75, %76 in 2 : vector<4x4x128xf32>, vector<4x4x128xf32>, vector<4x4x128xf32>, vector<4x4x128xf32> -> vector<4x4x512xf32>
    %c0_95 = arith.constant 0 : index
    %c0_96 = arith.constant 0 : index
    %c0_97 = arith.constant 0 : index
    %78 = vector.load %arg6[%c0_95, %c0_96, %c0_97] : memref<4x512x128xf32, #tpu.memory_space<vmem>>, vector<1x512x128xf32>
    %79 = vector.shape_cast %78 : vector<1x512x128xf32> to vector<512x128xf32>
    "tpu.trace_start"() <{level = 10 : i32, message = "hwk,kd->hwd"}> : () -> ()
    %cst_98 = arith.constant dense<0.000000e+00> : vector<4x4x128xf32>
    %80 = tpu.matmul %77, %79, %cst_98 {dimension_numbers = #tpu.dot_dimension_numbers<[2], [0], [0, 1], [1], [0, 0, 0, 1, 1, 1], [], []>} : vector<4x4x512xf32>, vector<512x128xf32>, vector<4x4x128xf32> -> vector<4x4x128xf32>
    "tpu.trace_stop"() : () -> ()
    %c0_99 = arith.constant 0 : index
    %c1_100 = arith.constant 1 : index
    %c0_101 = arith.constant 0 : index
    %81 = vector.load %arg14[%c0_99, %c1_100, %c0_101] : memref<6x6x128xf32, #tpu.memory_space<vmem>>, vector<4x4x128xf32>
    %c0_102 = arith.constant 0 : index
    %c2_103 = arith.constant 2 : index
    %c0_104 = arith.constant 0 : index
    %82 = vector.load %arg14[%c0_102, %c2_103, %c0_104] : memref<6x6x128xf32, #tpu.memory_space<vmem>>, vector<4x4x128xf32>
    %c1_105 = arith.constant 1 : index
    %c1_106 = arith.constant 1 : index
    %c0_107 = arith.constant 0 : index
    %83 = vector.load %arg14[%c1_105, %c1_106, %c0_107] : memref<6x6x128xf32, #tpu.memory_space<vmem>>, vector<4x4x128xf32>
    %c1_108 = arith.constant 1 : index
    %c2_109 = arith.constant 2 : index
    %c0_110 = arith.constant 0 : index
    %84 = vector.load %arg14[%c1_108, %c2_109, %c0_110] : memref<6x6x128xf32, #tpu.memory_space<vmem>>, vector<4x4x128xf32>
    %85 = tpu.concatenate %81, %82, %83, %84 in 2 : vector<4x4x128xf32>, vector<4x4x128xf32>, vector<4x4x128xf32>, vector<4x4x128xf32> -> vector<4x4x512xf32>
    %c1_111 = arith.constant 1 : index
    %c0_112 = arith.constant 0 : index
    %c0_113 = arith.constant 0 : index
    %86 = vector.load %arg6[%c1_111, %c0_112, %c0_113] : memref<4x512x128xf32, #tpu.memory_space<vmem>>, vector<1x512x128xf32>
    %87 = vector.shape_cast %86 : vector<1x512x128xf32> to vector<512x128xf32>
    "tpu.trace_start"() <{level = 10 : i32, message = "hwk,kd->hwd"}> : () -> ()
    %cst_114 = arith.constant dense<0.000000e+00> : vector<4x4x128xf32>
    %88 = tpu.matmul %85, %87, %cst_114 {dimension_numbers = #tpu.dot_dimension_numbers<[2], [0], [0, 1], [1], [0, 0, 0, 1, 1, 1], [], []>} : vector<4x4x512xf32>, vector<512x128xf32>, vector<4x4x128xf32> -> vector<4x4x128xf32>
    "tpu.trace_stop"() : () -> ()
    %c1_115 = arith.constant 1 : index
    %c0_116 = arith.constant 0 : index
    %c0_117 = arith.constant 0 : index
    %89 = vector.load %arg14[%c1_115, %c0_116, %c0_117] : memref<6x6x128xf32, #tpu.memory_space<vmem>>, vector<4x4x128xf32>
    %c1_118 = arith.constant 1 : index
    %c1_119 = arith.constant 1 : index
    %c0_120 = arith.constant 0 : index
    %90 = vector.load %arg14[%c1_118, %c1_119, %c0_120] : memref<6x6x128xf32, #tpu.memory_space<vmem>>, vector<4x4x128xf32>
    %c2_121 = arith.constant 2 : index
    %c0_122 = arith.constant 0 : index
    %c0_123 = arith.constant 0 : index
    %91 = vector.load %arg14[%c2_121, %c0_122, %c0_123] : memref<6x6x128xf32, #tpu.memory_space<vmem>>, vector<4x4x128xf32>
    %c2_124 = arith.constant 2 : index
    %c1_125 = arith.constant 1 : index
    %c0_126 = arith.constant 0 : index
    %92 = vector.load %arg14[%c2_124, %c1_125, %c0_126] : memref<6x6x128xf32, #tpu.memory_space<vmem>>, vector<4x4x128xf32>
    %93 = tpu.concatenate %89, %90, %91, %92 in 2 : vector<4x4x128xf32>, vector<4x4x128xf32>, vector<4x4x128xf32>, vector<4x4x128xf32> -> vector<4x4x512xf32>
    %c2_127 = arith.constant 2 : index
    %c0_128 = arith.constant 0 : index
    %c0_129 = arith.constant 0 : index
    %94 = vector.load %arg6[%c2_127, %c0_128, %c0_129] : memref<4x512x128xf32, #tpu.memory_space<vmem>>, vector<1x512x128xf32>
    %95 = vector.shape_cast %94 : vector<1x512x128xf32> to vector<512x128xf32>
    "tpu.trace_start"() <{level = 10 : i32, message = "hwk,kd->hwd"}> : () -> ()
    %cst_130 = arith.constant dense<0.000000e+00> : vector<4x4x128xf32>
    %96 = tpu.matmul %93, %95, %cst_130 {dimension_numbers = #tpu.dot_dimension_numbers<[2], [0], [0, 1], [1], [0, 0, 0, 1, 1, 1], [], []>} : vector<4x4x512xf32>, vector<512x128xf32>, vector<4x4x128xf32> -> vector<4x4x128xf32>
    "tpu.trace_stop"() : () -> ()
    %c1_131 = arith.constant 1 : index
    %c1_132 = arith.constant 1 : index
    %c0_133 = arith.constant 0 : index
    %97 = vector.load %arg14[%c1_131, %c1_132, %c0_133] : memref<6x6x128xf32, #tpu.memory_space<vmem>>, vector<4x4x128xf32>
    %c1_134 = arith.constant 1 : index
    %c2_135 = arith.constant 2 : index
    %c0_136 = arith.constant 0 : index
    %98 = vector.load %arg14[%c1_134, %c2_135, %c0_136] : memref<6x6x128xf32, #tpu.memory_space<vmem>>, vector<4x4x128xf32>
    %c2_137 = arith.constant 2 : index
    %c1_138 = arith.constant 1 : index
    %c0_139 = arith.constant 0 : index
    %99 = vector.load %arg14[%c2_137, %c1_138, %c0_139] : memref<6x6x128xf32, #tpu.memory_space<vmem>>, vector<4x4x128xf32>
    %c2_140 = arith.constant 2 : index
    %c2_141 = arith.constant 2 : index
    %c0_142 = arith.constant 0 : index
    %100 = vector.load %arg14[%c2_140, %c2_141, %c0_142] : memref<6x6x128xf32, #tpu.memory_space<vmem>>, vector<4x4x128xf32>
    %101 = tpu.concatenate %97, %98, %99, %100 in 2 : vector<4x4x128xf32>, vector<4x4x128xf32>, vector<4x4x128xf32>, vector<4x4x128xf32> -> vector<4x4x512xf32>
    %c3_143 = arith.constant 3 : index
    %c0_144 = arith.constant 0 : index
    %c0_145 = arith.constant 0 : index
    %102 = vector.load %arg6[%c3_143, %c0_144, %c0_145] : memref<4x512x128xf32, #tpu.memory_space<vmem>>, vector<1x512x128xf32>
    %103 = vector.shape_cast %102 : vector<1x512x128xf32> to vector<512x128xf32>
    "tpu.trace_start"() <{level = 10 : i32, message = "hwk,kd->hwd"}> : () -> ()
    %cst_146 = arith.constant dense<0.000000e+00> : vector<4x4x128xf32>
    %104 = tpu.matmul %101, %103, %cst_146 {dimension_numbers = #tpu.dot_dimension_numbers<[2], [0], [0, 1], [1], [0, 0, 0, 1, 1, 1], [], []>} : vector<4x4x512xf32>, vector<512x128xf32>, vector<4x4x128xf32> -> vector<4x4x128xf32>
    "tpu.trace_stop"() : () -> ()
    %105 = vector.shape_cast %80 : vector<4x4x128xf32> to vector<4x4x1x128xf32>
    %106 = vector.shape_cast %88 : vector<4x4x128xf32> to vector<4x4x1x128xf32>
    %107 = tpu.concatenate %105, %106 in 2 : vector<4x4x1x128xf32>, vector<4x4x1x128xf32> -> vector<4x4x2x128xf32>
    %108 = vector.shape_cast %96 : vector<4x4x128xf32> to vector<4x4x1x128xf32>
    %109 = vector.shape_cast %104 : vector<4x4x128xf32> to vector<4x4x1x128xf32>
    %110 = tpu.concatenate %108, %109 in 2 : vector<4x4x1x128xf32>, vector<4x4x1x128xf32> -> vector<4x4x2x128xf32>
    %111 = vector.shape_cast %107 : vector<4x4x2x128xf32> to vector<4x8x128xf32>
    %112 = vector.shape_cast %110 : vector<4x4x2x128xf32> to vector<4x8x128xf32>
    %113 = vector.shape_cast %111 : vector<4x8x128xf32> to vector<4x1x8x128xf32>
    %114 = vector.shape_cast %112 : vector<4x8x128xf32> to vector<4x1x8x128xf32>
    %115 = tpu.concatenate %113, %114 in 1 : vector<4x1x8x128xf32>, vector<4x1x8x128xf32> -> vector<4x2x8x128xf32>
    %116 = vector.shape_cast %115 : vector<4x2x8x128xf32> to vector<8x8x128xf32>
    %c0_147 = arith.constant 0 : index
    %c0_148 = arith.constant 0 : index
    %117 = vector.load %arg7[%c0_147, %c0_148] : memref<1x128xf32, #tpu.memory_space<vmem>>, vector<1x128xf32>
    %118 = vector.shape_cast %117 : vector<1x128xf32> to vector<1x1x128xf32>
    %119 = vector.broadcast %118 : vector<1x1x128xf32> to vector<8x8x128xf32>
    %120 = arith.addf %116, %119 : vector<8x8x128xf32>
    %cst_149 = arith.constant 0.000000e+00 : f32
    %121 = vector.broadcast %cst_149 : f32 to vector<10x10x128xf32>
    %c0_150 = arith.constant 0 : index
    %c0_151 = arith.constant 0 : index
    %c0_152 = arith.constant 0 : index
    %122 = vector.load %arg15[%c0_150, %c0_151, %c0_152] : memref<10x10x128xf32, #tpu.memory_space<vmem>>, vector<10x10x128xf32>
    tpu.vector_store %arg15[%c0_150, %c0_151, %c0_152], %121 {strides = array<i32>} : memref<10x10x128xf32, #tpu.memory_space<vmem>>, vector<10x10x128xf32>,
    %cst_153 = arith.constant 0.000000e+00 : f32
    %123 = vector.broadcast %cst_153 : f32 to vector<8x8x128xf32>
    %124 = arith.maximumf %120, %123 : vector<8x8x128xf32>
    %c1_154 = arith.constant 1 : index
    %c1_155 = arith.constant 1 : index
    %c0_156 = arith.constant 0 : index
    %125 = vector.load %arg15[%c1_154, %c1_155, %c0_156] : memref<10x10x128xf32, #tpu.memory_space<vmem>>, vector<8x8x128xf32>
    tpu.vector_store %arg15[%c1_154, %c1_155, %c0_156], %124 {strides = array<i32>} : memref<10x10x128xf32, #tpu.memory_space<vmem>>, vector<8x8x128xf32>,
    %c0_157 = arith.constant 0 : index
    %c0_158 = arith.constant 0 : index
    %c0_159 = arith.constant 0 : index
    %126 = vector.load %arg15[%c0_157, %c0_158, %c0_159] : memref<10x10x128xf32, #tpu.memory_space<vmem>>, vector<8x8x128xf32>
    %c0_160 = arith.constant 0 : index
    %c1_161 = arith.constant 1 : index
    %c0_162 = arith.constant 0 : index
    %127 = vector.load %arg15[%c0_160, %c1_161, %c0_162] : memref<10x10x128xf32, #tpu.memory_space<vmem>>, vector<8x8x128xf32>
    %c1_163 = arith.constant 1 : index
    %c0_164 = arith.constant 0 : index
    %c0_165 = arith.constant 0 : index
    %128 = vector.load %arg15[%c1_163, %c0_164, %c0_165] : memref<10x10x128xf32, #tpu.memory_space<vmem>>, vector<8x8x128xf32>
    %c1_166 = arith.constant 1 : index
    %c1_167 = arith.constant 1 : index
    %c0_168 = arith.constant 0 : index
    %129 = vector.load %arg15[%c1_166, %c1_167, %c0_168] : memref<10x10x128xf32, #tpu.memory_space<vmem>>, vector<8x8x128xf32>
    %130 = tpu.concatenate %126, %127, %128, %129 in 2 : vector<8x8x128xf32>, vector<8x8x128xf32>, vector<8x8x128xf32>, vector<8x8x128xf32> -> vector<8x8x512xf32>
    %c0_169 = arith.constant 0 : index
    %c0_170 = arith.constant 0 : index
    %c0_171 = arith.constant 0 : index
    %131 = vector.load %arg8[%c0_169, %c0_170, %c0_171] : memref<4x512x128xf32, #tpu.memory_space<vmem>>, vector<1x512x128xf32>
    %132 = vector.shape_cast %131 : vector<1x512x128xf32> to vector<512x128xf32>
    "tpu.trace_start"() <{level = 10 : i32, message = "hwk,kd->hwd"}> : () -> ()
    %cst_172 = arith.constant dense<0.000000e+00> : vector<8x8x128xf32>
    %133 = tpu.matmul %130, %132, %cst_172 {dimension_numbers = #tpu.dot_dimension_numbers<[2], [0], [0, 1], [1], [0, 0, 0, 1, 1, 1], [], []>} : vector<8x8x512xf32>, vector<512x128xf32>, vector<8x8x128xf32> -> vector<8x8x128xf32>
    "tpu.trace_stop"() : () -> ()
    %c0_173 = arith.constant 0 : index
    %c1_174 = arith.constant 1 : index
    %c0_175 = arith.constant 0 : index
    %134 = vector.load %arg15[%c0_173, %c1_174, %c0_175] : memref<10x10x128xf32, #tpu.memory_space<vmem>>, vector<8x8x128xf32>
    %c0_176 = arith.constant 0 : index
    %c2_177 = arith.constant 2 : index
    %c0_178 = arith.constant 0 : index
    %135 = vector.load %arg15[%c0_176, %c2_177, %c0_178] : memref<10x10x128xf32, #tpu.memory_space<vmem>>, vector<8x8x128xf32>
    %c1_179 = arith.constant 1 : index
    %c1_180 = arith.constant 1 : index
    %c0_181 = arith.constant 0 : index
    %136 = vector.load %arg15[%c1_179, %c1_180, %c0_181] : memref<10x10x128xf32, #tpu.memory_space<vmem>>, vector<8x8x128xf32>
    %c1_182 = arith.constant 1 : index
    %c2_183 = arith.constant 2 : index
    %c0_184 = arith.constant 0 : index
    %137 = vector.load %arg15[%c1_182, %c2_183, %c0_184] : memref<10x10x128xf32, #tpu.memory_space<vmem>>, vector<8x8x128xf32>
    %138 = tpu.concatenate %134, %135, %136, %137 in 2 : vector<8x8x128xf32>, vector<8x8x128xf32>, vector<8x8x128xf32>, vector<8x8x128xf32> -> vector<8x8x512xf32>
    %c1_185 = arith.constant 1 : index
    %c0_186 = arith.constant 0 : index
    %c0_187 = arith.constant 0 : index
    %139 = vector.load %arg8[%c1_185, %c0_186, %c0_187] : memref<4x512x128xf32, #tpu.memory_space<vmem>>, vector<1x512x128xf32>
    %140 = vector.shape_cast %139 : vector<1x512x128xf32> to vector<512x128xf32>
    "tpu.trace_start"() <{level = 10 : i32, message = "hwk,kd->hwd"}> : () -> ()
    %cst_188 = arith.constant dense<0.000000e+00> : vector<8x8x128xf32>
    %141 = tpu.matmul %138, %140, %cst_188 {dimension_numbers = #tpu.dot_dimension_numbers<[2], [0], [0, 1], [1], [0, 0, 0, 1, 1, 1], [], []>} : vector<8x8x512xf32>, vector<512x128xf32>, vector<8x8x128xf32> -> vector<8x8x128xf32>
    "tpu.trace_stop"() : () -> ()
    %c1_189 = arith.constant 1 : index
    %c0_190 = arith.constant 0 : index
    %c0_191 = arith.constant 0 : index
    %142 = vector.load %arg15[%c1_189, %c0_190, %c0_191] : memref<10x10x128xf32, #tpu.memory_space<vmem>>, vector<8x8x128xf32>
    %c1_192 = arith.constant 1 : index
    %c1_193 = arith.constant 1 : index
    %c0_194 = arith.constant 0 : index
    %143 = vector.load %arg15[%c1_192, %c1_193, %c0_194] : memref<10x10x128xf32, #tpu.memory_space<vmem>>, vector<8x8x128xf32>
    %c2_195 = arith.constant 2 : index
    %c0_196 = arith.constant 0 : index
    %c0_197 = arith.constant 0 : index
    %144 = vector.load %arg15[%c2_195, %c0_196, %c0_197] : memref<10x10x128xf32, #tpu.memory_space<vmem>>, vector<8x8x128xf32>
    %c2_198 = arith.constant 2 : index
    %c1_199 = arith.constant 1 : index
    %c0_200 = arith.constant 0 : index
    %145 = vector.load %arg15[%c2_198, %c1_199, %c0_200] : memref<10x10x128xf32, #tpu.memory_space<vmem>>, vector<8x8x128xf32>
    %146 = tpu.concatenate %142, %143, %144, %145 in 2 : vector<8x8x128xf32>, vector<8x8x128xf32>, vector<8x8x128xf32>, vector<8x8x128xf32> -> vector<8x8x512xf32>
    %c2_201 = arith.constant 2 : index
    %c0_202 = arith.constant 0 : index
    %c0_203 = arith.constant 0 : index
    %147 = vector.load %arg8[%c2_201, %c0_202, %c0_203] : memref<4x512x128xf32, #tpu.memory_space<vmem>>, vector<1x512x128xf32>
    %148 = vector.shape_cast %147 : vector<1x512x128xf32> to vector<512x128xf32>
    "tpu.trace_start"() <{level = 10 : i32, message = "hwk,kd->hwd"}> : () -> ()
    %cst_204 = arith.constant dense<0.000000e+00> : vector<8x8x128xf32>
    %149 = tpu.matmul %146, %148, %cst_204 {dimension_numbers = #tpu.dot_dimension_numbers<[2], [0], [0, 1], [1], [0, 0, 0, 1, 1, 1], [], []>} : vector<8x8x512xf32>, vector<512x128xf32>, vector<8x8x128xf32> -> vector<8x8x128xf32>
    "tpu.trace_stop"() : () -> ()
    %c1_205 = arith.constant 1 : index
    %c1_206 = arith.constant 1 : index
    %c0_207 = arith.constant 0 : index
    %150 = vector.load %arg15[%c1_205, %c1_206, %c0_207] : memref<10x10x128xf32, #tpu.memory_space<vmem>>, vector<8x8x128xf32>
    %c1_208 = arith.constant 1 : index
    %c2_209 = arith.constant 2 : index
    %c0_210 = arith.constant 0 : index
    %151 = vector.load %arg15[%c1_208, %c2_209, %c0_210] : memref<10x10x128xf32, #tpu.memory_space<vmem>>, vector<8x8x128xf32>
    %c2_211 = arith.constant 2 : index
    %c1_212 = arith.constant 1 : index
    %c0_213 = arith.constant 0 : index
    %152 = vector.load %arg15[%c2_211, %c1_212, %c0_213] : memref<10x10x128xf32, #tpu.memory_space<vmem>>, vector<8x8x128xf32>
    %c2_214 = arith.constant 2 : index
    %c2_215 = arith.constant 2 : index
    %c0_216 = arith.constant 0 : index
    %153 = vector.load %arg15[%c2_214, %c2_215, %c0_216] : memref<10x10x128xf32, #tpu.memory_space<vmem>>, vector<8x8x128xf32>
    %154 = tpu.concatenate %150, %151, %152, %153 in 2 : vector<8x8x128xf32>, vector<8x8x128xf32>, vector<8x8x128xf32>, vector<8x8x128xf32> -> vector<8x8x512xf32>
    %c3_217 = arith.constant 3 : index
    %c0_218 = arith.constant 0 : index
    %c0_219 = arith.constant 0 : index
    %155 = vector.load %arg8[%c3_217, %c0_218, %c0_219] : memref<4x512x128xf32, #tpu.memory_space<vmem>>, vector<1x512x128xf32>
    %156 = vector.shape_cast %155 : vector<1x512x128xf32> to vector<512x128xf32>
    "tpu.trace_start"() <{level = 10 : i32, message = "hwk,kd->hwd"}> : () -> ()
    %cst_220 = arith.constant dense<0.000000e+00> : vector<8x8x128xf32>
    %157 = tpu.matmul %154, %156, %cst_220 {dimension_numbers = #tpu.dot_dimension_numbers<[2], [0], [0, 1], [1], [0, 0, 0, 1, 1, 1], [], []>} : vector<8x8x512xf32>, vector<512x128xf32>, vector<8x8x128xf32> -> vector<8x8x128xf32>
    "tpu.trace_stop"() : () -> ()
    %158 = vector.shape_cast %133 : vector<8x8x128xf32> to vector<8x8x1x128xf32>
    %159 = vector.shape_cast %141 : vector<8x8x128xf32> to vector<8x8x1x128xf32>
    %160 = tpu.concatenate %158, %159 in 2 : vector<8x8x1x128xf32>, vector<8x8x1x128xf32> -> vector<8x8x2x128xf32>
    %161 = vector.shape_cast %149 : vector<8x8x128xf32> to vector<8x8x1x128xf32>
    %162 = vector.shape_cast %157 : vector<8x8x128xf32> to vector<8x8x1x128xf32>
    %163 = tpu.concatenate %161, %162 in 2 : vector<8x8x1x128xf32>, vector<8x8x1x128xf32> -> vector<8x8x2x128xf32>
    %164 = vector.shape_cast %160 : vector<8x8x2x128xf32> to vector<8x16x128xf32>
    %165 = vector.shape_cast %163 : vector<8x8x2x128xf32> to vector<8x16x128xf32>
    %166 = vector.shape_cast %164 : vector<8x16x128xf32> to vector<8x1x16x128xf32>
    %167 = vector.shape_cast %165 : vector<8x16x128xf32> to vector<8x1x16x128xf32>
    %168 = tpu.concatenate %166, %167 in 1 : vector<8x1x16x128xf32>, vector<8x1x16x128xf32> -> vector<8x2x16x128xf32>
    %169 = vector.shape_cast %168 : vector<8x2x16x128xf32> to vector<16x16x128xf32>
    %c0_221 = arith.constant 0 : index
    %c0_222 = arith.constant 0 : index
    %170 = vector.load %arg9[%c0_221, %c0_222] : memref<1x128xf32, #tpu.memory_space<vmem>>, vector<1x128xf32>
    %171 = vector.shape_cast %170 : vector<1x128xf32> to vector<1x1x128xf32>
    %172 = vector.broadcast %171 : vector<1x1x128xf32> to vector<16x16x128xf32>
    %173 = arith.addf %169, %172 : vector<16x16x128xf32>
    %cst_223 = arith.constant 0.000000e+00 : f32
    %174 = vector.broadcast %cst_223 : f32 to vector<18x18x128xf32>
    %c0_224 = arith.constant 0 : index
    %c0_225 = arith.constant 0 : index
    %c0_226 = arith.constant 0 : index
    %175 = vector.load %arg16[%c0_224, %c0_225, %c0_226] : memref<18x18x128xf32, #tpu.memory_space<vmem>>, vector<18x18x128xf32>
    tpu.vector_store %arg16[%c0_224, %c0_225, %c0_226], %174 {strides = array<i32>} : memref<18x18x128xf32, #tpu.memory_space<vmem>>, vector<18x18x128xf32>,
    %cst_227 = arith.constant 0.000000e+00 : f32
    %176 = vector.broadcast %cst_227 : f32 to vector<16x16x128xf32>
    %177 = arith.maximumf %173, %176 : vector<16x16x128xf32>
    %c1_228 = arith.constant 1 : index
    %c1_229 = arith.constant 1 : index
    %c0_230 = arith.constant 0 : index
    %178 = vector.load %arg16[%c1_228, %c1_229, %c0_230] : memref<18x18x128xf32, #tpu.memory_space<vmem>>, vector<16x16x128xf32>
    tpu.vector_store %arg16[%c1_228, %c1_229, %c0_230], %177 {strides = array<i32>} : memref<18x18x128xf32, #tpu.memory_space<vmem>>, vector<16x16x128xf32>,
    %c0_231 = arith.constant 0 : index
    %c0_232 = arith.constant 0 : index
    %c0_233 = arith.constant 0 : index
    %179 = vector.load %arg16[%c0_231, %c0_232, %c0_233] : memref<18x18x128xf32, #tpu.memory_space<vmem>>, vector<16x16x128xf32>
    %c0_234 = arith.constant 0 : index
    %c1_235 = arith.constant 1 : index
    %c0_236 = arith.constant 0 : index
    %180 = vector.load %arg16[%c0_234, %c1_235, %c0_236] : memref<18x18x128xf32, #tpu.memory_space<vmem>>, vector<16x16x128xf32>
    %c0_237 = arith.constant 0 : index
    %c2_238 = arith.constant 2 : index
    %c0_239 = arith.constant 0 : index
    %181 = vector.load %arg16[%c0_237, %c2_238, %c0_239] : memref<18x18x128xf32, #tpu.memory_space<vmem>>, vector<16x16x128xf32>
    %c1_240 = arith.constant 1 : index
    %c0_241 = arith.constant 0 : index
    %c0_242 = arith.constant 0 : index
    %182 = vector.load %arg16[%c1_240, %c0_241, %c0_242] : memref<18x18x128xf32, #tpu.memory_space<vmem>>, vector<16x16x128xf32>
    %c1_243 = arith.constant 1 : index
    %c1_244 = arith.constant 1 : index
    %c0_245 = arith.constant 0 : index
    %183 = vector.load %arg16[%c1_243, %c1_244, %c0_245] : memref<18x18x128xf32, #tpu.memory_space<vmem>>, vector<16x16x128xf32>
    %c1_246 = arith.constant 1 : index
    %c2_247 = arith.constant 2 : index
    %c0_248 = arith.constant 0 : index
    %184 = vector.load %arg16[%c1_246, %c2_247, %c0_248] : memref<18x18x128xf32, #tpu.memory_space<vmem>>, vector<16x16x128xf32>
    %c2_249 = arith.constant 2 : index
    %c0_250 = arith.constant 0 : index
    %c0_251 = arith.constant 0 : index
    %185 = vector.load %arg16[%c2_249, %c0_250, %c0_251] : memref<18x18x128xf32, #tpu.memory_space<vmem>>, vector<16x16x128xf32>
    %c2_252 = arith.constant 2 : index
    %c1_253 = arith.constant 1 : index
    %c0_254 = arith.constant 0 : index
    %186 = vector.load %arg16[%c2_252, %c1_253, %c0_254] : memref<18x18x128xf32, #tpu.memory_space<vmem>>, vector<16x16x128xf32>
    %c2_255 = arith.constant 2 : index
    %c2_256 = arith.constant 2 : index
    %c0_257 = arith.constant 0 : index
    %187 = vector.load %arg16[%c2_255, %c2_256, %c0_257] : memref<18x18x128xf32, #tpu.memory_space<vmem>>, vector<16x16x128xf32>
    %188 = tpu.concatenate %179, %180, %181, %182, %183, %184, %185, %186, %187 in 2 : vector<16x16x128xf32>, vector<16x16x128xf32>, vector<16x16x128xf32>, vector<16x16x128xf32>, vector<16x16x128xf32>, vector<16x16x128xf32>, vector<16x16x128xf32>, vector<16x16x128xf32>, vector<16x16x128xf32> -> vector<16x16x1152xf32>
    %c0_258 = arith.constant 0 : index
    %c0_259 = arith.constant 0 : index
    %189 = vector.load %arg10[%c0_258, %c0_259] : memref<1152x128xf32, #tpu.memory_space<vmem>>, vector<1152x128xf32>
    "tpu.trace_start"() <{level = 10 : i32, message = "hwk,kd->hwd"}> : () -> ()
    %cst_260 = arith.constant dense<0.000000e+00> : vector<16x16x128xf32>
    %190 = tpu.matmul %188, %189, %cst_260 {dimension_numbers = #tpu.dot_dimension_numbers<[2], [0], [0, 1], [1], [0, 0, 0, 1, 1, 1], [], []>} : vector<16x16x1152xf32>, vector<1152x128xf32>, vector<16x16x128xf32> -> vector<16x16x128xf32>
    "tpu.trace_stop"() : () -> ()
    %c0_261 = arith.constant 0 : index
    %c0_262 = arith.constant 0 : index
    %191 = vector.load %arg11[%c0_261, %c0_262] : memref<1x128xf32, #tpu.memory_space<vmem>>, vector<1x128xf32>
    %192 = vector.shape_cast %191 : vector<1x128xf32> to vector<1x1x128xf32>
    %193 = vector.broadcast %192 : vector<1x1x128xf32> to vector<16x16x128xf32>
    %194 = arith.addf %190, %193 : vector<16x16x128xf32>
    %c0_263 = arith.constant 0 : index
    %c0_264 = arith.constant 0 : index
    %c0_265 = arith.constant 0 : index
    %c0_266 = arith.constant 0 : index
    %195 = vector.load %arg12[%c0_263, %c0_264, %c0_265, %c0_266] : memref<1x16x16x128xf32, #tpu.memory_space<vmem>>, vector<1x16x16x128xf32>
    %196 = vector.shape_cast %195 : vector<1x16x16x128xf32> to vector<16x16x128xf32>
    %197 = vector.shape_cast %194 : vector<16x16x128xf32> to vector<1x16x16x128xf32>
    tpu.vector_store %arg12[%c0_263, %c0_264, %c0_265, %c0_266], %197 {strides = array<i32>} : memref<1x16x16x128xf32, #tpu.memory_space<vmem>>, vector<1x16x16x128xf32>,
    return
  }
  func.func @transform_0(%arg0: i32) -> (i32, i32) {
    %c0_i32 = arith.constant 0 : i32
    %c0_i32_0 = arith.constant 0 : i32
    %c0_i32_1 = arith.constant 0 : i32
    return %c0_i32, %c0_i32_0 : i32, i32
  }
  func.func @transform_1(%arg0: i32) -> (i32, i32) {
    %c0_i32 = arith.constant 0 : i32
    %c0_i32_0 = arith.constant 0 : i32
    %c0_i32_1 = arith.constant 0 : i32
    return %c0_i32, %c0_i32_0 : i32, i32
  }
  func.func @transform_2(%arg0: i32) -> (i32, i32) {
    %c0_i32 = arith.constant 0 : i32
    %c0_i32_0 = arith.constant 0 : i32
    %c0_i32_1 = arith.constant 0 : i32
    return %c0_i32, %c0_i32_0 : i32, i32
  }
  func.func @transform_3(%arg0: i32) -> (i32, i32, i32) {
    %c0_i32 = arith.constant 0 : i32
    %c0_i32_0 = arith.constant 0 : i32
    %c0_i32_1 = arith.constant 0 : i32
    %c0_i32_2 = arith.constant 0 : i32
    return %c0_i32, %c0_i32_0, %c0_i32_1 : i32, i32, i32
  }
  func.func @transform_4(%arg0: i32) -> (i32, i32) {
    %c0_i32 = arith.constant 0 : i32
    %c0_i32_0 = arith.constant 0 : i32
    %c0_i32_1 = arith.constant 0 : i32
    return %c0_i32, %c0_i32_0 : i32, i32
  }
  func.func @transform_5(%arg0: i32) -> (i32, i32, i32) {
    %c0_i32 = arith.constant 0 : i32
    %c0_i32_0 = arith.constant 0 : i32
    %c0_i32_1 = arith.constant 0 : i32
    %c0_i32_2 = arith.constant 0 : i32
    return %c0_i32, %c0_i32_0, %c0_i32_1 : i32, i32, i32
  }
  func.func @transform_6(%arg0: i32) -> (i32, i32) {
    %c0_i32 = arith.constant 0 : i32
    %c0_i32_0 = arith.constant 0 : i32
    %c0_i32_1 = arith.constant 0 : i32
    return %c0_i32, %c0_i32_0 : i32, i32
  }
  func.func @transform_7(%arg0: i32) -> (i32, i32, i32) {
    %c0_i32 = arith.constant 0 : i32
    %c0_i32_0 = arith.constant 0 : i32
    %c0_i32_1 = arith.constant 0 : i32
    %c0_i32_2 = arith.constant 0 : i32
    return %c0_i32, %c0_i32_0, %c0_i32_1 : i32, i32, i32
  }
  func.func @transform_8(%arg0: i32) -> (i32, i32) {
    %c0_i32 = arith.constant 0 : i32
    %c0_i32_0 = arith.constant 0 : i32
    %c0_i32_1 = arith.constant 0 : i32
    return %c0_i32, %c0_i32_0 : i32, i32
  }
  func.func @transform_9(%arg0: i32) -> (i32, i32) {
    %c0_i32 = arith.constant 0 : i32
    %c0_i32_0 = arith.constant 0 : i32
    %c0_i32_1 = arith.constant 0 : i32
    return %c0_i32, %c0_i32_0 : i32, i32
  }
  func.func @transform_10(%arg0: i32) -> (i32, i32) {
    %c0_i32 = arith.constant 0 : i32
    %c0_i32_0 = arith.constant 0 : i32
    %c0_i32_1 = arith.constant 0 : i32
    return %c0_i32, %c0_i32_0 : i32, i32
  }
  func.func @transform_11(%arg0: i32) -> (i32, i32, i32, i32) {
    %c0_i32 = arith.constant 0 : i32
    %c0_i32_0 = arith.constant 0 : i32
    %c0_i32_1 = arith.constant 0 : i32
    %c0_i32_2 = arith.constant 0 : i32
    return %arg0, %c0_i32, %c0_i32_0, %c0_i32_1 : i32, i32, i32, i32
  }
}

</mosaic_0001>

<bundles_post_ra>
// kernel: conv_decoder_forward.1
= control target key start
LH: loop header
LB: loop body
LE: loop exit
PB: predicated region body
PF: predicated region fallthrough
CT: control target
= control target key end

     0   :  { %16 = vsyncpa [#allocation7], 0  ;;  %s15157_s0 = inlined_call_operand.hbm [shape: f32[2,32], index: 0, kind: input, shape index: {}]   ;;  %s15158_s1 = inlined_call_operand.hbm [shape: f32[32,512], index: 1, kind: input, shape index: {}]   ;;  %s15159_s2 = inlined_call_operand.vmem [shape: f32[1,512], index: 2, kind: input, shape index: {}]   ;;  %s15160_s3 = inlined_call_operand.hbm [shape: f32[4,512,128], index: 3, kind: input, shape index: {}]   ;;  %s15161_s4 = inlined_call_operand.vmem [shape: f32[1,128], index: 4, kind: input, shape index: {}]   ;;  %s15162_s5 = inlined_call_operand.hbm [shape: f32[4,512,128], index: 5, kind: input, shape index: {}]   ;;  %s15163_s6 = inlined_call_operand.vmem [shape: f32[1,128], index: 6, kind: input, shape index: {}]   ;;  %s15164_s7 = inlined_call_operand.hbm [shape: f32[4,512,128], index: 7, kind: input, shape index: {}]   ;;  %s15165_s8 = inlined_call_operand.vmem [shape: f32[1,128], index: 8, kind: input, shape index: {}]   ;;  %s15166_s9 = inlined_call_operand.hbm [shape: f32[1152,128], index: 9, kind: input, shape index: {}]   ;;  %s15167_s10 = inlined_call_operand.hbm [shape: f32[1,128], index: 10, kind: input, shape index: {}]   ;;  %s15168_s11 = inlined_call_operand.vmem [shape: f32[2,16,16,128], index: 11, kind: output, shape index: {}]  }
   0x1   :  { %17 = vsyncpa [#allocation9], 0 }
   0x2   :  { %18 = vsyncpa [#allocation12], 0 }
   0x3   :  { %19 = vsyncpa [#allocation15], 0  ;;  %s12201_s17 = smov 0  }
   0x4 LB: > { %s12127_s18 = smov [#allocation8]   ;;  %s12207_s20 = sadd.s32 4294967295, %s12125_s17   ;;  %s12125_s17 = sphi %s12201_s17, %s25_s17  }
   0x5   : > { %s310_s19 = sshll.u32 %s12127_s18, 4  ;;  %p10534_p0 = scmp.ge.s32.totalorder %s12125_s17, 1  ;;  %s311_s19 = int_to_ptr.vmem [resolvable:$true] %s310_s19 }
   0x6   : > { %p287_p1 = scmp.lt.s32.totalorder %s12125_s17, 3  ;;  %p15169_p2 = scmp.eq.s32.totalorder %s12207_s20, 0 }
   0x7   : > { %s12128_s23 = smov [#allocation11]   ;;  %s12129_s25 = smov [#allocation14]  }
   0x8   : > { %p12212_p3 = pnand %p10534_p0, %p287_p1  ;;  %s342_s24 = sshll.u32 %s12128_s23, 4  ;;  %s12224_s24 = int_to_ptr.vmem [resolvable:$true] %s342_s24 }
   0x9   : > { %s374_s26 = sshll.u32 %s12129_s25, 4  ;;  %s11932_s28 = scalar_lea.vmem %s311_s19, 2048  ;;  %s12226_s26 = int_to_ptr.vmem [resolvable:$true] %s374_s26 }
   0xa   : > { %s15175_s21 = scalar_select %p12212_p3, 1, 0 }
   0xb   : > { %p11797_p4 = pneg %p12212_p3  ;;  %p11933_p7 = scmp.ne.s32.totalorder %s311_s19, %s11932_s28 }
   0xc   : > { %p11940_p10 = scmp.lt.s32.totalorder %s311_s19, %s311_s19  ;;  %p11941_p11 = scmp.lt.s32.totalorder %s11932_s28, %s11932_s28 }
   0xd   : > { %p12220_p5 = pnand %p15169_p2, %p11797_p4 }
   0xe   : > { %p11942_p12 = por %p11941_p11, %p11940_p10 }
   0xf   : > { %p12230_p6 = pneg %p12220_p5 }
  0x11   : > { %p11935_p8 = pnand %p11933_p7, %p12230_p6 }
  0x13   : > { %p11936_p9 = pneg %p11935_p8 }
  0x15   : > { %p11943_p13 = pnand %p11942_p12, %p11936_p9 }
  0x17   : > { %11946 = shalt.err (!%p11943_p13)
}
  0x18   : > { %s12130_s29 = smov 512   ;;  %s12131_s30 = smov 32  }
  0x19   : > { %11803 = dma.hbm_to_vmem [thread:$0]  (!%p12220_p5), %s15158_s1, 2048, %s311_s19, [#allocation9], %s12130_s29, %s12130_s29, %s12131_s30  }
  0x1a   : > { %s11958_s14 = scalar_lea.vmem %s12224_s24, 32768  ;;  %p11966_p7 = scmp.lt.s32.totalorder %s12224_s24, %s12224_s24 }
  0x1b   : > { %p11959_p0 = scmp.ne.s32.totalorder %s12224_s24, %s11958_s14  ;;  %p11967_p8 = scmp.lt.s32.totalorder %s11958_s14, %s11958_s14 }
  0x1d   : > { %p11961_p1 = pnand %p11959_p0, %p12230_p6  ;;  %p11968_p9 = por %p11967_p8, %p11966_p7 }
  0x1f   : > { %p11962_p4 = pneg %p11961_p1 }
  0x21   : > { %p11969_p10 = pnand %p11968_p9, %p11962_p4 }
  0x23   : > { %11972 = shalt.err (!%p11969_p10)
}
  0x24   : > { %s12132_s15 = smov 128   ;;  %s12133_s16 = smov 8  }
  0x25   : > { %11809 = dma.hbm_to_vmem [thread:$0]  (!%p12220_p5), %s15162_s5, 32768, %s12224_s24, [#allocation12], %s12132_s15, %s12132_s15, %s12133_s16  }
  0x26   : > { %s11984_s23 = scalar_lea.vmem %s12226_s26, 18432  ;;  %p11992_p0 = scmp.lt.s32.totalorder %s12226_s26, %s12226_s26 }
  0x27   : > { %p11985_p11 = scmp.ne.s32.totalorder %s12226_s26, %s11984_s23  ;;  %p11993_p1 = scmp.lt.s32.totalorder %s11984_s23, %s11984_s23 }
  0x29   : > { %p11987_p12 = pnand %p11985_p11, %p12230_p6  ;;  %p11994_p4 = por %p11993_p1, %p11992_p0 }
  0x2b   : > { %p11988_p13 = pneg %p11987_p12 }
  0x2d   : > { %p11995_p7 = pnand %p11994_p4, %p11988_p13 }
  0x2f   : > { %11998 = shalt.err (!%p11995_p7)
}
  0x30   : > { %11815 = dma.hbm_to_vmem [thread:$0]  (!%p12220_p5), %s15166_s9, 18432, %s12226_s26, [#allocation15], %s12132_s15, %s12132_s15, %s12133_s16  }
  0x31   : > { %s12134_s24 = smov [#allocation6]   ;;  %s12135_s30 = smov [#allocation10]  }
  0x32   : > { %s300_s29 = sshll.u32 %s12134_s24, 4  ;;  %s326_s12 = sshll.u32 %s12135_s30, 4  ;;  %s301_s29 = int_to_ptr.vmem [resolvable:$true] %s300_s29  ;;  %s327_s12 = int_to_ptr.vmem [resolvable:$true] %s326_s12 }
  0x33   : > { %s12010_s13 = scalar_lea.vmem %s301_s29, 32  ;;  %p12018_p11 = scmp.lt.s32.totalorder %s301_s29, %s301_s29 }
  0x34   : > { %p12011_p8 = scmp.ne.s32.totalorder %s301_s29, %s12010_s13  ;;  %p12019_p12 = scmp.lt.s32.totalorder %s12010_s13, %s12010_s13 }
  0x36   : > { %p12013_p9 = pnand %p12011_p8, %p12230_p6  ;;  %p12020_p13 = por %p12019_p12, %p12018_p11 }
  0x38   : > { %p12014_p10 = pneg %p12013_p9 }
  0x3a   : > { %p12021_p0 = pnand %p12020_p13, %p12014_p10 }
  0x3c   : > { %12024 = shalt.err (!%p12021_p0)
}
  0x3d   : > { %11800 = dma.hbm_to_vmem [thread:$0]  (!%p12220_p5), %s15157_s0, 32, %s301_s29, [#allocation7]  }
  0x3e   : > { %s12036_s18 = scalar_lea.vmem %s327_s12, 32768  ;;  %p12044_p2 = scmp.lt.s32.totalorder %s327_s12, %s327_s12 }
  0x3f   : > { %p12037_p1 = scmp.ne.s32.totalorder %s327_s12, %s12036_s18  ;;  %p12045_p8 = scmp.lt.s32.totalorder %s12036_s18, %s12036_s18 }
  0x41   : > { %p12039_p4 = pnand %p12037_p1, %p12230_p6  ;;  %p12046_p9 = por %p12045_p8, %p12044_p2 }
  0x43   : > { %p12040_p7 = pneg %p12039_p4 }
  0x45   : > { %p12047_p3 = pnand %p12046_p9, %p12040_p7 }
  0x47   : > { %12050 = shalt.err (!%p12047_p3)
}
  0x48   : > { %11806 = dma.hbm_to_vmem [thread:$0]  (!%p12220_p5), %s15160_s3, 32768, %s327_s12, [#allocation9], %s12132_s15, %s12132_s15, %s12133_s16  }
  0x49   : > { %s12136_s25 = smov [#allocation13]   ;;  %s12137_s24 = smov [#allocation16]  }
  0x4a   : > { %s358_s28 = sshll.u32 %s12136_s25, 4  ;;  %s388_s29 = sshll.u32 %s12137_s24, 4  ;;  %s359_s28 = int_to_ptr.vmem [resolvable:$true] %s358_s28  ;;  %s389_s29 = int_to_ptr.vmem [resolvable:$true] %s388_s29 }
  0x4b   : > { %s12062_s30 = scalar_lea.vmem %s359_s28, 32768  ;;  %p12070_p11 = scmp.lt.s32.totalorder %s359_s28, %s359_s28 }
  0x4c   : > { %p12063_p2 = scmp.ne.s32.totalorder %s359_s28, %s12062_s30  ;;  %p12071_p12 = scmp.lt.s32.totalorder %s12062_s30, %s12062_s30 }
  0x4e   : > { %p12065_p3 = pnand %p12063_p2, %p12230_p6  ;;  %p12072_p13 = por %p12071_p12, %p12070_p11 }
  0x50   : > { %p12066_p10 = pneg %p12065_p3 }
  0x52   : > { %p12073_p0 = pnand %p12072_p13, %p12066_p10 }
  0x54   : > { %12076 = shalt.err (!%p12073_p0)
}
  0x55   : > { %11812 = dma.hbm_to_vmem [thread:$0]  (!%p12220_p5), %s15164_s7, 32768, %s359_s28, [#allocation12], %s12132_s15, %s12132_s15, %s12133_s16  }
  0x56   : > { %s12088_s14 = scalar_lea.vmem %s389_s29, 16  ;;  %s12095_s26 = scalar_lea.vmem %s389_s29, 32 }
  0x57   : > { %p12089_p1 = scmp.ne.s32.totalorder %s389_s29, %s12088_s14  ;;  %p12096_p8 = scmp.lt.s32.totalorder %s389_s29, %s389_s29 }
  0x58   : > { %p12097_p9 = scmp.lt.s32.totalorder %s12095_s26, %s12088_s14 }
  0x59   : > { %p12091_p4 = pnand %p12089_p1, %p12230_p6 }
  0x5a   : > { %p12098_p2 = por %p12097_p9, %p12096_p8 }
  0x5b   : > { %p12092_p7 = pneg %p12091_p4 }
  0x5d   : > { %p12099_p3 = pnand %p12098_p2, %p12092_p7 }
  0x5f   : > { %12102 = shalt.err (!%p12099_p3)
}
  0x60   : > { %11818 = dma.hbm_to_vmem [thread:$0]  (!%p12220_p5), %s15167_s10, 16, %s389_s29, [#allocation15]  }
  0x61   : > { %p15178_p10 = scmp.ne.s32.totalorder %s15175_s21, 0 }
  0x63   : > { %401 = sbr.rel (%p15178_p10) target bundleno = 1965 (0x7ad), region = 64 }
  0x68   : > { %p15179_p11 = scmp.eq.s32.totalorder %s12207_s20, 0 }
  0x6a   : > { %12108 = dma.done.wait (%p15179_p11), [#allocation7], 32   ;;  %p15180_p6 = pmov %p15179_p11 }
  0x6c   : > { %12110 = vsyncadd (%p15180_p6), [#allocation7], 4294967264  ;;  %p15181_p12 = pmov %p15180_p6 }
  0x6d   : > { %p15182_p13 = pmov %p15180_p6 }
  0x6e   : > { %12112 = dma.done.wait (%p15181_p12), [#allocation9], 34816  }
  0x6f   : > { %12114 = vsyncadd (%p15182_p13), [#allocation9], 4294932480  ;;  %p15183_p0 = pmov %p15180_p6 }
  0x71   : > { %12116 = dma.done.wait (%p15183_p0), [#allocation12], 65536   ;;  %p15184_p5 = pmov %p15183_p0 }
  0x72   : > { %p15185_p1 = pmov %p15183_p0 }
  0x73   : > { %12118 = vsyncadd (%p15184_p5), [#allocation12], 4294901760 }
  0x74   : > { %12120 = dma.done.wait (%p15185_p1), [#allocation15], 18448   ;;  %p15186_p4 = pmov %p15183_p0 }
  0x75   : > { %v12138_v0 = vmov 0.0   ;;  %v480_v1 = vld [vmem:[#allocation8 + $0x68] sm:$0xff]  ;;  %v482_v2 = vld [vmem:[#allocation8 + $0x78] sm:$0xff]  ;;  %v479_v3 = vld [vmem:[#allocation8 + $0x60] sm:$0xff]  ;;  %s10606_s21 = scalar_lea.vmem [#allocation6], %s12125_s17  ;;  %vm505_vm0 = vcmask 261120  }
  0x76   : > { %12122 = vsyncadd (%p15186_p4), [#allocation15], 4294948848  ;;  %573 = vmatprep.mubr.f32.mxu0 %v12138_v0  ;;  %660 = vst [vmem:[#allocation2] sm:$0xf] %v12138_v0  ;;  %644 = vmatprep.mubr.f32.mxu1 %v12138_v0  ;;  %v481_v4 = vld [vmem:[#allocation8 + $0x70] sm:$0xff]  ;;  %v476_v5 = vld [vmem:[#allocation8 + $0x48] sm:$0xff] }
  0x77   : > { %661 = vst [vmem:[#allocation2 + $0x4] sm:$0xf] %v12138_v0  ;;  %662 = vst [vmem:[#allocation2 + $0x8] sm:$0xf] %v12138_v0  ;;  %533 = vmatprep.subr.mxu0 %v480_v1  ;;  %604 = vmatprep.subr.mxu1 %v482_v2  ;;  %v478_v6 = vld [vmem:[#allocation8 + $0x58] sm:$0xff]  ;;  %v475_v7 = vld [vmem:[#allocation8 + $0x40] sm:$0xff] }
  0x78   : > { %663 = vst [vmem:[#allocation2 + $0xc] sm:$0xf] %v12138_v0  ;;  %1957 = vst [vmem:[#allocation3] sm:$0x3f] %v12138_v0  ;;  %534 = vmatpush1.msra.mxu0 %v479_v3  ;;  %605 = vmatpush1.msra.mxu1 %v481_v4  ;;  %v477_v8 = vld [vmem:[#allocation8 + $0x50] sm:$0xff]  ;;  %v472_v9 = vld [vmem:[#allocation8 + $0x28] sm:$0xff] }
  0x79   : > { %1958 = vst [vmem:[#allocation3 + $0x8] sm:$0x3f] %v12138_v0  ;;  %1959 = vst [vmem:[#allocation3 + $0x10] sm:$0x3f] %v12138_v0  ;;  %535 = vmatprep.subr.mxu0 %v476_v5  ;;  %606 = vmatprep.subr.mxu1 %v478_v6  ;;  %v474_v10 = vld [vmem:[#allocation8 + $0x38] sm:$0xff]  ;;  %v471_v11 = vld [vmem:[#allocation8 + $0x20] sm:$0xff] }
  0x7a   : > { %1960 = vst [vmem:[#allocation3 + $0x18] sm:$0x3f] %v12138_v0  ;;  %1961 = vst [vmem:[#allocation3 + $0x20] sm:$0x3f] %v12138_v0  ;;  %v473_v12 = vld [vmem:[#allocation8 + $0x30] sm:$0xff]  ;;  %536 = vmatpush1.msra.mxu0 %v475_v7  ;;  %607 = vmatpush1.msra.mxu1 %v477_v8  ;;  %v468_v13 = vld [vmem:[#allocation8 + $0x8] sm:$0xff] }
  0x7b   : > { %1962 = vst [vmem:[#allocation3 + $0x28] sm:$0x3f] %v12138_v0  ;;  %3787 = vst [vmem:[#allocation4] sm:$0xff] %v12138_v0  ;;  %v470_v14 = vld [vmem:[#allocation8 + $0x18] sm:$0xff]  ;;  %537 = vmatprep.subr.mxu0 %v472_v9  ;;  %608 = vmatprep.subr.mxu1 %v474_v10  ;;  %v467_v15 = vld [vmem:[#allocation8] sm:$0xff]  ;;  %vm654_vm1 = vcmask 1040384  }
  0x7c   : > { %3788 = vst [vmem:[#allocation4 + $0x8] sm:$0x3] %v12138_v0  ;;  %3789 = vst [vmem:[#allocation4 + $0x10] sm:$0xff] %v12138_v0  ;;  %v469_v16 = vld [vmem:[#allocation8 + $0x10] sm:$0xff]  ;;  %v10608_v17 = vld [vmem:[%s10606_s21 - $0x1] sm:$0x1]  ;;  %538 = vmatpush1.msra.mxu0 %v471_v11  ;;  %609 = vmatpush1.msra.mxu1 %v473_v12 }
  0x7d   : > { %3790 = vst [vmem:[#allocation4 + $0x18] sm:$0x3] %v12138_v0  ;;  %3791 = vst [vmem:[#allocation4 + $0x20] sm:$0xff] %v12138_v0  ;;  %v708_v18 = vld [vmem:[#allocation10 + $0xf8] sm:$0xff]  ;;  %539 = vmatprep.subr.mxu0 %v468_v13  ;;  %610 = vmatprep.subr.mxu1 %v470_v14  ;;  %v707_v22 = vld [vmem:[#allocation10 + $0xf0] sm:$0xff]  ;;  %p460_p7 = scmp.lt.s32.totalorder %s12207_s20, 1 }
  0x7e   : > { %3792 = vst [vmem:[#allocation4 + $0x28] sm:$0x3] %v12138_v0  ;;  %3793 = vst [vmem:[#allocation4 + $0x30] sm:$0xff] %v12138_v0  ;;  %v985_v19 = vld [vmem:[#allocation10 + $0x2f8] sm:$0xff]  ;;  %v984_v23 = vld [vmem:[#allocation10 + $0x2f0] sm:$0xff]  ;;  %540 = vmatpush1.msra.mxu0 %v467_v15  ;;  %611 = vmatpush1.msra.mxu1 %v469_v16 }
  0x7f   : > { %3794 = vst [vmem:[#allocation4 + $0x38] sm:$0x3] %v12138_v0  ;;  %3795 = vst [vmem:[#allocation4 + $0x40] sm:$0xff] %v12138_v0  ;;  %v692_v20 = vld [vmem:[#allocation10 + $0x78] sm:$0xff]  ;;  %v691_v24 = vld [vmem:[#allocation10 + $0x70] sm:$0xff]  ;;  %10553 = vmatmul.mubr.msk.f32.vlgmr.msra.gmra.mxu0 %vm505_vm0, %v10608_v17  ;;  %10554 = vmatmul.mubr.msk.f32.vlgmr.msra.gmra.mxu1 %vm505_vm0, %v10608_v17  ;;  %s15255_s20 = smov (!%p460_p7, %s12207_s20), 1 }
  0x80   : > { %3796 = vst [vmem:[#allocation4 + $0x48] sm:$0x3] %v12138_v0  ;;  %3797 = vst [vmem:[#allocation4 + $0x50] sm:$0xff] %v12138_v0  ;;  %v969_v21 = vld [vmem:[#allocation10 + $0x278] sm:$0xff]  ;;  %v968_v25 = vld [vmem:[#allocation10 + $0x270] sm:$0xff]  ;;  %10609 = vmatprep.subr.mxu1 %v708_v18  ;;  %10679 = vmatprep.subr.mxu0 %v985_v19  ;;  %s10605_s29 = sshll.u32 %s15255_s20, 8 }
  0x81   : > { %3798 = vst [vmem:[#allocation4 + $0x58] sm:$0x3] %v12138_v0  ;;  %3799 = vst [vmem:[#allocation4 + $0x60] sm:$0xff] %v12138_v0  ;;  %10610 = vmatpush3.msra.mxu1 %v692_v20  ;;  %10680 = vmatpush3.msra.mxu0 %v969_v21  ;;  %v706_v26 = vld [vmem:[#allocation10 + $0xe8] sm:$0xff]  ;;  %v705_v30 = vld [vmem:[#allocation10 + $0xe0] sm:$0xff]  ;;  %v485_v20 = vlaneseq  ;;  %s15078_s13 = scalar_lea.vmem %s15168_s11, %s10605_s29 }
  0x82   : > { %3800 = vst [vmem:[#allocation4 + $0x68] sm:$0x3] %v12138_v0  ;;  %3801 = vst [vmem:[#allocation4 + $0x70] sm:$0xff] %v12138_v0  ;;  %10611 = vmatprep.subr.mxu1 %v707_v22  ;;  %10681 = vmatprep.subr.mxu0 %v984_v23  ;;  %v983_v27 = vld [vmem:[#allocation10 + $0x2e8] sm:$0xff]  ;;  %v982_v31 = vld [vmem:[#allocation10 + $0x2e0] sm:$0xff] }
  0x83   : > { %3802 = vst [vmem:[#allocation4 + $0x78] sm:$0x3] %v12138_v0  ;;  %3803 = vst [vmem:[#allocation4 + $0x80] sm:$0xff] %v12138_v0  ;;  %10612 = vmatpush3.msra.mxu1 %v691_v24  ;;  %10682 = vmatpush3.msra.mxu0 %v968_v25  ;;  %v690_v28 = vld [vmem:[#allocation10 + $0x68] sm:$0xff]  ;;  %v689_v32 = vld [vmem:[#allocation10 + $0x60] sm:$0xff]  ;;  %v12410_v21 = vshrl.u32 %v485_v20, 7 }
  0x84   : > { %3804 = vst [vmem:[#allocation4 + $0x88] sm:$0x3] %v12138_v0  ;;  %3805 = vst [vmem:[#allocation4 + $0x90] sm:$0xff] %v12138_v0  ;;  %10613 = vmatprep.subr.mxu1 %v706_v26  ;;  %10683 = vmatprep.subr.mxu0 %v983_v27  ;;  %v967_v29 = vld [vmem:[#allocation10 + $0x268] sm:$0xff]  ;;  %v966_v33 = vld [vmem:[#allocation10 + $0x260] sm:$0xff] }
  0x85   : > { %3806 = vst [vmem:[#allocation4 + $0x98] sm:$0x3] %v12138_v0  ;;  %7903 = vst [vmem:[#allocation5] sm:$0xff] %v12138_v0  ;;  %10614 = vmatpush3.msra.mxu1 %v690_v28  ;;  %10684 = vmatpush3.msra.mxu0 %v967_v29  ;;  %v704_v34 = vld [vmem:[#allocation10 + $0xd8] sm:$0xff]  ;;  %v703_v38 = vld [vmem:[#allocation10 + $0xd0] sm:$0xff]  ;;  %v495_v22 = vsub.s32 2, %v12410_v21 }
  0x86   : > { %7904 = vst [vmem:[#allocation5 + $0x8] sm:$0xff] %v12138_v0  ;;  %7905 = vst [vmem:[#allocation5 + $0x10] sm:$0x3] %v12138_v0  ;;  %10615 = vmatprep.subr.mxu1 %v705_v30  ;;  %10685 = vmatprep.subr.mxu0 %v982_v31  ;;  %v981_v35 = vld [vmem:[#allocation10 + $0x2d8] sm:$0xff]  ;;  %v980_v39 = vld [vmem:[#allocation10 + $0x2d0] sm:$0xff]  ;;  %v491_v23 = vsub.s32 1, %v12410_v21 }
  0x87   : > { %7906 = vst [vmem:[#allocation5 + $0x18] sm:$0xff] %v12138_v0  ;;  %7907 = vst [vmem:[#allocation5 + $0x20] sm:$0xff] %v12138_v0  ;;  %10616 = vmatpush3.msra.mxu1 %v689_v32  ;;  %10686 = vmatpush3.msra.mxu0 %v966_v33  ;;  %v688_v36 = vld [vmem:[#allocation10 + $0x58] sm:$0xff]  ;;  %v687_v40 = vld [vmem:[#allocation10 + $0x50] sm:$0xff]  ;;  %v499_v24 = vsub.s32 3, %v12410_v21  ;;  %v12416_v25 = vsub.s32 0, %v12410_v21 }
  0x88   : > { %7908 = vst [vmem:[#allocation5 + $0x28] sm:$0x3] %v12138_v0  ;;  %7909 = vst [vmem:[#allocation5 + $0x30] sm:$0xff] %v12138_v0  ;;  %10617 = vmatprep.subr.mxu1 %v704_v34  ;;  %v965_v37 = vld [vmem:[#allocation10 + $0x258] sm:$0xff]  ;;  %10687 = vmatprep.subr.mxu0 %v981_v35  ;;  %v964_v41 = vld [vmem:[#allocation10 + $0x250] sm:$0xff] }
  0x89   : > { %7910 = vst [vmem:[#allocation5 + $0x38] sm:$0xff] %v12138_v0  ;;  %7911 = vst [vmem:[#allocation5 + $0x40] sm:$0x3] %v12138_v0  ;;  %10618 = vmatpush3.msra.mxu1 %v688_v36  ;;  %10688 = vmatpush3.msra.mxu0 %v965_v37  ;;  %v702_v42 = vld [vmem:[#allocation10 + $0xc8] sm:$0xff]  ;;  %v701_v46 = vld [vmem:[#allocation10 + $0xc0] sm:$0xff] }
  0x8a   : > { %7912 = vst [vmem:[#allocation5 + $0x48] sm:$0xff] %v12138_v0  ;;  %7913 = vst [vmem:[#allocation5 + $0x50] sm:$0xff] %v12138_v0  ;;  %10619 = vmatprep.subr.mxu1 %v703_v38  ;;  %10689 = vmatprep.subr.mxu0 %v980_v39  ;;  %v979_v43 = vld [vmem:[#allocation10 + $0x2c8] sm:$0xff]  ;;  %v978_v47 = vld [vmem:[#allocation10 + $0x2c0] sm:$0xff] }
  0x8b   : > { %7914 = vst [vmem:[#allocation5 + $0x58] sm:$0x3] %v12138_v0  ;;  %7915 = vst [vmem:[#allocation5 + $0x60] sm:$0xff] %v12138_v0  ;;  %10620 = vmatpush3.msra.mxu1 %v687_v40  ;;  %10690 = vmatpush3.msra.mxu0 %v964_v41  ;;  %v686_v44 = vld [vmem:[#allocation10 + $0x48] sm:$0xff]  ;;  %v685_v48 = vld [vmem:[#allocation10 + $0x40] sm:$0xff] }
  0x8c   : > { %7916 = vst [vmem:[#allocation5 + $0x68] sm:$0xff] %v12138_v0  ;;  %7917 = vst [vmem:[#allocation5 + $0x70] sm:$0x3] %v12138_v0  ;;  %10621 = vmatprep.subr.mxu1 %v702_v42  ;;  %v963_v45 = vld [vmem:[#allocation10 + $0x248] sm:$0xff]  ;;  %10691 = vmatprep.subr.mxu0 %v979_v43  ;;  %v962_v49 = vld [vmem:[#allocation10 + $0x240] sm:$0xff] }
  0x8d   : > { %7918 = vst [vmem:[#allocation5 + $0x78] sm:$0xff] %v12138_v0  ;;  %7919 = vst [vmem:[#allocation5 + $0x80] sm:$0xff] %v12138_v0  ;;  %10622 = vmatpush3.msra.mxu1 %v686_v44  ;;  %10692 = vmatpush3.msra.mxu0 %v963_v45  ;;  %v700_v50 = vld [vmem:[#allocation10 + $0xb8] sm:$0xff]  ;;  %v699_v54 = vld [vmem:[#allocation10 + $0xb0] sm:$0xff]  ;;  %v12139_v41 = vmov 1983009808  }
  0x8e   : > { %7920 = vst [vmem:[#allocation5 + $0x88] sm:$0x3] %v12138_v0  ;;  %7921 = vst [vmem:[#allocation5 + $0x90] sm:$0xff] %v12138_v0  ;;  %10623 = vmatprep.subr.mxu1 %v701_v46  ;;  %10693 = vmatprep.subr.mxu0 %v978_v47  ;;  %v977_v51 = vld [vmem:[#allocation10 + $0x2b8] sm:$0xff]  ;;  %v976_v55 = vld [vmem:[#allocation10 + $0x2b0] sm:$0xff]  ;;  %v752_v42 = vunpack.c.l.s4 %v12139_v41 }
  0x8f   : > { %7922 = vst [vmem:[#allocation5 + $0x98] sm:$0xff] %v12138_v0  ;;  %7923 = vst [vmem:[#allocation5 + $0xa0] sm:$0x3] %v12138_v0  ;;  %10624 = vmatpush3.msra.mxu1 %v685_v48  ;;  %v684_v52 = vld [vmem:[#allocation10 + $0x38] sm:$0xff]  ;;  %10694 = vmatpush3.msra.mxu0 %v962_v49  ;;  %v683_v56 = vld [vmem:[#allocation10 + $0x30] sm:$0xff] }
  0x90   : > { %7924 = vst [vmem:[#allocation5 + $0xa8] sm:$0xff] %v12138_v0  ;;  %7925 = vst [vmem:[#allocation5 + $0xb0] sm:$0xff] %v12138_v0  ;;  %v961_v53 = vld [vmem:[#allocation10 + $0x238] sm:$0xff]  ;;  %10625 = vmatprep.subr.mxu1 %v700_v50  ;;  %10695 = vmatprep.subr.mxu0 %v977_v51  ;;  %v960_v57 = vld [vmem:[#allocation10 + $0x230] sm:$0xff]  ;;  %v753_v47 = vunpack.c.0.s8 %v752_v42 }
  0x91   : > { %7926 = vst [vmem:[#allocation5 + $0xb8] sm:$0x3] %v12138_v0  ;;  %7927 = vst [vmem:[#allocation5 + $0xc0] sm:$0xff] %v12138_v0  ;;  %10626 = vmatpush3.msra.mxu1 %v684_v52  ;;  %v698_v58 = vld [vmem:[#allocation10 + $0xa8] sm:$0xff]  ;;  %10696 = vmatpush3.msra.mxu0 %v961_v53  ;;  %v697_v62 = vld [vmem:[#allocation10 + $0xa0] sm:$0xff] }
  0x92   : > { %7928 = vst [vmem:[#allocation5 + $0xc8] sm:$0xff] %v12138_v0  ;;  %7929 = vst [vmem:[#allocation5 + $0xd0] sm:$0x3] %v12138_v0  ;;  %10627 = vmatprep.subr.mxu1 %v699_v54  ;;  %v975_v59 = vld [vmem:[#allocation10 + $0x2a8] sm:$0xff]  ;;  %10697 = vmatprep.subr.mxu0 %v976_v55  ;;  %v974_v63 = vld [vmem:[#allocation10 + $0x2a0] sm:$0xff]  ;;  %v12425_v52 = vsub.s32 %v753_v47, %v12410_v21 }
  0x93   : > { %7930 = vst [vmem:[#allocation5 + $0xd8] sm:$0xff] %v12138_v0  ;;  %7931 = vst [vmem:[#allocation5 + $0xe0] sm:$0xff] %v12138_v0  ;;  %v682_v60 = vld [vmem:[#allocation10 + $0x28] sm:$0xff]  ;;  %10628 = vmatpush3.msra.mxu1 %v683_v56  ;;  %10698 = vmatpush3.msra.mxu0 %v960_v57  ;;  %v958_v1 = vld [vmem:[#allocation10 + $0x220] sm:$0xff] }
  0x94   : > { %7932 = vst [vmem:[#allocation5 + $0xe8] sm:$0x3] %v12138_v0  ;;  %7933 = vst [vmem:[#allocation5 + $0xf0] sm:$0xff] %v12138_v0  ;;  %v959_v61 = vld [vmem:[#allocation10 + $0x228] sm:$0xff]  ;;  %10629 = vmatprep.subr.mxu1 %v698_v58  ;;  %10699 = vmatprep.subr.mxu0 %v975_v59  ;;  %v696_v2 = vld [vmem:[#allocation10 + $0x98] sm:$0xff] }
  0x95   : > { %7934 = vst [vmem:[#allocation5 + $0xf8] sm:$0xff] %v12138_v0  ;;  %7935 = vst [vmem:[#allocation5 + $0x100] sm:$0x3] %v12138_v0  ;;  %10630 = vmatpush3.msra.mxu1 %v682_v60  ;;  %10700 = vmatpush3.msra.mxu0 %v959_v61  ;;  %v973_v3 = vld [vmem:[#allocation10 + $0x298] sm:$0xff]  ;;  %v695_v6 = vld [vmem:[#allocation10 + $0x90] sm:$0xff] }
  0x96   : > { %7936 = vst [vmem:[#allocation5 + $0x108] sm:$0xff] %v12138_v0  ;;  %7937 = vst [vmem:[#allocation5 + $0x110] sm:$0xff] %v12138_v0  ;;  %10631 = vmatprep.subr.mxu1 %v697_v62  ;;  %v680_v4 = vld [vmem:[#allocation10 + $0x18] sm:$0xff]  ;;  %10701 = vmatprep.subr.mxu0 %v974_v63  ;;  %v972_v7 = vld [vmem:[#allocation10 + $0x290] sm:$0xff] }
  0x97   : > { %7938 = vst [vmem:[#allocation5 + $0x118] sm:$0x3] %v12138_v0  ;;  %7939 = vst [vmem:[#allocation5 + $0x120] sm:$0xff] %v12138_v0  ;;  %v957_v5 = vld [vmem:[#allocation10 + $0x218] sm:$0xff]  ;;  %10702 = vmatpush3.msra.mxu0 %v958_v1  ;;  %v679_v8 = vld [vmem:[#allocation10 + $0x10] sm:$0xff] }
  0x98   : > { %7940 = vst [vmem:[#allocation5 + $0x128] sm:$0xff] %v12138_v0  ;;  %7941 = vst [vmem:[#allocation5 + $0x130] sm:$0x3] %v12138_v0  ;;  %10703 = vmatprep.subr.mxu0 %v973_v3  ;;  %v956_v9 = vld [vmem:[#allocation10 + $0x210] sm:$0xff]  ;;  %v694_v10 = vld [vmem:[#allocation10 + $0x88] sm:$0xff] }
  0x99   : > { %7942 = vst [vmem:[#allocation5 + $0x138] sm:$0xff] %v12138_v0  ;;  %7943 = vst [vmem:[#allocation5 + $0x140] sm:$0xff] %v12138_v0  ;;  %10704 = vmatpush3.msra.mxu0 %v957_v5  ;;  %v971_v11 = vld [vmem:[#allocation10 + $0x288] sm:$0xff]  ;;  %v693_v14 = vld [vmem:[#allocation10 + $0x80] sm:$0xff] }
  0x9a   : > { %7944 = vst [vmem:[#allocation5 + $0x148] sm:$0x3] %v12138_v0  ;;  %7945 = vst [vmem:[#allocation5 + $0x150] sm:$0xff] %v12138_v0  ;;  %v678_v12 = vld [vmem:[#allocation10 + $0x8] sm:$0xff]  ;;  %10705 = vmatprep.subr.mxu0 %v972_v7  ;;  %v970_v15 = vld [vmem:[#allocation10 + $0x280] sm:$0xff] }
  0x9b   : > { %7946 = vst [vmem:[#allocation5 + $0x158] sm:$0xff] %v12138_v0  ;;  %7947 = vst [vmem:[#allocation5 + $0x160] sm:$0x3] %v12138_v0  ;;  %v955_v13 = vld [vmem:[#allocation10 + $0x208] sm:$0xff]  ;;  %10706 = vmatpush3.msra.mxu0 %v956_v9  ;;  %v677_v16 = vld [vmem:[#allocation10] sm:$0xff] }
  0x9c   : > { %7948 = vst [vmem:[#allocation5 + $0x168] sm:$0xff] %v12138_v0  ;;  %7949 = vst [vmem:[#allocation5 + $0x170] sm:$0xff] %v12138_v0  ;;  %10707 = vmatprep.subr.mxu0 %v971_v11  ;;  %v954_v17 = vld [vmem:[#allocation10 + $0x200] sm:$0xff]  ;;  %v740_v18 = vld [vmem:[#allocation10 + $0x1f8] sm:$0xff] }
  0x9d   : > { %7950 = vst [vmem:[#allocation5 + $0x178] sm:$0x3] %v12138_v0  ;;  %7951 = vst [vmem:[#allocation5 + $0x180] sm:$0xff] %v12138_v0  ;;  %10708 = vmatpush3.msra.mxu0 %v955_v13  ;;  %v1263_v19 = vld [vmem:[#allocation10 + $0x4f8] sm:$0xff]  ;;  %v483_v26 = vld [vmem:[%s15159_s2] sm:$0xf] }
  0x9e   : > { %7952 = vst [vmem:[#allocation5 + $0x188] sm:$0xff] %v12138_v0  ;;  %7953 = vst [vmem:[#allocation5 + $0x190] sm:$0x3] %v12138_v0  ;;  %10709 = vmatprep.subr.mxu0 %v970_v15  ;;  %v496_v27 = vrot.slane %v483_v26, %v495_v22  ;;  %v492_v28 = vrot.slane %v483_v26, %v491_v23  ;;  %v500_v29 = vrot.slane %v483_v26, %v499_v24  ;;  %v669_v48 = vld [vmem:[#allocation2] sm:$0x3]  ;;  %v737_v41 = vld [vmem:[#allocation10 + $0x1e0] sm:$0xff] }
  0x9f   : > { %7954 = vst [vmem:[#allocation5 + $0x198] sm:$0xff] %v12138_v0  ;;  %7955 = vst [vmem:[#allocation5 + $0x1a0] sm:$0xff] %v12138_v0  ;;  %10710 = vmatpush3.msra.mxu0 %v954_v17  ;;  %v488_v32 = vrot.slane %v483_v26, %v12416_v25  ;;  %v671_v49 = vld [vmem:[#allocation2 + $0x1] sm:$0x3]  ;;  %v1260_v42 = vld [vmem:[#allocation10 + $0x4e0] sm:$0xff] }
  0xa0   : > { %7956 = vst [vmem:[#allocation5 + $0x1a8] sm:$0x3] %v12138_v0  ;;  %v681_v0 = vld [vmem:[#allocation10 + $0x20] sm:$0xff]  ;;  %10749 = vmatprep.subr.mxu0 %v1263_v19  ;;  %v945_v50 = vld [vmem:[#allocation2 + $0x1] sm:$0x3]  ;;  %v749_v53 = vcombine.low %v669_v48, %v671_v49  ;;  %v720_v47 = vld [vmem:[#allocation10 + $0x158] sm:$0xff] }
  0xa1   : > { %10632 = vmatpush3.msra.mxu1 %v681_v0  ;;  %v947_v51 = vld [vmem:[#allocation2 + $0x2] sm:$0x3]  ;;  %v1243_v48 = vld [vmem:[#allocation10 + $0x458] sm:$0xff] }
  0xa2   : > { %10633 = vmatprep.subr.mxu1 %v696_v2  ;;  %v1026_v54 = vcombine.low %v945_v50, %v947_v51  ;;  %v757_v58 = vrot.slane %v749_v53, %v12425_v52  ;;  %v735_v49 = vld [vmem:[#allocation10 + $0x1d0] sm:$0xff] }
  0xa3   : > { %10634 = vmatpush3.msra.mxu1 %v680_v4  ;;  %v1258_v50 = vld [vmem:[#allocation10 + $0x4d0] sm:$0xff] }
  0xa4   : > { %10635 = vmatprep.subr.mxu1 %v695_v6  ;;  %v1034_v63 = vrot.slane %v1026_v54, %v12425_v52  ;;  %v719_v51 = vld [vmem:[#allocation10 + $0x150] sm:$0xff]  ;;  %v734_v54 = vld [vmem:[#allocation10 + $0x1c8] sm:$0xff] }
  0xa5   : > { %10636 = vmatpush3.msra.mxu1 %v679_v8  ;;  %v1242_v53 = vld [vmem:[#allocation10 + $0x450] sm:$0xff] }
  0xa6   : > { %10637 = vmatprep.subr.mxu1 %v694_v10 }
  0xa7   : > { %10638 = vmatpush3.msra.mxu1 %v678_v12 }
  0xa8   : > { %10639 = vmatprep.subr.mxu1 %v693_v14 }
  0xa9   : > { %10640 = vmatpush3.msra.mxu1 %v677_v16 }
  0xaa   : > { %10644 = vmatprep.subr.mxu1 %v740_v18 }
 0x13f   : > { %v575_v30 = vpop.f32.mrf.mxu0  ;;  %v646_v31 = vpop.f32.mrf.mxu1 }
 0x140   : > { %v647_v35 = vadd.f32 %v646_v31, %v496_v27  ;;  %v576_v38 = vadd.f32 %v575_v30, %v488_v32  ;;  %v1247_v30 = vld [vmem:[#allocation10 + $0x478] sm:$0xff]  ;;  %v739_v31 = vld [vmem:[#allocation10 + $0x1f0] sm:$0xff] }
 0x141   : > { %v577_v33 = vpop.f32.mrf.mxu0  ;;  %v648_v34 = vpop.f32.mrf.mxu1  ;;  %v1262_v32 = vld [vmem:[#allocation10 + $0x4f0] sm:$0xff] }
 0x142   : > { %v578_v36 = vadd.f32 %v577_v33, %v492_v28  ;;  %v649_v37 = vadd.f32 %v648_v34, %v500_v29  ;;  %v724_v28 = vld [vmem:[#allocation10 + $0x178] sm:$0xff]  ;;  %v723_v34 = vld [vmem:[#allocation10 + $0x170] sm:$0xff] }
 0x144   : > { %v652_v39 = vrot.slane %v578_v36, 7  ;;  %v657_v40 = vrot.slane %v649_v37, 7  ;;  %v1246_v36 = vld [vmem:[#allocation10 + $0x470] sm:$0xff]  ;;  %v738_v37 = vld [vmem:[#allocation10 + $0x1e8] sm:$0xff] }
 0x146   : > { %v655_v43 = vsel %vm654_vm1, %v576_v38, %v652_v39  ;;  %v659_v44 = vsel %vm654_vm1, %v647_v35, %v657_v40  ;;  %v1261_v38 = vld [vmem:[#allocation10 + $0x4e8] sm:$0xff] }
 0x147   : > { %v664_v45 = vmax.f32 %v655_v43, 0.0  ;;  %v665_v46 = vmax.f32 %v659_v44, 0.0  ;;  %v722_v39 = vld [vmem:[#allocation10 + $0x168] sm:$0xff]  ;;  %v721_v43 = vld [vmem:[#allocation10 + $0x160] sm:$0xff] }
 0x148   : > { %v1245_v40 = vld [vmem:[#allocation10 + $0x468] sm:$0xff]  ;;  %v1244_v44 = vld [vmem:[#allocation10 + $0x460] sm:$0xff] }
 0x149   : > { %667 = vst [vmem:[#allocation2 + $0x5] sm:$0x3] %v664_v45  ;;  %668 = vst [vmem:[#allocation2 + $0x9] sm:$0x3] %v665_v46  ;;  %v736_v45 = vld [vmem:[#allocation10 + $0x1d8] sm:$0xff] }
 0x14a   : > { %v1259_v46 = vld [vmem:[#allocation10 + $0x4d8] sm:$0xff] }
 0x150   : > { %v670_v55 = vld [vmem:[#allocation2 + $0x4] sm:$0x3]  ;;  %v948_v60 = vld [vmem:[#allocation2 + $0x6] sm:$0x3]  ;;  %v674_v62 = vld [vmem:[#allocation2 + $0x8] sm:$0x3] }
 0x151   : > { %v672_v56 = vld [vmem:[#allocation2 + $0x5] sm:$0x3]  ;;  %v676_v2 = vld [vmem:[#allocation2 + $0x9] sm:$0x3] }
 0x152   : > { %v946_v57 = vld [vmem:[#allocation2 + $0x5] sm:$0x3]  ;;  %v766_v59 = vcombine.low %v670_v55, %v672_v56  ;;  %v767_v6 = vcombine.low %v674_v62, %v676_v2  ;;  %v1223_v7 = vld [vmem:[#allocation2 + $0x8] sm:$0x3]  ;;  %v1257_v55 = vld [vmem:[#allocation10 + $0x4c8] sm:$0xff] }
 0x153   : > { %v673_v61 = vld [vmem:[#allocation2 + $0x4] sm:$0x3]  ;;  %v1043_v0 = vcombine.low %v946_v57, %v948_v60  ;;  %v1225_v9 = vld [vmem:[#allocation2 + $0x9] sm:$0x3]  ;;  %v718_v56 = vld [vmem:[#allocation10 + $0x148] sm:$0xff] }
 0x154   : > { %v675_v1 = vld [vmem:[#allocation2 + $0x5] sm:$0x3]  ;;  %v774_v4 = vrot.slane %v766_v59, %v12425_v52  ;;  %v1321_v12 = vcombine.low %v1223_v7, %v1225_v9  ;;  %v781_v15 = vrot.slane %v767_v6, %v12425_v52  ;;  %v1241_v57 = vld [vmem:[#allocation10 + $0x448] sm:$0xff]  ;;  %v1256_v59 = vld [vmem:[#allocation10 + $0x4c0] sm:$0xff] }
 0x155   : > { %v1222_v3 = vld [vmem:[#allocation2 + $0x4] sm:$0x3]  ;;  %v750_v5 = vcombine.low %v673_v61, %v675_v1  ;;  %v1051_v10 = vrot.slane %v1043_v0, %v12425_v52  ;;  %v717_v60 = vld [vmem:[#allocation10 + $0x140] sm:$0xff]  ;;  %v732_v62 = vld [vmem:[#allocation10 + $0x1b8] sm:$0xff] }
 0x156   : > { %v1224_v8 = vld [vmem:[#allocation2 + $0x5] sm:$0x3]  ;;  %v10555_v13 = vcombine.low %v757_v58, %v774_v4  ;;  %v1329_v18 = vrot.slane %v1321_v12, %v12425_v52  ;;  %v733_v58 = vld [vmem:[#allocation10 + $0x1c0] sm:$0xff]  ;;  %v716_v0 = vld [vmem:[#allocation10 + $0x138] sm:$0xff] }
 0x157   : > { %v1304_v11 = vcombine.low %v1222_v3, %v1224_v8  ;;  %v764_v14 = vrot.slane %v750_v5, %v12425_v52  ;;  %v10557_v16 = vcombine.low %v1034_v63, %v1051_v10  ;;  %v1240_v61 = vld [vmem:[#allocation10 + $0x440] sm:$0xff]  ;;  %v1255_v63 = vld [vmem:[#allocation10 + $0x4b8] sm:$0xff]  ;;  %v731_v2 = vld [vmem:[#allocation10 + $0x1b0] sm:$0xff] }
 0x158   : > { %v791_v19 = vrot.slane %v10555_v13, %v12425_v52  ;;  %v1239_v1 = vld [vmem:[#allocation10 + $0x438] sm:$0xff]  ;;  %v949_v3 = vld [vmem:[#allocation2 + $0x5] sm:$0x3] }
 0x159   : > { %v1312_v17 = vrot.slane %v1304_v11, %v12425_v52  ;;  %v10556_v20 = vcombine.low %v764_v14, %v781_v15  ;;  %v1068_v22 = vrot.slane %v10557_v16, %v12425_v52  ;;  %v950_v4 = vld [vmem:[#allocation2 + $0x9] sm:$0x3]  ;;  %v951_v5 = vld [vmem:[#allocation2 + $0x6] sm:$0x3]  ;;  %v730_v14 = vld [vmem:[#allocation10 + $0x1a8] sm:$0xff] }
 0x15a   : > { %v799_v24 = vcombine.high %v791_v19, %v791_v19  ;;  %v952_v6 = vld [vmem:[#allocation2 + $0xa] sm:$0x3]  ;;  %v1500_v7 = vld [vmem:[#allocation2 + $0x5] sm:$0x3]  ;;  %v1027_v15 = vcombine.low %v949_v3, %v951_v5  ;;  %v1014_v3 = vld [vmem:[#allocation10 + $0x3e0] sm:$0xff] }
 0x15b   : > { %v10559_v23 = vcombine.low %v1312_v17, %v1329_v18  ;;  %v12438_v26 = vrot.slane %v10556_v20, %v12425_v52  ;;  %v1076_v27 = vcombine.high %v1068_v22, %v1068_v22  ;;  %v1501_v8 = vld [vmem:[#allocation2 + $0x9] sm:$0x3]  ;;  %v1502_v9 = vld [vmem:[#allocation2 + $0x6] sm:$0x3]  ;;  %v1044_v16 = vcombine.low %v950_v4, %v952_v6  ;;  %v1253_v17 = vld [vmem:[#allocation10 + $0x4a8] sm:$0xff] }
 0x15c   : > { %869 = vmatprep.mubr.f32.mxu1 %v799_v24  ;;  %v1503_v10 = vld [vmem:[#allocation2 + $0xa] sm:$0x3]  ;;  %v1254_v11 = vld [vmem:[#allocation10 + $0x4b0] sm:$0xff]  ;;  %v714_v18 = vld [vmem:[#allocation10 + $0x128] sm:$0xff] }
 0x15d   : > { %v12441_v29 = vrot.slane %v10559_v23, %v12425_v52  ;;  %1146 = vmatprep.mubr.f32.mxu0 %v1076_v27  ;;  %870 = vmatmul.mubr.f32.vlgmr.msra.gmra.mxu1 %v791_v19  ;;  %v800_v33 = vcombine.high %v12438_v26, %v12438_v26  ;;  %v715_v12 = vld [vmem:[#allocation10 + $0x130] sm:$0xff]  ;;  %v1581_v19 = vcombine.low %v1500_v7, %v1502_v9  ;;  %v729_v23 = vld [vmem:[#allocation10 + $0x1a0] sm:$0xff]  ;;  %v1013_v7 = vld [vmem:[#allocation10 + $0x3d8] sm:$0xff] }
 0x15e   : > { %10645 = vmatpush3.msra.mxu1 %v724_v28  ;;  %1147 = vmatmul.mubr.f32.vlgmr.msra.gmra.mxu0 %v1068_v22  ;;  %v1238_v13 = vld [vmem:[#allocation10 + $0x430] sm:$0xff]  ;;  %v1598_v20 = vcombine.low %v1501_v8, %v1503_v10  ;;  %v1237_v22 = vld [vmem:[#allocation10 + $0x428] sm:$0xff]  ;;  %v1252_v24 = vld [vmem:[#allocation10 + $0x4a0] sm:$0xff] }
 0x15f   : > { %10750 = vmatpush3.msra.mxu0 %v1247_v30  ;;  %10646 = vmatprep.subr.mxu1 %v739_v31  ;;  %v1354_v35 = vcombine.high %v12441_v29, %v12441_v29  ;;  %v713_v27 = vld [vmem:[#allocation10 + $0x120] sm:$0xff]  ;;  %v728_v30 = vld [vmem:[#allocation10 + $0x198] sm:$0xff]  ;;  %v1041_v31 = vrot.slane %v1027_v15, %v12425_v52  ;;  %v1011_v15 = vld [vmem:[#allocation10 + $0x3c8] sm:$0xff] }
 0x160   : > { %939 = vmatprep.mubr.f32.mxu1 %v800_v33  ;;  %10751 = vmatprep.subr.mxu0 %v1262_v32  ;;  %v1236_v28 = vld [vmem:[#allocation10 + $0x420] sm:$0xff]  ;;  %v1058_v32 = vrot.slane %v1044_v16, %v12425_v52  ;;  %v1251_v33 = vld [vmem:[#allocation10 + $0x498] sm:$0xff]  ;;  %v1534_v16 = vld [vmem:[#allocation10 + $0x6c8] sm:$0xff] }
 0x161   : > { %1424 = vmatprep.mubr.f32.mxu0 %v1354_v35  ;;  %10647 = vmatpush3.msra.mxu1 %v723_v34  ;;  %v712_v34 = vld [vmem:[#allocation10 + $0x118] sm:$0xff]  ;;  %v1589_v35 = vrot.slane %v1581_v19, %v12425_v52  ;;  %v1537_v4 = vld [vmem:[#allocation10 + $0x6e0] sm:$0xff] }
 0x162   : > { %10752 = vmatpush3.msra.mxu0 %v1246_v36  ;;  %10648 = vmatprep.subr.mxu1 %v738_v37  ;;  %v1606_v36 = vrot.slane %v1598_v20, %v12425_v52  ;;  %v1235_v37 = vld [vmem:[#allocation10 + $0x418] sm:$0xff]  ;;  %v998_v5 = vld [vmem:[#allocation10 + $0x360] sm:$0xff] }
 0x163   : > { %10753 = vmatprep.subr.mxu0 %v1261_v38  ;;  %10649 = vmatpush3.msra.mxu1 %v722_v39  ;;  %v727_v38 = vld [vmem:[#allocation10 + $0x190] sm:$0xff]  ;;  %v1521_v6 = vld [vmem:[#allocation10 + $0x660] sm:$0xff]  ;;  %v1536_v8 = vld [vmem:[#allocation10 + $0x6d8] sm:$0xff] }
 0x164   : > { %10754 = vmatpush3.msra.mxu0 %v1245_v40  ;;  %10650 = vmatprep.subr.mxu1 %v737_v41  ;;  %v1250_v39 = vld [vmem:[#allocation10 + $0x490] sm:$0xff]  ;;  %v997_v9 = vld [vmem:[#allocation10 + $0x358] sm:$0xff]  ;;  %v1010_v19 = vld [vmem:[#allocation10 + $0x3c0] sm:$0xff] }
 0x165   : > { %10755 = vmatprep.subr.mxu0 %v1260_v42  ;;  %10651 = vmatpush3.msra.mxu1 %v721_v43  ;;  %v711_v40 = vld [vmem:[#allocation10 + $0x110] sm:$0xff]  ;;  %v726_v42 = vld [vmem:[#allocation10 + $0x188] sm:$0xff]  ;;  %v10558_v43 = vcombine.low %v1041_v31, %v1058_v32  ;;  %v1520_v10 = vld [vmem:[#allocation10 + $0x658] sm:$0xff] }
 0x166   : > { %10756 = vmatpush3.msra.mxu0 %v1244_v44  ;;  %10652 = vmatprep.subr.mxu1 %v736_v45  ;;  %v1234_v41 = vld [vmem:[#allocation10 + $0x410] sm:$0xff]  ;;  %v1249_v44 = vld [vmem:[#allocation10 + $0x488] sm:$0xff]  ;;  %v1228_v20 = vld [vmem:[#allocation2 + $0xc] sm:$0x3] }
 0x167   : > { %10757 = vmatprep.subr.mxu0 %v1259_v46  ;;  %10653 = vmatpush3.msra.mxu1 %v720_v47  ;;  %v710_v45 = vld [vmem:[#allocation10 + $0x108] sm:$0xff]  ;;  %v10561_v46 = vcombine.low %v1589_v35, %v1606_v36  ;;  %v1229_v31 = vld [vmem:[#allocation2 + $0x9] sm:$0x3] }
 0x168   : > { %10758 = vmatpush3.msra.mxu0 %v1243_v48  ;;  %10654 = vmatprep.subr.mxu1 %v735_v49  ;;  %v1233_v47 = vld [vmem:[#allocation10 + $0x408] sm:$0xff]  ;;  %v725_v48 = vld [vmem:[#allocation10 + $0x180] sm:$0xff]  ;;  %v1532_v32 = vld [vmem:[#allocation10 + $0x6b8] sm:$0xff] }
 0x169   : > { %10759 = vmatprep.subr.mxu0 %v1258_v50  ;;  %10655 = vmatpush3.msra.mxu1 %v719_v51  ;;  %v1248_v49 = vld [vmem:[#allocation10 + $0x480] sm:$0xff]  ;;  %v1008_v35 = vld [vmem:[#allocation10 + $0x3b0] sm:$0xff] }
 0x16a   : > { %10760 = vmatpush3.msra.mxu0 %v1242_v53  ;;  %10656 = vmatprep.subr.mxu1 %v734_v54  ;;  %v709_v50 = vld [vmem:[#allocation10 + $0x100] sm:$0xff]  ;;  %v12452_v53 = vrot.slane %v10558_v43, %v12425_v52  ;;  %v1017_v54 = vld [vmem:[#allocation10 + $0x3f8] sm:$0xff]  ;;  %v1531_v36 = vld [vmem:[#allocation10 + $0x6b0] sm:$0xff] }
 0x16b   : > { %10761 = vmatprep.subr.mxu0 %v1257_v55  ;;  %10657 = vmatpush3.msra.mxu1 %v718_v56  ;;  %v1232_v51 = vld [vmem:[#allocation10 + $0x400] sm:$0xff]  ;;  %v12455_v55 = vrot.slane %v10561_v46, %v12425_v52  ;;  %v1540_v56 = vld [vmem:[#allocation10 + $0x6f8] sm:$0xff]  ;;  %v991_v43 = vld [vmem:[#allocation10 + $0x328] sm:$0xff] }
 0x16c   : > { %10762 = vmatpush3.msra.mxu0 %v1241_v57  ;;  %10658 = vmatprep.subr.mxu1 %v733_v58  ;;  %v1001_v57 = vld [vmem:[#allocation10 + $0x378] sm:$0xff]  ;;  %v1529_v46 = vld [vmem:[#allocation10 + $0x6a0] sm:$0xff] }
 0x16d   : > { %10763 = vmatprep.subr.mxu0 %v1256_v59  ;;  %10659 = vmatpush3.msra.mxu1 %v717_v60  ;;  %v1524_v58 = vld [vmem:[#allocation10 + $0x678] sm:$0xff]  ;;  %v1077_v59 = vcombine.high %v12452_v53, %v12452_v53  ;;  %v1016_v60 = vld [vmem:[#allocation10 + $0x3f0] sm:$0xff] }
 0x16e   : > { %10764 = vmatpush3.msra.mxu0 %v1240_v61  ;;  %10660 = vmatprep.subr.mxu1 %v732_v62  ;;  %v1631_v61 = vcombine.high %v12455_v55, %v12455_v55  ;;  %v1539_v62 = vld [vmem:[#allocation10 + $0x6f0] sm:$0xff] }
 0x16f   : > { %10765 = vmatprep.subr.mxu0 %v1255_v63  ;;  %10661 = vmatpush3.msra.mxu1 %v716_v0  ;;  %v1000_v63 = vld [vmem:[#allocation10 + $0x370] sm:$0xff] }
 0x170   : > { %10766 = vmatpush3.msra.mxu0 %v1239_v1  ;;  %10662 = vmatprep.subr.mxu1 %v731_v2  ;;  %v1523_v0 = vld [vmem:[#allocation10 + $0x670] sm:$0xff]  ;;  %v1015_v1 = vld [vmem:[#allocation10 + $0x3e8] sm:$0xff] }
 0x171   : > { %10767 = vmatprep.subr.mxu0 %v1254_v11  ;;  %10663 = vmatpush3.msra.mxu1 %v715_v12  ;;  %v999_v2 = vld [vmem:[#allocation10 + $0x368] sm:$0xff]  ;;  %v1012_v11 = vld [vmem:[#allocation10 + $0x3d0] sm:$0xff] }
 0x172   : > { %10768 = vmatpush3.msra.mxu0 %v1238_v13  ;;  %10664 = vmatprep.subr.mxu1 %v730_v14  ;;  %v1535_v12 = vld [vmem:[#allocation10 + $0x6d0] sm:$0xff] }
 0x173   : > { %10769 = vmatprep.subr.mxu0 %v1253_v17  ;;  %10665 = vmatpush3.msra.mxu1 %v714_v18  ;;  %v996_v13 = vld [vmem:[#allocation10 + $0x350] sm:$0xff]  ;;  %v995_v17 = vld [vmem:[#allocation10 + $0x348] sm:$0xff] }
 0x174   : > { %10770 = vmatpush3.msra.mxu0 %v1237_v22  ;;  %10666 = vmatprep.subr.mxu1 %v729_v23  ;;  %v1519_v14 = vld [vmem:[#allocation10 + $0x650] sm:$0xff]  ;;  %v1518_v18 = vld [vmem:[#allocation10 + $0x648] sm:$0xff]  ;;  %v1230_v22 = vld [vmem:[#allocation2 + $0xd] sm:$0x3] }
 0x175   : > { %10771 = vmatprep.subr.mxu0 %v1252_v24  ;;  %10667 = vmatpush3.msra.mxu1 %v713_v27  ;;  %v1533_v23 = vld [vmem:[#allocation10 + $0x6c0] sm:$0xff] }
 0x176   : > { %10772 = vmatpush3.msra.mxu0 %v1236_v28  ;;  %10668 = vmatprep.subr.mxu1 %v728_v30  ;;  %v994_v24 = vld [vmem:[#allocation10 + $0x340] sm:$0xff]  ;;  %v1009_v28 = vld [vmem:[#allocation10 + $0x3b8] sm:$0xff]  ;;  %v1227_v30 = vld [vmem:[#allocation2 + $0x8] sm:$0x3] }
 0x177   : > { %10773 = vmatprep.subr.mxu0 %v1251_v33  ;;  %10669 = vmatpush3.msra.mxu1 %v712_v34  ;;  %v1517_v27 = vld [vmem:[#allocation10 + $0x640] sm:$0xff]  ;;  %v993_v33 = vld [vmem:[#allocation10 + $0x338] sm:$0xff] }
 0x178   : > { %10774 = vmatpush3.msra.mxu0 %v1235_v37  ;;  %10670 = vmatprep.subr.mxu1 %v727_v38  ;;  %v1516_v34 = vld [vmem:[#allocation10 + $0x638] sm:$0xff]  ;;  %v992_v37 = vld [vmem:[#allocation10 + $0x330] sm:$0xff]  ;;  %v1305_v38 = vcombine.low %v1227_v30, %v1229_v31 }
 0x179   : > { %10775 = vmatprep.subr.mxu0 %v1250_v39  ;;  %10671 = vmatpush3.msra.mxu1 %v711_v40  ;;  %v1322_v39 = vcombine.low %v1228_v20, %v1230_v22  ;;  %v1515_v40 = vld [vmem:[#allocation10 + $0x630] sm:$0xff]  ;;  %v1505_v20 = vld [vmem:[#allocation2 + $0xd] sm:$0x3] }
 0x17a   : > { %10776 = vmatpush3.msra.mxu0 %v1234_v41  ;;  %10672 = vmatprep.subr.mxu1 %v726_v42  ;;  %v1007_v41 = vld [vmem:[#allocation10 + $0x3a8] sm:$0xff]  ;;  %v1507_v22 = vld [vmem:[#allocation2 + $0xe] sm:$0x3]  ;;  %v1286_v31 = vld [vmem:[#allocation10 + $0x5b0] sm:$0xff] }
 0x17b   : > { %10777 = vmatprep.subr.mxu0 %v1249_v44  ;;  %10673 = vmatpush3.msra.mxu1 %v710_v45  ;;  %v1530_v42 = vld [vmem:[#allocation10 + $0x6a8] sm:$0xff]  ;;  %v1006_v45 = vld [vmem:[#allocation10 + $0x3a0] sm:$0xff]  ;;  %v1271_v30 = vld [vmem:[#allocation10 + $0x538] sm:$0xff] }
 0x17c   : > { %10778 = vmatpush3.msra.mxu0 %v1233_v47  ;;  %10674 = vmatprep.subr.mxu1 %v725_v48  ;;  %v1514_v44 = vld [vmem:[#allocation10 + $0x628] sm:$0xff]  ;;  %v990_v47 = vld [vmem:[#allocation10 + $0x320] sm:$0xff]  ;;  %v1319_v48 = vrot.slane %v1305_v38, %v12425_v52 }
 0x17d   : > { %10779 = vmatprep.subr.mxu0 %v1248_v49  ;;  %10675 = vmatpush3.msra.mxu1 %v709_v50  ;;  %v1336_v49 = vrot.slane %v1322_v39, %v12425_v52  ;;  %v1513_v50 = vld [vmem:[#allocation10 + $0x620] sm:$0xff] }
 0x17e   : > { %10780 = vmatpush3.msra.mxu0 %v1232_v51  ;;  %940 = vmatmul.mubr.f32.vlgmr.msra.gmra.mxu1 %v12438_v26  ;;  %v1538_v26 = vld [vmem:[#allocation10 + $0x6e8] sm:$0xff]  ;;  %v1005_v51 = vld [vmem:[#allocation10 + $0x398] sm:$0xff] }
 0x17f   : > { %10714 = vmatprep.subr.mxu1 %v1017_v54  ;;  %1425 = vmatmul.mubr.f32.vlgmr.msra.gmra.mxu0 %v12441_v29  ;;  %v1522_v29 = vld [vmem:[#allocation10 + $0x668] sm:$0xff]  ;;  %v1528_v54 = vld [vmem:[#allocation10 + $0x698] sm:$0xff] }
 0x180   : > { %10819 = vmatprep.subr.mxu0 %v1540_v56  ;;  %10715 = vmatpush3.msra.mxu1 %v1001_v57  ;;  %v989_v56 = vld [vmem:[#allocation10 + $0x318] sm:$0xff] }
 0x181   : > { %1216 = vmatprep.mubr.f32.mxu1 %v1077_v59  ;;  %10820 = vmatpush3.msra.mxu0 %v1524_v58  ;;  %v1512_v57 = vld [vmem:[#allocation10 + $0x618] sm:$0xff]  ;;  %v1004_v58 = vld [vmem:[#allocation10 + $0x390] sm:$0xff] }
 0x182   : > { %1701 = vmatprep.mubr.f32.mxu0 %v1631_v61  ;;  %10716 = vmatprep.subr.mxu1 %v1016_v60  ;;  %v1527_v59 = vld [vmem:[#allocation10 + $0x690] sm:$0xff]  ;;  %v10560_v61 = vcombine.low %v1319_v48, %v1336_v49  ;;  %v1280_v48 = vld [vmem:[#allocation10 + $0x580] sm:$0xff] }
 0x183   : > { %10821 = vmatprep.subr.mxu0 %v1539_v62  ;;  %10717 = vmatpush3.msra.mxu1 %v1000_v63  ;;  %v988_v60 = vld [vmem:[#allocation10 + $0x310] sm:$0xff]  ;;  %v1003_v63 = vld [vmem:[#allocation10 + $0x388] sm:$0xff] }
 0x184   : > { %10822 = vmatpush3.msra.mxu0 %v1523_v0  ;;  %10718 = vmatprep.subr.mxu1 %v1015_v1  ;;  %v1511_v62 = vld [vmem:[#allocation10 + $0x610] sm:$0xff]  ;;  %v1526_v0 = vld [vmem:[#allocation10 + $0x688] sm:$0xff] }
 0x185   : > { %10823 = vmatprep.subr.mxu0 %v1538_v26  ;;  %10719 = vmatpush3.msra.mxu1 %v999_v2  ;;  %v987_v1 = vld [vmem:[#allocation10 + $0x308] sm:$0xff]  ;;  %v1002_v2 = vld [vmem:[#allocation10 + $0x380] sm:$0xff] }
 0x186   : > { %10824 = vmatpush3.msra.mxu0 %v1522_v29  ;;  %10720 = vmatprep.subr.mxu1 %v1014_v3  ;;  %v1510_v26 = vld [vmem:[#allocation10 + $0x608] sm:$0xff]  ;;  %v1525_v29 = vld [vmem:[#allocation10 + $0x680] sm:$0xff] }
 0x187   : > { %10825 = vmatprep.subr.mxu0 %v1537_v4  ;;  %10721 = vmatpush3.msra.mxu1 %v998_v5  ;;  %v986_v3 = vld [vmem:[#allocation10 + $0x300] sm:$0xff]  ;;  %v12466_v4 = vrot.slane %v10560_v61, %v12425_v52 }
 0x188   : > { %10826 = vmatpush3.msra.mxu0 %v1521_v6  ;;  %10722 = vmatprep.subr.mxu1 %v1013_v7  ;;  %v1509_v5 = vld [vmem:[#allocation10 + $0x600] sm:$0xff]  ;;  %v1295_v6 = vld [vmem:[#allocation10 + $0x5f8] sm:$0xff] }
 0x189   : > { %10827 = vmatprep.subr.mxu0 %v1536_v8  ;;  %10723 = vmatpush3.msra.mxu1 %v997_v9  ;;  %v1279_v7 = vld [vmem:[#allocation10 + $0x578] sm:$0xff]  ;;  %v1355_v8 = vcombine.high %v12466_v4, %v12466_v4  ;;  %v1294_v9 = vld [vmem:[#allocation10 + $0x5f0] sm:$0xff]  ;;  %v1569_v61 = vld [vmem:[#allocation10 + $0x7e0] sm:$0xff] }
 0x18a   : > { %10828 = vmatpush3.msra.mxu0 %v1520_v10  ;;  %10724 = vmatprep.subr.mxu1 %v1012_v11  ;;  %v1278_v10 = vld [vmem:[#allocation10 + $0x570] sm:$0xff]  ;;  %v1293_v11 = vld [vmem:[#allocation10 + $0x5e8] sm:$0xff] }
 0x18b   : > { %10829 = vmatprep.subr.mxu0 %v1535_v12  ;;  %10725 = vmatpush3.msra.mxu1 %v996_v13  ;;  %v1277_v12 = vld [vmem:[#allocation10 + $0x568] sm:$0xff]  ;;  %v1292_v13 = vld [vmem:[#allocation10 + $0x5e0] sm:$0xff] }
 0x18c   : > { %10830 = vmatpush3.msra.mxu0 %v1519_v14  ;;  %10726 = vmatprep.subr.mxu1 %v1011_v15  ;;  %v1276_v14 = vld [vmem:[#allocation10 + $0x560] sm:$0xff]  ;;  %v1291_v15 = vld [vmem:[#allocation10 + $0x5d8] sm:$0xff] }
 0x18d   : > { %10831 = vmatprep.subr.mxu0 %v1534_v16  ;;  %10727 = vmatpush3.msra.mxu1 %v995_v17  ;;  %v1290_v16 = vld [vmem:[#allocation10 + $0x5d0] sm:$0xff] }
 0x18e   : > { %10832 = vmatpush3.msra.mxu0 %v1518_v18  ;;  %10728 = vmatprep.subr.mxu1 %v1010_v19  ;;  %v1274_v17 = vld [vmem:[#allocation10 + $0x550] sm:$0xff]  ;;  %v1273_v18 = vld [vmem:[#allocation10 + $0x548] sm:$0xff]  ;;  %v1288_v19 = vld [vmem:[#allocation10 + $0x5c0] sm:$0xff] }
 0x18f   : > { %10833 = vmatprep.subr.mxu0 %v1533_v23  ;;  %10729 = vmatpush3.msra.mxu1 %v994_v24  ;;  %v1272_v23 = vld [vmem:[#allocation10 + $0x540] sm:$0xff]  ;;  %v1504_v24 = vld [vmem:[#allocation2 + $0x9] sm:$0x3] }
 0x190   : > { %10834 = vmatpush3.msra.mxu0 %v1517_v27  ;;  %10730 = vmatprep.subr.mxu1 %v1009_v28  ;;  %v1506_v27 = vld [vmem:[#allocation2 + $0xa] sm:$0x3] }
 0x191   : > { %10835 = vmatprep.subr.mxu0 %v1532_v32  ;;  %10731 = vmatpush3.msra.mxu1 %v993_v33  ;;  %v1287_v28 = vld [vmem:[#allocation10 + $0x5b8] sm:$0xff]  ;;  %v1582_v32 = vcombine.low %v1504_v24, %v1506_v27  ;;  %v1599_v33 = vcombine.low %v1505_v20, %v1507_v22  ;;  %v2066_v22 = vld [vmem:[#allocation11 + $0xf0] sm:$0xff]  ;;  %v2065_v24 = vld [vmem:[#allocation11 + $0xe8] sm:$0xff] }
 0x192   : > { %10836 = vmatpush3.msra.mxu0 %v1516_v34  ;;  %10732 = vmatprep.subr.mxu1 %v1008_v35  ;;  %v1270_v34 = vld [vmem:[#allocation10 + $0x530] sm:$0xff]  ;;  %v1285_v35 = vld [vmem:[#allocation10 + $0x5a8] sm:$0xff]  ;;  %v2051_v20 = vld [vmem:[#allocation11 + $0x78] sm:$0xff] }
 0x193   : > { %10837 = vmatprep.subr.mxu0 %v1531_v36  ;;  %10733 = vmatpush3.msra.mxu1 %v992_v37  ;;  %v1269_v36 = vld [vmem:[#allocation10 + $0x528] sm:$0xff]  ;;  %v1284_v37 = vld [vmem:[#allocation10 + $0x5a0] sm:$0xff]  ;;  %v1596_v38 = vrot.slane %v1582_v32, %v12425_v52  ;;  %v1613_v39 = vrot.slane %v1599_v33, %v12425_v52  ;;  %v2047_v32 = vld [vmem:[#allocation11 + $0x58] sm:$0xff] }
 0x194   : > { %10838 = vmatpush3.msra.mxu0 %v1515_v40  ;;  %10734 = vmatprep.subr.mxu1 %v1007_v41  ;;  %v1268_v40 = vld [vmem:[#allocation10 + $0x520] sm:$0xff]  ;;  %v1283_v41 = vld [vmem:[#allocation10 + $0x598] sm:$0xff]  ;;  %v2049_v27 = vld [vmem:[#allocation11 + $0x68] sm:$0xff] }
 0x195   : > { %10839 = vmatprep.subr.mxu0 %v1530_v42  ;;  %10735 = vmatpush3.msra.mxu1 %v991_v43  ;;  %v1267_v42 = vld [vmem:[#allocation10 + $0x518] sm:$0xff]  ;;  %v1282_v43 = vld [vmem:[#allocation10 + $0x590] sm:$0xff] }
 0x196   : > { %10840 = vmatpush3.msra.mxu0 %v1514_v44  ;;  %10736 = vmatprep.subr.mxu1 %v1006_v45  ;;  %v10562_v44 = vcombine.low %v1596_v38, %v1613_v39  ;;  %v1266_v45 = vld [vmem:[#allocation10 + $0x510] sm:$0xff]  ;;  %v2044_v38 = vld [vmem:[#allocation11 + $0x40] sm:$0xff]  ;;  %v2059_v39 = vld [vmem:[#allocation11 + $0xb8] sm:$0xff] }
 0x197   : > { %10841 = vmatprep.subr.mxu0 %v1529_v46  ;;  %10737 = vmatpush3.msra.mxu1 %v990_v47  ;;  %v1281_v46 = vld [vmem:[#allocation10 + $0x588] sm:$0xff]  ;;  %v2062_v33 = vld [vmem:[#allocation11 + $0xd0] sm:$0xff] }
 0x198   : > { %10842 = vmatpush3.msra.mxu0 %v1513_v50  ;;  %10738 = vmatprep.subr.mxu1 %v1005_v51  ;;  %v1265_v47 = vld [vmem:[#allocation10 + $0x508] sm:$0xff]  ;;  %v12475_v49 = vrot.slane %v10562_v44, %v12425_v52  ;;  %v1264_v50 = vld [vmem:[#allocation10 + $0x500] sm:$0xff]  ;;  %v1572_v51 = vld [vmem:[#allocation10 + $0x7f8] sm:$0xff] }
 0x199   : > { %10843 = vmatprep.subr.mxu0 %v1528_v54  ;;  %10739 = vmatpush3.msra.mxu1 %v989_v56  ;;  %v1556_v54 = vld [vmem:[#allocation10 + $0x778] sm:$0xff]  ;;  %v2041_v44 = vld [vmem:[#allocation11 + $0x28] sm:$0xff] }
 0x19a   : > { %10844 = vmatpush3.msra.mxu0 %v1512_v57  ;;  %10740 = vmatprep.subr.mxu1 %v1004_v58  ;;  %v1632_v56 = vcombine.high %v12475_v49, %v12475_v49  ;;  %v1571_v57 = vld [vmem:[#allocation10 + $0x7f0] sm:$0xff] }
 0x19b   : > { %10845 = vmatprep.subr.mxu0 %v1527_v59  ;;  %10741 = vmatpush3.msra.mxu1 %v988_v60  ;;  %v1555_v58 = vld [vmem:[#allocation10 + $0x770] sm:$0xff]  ;;  %v1570_v59 = vld [vmem:[#allocation10 + $0x7e8] sm:$0xff] }
 0x19c   : > { %10846 = vmatpush3.msra.mxu0 %v1511_v62  ;;  %10742 = vmatprep.subr.mxu1 %v1003_v63  ;;  %v1554_v60 = vld [vmem:[#allocation10 + $0x768] sm:$0xff]  ;;  %v1553_v62 = vld [vmem:[#allocation10 + $0x760] sm:$0xff]  ;;  %v1568_v63 = vld [vmem:[#allocation10 + $0x7d8] sm:$0xff] }
 0x19d   : > { %10847 = vmatprep.subr.mxu0 %v1526_v0  ;;  %10743 = vmatpush3.msra.mxu1 %v987_v1  ;;  %v1552_v0 = vld [vmem:[#allocation10 + $0x758] sm:$0xff]  ;;  %v1567_v1 = vld [vmem:[#allocation10 + $0x7d0] sm:$0xff] }
 0x19e   : > { %10848 = vmatpush3.msra.mxu0 %v1510_v26  ;;  %10744 = vmatprep.subr.mxu1 %v1002_v2  ;;  %v1551_v26 = vld [vmem:[#allocation10 + $0x750] sm:$0xff]  ;;  %v1566_v2 = vld [vmem:[#allocation10 + $0x7c8] sm:$0xff] }
 0x19f   : > { %10849 = vmatprep.subr.mxu0 %v1525_v29  ;;  %10745 = vmatpush3.msra.mxu1 %v986_v3  ;;  %v1550_v29 = vld [vmem:[#allocation10 + $0x748] sm:$0xff]  ;;  %v1565_v3 = vld [vmem:[#allocation10 + $0x7c0] sm:$0xff] }
 0x1a0   : > { %10850 = vmatpush3.msra.mxu0 %v1509_v5  ;;  %1217 = vmatmul.mubr.f32.vlgmr.msra.gmra.mxu1 %v12452_v53  ;;  %v1275_v53 = vld [vmem:[#allocation10 + $0x558] sm:$0xff] }
 0x1a1   : > { %10784 = vmatprep.subr.mxu1 %v1295_v6  ;;  %1702 = vmatmul.mubr.f32.vlgmr.msra.gmra.mxu0 %v12455_v55  ;;  %v1289_v55 = vld [vmem:[#allocation10 + $0x5c8] sm:$0xff]  ;;  %v1564_v5 = vld [vmem:[#allocation10 + $0x7b8] sm:$0xff] }
 0x1a2   : > { %10785 = vmatpush3.msra.mxu1 %v1279_v7  ;;  %1494 = vmatprep.mubr.f32.mxu1 %v1355_v8  ;;  %v1548_v6 = vld [vmem:[#allocation10 + $0x738] sm:$0xff]  ;;  %v1563_v7 = vld [vmem:[#allocation10 + $0x7b0] sm:$0xff] }
 0x1a3   : > { %10786 = vmatprep.subr.mxu1 %v1294_v9  ;;  %v1547_v8 = vld [vmem:[#allocation10 + $0x730] sm:$0xff]  ;;  %v1562_v9 = vld [vmem:[#allocation10 + $0x7a8] sm:$0xff] }
 0x1a4   : > { %10787 = vmatpush3.msra.mxu1 %v1278_v10  ;;  %v1546_v10 = vld [vmem:[#allocation10 + $0x728] sm:$0xff] }
 0x1a5   : > { %10788 = vmatprep.subr.mxu1 %v1293_v11  ;;  %v1561_v11 = vld [vmem:[#allocation10 + $0x7a0] sm:$0xff] }
 0x1a6   : > { %10789 = vmatpush3.msra.mxu1 %v1277_v12  ;;  %v1545_v12 = vld [vmem:[#allocation10 + $0x720] sm:$0xff] }
 0x1a7   : > { %10790 = vmatprep.subr.mxu1 %v1292_v13  ;;  %v1560_v13 = vld [vmem:[#allocation10 + $0x798] sm:$0xff] }
 0x1a8   : > { %10791 = vmatpush3.msra.mxu1 %v1276_v14  ;;  %v1544_v14 = vld [vmem:[#allocation10 + $0x718] sm:$0xff] }
 0x1a9   : > { %10792 = vmatprep.subr.mxu1 %v1291_v15  ;;  %v1559_v15 = vld [vmem:[#allocation10 + $0x790] sm:$0xff] }
 0x1aa   : > { %10793 = vmatpush3.msra.mxu1 %v1275_v53  ;;  %v1543_v53 = vld [vmem:[#allocation10 + $0x710] sm:$0xff] }
 0x1ab   : > { %10794 = vmatprep.subr.mxu1 %v1290_v16  ;;  %v1558_v16 = vld [vmem:[#allocation10 + $0x788] sm:$0xff] }
 0x1ac   : > { %10795 = vmatpush3.msra.mxu1 %v1274_v17  ;;  %v1542_v17 = vld [vmem:[#allocation10 + $0x708] sm:$0xff] }
 0x1ad   : > { %10796 = vmatprep.subr.mxu1 %v1289_v55  ;;  %v1557_v55 = vld [vmem:[#allocation10 + $0x780] sm:$0xff] }
 0x1ae   : > { %10797 = vmatpush3.msra.mxu1 %v1273_v18  ;;  %v1541_v18 = vld [vmem:[#allocation10 + $0x700] sm:$0xff] }
 0x1af   : > { %10798 = vmatprep.subr.mxu1 %v1288_v19  ;;  %v2067_v19 = vld [vmem:[#allocation11 + $0xf8] sm:$0xff] }
 0x1b0   : > { %10799 = vmatpush3.msra.mxu1 %v1272_v23  ;;  %10889 = vmatprep.subr.mxu0 %v2067_v19  ;;  %v2050_v23 = vld [vmem:[#allocation11 + $0x70] sm:$0xff]  ;;  %v2085_v19 = vld [vmem:[#allocation11 + $0x188] sm:$0xff] }
 0x1b1   : > { %10800 = vmatprep.subr.mxu1 %v1287_v28  ;;  %10890 = vmatpush3.msra.mxu0 %v2051_v20  ;;  %v2064_v28 = vld [vmem:[#allocation11 + $0xe0] sm:$0xff]  ;;  %v2069_v20 = vld [vmem:[#allocation11 + $0x108] sm:$0xff] }
 0x1b2   : > { %10801 = vmatpush3.msra.mxu1 %v1271_v30  ;;  %10891 = vmatprep.subr.mxu0 %v2066_v22  ;;  %v2048_v30 = vld [vmem:[#allocation11 + $0x60] sm:$0xff] }
 0x1b3   : > { %10802 = vmatprep.subr.mxu1 %v1286_v31  ;;  %10892 = vmatpush3.msra.mxu0 %v2050_v23  ;;  %v2063_v31 = vld [vmem:[#allocation11 + $0xd8] sm:$0xff]  ;;  %v2084_v22 = vld [vmem:[#allocation11 + $0x180] sm:$0xff] }
 0x1b4   : > { %10803 = vmatpush3.msra.mxu1 %v1270_v34  ;;  %10893 = vmatprep.subr.mxu0 %v2065_v24  ;;  %v2046_v34 = vld [vmem:[#allocation11 + $0x50] sm:$0xff]  ;;  %v2068_v23 = vld [vmem:[#allocation11 + $0x100] sm:$0xff]  ;;  %v2370_v24 = vld [vmem:[#allocation11 + $0x3f8] sm:$0xff] }
 0x1b5   : > { %10804 = vmatprep.subr.mxu1 %v1285_v35  ;;  %10894 = vmatpush3.msra.mxu0 %v2049_v27  ;;  %v2061_v35 = vld [vmem:[#allocation11 + $0xc8] sm:$0xff] }
 0x1b6   : > { %10805 = vmatpush3.msra.mxu1 %v1269_v36  ;;  %10895 = vmatprep.subr.mxu0 %v2064_v28  ;;  %v2045_v36 = vld [vmem:[#allocation11 + $0x48] sm:$0xff] }
 0x1b7   : > { %10806 = vmatprep.subr.mxu1 %v1284_v37  ;;  %10896 = vmatpush3.msra.mxu0 %v2048_v30  ;;  %v2060_v37 = vld [vmem:[#allocation11 + $0xc0] sm:$0xff] }
 0x1b8   : > { %10807 = vmatpush3.msra.mxu1 %v1268_v40  ;;  %10897 = vmatprep.subr.mxu0 %v2063_v31  ;;  %v2043_v40 = vld [vmem:[#allocation11 + $0x38] sm:$0xff]  ;;  %v12140_v31 = vmov 1966171168  }
 0x1b9   : > { %10808 = vmatprep.subr.mxu1 %v1283_v41  ;;  %10898 = vmatpush3.msra.mxu0 %v2047_v32  ;;  %v2058_v41 = vld [vmem:[#allocation11 + $0xb0] sm:$0xff]  ;;  %v1779_v32 = vunpack.c.l.s4 %v12140_v31  ;;  %v2316_v31 = vld [vmem:[#allocation11 + $0x248] sm:$0xff] }
 0x1ba   : > { %10809 = vmatpush3.msra.mxu1 %v1267_v42  ;;  %10899 = vmatprep.subr.mxu0 %v2062_v33  ;;  %v2042_v42 = vld [vmem:[#allocation11 + $0x30] sm:$0xff] }
 0x1bb   : > { %10810 = vmatprep.subr.mxu1 %v1282_v43  ;;  %10900 = vmatpush3.msra.mxu0 %v2046_v34  ;;  %v2057_v43 = vld [vmem:[#allocation11 + $0xa8] sm:$0xff]  ;;  %v1780_v34 = vunpack.c.0.s8 %v1779_v32  ;;  %v2331_v32 = vld [vmem:[#allocation11 + $0x2c0] sm:$0xff] }
 0x1bc   : > { %10811 = vmatpush3.msra.mxu1 %v1266_v45  ;;  %10901 = vmatprep.subr.mxu0 %v2061_v35  ;;  %v2056_v45 = vld [vmem:[#allocation11 + $0xa0] sm:$0xff] }
 0x1bd   : > { %10812 = vmatprep.subr.mxu1 %v1281_v46  ;;  %10902 = vmatpush3.msra.mxu0 %v2045_v36  ;;  %v2040_v46 = vld [vmem:[#allocation11 + $0x20] sm:$0xff] }
 0x1be   : > { %10813 = vmatpush3.msra.mxu1 %v1265_v47  ;;  %10903 = vmatprep.subr.mxu0 %v2060_v37  ;;  %v2055_v47 = vld [vmem:[#allocation11 + $0x98] sm:$0xff] }
 0x1bf   : > { %10814 = vmatprep.subr.mxu1 %v1280_v48  ;;  %10904 = vmatpush3.msra.mxu0 %v2044_v38  ;;  %v2039_v48 = vld [vmem:[#allocation11 + $0x18] sm:$0xff]  ;;  %v12482_v38 = vsub.s32 %v1780_v34, %v12410_v21 }
 0x1c0   : > { %10815 = vmatpush3.msra.mxu1 %v1264_v50  ;;  %10905 = vmatprep.subr.mxu0 %v2059_v39  ;;  %v2038_v50 = vld [vmem:[#allocation11 + $0x10] sm:$0xff]  ;;  %v2330_v34 = vld [vmem:[#allocation11 + $0x2b8] sm:$0xff] }
 0x1c1   : > { %1495 = vmatmul.mubr.f32.vlgmr.msra.gmra.mxu1 %v12466_v4  ;;  %10854 = vmatprep.subr.mxu1 %v1572_v51  ;;  %v1549_v4 = vld [vmem:[#allocation10 + $0x740] sm:$0xff]  ;;  %v2053_v51 = vld [vmem:[#allocation11 + $0x88] sm:$0xff] }
 0x1c2   : > { %10855 = vmatpush3.msra.mxu1 %v1556_v54  ;;  %1771 = vmatprep.mubr.f32.mxu1 %v1632_v56  ;;  %v2037_v54 = vld [vmem:[#allocation11 + $0x8] sm:$0xff]  ;;  %v2052_v56 = vld [vmem:[#allocation11 + $0x80] sm:$0xff] }
 0x1c3   : > { %10856 = vmatprep.subr.mxu1 %v1571_v57  ;;  %10906 = vmatpush3.msra.mxu0 %v2043_v40  ;;  %v2036_v57 = vld [vmem:[#allocation11] sm:$0xff] }
 0x1c4   : > { %10857 = vmatpush3.msra.mxu1 %v1555_v58  ;;  %10907 = vmatprep.subr.mxu0 %v2058_v41  ;;  %v2099_v58 = vld [vmem:[#allocation11 + $0x1f8] sm:$0xff] }
 0x1c5   : > { %10858 = vmatprep.subr.mxu1 %v1570_v59  ;;  %10908 = vmatpush3.msra.mxu0 %v2042_v42  ;;  %v2083_v59 = vld [vmem:[#allocation11 + $0x178] sm:$0xff] }
 0x1c6   : > { %10859 = vmatpush3.msra.mxu1 %v1554_v60  ;;  %10909 = vmatprep.subr.mxu0 %v2057_v43  ;;  %v2098_v60 = vld [vmem:[#allocation11 + $0x1f0] sm:$0xff] }
 0x1c7   : > { %10860 = vmatprep.subr.mxu1 %v1569_v61  ;;  %10910 = vmatpush3.msra.mxu0 %v2041_v44  ;;  %v2082_v61 = vld [vmem:[#allocation11 + $0x170] sm:$0xff] }
 0x1c8   : > { %10861 = vmatpush3.msra.mxu1 %v1553_v62  ;;  %10911 = vmatprep.subr.mxu0 %v2056_v45  ;;  %v2097_v62 = vld [vmem:[#allocation11 + $0x1e8] sm:$0xff] }
 0x1c9   : > { %10862 = vmatprep.subr.mxu1 %v1568_v63  ;;  %10912 = vmatpush3.msra.mxu0 %v2040_v46  ;;  %v2338_v63 = vld [vmem:[#allocation11 + $0x2f8] sm:$0xff] }
 0x1ca   : > { %10863 = vmatpush3.msra.mxu1 %v1552_v0  ;;  %10913 = vmatprep.subr.mxu0 %v2055_v47  ;;  %v2081_v0 = vld [vmem:[#allocation11 + $0x168] sm:$0xff] }
 0x1cb   : > { %10864 = vmatprep.subr.mxu1 %v1567_v1  ;;  %10914 = vmatpush3.msra.mxu0 %v2039_v48  ;;  %v2096_v1 = vld [vmem:[#allocation11 + $0x1e0] sm:$0xff]  ;;  %v10563_v47 = vld [vmem:[%s15161_s4] ss:$0 sm:$0xff] }
 0x1cc   : > { %10865 = vmatpush3.msra.mxu1 %v1551_v26  ;;  %v2080_v26 = vld [vmem:[#allocation11 + $0x160] sm:$0xff]  ;;  %v12491_v21 = vrot.slane %v10563_v47, %v12425_v52  ;;  %v2325_v47 = vld [vmem:[#allocation11 + $0x290] sm:$0xff] }
 0x1cd   : > { %10866 = vmatprep.subr.mxu1 %v1566_v2  ;;  %v2095_v2 = vld [vmem:[#allocation11 + $0x1d8] sm:$0xff] }
 0x1ce   : > { %10867 = vmatpush3.msra.mxu1 %v1550_v29  ;;  %v2079_v29 = vld [vmem:[#allocation11 + $0x158] sm:$0xff] }
 0x1cf   : > { %10868 = vmatprep.subr.mxu1 %v1565_v3  ;;  %v2094_v3 = vld [vmem:[#allocation11 + $0x1d0] sm:$0xff] }
 0x1d0   : > { %10869 = vmatpush3.msra.mxu1 %v1549_v4  ;;  %v2078_v4 = vld [vmem:[#allocation11 + $0x150] sm:$0xff] }
 0x1d1   : > { %10870 = vmatprep.subr.mxu1 %v1564_v5  ;;  %v2093_v5 = vld [vmem:[#allocation11 + $0x1c8] sm:$0xff] }
 0x1d2   : > { %10871 = vmatpush3.msra.mxu1 %v1548_v6  ;;  %v2077_v6 = vld [vmem:[#allocation11 + $0x148] sm:$0xff] }
 0x1d3   : > { %10872 = vmatprep.subr.mxu1 %v1563_v7  ;;  %v2092_v7 = vld [vmem:[#allocation11 + $0x1c0] sm:$0xff] }
 0x1d4   : > { %10873 = vmatpush3.msra.mxu1 %v1547_v8  ;;  %v2076_v8 = vld [vmem:[#allocation11 + $0x140] sm:$0xff] }
 0x1d5   : > { %10874 = vmatprep.subr.mxu1 %v1562_v9  ;;  %v2091_v9 = vld [vmem:[#allocation11 + $0x1b8] sm:$0xff] }
 0x1d6   : > { %10875 = vmatpush3.msra.mxu1 %v1546_v10  ;;  %v2075_v10 = vld [vmem:[#allocation11 + $0x138] sm:$0xff] }
 0x1d7   : > { %10876 = vmatprep.subr.mxu1 %v1561_v11  ;;  %v2090_v11 = vld [vmem:[#allocation11 + $0x1b0] sm:$0xff] }
 0x1d8   : > { %10877 = vmatpush3.msra.mxu1 %v1545_v12  ;;  %v2074_v12 = vld [vmem:[#allocation11 + $0x130] sm:$0xff] }
 0x1d9   : > { %10878 = vmatprep.subr.mxu1 %v1560_v13  ;;  %v2089_v13 = vld [vmem:[#allocation11 + $0x1a8] sm:$0xff] }
 0x1da   : > { %10879 = vmatpush3.msra.mxu1 %v1544_v14  ;;  %v2073_v14 = vld [vmem:[#allocation11 + $0x128] sm:$0xff] }
 0x1db   : > { %10880 = vmatprep.subr.mxu1 %v1559_v15  ;;  %v2088_v15 = vld [vmem:[#allocation11 + $0x1a0] sm:$0xff] }
 0x1dc   : > { %10881 = vmatpush3.msra.mxu1 %v1543_v53  ;;  %v2072_v53 = vld [vmem:[#allocation11 + $0x120] sm:$0xff] }
 0x1dd   : > { %10882 = vmatprep.subr.mxu1 %v1558_v16  ;;  %v2087_v16 = vld [vmem:[#allocation11 + $0x198] sm:$0xff] }
 0x1de   : > { %10883 = vmatpush3.msra.mxu1 %v1542_v17  ;;  %v2071_v17 = vld [vmem:[#allocation11 + $0x118] sm:$0xff] }
 0x1df   : > { %10884 = vmatprep.subr.mxu1 %v1557_v55  ;;  %v2086_v55 = vld [vmem:[#allocation11 + $0x190] sm:$0xff] }
 0x1e0   : > { %10885 = vmatpush3.msra.mxu1 %v1541_v18  ;;  %v2070_v18 = vld [vmem:[#allocation11 + $0x110] sm:$0xff] }
 0x1e1   : > { %1772 = vmatmul.mubr.f32.vlgmr.msra.gmra.mxu1 %v12475_v49  ;;  %v2054_v49 = vld [vmem:[#allocation11 + $0x90] sm:$0xff]  ;;  %10927 = vmatprep.subr.mxu1 %v2099_v58 }
 0x1e2   : > { %10915 = vmatprep.subr.mxu0 %v2054_v49  ;;  %10928 = vmatpush3.msra.mxu1 %v2083_v59 }
 0x1e3   : > { %10916 = vmatpush3.msra.mxu0 %v2038_v50  ;;  %10929 = vmatprep.subr.mxu1 %v2098_v60 }
 0x1e4   : > { %10917 = vmatprep.subr.mxu0 %v2053_v51  ;;  %10930 = vmatpush3.msra.mxu1 %v2082_v61  ;;  %v12499_v61 = vcombine.high %v12491_v21, %v12491_v21 }
 0x1e5   : > { %10918 = vmatpush3.msra.mxu0 %v2037_v54  ;;  %10931 = vmatprep.subr.mxu1 %v2097_v62 }
 0x1e6   : > { %10919 = vmatprep.subr.mxu0 %v2052_v56  ;;  %10932 = vmatpush3.msra.mxu1 %v2081_v0 }
 0x1e7   : > { %10920 = vmatpush3.msra.mxu0 %v2036_v57  ;;  %10933 = vmatprep.subr.mxu1 %v2096_v1 }
 0x1e8   : > { %10965 = vmatprep.subr.mxu0 %v2338_v63  ;;  %10934 = vmatpush3.msra.mxu1 %v2080_v26 }
 0x1e9   : > { %10935 = vmatprep.subr.mxu1 %v2095_v2 }
 0x1ea   : > { %10936 = vmatpush3.msra.mxu1 %v2079_v29 }
 0x1eb   : > { %10937 = vmatprep.subr.mxu1 %v2094_v3 }
 0x1ec   : > { %10938 = vmatpush3.msra.mxu1 %v2078_v4 }
 0x1ed   : > { %10939 = vmatprep.subr.mxu1 %v2093_v5 }
 0x1ee   : > { %10940 = vmatpush3.msra.mxu1 %v2077_v6 }
 0x1ef   : > { %10941 = vmatprep.subr.mxu1 %v2092_v7 }
 0x1f0   : > { %10942 = vmatpush3.msra.mxu1 %v2076_v8 }
 0x1f1   : > { %10943 = vmatprep.subr.mxu1 %v2091_v9 }
 0x1f2   : > { %10944 = vmatpush3.msra.mxu1 %v2075_v10 }
 0x1f3   : > { %10945 = vmatprep.subr.mxu1 %v2090_v11 }
 0x1f4   : > { %10946 = vmatpush3.msra.mxu1 %v2074_v12 }
 0x1f5   : > { %10947 = vmatprep.subr.mxu1 %v2089_v13 }
 0x1f6   : > { %10948 = vmatpush3.msra.mxu1 %v2073_v14 }
 0x1f7   : > { %10949 = vmatprep.subr.mxu1 %v2088_v15  ;;  %v2322_v15 = vld [vmem:[#allocation11 + $0x278] sm:$0xff] }
 0x1f8   : > { %10950 = vmatpush3.msra.mxu1 %v2072_v53 }
 0x1f9   : > { %10951 = vmatprep.subr.mxu1 %v2087_v16  ;;  %v2337_v16 = vld [vmem:[#allocation11 + $0x2f0] sm:$0xff] }
 0x1fa   : > { %10952 = vmatpush3.msra.mxu1 %v2071_v17 }
 0x1fb   : > { %10953 = vmatprep.subr.mxu1 %v2086_v55  ;;  %v2321_v55 = vld [vmem:[#allocation11 + $0x270] sm:$0xff] }
 0x1fc   : > { %10954 = vmatpush3.msra.mxu1 %v2070_v18  ;;  %v2336_v18 = vld [vmem:[#allocation11 + $0x2e8] sm:$0xff] }
 0x1fd   : > { %10955 = vmatprep.subr.mxu1 %v2085_v19  ;;  %v2320_v19 = vld [vmem:[#allocation11 + $0x268] sm:$0xff] }
 0x1fe   : > { %10956 = vmatpush3.msra.mxu1 %v2069_v20  ;;  %v2335_v20 = vld [vmem:[#allocation11 + $0x2e0] sm:$0xff] }
 0x1ff   : > { %10957 = vmatprep.subr.mxu1 %v2084_v22  ;;  %v2319_v22 = vld [vmem:[#allocation11 + $0x260] sm:$0xff] }
 0x200   : > { %10958 = vmatpush3.msra.mxu1 %v2068_v23  ;;  %v2334_v23 = vld [vmem:[#allocation11 + $0x2d8] sm:$0xff] }
 0x201   : > { %11003 = vmatprep.subr.mxu1 %v2370_v24  ;;  %v2318_v24 = vld [vmem:[#allocation11 + $0x258] sm:$0xff] }
 0x21d   : > { %v10641_v27 = vpop.f32.mrf.mxu1 }
 0x21e   : > { %v10711_v36 = vpop.f32.mrf.mxu0 }
 0x21f   : > { %v10642_v28 = vpop.f32.mrf.mxu1 }
 0x220   : > { %v10643_v37 = vadd.f32 %v10642_v28, %v10641_v27  ;;  %v10712_v40 = vpop.f32.mrf.mxu0  ;;  %v2333_v27 = vld [vmem:[#allocation11 + $0x2d0] sm:$0xff] }
 0x221   : > { %v10713_v43 = vadd.f32 %v10712_v40, %v10711_v36  ;;  %v2317_v28 = vld [vmem:[#allocation11 + $0x250] sm:$0xff]  ;;  %v2312_v40 = vld [vmem:[#allocation11 + $0x228] sm:$0xff] }
 0x222   : > { %v2329_v36 = vld [vmem:[#allocation11 + $0x2b0] sm:$0xff] }
 0x23e   : > { %v10676_v30 = vpop.f32.mrf.mxu1 }
 0x240   : > { %v10677_v33 = vpop.f32.mrf.mxu1 }
 0x241   : > { %v10678_v35 = vadd.f32 %v10677_v33, %v10676_v30  ;;  %v2332_v30 = vld [vmem:[#allocation11 + $0x2c8] sm:$0xff]  ;;  %v2315_v33 = vld [vmem:[#allocation11 + $0x240] sm:$0xff] }
 0x243   : > { %v942_v39 = vadd.f32 %v10678_v35, %v10643_v37  ;;  %v2314_v35 = vld [vmem:[#allocation11 + $0x238] sm:$0xff]  ;;  %v2313_v37 = vld [vmem:[#allocation11 + $0x230] sm:$0xff] }
 0x245   : > { %v1784_v44 = vrot.slane %v942_v39, %v12482_v38  ;;  %v2328_v39 = vld [vmem:[#allocation11 + $0x2a8] sm:$0xff] }
 0x247   : > { %v1785_v48 = vcombine.high %v1784_v44, %v1784_v44  ;;  %v1792_v50 = vrot.slane %v1784_v44, %v12482_v38  ;;  %v2326_v44 = vld [vmem:[#allocation11 + $0x298] sm:$0xff] }
 0x249   : > { %v1799_v56 = vrot.slane %v1785_v48, %v12482_v38  ;;  %v1800_v60 = vcombine.high %v1792_v50, %v1792_v50  ;;  %v2309_v48 = vld [vmem:[#allocation11 + $0x210] sm:$0xff] }
 0x24b   : > { %v1801_v2 = vcombine.high %v1799_v56, %v1799_v56 }
 0x260   : > { %v10746_v41 = vpop.f32.mrf.mxu1 }
 0x262   : > { %v10747_v42 = vpop.f32.mrf.mxu1 }
 0x263   : > { %v10748_v45 = vadd.f32 %v10747_v42, %v10746_v41  ;;  %v2327_v41 = vld [vmem:[#allocation11 + $0x2a0] sm:$0xff] }
 0x264   : > { %v2311_v42 = vld [vmem:[#allocation11 + $0x220] sm:$0xff] }
 0x265   : > { %v1219_v46 = vadd.f32 %v10748_v45, %v10713_v43  ;;  %v2310_v45 = vld [vmem:[#allocation11 + $0x218] sm:$0xff] }
 0x267   : > { %v1813_v49 = vrot.slane %v1219_v46, %v12482_v38  ;;  %v10781_v46 = vpop.f32.mrf.mxu0 }
 0x269   : > { %v1814_v51 = vcombine.high %v1813_v49, %v1813_v49  ;;  %v1821_v54 = vrot.slane %v1813_v49, %v12482_v38 }
 0x26b   : > { %v1828_v57 = vrot.slane %v1814_v51, %v12482_v38  ;;  %v1829_v58 = vcombine.high %v1821_v54, %v1821_v54  ;;  %v1834_v59 = vrot.slane %v1821_v54, %v12416_v25  ;;  %v2308_v51 = vld [vmem:[#allocation11 + $0x208] sm:$0xff]  ;;  %v10782_v54 = vpop.f32.mrf.mxu0 }
 0x26d   : > { %v1830_v62 = vcombine.high %v1828_v57, %v1828_v57  ;;  %v1838_v63 = vrot.slane %v1828_v57, %v12416_v25  ;;  %v1842_v0 = vrot.slane %v1829_v58, %v12416_v25  ;;  %v1851_v1 = vsel %vm654_vm1, %v1792_v50, %v1834_v59  ;;  %v2324_v50 = vld [vmem:[#allocation11 + $0x288] sm:$0xff]  ;;  %v2307_v58 = vld [vmem:[#allocation11 + $0x200] sm:$0xff]  ;;  %v10851_v59 = vpop.f32.mrf.mxu0 }
 0x26e   : > { %v1949_v26 = vadd.f32 %v12491_v21, %v1851_v1 }
 0x26f   : > { %v1846_v29 = vrot.slane %v1830_v62, %v12416_v25  ;;  %v1852_v3 = vsel %vm654_vm1, %v1799_v56, %v1838_v63  ;;  %v1853_v4 = vsel %vm654_vm1, %v1800_v60, %v1842_v0  ;;  %v2323_v56 = vld [vmem:[#allocation11 + $0x280] sm:$0xff]  ;;  %v2610_v60 = vld [vmem:[#allocation11 + $0x4f8] sm:$0xff]  ;;  %v10783_v62 = vadd.f32 %v10782_v54, %v10781_v46  ;;  %v10852_v0 = vpop.f32.mrf.mxu0  ;;  %v2593_v54 = vld [vmem:[#allocation11 + $0x470] sm:$0xff] }
 0x270   : > { %v1950_v5 = vadd.f32 %v12499_v61, %v1852_v3  ;;  %v1953_v6 = vadd.f32 %v12491_v21, %v1853_v4  ;;  %v1963_v9 = vmax.f32 %v1949_v26, 0.0  ;;  %v2594_v46 = vld [vmem:[#allocation11 + $0x478] sm:$0xff] }
 0x271   : > { %v1854_v7 = vsel %vm654_vm1, %v1801_v2, %v1846_v29  ;;  %v10853_v2 = vadd.f32 %v10852_v0, %v10851_v59  ;;  %v2607_v0 = vld [vmem:[#allocation11 + $0x4e0] sm:$0xff] }
 0x272   : > { %v1954_v8 = vadd.f32 %v12499_v61, %v1854_v7  ;;  %v1964_v10 = vmax.f32 %v1950_v5, 0.0  ;;  %v1967_v11 = vmax.f32 %v1953_v6, 0.0 }
 0x274   : > { %v1968_v12 = vmax.f32 %v1954_v8, 0.0  ;;  %v1979_v13 = vcombine.low %v1963_v9, %v1964_v10 }
 0x276   : > { %v1995_v14 = vcombine.low %v1967_v11, %v1968_v12  ;;  %10564 = vst.sshfl [vmem:[#allocation3 + $0x9] sm:$0x33 pattern:$0x76325410] %v1979_v13 }
 0x278   : > { %10566 = vst.sshfl [vmem:[#allocation3 + $0x19] sm:$0x33 pattern:$0x76325410] %v1995_v14 }
 0x27d   : > { %v11855_v53 = vld [vmem:[#allocation3 + $0x1] ss:$8 sps:$4 sm:$0xff]  }
 0x27e   : > { %v11856_v17 = vld [vmem:[#allocation3] ss:$8 sps:$4 sm:$0xff]   ;;  %2204 = vmatprep.mubr.f32.mxu0 %v11855_v53 }
 0x27f   : > { %2205 = vmatmul.mubr.f32.vlgmr.msra.gmra.mxu0 %v11856_v17 }
 0x280   : > { %10966 = vmatpush3.msra.mxu0 %v2322_v15 }
 0x281   : > { %10967 = vmatprep.subr.mxu0 %v2337_v16  ;;  %v10816_v43 = vpop.f32.mrf.mxu1 }
 0x282   : > { %10968 = vmatpush3.msra.mxu0 %v2321_v55 }
 0x283   : > { %10969 = vmatprep.subr.mxu0 %v2336_v18  ;;  %v10817_v49 = vpop.f32.mrf.mxu1 }
 0x284   : > { %10970 = vmatpush3.msra.mxu0 %v2320_v19  ;;  %v10818_v57 = vadd.f32 %v10817_v49, %v10816_v43  ;;  %v2353_v43 = vld [vmem:[#allocation11 + $0x370] sm:$0xff] }
 0x285   : > { %10971 = vmatprep.subr.mxu0 %v2335_v20 }
 0x286   : > { %10972 = vmatpush3.msra.mxu0 %v2319_v22  ;;  %v1497_v63 = vadd.f32 %v10818_v57, %v10783_v62  ;;  %v2366_v57 = vld [vmem:[#allocation11 + $0x3d8] sm:$0xff]  ;;  %v2592_v62 = vld [vmem:[#allocation11 + $0x468] sm:$0xff] }
 0x287   : > { %10973 = vmatprep.subr.mxu0 %v2334_v23 }
 0x288   : > { %10974 = vmatpush3.msra.mxu0 %v2318_v24  ;;  %v1862_v29 = vrot.slane %v1497_v63, %v12482_v38  ;;  %v2365_v63 = vld [vmem:[#allocation11 + $0x3d0] sm:$0xff] }
 0x289   : > { %10975 = vmatprep.subr.mxu0 %v2333_v27 }
 0x28a   : > { %10976 = vmatpush3.msra.mxu0 %v2317_v28  ;;  %v1863_v5 = vcombine.high %v1862_v29, %v1862_v29  ;;  %v1870_v7 = vrot.slane %v1862_v29, %v12482_v38  ;;  %v2364_v29 = vld [vmem:[#allocation11 + $0x3c8] sm:$0xff] }
 0x28b   : > { %10977 = vmatprep.subr.mxu0 %v2332_v30 }
 0x28c   : > { %10978 = vmatpush3.msra.mxu0 %v2316_v31  ;;  %v1877_v10 = vrot.slane %v1863_v5, %v12482_v38  ;;  %v1878_v14 = vcombine.high %v1870_v7, %v1870_v7  ;;  %v2348_v5 = vld [vmem:[#allocation11 + $0x348] sm:$0xff] }
 0x28d   : > { %10979 = vmatprep.subr.mxu0 %v2331_v32 }
 0x28e   : > { %10980 = vmatpush3.msra.mxu0 %v2315_v33  ;;  %v1879_v18 = vcombine.high %v1877_v10, %v1877_v10 }
 0x28f   : > { %10981 = vmatprep.subr.mxu0 %v2330_v34 }
 0x290   : > { %10982 = vmatpush3.msra.mxu0 %v2314_v35 }
 0x291   : > { %10983 = vmatprep.subr.mxu0 %v2329_v36 }
 0x292   : > { %10984 = vmatpush3.msra.mxu0 %v2313_v37  ;;  %v2354_v37 = vld [vmem:[#allocation11 + $0x378] sm:$0xff] }
 0x293   : > { %10985 = vmatprep.subr.mxu0 %v2328_v39  ;;  %v11862_v39 = vld [vmem:[#allocation3 + $0x2] ss:$8 sps:$4 sm:$0xff]  }
 0x294   : > { %10986 = vmatpush3.msra.mxu0 %v2312_v40 }
 0x295   : > { %10987 = vmatprep.subr.mxu0 %v2327_v41 }
 0x296   : > { %10988 = vmatpush3.msra.mxu0 %v2311_v42  ;;  %v2369_v42 = vld [vmem:[#allocation11 + $0x3f0] sm:$0xff] }
 0x297   : > { %10989 = vmatprep.subr.mxu0 %v2326_v44  ;;  %v2368_v44 = vld [vmem:[#allocation11 + $0x3e8] sm:$0xff] }
 0x298   : > { %10990 = vmatpush3.msra.mxu0 %v2310_v45  ;;  %v2352_v45 = vld [vmem:[#allocation11 + $0x368] sm:$0xff] }
 0x299   : > { %10991 = vmatprep.subr.mxu0 %v2325_v47  ;;  %v11864_v47 = vld [vmem:[#allocation3 + $0x1] ss:$8 sps:$4 sm:$0xff]  }
 0x29a   : > { %10992 = vmatpush3.msra.mxu0 %v2309_v48  ;;  %v2367_v48 = vld [vmem:[#allocation11 + $0x3e0] sm:$0xff] }
 0x29b   : > { %10993 = vmatprep.subr.mxu0 %v2324_v50  ;;  %v2609_v50 = vld [vmem:[#allocation11 + $0x4f0] sm:$0xff] }
 0x29c   : > { %10994 = vmatpush3.msra.mxu0 %v2308_v51  ;;  %v2351_v51 = vld [vmem:[#allocation11 + $0x360] sm:$0xff] }
 0x29d   : > { %10995 = vmatprep.subr.mxu0 %v2323_v56 }
 0x29e   : > { %10996 = vmatpush3.msra.mxu0 %v2307_v58  ;;  %v2608_v58 = vld [vmem:[#allocation11 + $0x4e8] sm:$0xff] }
 0x29f   : > { %11041 = vmatprep.subr.mxu0 %v2610_v60  ;;  %v2350_v60 = vld [vmem:[#allocation11 + $0x358] sm:$0xff] }
 0x2a1   : > { %v10886_v1 = vpop.f32.mrf.mxu1 }
 0x2a3   : > { %v10887_v26 = vpop.f32.mrf.mxu1 }
 0x2a4   : > { %v10888_v3 = vadd.f32 %v10887_v26, %v10886_v1  ;;  %v2349_v26 = vld [vmem:[#allocation11 + $0x350] sm:$0xff] }
 0x2a6   : > { %v1774_v4 = vadd.f32 %v10888_v3, %v10853_v2  ;;  %v2591_v2 = vld [vmem:[#allocation11 + $0x460] sm:$0xff] }
 0x2a8   : > { %v1891_v6 = vrot.slane %v1774_v4, %v12482_v38  ;;  %v2606_v4 = vld [vmem:[#allocation11 + $0x4d8] sm:$0xff] }
 0x2aa   : > { %v1892_v8 = vcombine.high %v1891_v6, %v1891_v6  ;;  %v1899_v9 = vrot.slane %v1891_v6, %v12482_v38  ;;  %v2590_v6 = vld [vmem:[#allocation11 + $0x458] sm:$0xff] }
 0x2ac   : > { %v1906_v11 = vrot.slane %v1892_v8, %v12482_v38  ;;  %v1907_v12 = vcombine.high %v1899_v9, %v1899_v9  ;;  %v1912_v13 = vrot.slane %v1899_v9, %v12416_v25  ;;  %v2605_v8 = vld [vmem:[#allocation11 + $0x4d0] sm:$0xff]  ;;  %v2347_v9 = vld [vmem:[#allocation11 + $0x340] sm:$0xff] }
 0x2ae   : > { %v1908_v15 = vcombine.high %v1906_v11, %v1906_v11  ;;  %v1916_v53 = vrot.slane %v1906_v11, %v12416_v25  ;;  %v1920_v16 = vrot.slane %v1907_v12, %v12416_v25  ;;  %v1929_v17 = vsel %vm654_vm1, %v1870_v7, %v1912_v13  ;;  %v2363_v7 = vld [vmem:[#allocation11 + $0x3c0] sm:$0xff]  ;;  %v2362_v11 = vld [vmem:[#allocation11 + $0x3b8] sm:$0xff]  ;;  %v2604_v12 = vld [vmem:[#allocation11 + $0x4c8] sm:$0xff] }
 0x2af   : > { %v1951_v55 = vadd.f32 %v12491_v21, %v1929_v17  ;;  %v2346_v13 = vld [vmem:[#allocation11 + $0x338] sm:$0xff]  ;;  %v2587_v17 = vld [vmem:[#allocation11 + $0x440] sm:$0xff] }
 0x2b0   : > { %v1924_v19 = vrot.slane %v1908_v15, %v12416_v25  ;;  %v1930_v20 = vsel %vm654_vm1, %v1877_v10, %v1916_v53  ;;  %v1931_v22 = vsel %vm654_vm1, %v1878_v14, %v1920_v16  ;;  %v2589_v10 = vld [vmem:[#allocation11 + $0x450] sm:$0xff]  ;;  %v2588_v14 = vld [vmem:[#allocation11 + $0x448] sm:$0xff]  ;;  %v2603_v53 = vld [vmem:[#allocation11 + $0x4c0] sm:$0xff] }
 0x2b1   : > { %v1952_v23 = vadd.f32 %v12499_v61, %v1930_v20  ;;  %v1955_v24 = vadd.f32 %v12491_v21, %v1931_v22  ;;  %v1965_v30 = vmax.f32 %v1951_v55, 0.0  ;;  %v2361_v15 = vld [vmem:[#allocation11 + $0x3b0] sm:$0xff]  ;;  %v2360_v55 = vld [vmem:[#allocation11 + $0x3a8] sm:$0xff]  ;;  %v2586_v20 = vld [vmem:[#allocation11 + $0x438] sm:$0xff] }
 0x2b2   : > { %v1932_v27 = vsel %vm654_vm1, %v1879_v18, %v1924_v19  ;;  %v2345_v16 = vld [vmem:[#allocation11 + $0x330] sm:$0xff]  ;;  %v2602_v18 = vld [vmem:[#allocation11 + $0x4b8] sm:$0xff]  ;;  %v2344_v19 = vld [vmem:[#allocation11 + $0x328] sm:$0xff] }
 0x2b3   : > { %v1956_v28 = vadd.f32 %v12499_v61, %v1932_v27  ;;  %v1966_v31 = vmax.f32 %v1952_v23, 0.0  ;;  %v1969_v32 = vmax.f32 %v1955_v24, 0.0  ;;  %v2359_v22 = vld [vmem:[#allocation11 + $0x3a0] sm:$0xff]  ;;  %v2601_v23 = vld [vmem:[#allocation11 + $0x4b0] sm:$0xff] }
 0x2b4   : > { %v2343_v24 = vld [vmem:[#allocation11 + $0x320] sm:$0xff]  ;;  %v2585_v27 = vld [vmem:[#allocation11 + $0x430] sm:$0xff] }
 0x2b5   : > { %v1970_v33 = vmax.f32 %v1956_v28, 0.0  ;;  %v1987_v34 = vcombine.low %v1965_v30, %v1966_v31  ;;  %v2358_v28 = vld [vmem:[#allocation11 + $0x398] sm:$0xff]  ;;  %v2600_v30 = vld [vmem:[#allocation11 + $0x4a8] sm:$0xff] }
 0x2b6   : > { %v2342_v31 = vld [vmem:[#allocation11 + $0x318] sm:$0xff] }
 0x2b7   : > { %v2003_v35 = vcombine.low %v1969_v32, %v1970_v33  ;;  %10565 = vst.sshfl [vmem:[#allocation3 + $0x11] sm:$0x33 pattern:$0x76325410] %v1987_v34  ;;  %v2584_v32 = vld [vmem:[#allocation11 + $0x428] sm:$0xff]  ;;  %v2357_v33 = vld [vmem:[#allocation11 + $0x390] sm:$0xff] }
 0x2b8   : > { %v2599_v34 = vld [vmem:[#allocation11 + $0x4a0] sm:$0xff] }
 0x2b9   : > { %10567 = vst.sshfl [vmem:[#allocation3 + $0x21] sm:$0x33 pattern:$0x76325410] %v2003_v35  ;;  %v2341_v35 = vld [vmem:[#allocation11 + $0x310] sm:$0xff] }
 0x2be   : > { %v11857_v36 = vld [vmem:[#allocation3 + $0x11] ss:$8 sps:$4 sm:$0xff]  }
 0x2bf   : > { %v11858_v40 = vld [vmem:[#allocation3 + $0x9] ss:$8 sps:$4 sm:$0xff]   ;;  %2209 = vmatprep.mubr.f32.mxu0 %v11857_v36 }
 0x2c0   : > { %v11859_v41 = vld [vmem:[#allocation3 + $0x10] ss:$8 sps:$4 sm:$0xff]   ;;  %2279 = vmatprep.mubr.f32.mxu1 %v11858_v40  ;;  %v2583_v36 = vld [vmem:[#allocation11 + $0x420] sm:$0xff] }
 0x2c1   : > { %v11860_v21 = vld [vmem:[#allocation3 + $0x8] ss:$8 sps:$4 sm:$0xff]   ;;  %2210 = vmatmul.mubr.f32.gmra.mxu0 %v11859_v41  ;;  %v11861_v61 = vld [vmem:[#allocation3 + $0x19] ss:$8 sps:$4 sm:$0xff]  }
 0x2c2   : > { %2280 = vmatmul.mubr.f32.vlgmr.msra.gmra.mxu1 %v11860_v21  ;;  %2475 = vmatprep.mubr.f32.mxu0 %v11862_v39  ;;  %v11863_v49 = vld [vmem:[#allocation3 + $0x18] ss:$8 sps:$4 sm:$0xff]   ;;  %v11866_v59 = vld [vmem:[#allocation3 + $0xa] ss:$8 sps:$4 sm:$0xff]  }
 0x2c3   : > { %11004 = vmatpush3.msra.mxu1 %v2354_v37  ;;  %2284 = vmatprep.mubr.f32.mxu1 %v11861_v61  ;;  %v11865_v56 = vld [vmem:[#allocation3 + $0x12] ss:$8 sps:$4 sm:$0xff]   ;;  %v2356_v37 = vld [vmem:[#allocation11 + $0x388] sm:$0xff] }
 0x2c4   : > { %11005 = vmatprep.subr.mxu1 %v2369_v42  ;;  %v11867_v1 = vld [vmem:[#allocation3 + $0x11] ss:$8 sps:$4 sm:$0xff]   ;;  %v2355_v42 = vld [vmem:[#allocation11 + $0x380] sm:$0xff] }
 0x2c5   : > { %11006 = vmatpush3.msra.mxu1 %v2353_v43  ;;  %2476 = vmatmul.mubr.f32.vlgmr.msra.gmra.mxu0 %v11864_v47  ;;  %v11868_v3 = vld [vmem:[#allocation3 + $0x9] ss:$8 sps:$4 sm:$0xff]   ;;  %v2598_v39 = vld [vmem:[#allocation11 + $0x498] sm:$0xff] }
 0x2c6   : > { %11007 = vmatprep.subr.mxu1 %v2368_v44  ;;  %2285 = vmatmul.mubr.f32.gmra.mxu1 %v11863_v49  ;;  %v2340_v40 = vld [vmem:[#allocation11 + $0x308] sm:$0xff]  ;;  %v2582_v41 = vld [vmem:[#allocation11 + $0x418] sm:$0xff]  ;;  %v2597_v21 = vld [vmem:[#allocation11 + $0x490] sm:$0xff] }
 0x2c7   : > { %11008 = vmatpush3.msra.mxu1 %v2352_v45  ;;  %11042 = vmatpush3.msra.mxu0 %v2594_v46  ;;  %v2339_v43 = vld [vmem:[#allocation11 + $0x300] sm:$0xff]  ;;  %v2581_v61 = vld [vmem:[#allocation11 + $0x410] sm:$0xff]  ;;  %v2596_v44 = vld [vmem:[#allocation11 + $0x488] sm:$0xff] }
 0x2c8   : > { %2480 = vmatprep.mubr.f32.mxu0 %v11865_v56  ;;  %11009 = vmatprep.subr.mxu1 %v2367_v48  ;;  %v11869_v45 = vld [vmem:[#allocation3 + $0x9] ss:$8 sps:$4 sm:$0xff]   ;;  %v2642_v46 = vld [vmem:[#allocation11 + $0x5f8] sm:$0xff] }
 0x2c9   : > { %2550 = vmatprep.mubr.f32.mxu1 %v11866_v59  ;;  %11043 = vmatprep.subr.mxu0 %v2609_v50  ;;  %v11870_v47 = vld [vmem:[#allocation3 + $0x1a] ss:$8 sps:$4 sm:$0xff]   ;;  %v2580_v48 = vld [vmem:[#allocation11 + $0x408] sm:$0xff]  ;;  %v2625_v56 = vld [vmem:[#allocation11 + $0x570] sm:$0xff] }
 0x2ca   : > { %11010 = vmatpush3.msra.mxu1 %v2351_v51  ;;  %11044 = vmatpush3.msra.mxu0 %v2593_v54  ;;  %v2626_v49 = vld [vmem:[#allocation11 + $0x578] sm:$0xff]  ;;  %v2595_v50 = vld [vmem:[#allocation11 + $0x480] sm:$0xff]  ;;  %v2641_v51 = vld [vmem:[#allocation11 + $0x5f0] sm:$0xff] }
 0x2cb   : > { %11011 = vmatprep.subr.mxu1 %v2366_v57  ;;  %11045 = vmatprep.subr.mxu0 %v2608_v58  ;;  %v2579_v54 = vld [vmem:[#allocation11 + $0x400] sm:$0xff]  ;;  %v2640_v57 = vld [vmem:[#allocation11 + $0x5e8] sm:$0xff] }
 0x2cc   : > { %2481 = vmatmul.mubr.f32.gmra.mxu0 %v11867_v1  ;;  %11012 = vmatpush3.msra.mxu1 %v2350_v60  ;;  %v11871_v58 = vld [vmem:[#allocation3 + $0x19] ss:$8 sps:$4 sm:$0xff]   ;;  %v11872_v59 = vld [vmem:[#allocation3 + $0x8] ss:$8 sps:$4 sm:$0xff]  }
 0x2cd   : > { %11046 = vmatpush3.msra.mxu0 %v2592_v62  ;;  %11013 = vmatprep.subr.mxu1 %v2365_v63  ;;  %v2881_v60 = vld [vmem:[#allocation11 + $0x6f8] sm:$0xff]  ;;  %v2624_v62 = vld [vmem:[#allocation11 + $0x568] sm:$0xff] }
 0x2ce   : > { %11047 = vmatprep.subr.mxu0 %v2607_v0  ;;  %2747 = vmatprep.mubr.f32.mxu0 %v11868_v3  ;;  %v11873_v63 = vld [vmem:[#allocation3 + $0x19] ss:$8 sps:$4 sm:$0xff]  }
 0x2cf   : > { %11014 = vmatpush3.msra.mxu1 %v2349_v26  ;;  %11048 = vmatpush3.msra.mxu0 %v2591_v2  ;;  %v2865_v0 = vld [vmem:[#allocation11 + $0x678] sm:$0xff]  ;;  %v2639_v26 = vld [vmem:[#allocation11 + $0x5e0] sm:$0xff]  ;;  %v2880_v2 = vld [vmem:[#allocation11 + $0x6f0] sm:$0xff] }
 0x2d0   : > { %11015 = vmatprep.subr.mxu1 %v2364_v29  ;;  %11049 = vmatprep.subr.mxu0 %v2606_v4  ;;  %v11874_v1 = vld [vmem:[#allocation3 + $0x11] ss:$8 sps:$4 sm:$0xff]   ;;  %v2623_v29 = vld [vmem:[#allocation11 + $0x560] sm:$0xff] }
 0x2d1   : > { %11016 = vmatpush3.msra.mxu1 %v2348_v5  ;;  %11050 = vmatpush3.msra.mxu0 %v2590_v6  ;;  %v2864_v3 = vld [vmem:[#allocation11 + $0x670] sm:$0xff]  ;;  %v2638_v4 = vld [vmem:[#allocation11 + $0x5d8] sm:$0xff]  ;;  %v2879_v6 = vld [vmem:[#allocation11 + $0x6e8] sm:$0xff] }
 0x2d2   : > { %11017 = vmatprep.subr.mxu1 %v2363_v7  ;;  %11051 = vmatprep.subr.mxu0 %v2605_v8  ;;  %v11875_v5 = vld [vmem:[#allocation3 + $0x18] ss:$8 sps:$4 sm:$0xff]   ;;  %v2863_v8 = vld [vmem:[#allocation11 + $0x668] sm:$0xff] }
 0x2d3   : > { %11018 = vmatpush3.msra.mxu1 %v2347_v9  ;;  %11052 = vmatpush3.msra.mxu0 %v2589_v10  ;;  %v2622_v7 = vld [vmem:[#allocation11 + $0x558] sm:$0xff]  ;;  %v11876_v9 = vld [vmem:[#allocation3 + $0xa] ss:$8 sps:$4 sm:$0xff]  }
 0x2d4   : > { %11019 = vmatprep.subr.mxu1 %v2362_v11  ;;  %11053 = vmatprep.subr.mxu0 %v2604_v12  ;;  %v2637_v10 = vld [vmem:[#allocation11 + $0x5d0] sm:$0xff]  ;;  %v2878_v11 = vld [vmem:[#allocation11 + $0x6e0] sm:$0xff] }
 0x2d5   : > { %11020 = vmatpush3.msra.mxu1 %v2346_v13  ;;  %11054 = vmatpush3.msra.mxu0 %v2588_v14  ;;  %v2621_v12 = vld [vmem:[#allocation11 + $0x550] sm:$0xff]  ;;  %v2862_v13 = vld [vmem:[#allocation11 + $0x660] sm:$0xff]  ;;  %v2636_v14 = vld [vmem:[#allocation11 + $0x5c8] sm:$0xff] }
 0x2d6   : > { %11021 = vmatprep.subr.mxu1 %v2361_v15  ;;  %11055 = vmatprep.subr.mxu0 %v2603_v53  ;;  %v2877_v15 = vld [vmem:[#allocation11 + $0x6d8] sm:$0xff]  ;;  %v2620_v53 = vld [vmem:[#allocation11 + $0x548] sm:$0xff] }
 0x2d7   : > { %11022 = vmatpush3.msra.mxu1 %v2345_v16  ;;  %11056 = vmatpush3.msra.mxu0 %v2587_v17  ;;  %v2861_v16 = vld [vmem:[#allocation11 + $0x658] sm:$0xff]  ;;  %v2635_v17 = vld [vmem:[#allocation11 + $0x5c0] sm:$0xff] }
 0x2d8   : > { %11023 = vmatprep.subr.mxu1 %v2360_v55  ;;  %11057 = vmatprep.subr.mxu0 %v2602_v18  ;;  %v2876_v55 = vld [vmem:[#allocation11 + $0x6d0] sm:$0xff]  ;;  %v2619_v18 = vld [vmem:[#allocation11 + $0x540] sm:$0xff] }
 0x2d9   : > { %11024 = vmatpush3.msra.mxu1 %v2344_v19  ;;  %11058 = vmatpush3.msra.mxu0 %v2586_v20  ;;  %v2860_v19 = vld [vmem:[#allocation11 + $0x650] sm:$0xff]  ;;  %v2634_v20 = vld [vmem:[#allocation11 + $0x5b8] sm:$0xff] }
 0x2da   : > { %11025 = vmatprep.subr.mxu1 %v2359_v22  ;;  %11059 = vmatprep.subr.mxu0 %v2601_v23  ;;  %v2875_v22 = vld [vmem:[#allocation11 + $0x6c8] sm:$0xff]  ;;  %v2618_v23 = vld [vmem:[#allocation11 + $0x538] sm:$0xff] }
 0x2db   : > { %11026 = vmatpush3.msra.mxu1 %v2343_v24  ;;  %11060 = vmatpush3.msra.mxu0 %v2585_v27  ;;  %v2859_v24 = vld [vmem:[#allocation11 + $0x648] sm:$0xff]  ;;  %v2633_v27 = vld [vmem:[#allocation11 + $0x5b0] sm:$0xff] }
 0x2dc   : > { %11027 = vmatprep.subr.mxu1 %v2358_v28  ;;  %11061 = vmatprep.subr.mxu0 %v2600_v30  ;;  %v2874_v28 = vld [vmem:[#allocation11 + $0x6c0] sm:$0xff]  ;;  %v2617_v30 = vld [vmem:[#allocation11 + $0x530] sm:$0xff] }
 0x2dd   : > { %11028 = vmatpush3.msra.mxu1 %v2342_v31  ;;  %11062 = vmatpush3.msra.mxu0 %v2584_v32  ;;  %v2858_v31 = vld [vmem:[#allocation11 + $0x640] sm:$0xff]  ;;  %v2632_v32 = vld [vmem:[#allocation11 + $0x5a8] sm:$0xff] }
 0x2de   : > { %11029 = vmatprep.subr.mxu1 %v2357_v33  ;;  %11063 = vmatprep.subr.mxu0 %v2599_v34  ;;  %v2873_v33 = vld [vmem:[#allocation11 + $0x6b8] sm:$0xff]  ;;  %v2616_v34 = vld [vmem:[#allocation11 + $0x528] sm:$0xff] }
 0x2df   : > { %11030 = vmatpush3.msra.mxu1 %v2341_v35  ;;  %11064 = vmatpush3.msra.mxu0 %v2583_v36  ;;  %v2857_v35 = vld [vmem:[#allocation11 + $0x638] sm:$0xff]  ;;  %v2631_v36 = vld [vmem:[#allocation11 + $0x5a0] sm:$0xff] }
 0x2e0   : > { %11031 = vmatprep.subr.mxu1 %v2356_v37  ;;  %11065 = vmatprep.subr.mxu0 %v2598_v39  ;;  %v2872_v37 = vld [vmem:[#allocation11 + $0x6b0] sm:$0xff]  ;;  %v2615_v39 = vld [vmem:[#allocation11 + $0x520] sm:$0xff] }
 0x2e1   : > { %11032 = vmatpush3.msra.mxu1 %v2340_v40  ;;  %11066 = vmatpush3.msra.mxu0 %v2582_v41  ;;  %v2856_v40 = vld [vmem:[#allocation11 + $0x630] sm:$0xff]  ;;  %v2630_v41 = vld [vmem:[#allocation11 + $0x598] sm:$0xff] }
 0x2e2   : > { %11033 = vmatprep.subr.mxu1 %v2355_v42  ;;  %11067 = vmatprep.subr.mxu0 %v2597_v21  ;;  %v2871_v42 = vld [vmem:[#allocation11 + $0x6a8] sm:$0xff]  ;;  %v2614_v21 = vld [vmem:[#allocation11 + $0x518] sm:$0xff] }
 0x2e3   : > { %11034 = vmatpush3.msra.mxu1 %v2339_v43  ;;  %11068 = vmatpush3.msra.mxu0 %v2581_v61  ;;  %v2855_v43 = vld [vmem:[#allocation11 + $0x628] sm:$0xff]  ;;  %v2629_v61 = vld [vmem:[#allocation11 + $0x590] sm:$0xff] }
 0x2e4   : > { %2551 = vmatmul.mubr.f32.vlgmr.msra.gmra.mxu1 %v11869_v45  ;;  %11069 = vmatprep.subr.mxu0 %v2596_v44  ;;  %v2870_v44 = vld [vmem:[#allocation11 + $0x6a0] sm:$0xff]  ;;  %v2613_v45 = vld [vmem:[#allocation11 + $0x510] sm:$0xff] }
 0x2e5   : > { %11079 = vmatprep.subr.mxu1 %v2642_v46  ;;  %2555 = vmatprep.mubr.f32.mxu1 %v11870_v47  ;;  %v2854_v46 = vld [vmem:[#allocation11 + $0x620] sm:$0xff]  ;;  %v2628_v47 = vld [vmem:[#allocation11 + $0x588] sm:$0xff] }
 0x2e6   : > { %11070 = vmatpush3.msra.mxu0 %v2580_v48  ;;  %11080 = vmatpush3.msra.mxu1 %v2626_v49  ;;  %v2869_v48 = vld [vmem:[#allocation11 + $0x698] sm:$0xff]  ;;  %v2612_v49 = vld [vmem:[#allocation11 + $0x508] sm:$0xff] }
 0x2e7   : > { %11071 = vmatprep.subr.mxu0 %v2595_v50  ;;  %11081 = vmatprep.subr.mxu1 %v2641_v51  ;;  %v2853_v50 = vld [vmem:[#allocation11 + $0x618] sm:$0xff]  ;;  %v2627_v51 = vld [vmem:[#allocation11 + $0x580] sm:$0xff] }
 0x2e8   : > { %11072 = vmatpush3.msra.mxu0 %v2579_v54  ;;  %11082 = vmatpush3.msra.mxu1 %v2625_v56  ;;  %v2868_v54 = vld [vmem:[#allocation11 + $0x690] sm:$0xff]  ;;  %v2611_v56 = vld [vmem:[#allocation11 + $0x500] sm:$0xff] }
 0x2e9   : > { %2556 = vmatmul.mubr.f32.gmra.mxu1 %v11871_v58  ;;  %2748 = vmatmul.mubr.f32.vlgmr.msra.gmra.mxu0 %v11872_v59  ;;  %v2867_v58 = vld [vmem:[#allocation11 + $0x688] sm:$0xff] }
 0x2ea   : > { %11083 = vmatprep.subr.mxu1 %v2640_v57  ;;  %11117 = vmatprep.subr.mxu0 %v2881_v60  ;;  %v2852_v57 = vld [vmem:[#allocation11 + $0x610] sm:$0xff]  ;;  %v2913_v60 = vld [vmem:[#allocation11 + $0x7f8] sm:$0xff] }
 0x2eb   : > { %2752 = vmatprep.mubr.f32.mxu0 %v11873_v63  ;;  %11084 = vmatpush3.msra.mxu1 %v2624_v62  ;;  %v11877_v59 = vld [vmem:[#allocation3 + $0x10] ss:$8 sps:$4 sm:$0xff]   ;;  %v11878_v62 = vld [vmem:[#allocation3 + $0x21] ss:$8 sps:$4 sm:$0xff]  }
 0x2ec   : > { %2822 = vmatprep.mubr.f32.mxu1 %v11874_v1  ;;  %11118 = vmatpush3.msra.mxu0 %v2865_v0  ;;  %v2851_v63 = vld [vmem:[#allocation11 + $0x608] sm:$0xff]  ;;  %v2897_v0 = vld [vmem:[#allocation11 + $0x778] sm:$0xff]  ;;  %v2866_v1 = vld [vmem:[#allocation11 + $0x680] sm:$0xff] }
 0x2ed   : > { %11085 = vmatprep.subr.mxu1 %v2639_v26  ;;  %11119 = vmatprep.subr.mxu0 %v2880_v2  ;;  %v2912_v26 = vld [vmem:[#allocation11 + $0x7f0] sm:$0xff]  ;;  %v2850_v2 = vld [vmem:[#allocation11 + $0x600] sm:$0xff] }
 0x2ee   : > { %11086 = vmatpush3.msra.mxu1 %v2623_v29  ;;  %11120 = vmatpush3.msra.mxu0 %v2864_v3  ;;  %v2896_v29 = vld [vmem:[#allocation11 + $0x770] sm:$0xff]  ;;  %v11879_v3 = vld [vmem:[#allocation3 + $0x20] ss:$8 sps:$4 sm:$0xff]  }
 0x2ef   : > { %2753 = vmatmul.mubr.f32.gmra.mxu0 %v11875_v5  ;;  %11087 = vmatprep.subr.mxu1 %v2638_v4  ;;  %v11880_v4 = vld [vmem:[#allocation3 + $0x9] ss:$8 sps:$4 sm:$0xff]  }
 0x2f0   : > { %11121 = vmatprep.subr.mxu0 %v2879_v6  ;;  %11088 = vmatpush3.msra.mxu1 %v2622_v7  ;;  %v2911_v5 = vld [vmem:[#allocation11 + $0x7e8] sm:$0xff]  ;;  %v11881_v6 = vld [vmem:[#allocation3 + $0x1a] ss:$8 sps:$4 sm:$0xff]  }
 0x2f1   : > { %11122 = vmatpush3.msra.mxu0 %v2863_v8  ;;  %3018 = vmatprep.mubr.f32.mxu0 %v11876_v9  ;;  %v2895_v7 = vld [vmem:[#allocation11 + $0x768] sm:$0xff]  ;;  %v11882_v8 = vld [vmem:[#allocation3 + $0x12] ss:$8 sps:$4 sm:$0xff]   ;;  %v2910_v9 = vld [vmem:[#allocation11 + $0x7e0] sm:$0xff] }
 0x2f2   : > { %11089 = vmatprep.subr.mxu1 %v2637_v10  ;;  %11123 = vmatprep.subr.mxu0 %v2878_v11  ;;  %v2894_v10 = vld [vmem:[#allocation11 + $0x760] sm:$0xff] }
 0x2f3   : > { %11090 = vmatpush3.msra.mxu1 %v2621_v12  ;;  %11124 = vmatpush3.msra.mxu0 %v2862_v13  ;;  %v11883_v11 = vld [vmem:[#allocation3 + $0x19] ss:$8 sps:$4 sm:$0xff]  }
 0x2f4   : > { %11091 = vmatprep.subr.mxu1 %v2636_v14  ;;  %11125 = vmatprep.subr.mxu0 %v2877_v15  ;;  %v2909_v12 = vld [vmem:[#allocation11 + $0x7d8] sm:$0xff]  ;;  %v2908_v14 = vld [vmem:[#allocation11 + $0x7d0] sm:$0xff] }
 0x2f5   : > { %11092 = vmatpush3.msra.mxu1 %v2620_v53  ;;  %11126 = vmatpush3.msra.mxu0 %v2861_v16  ;;  %v2893_v13 = vld [vmem:[#allocation11 + $0x758] sm:$0xff]  ;;  %v2892_v15 = vld [vmem:[#allocation11 + $0x750] sm:$0xff]  ;;  %v2907_v53 = vld [vmem:[#allocation11 + $0x7c8] sm:$0xff] }
 0x2f6   : > { %11093 = vmatprep.subr.mxu1 %v2635_v17  ;;  %11127 = vmatprep.subr.mxu0 %v2876_v55  ;;  %v2891_v16 = vld [vmem:[#allocation11 + $0x748] sm:$0xff]  ;;  %v2906_v17 = vld [vmem:[#allocation11 + $0x7c0] sm:$0xff] }
 0x2f7   : > { %11094 = vmatpush3.msra.mxu1 %v2619_v18  ;;  %11128 = vmatpush3.msra.mxu0 %v2860_v19  ;;  %v2890_v55 = vld [vmem:[#allocation11 + $0x740] sm:$0xff]  ;;  %v2905_v18 = vld [vmem:[#allocation11 + $0x7b8] sm:$0xff] }
 0x2f8   : > { %11095 = vmatprep.subr.mxu1 %v2634_v20  ;;  %11129 = vmatprep.subr.mxu0 %v2875_v22  ;;  %v2889_v19 = vld [vmem:[#allocation11 + $0x738] sm:$0xff]  ;;  %v2904_v20 = vld [vmem:[#allocation11 + $0x7b0] sm:$0xff] }
 0x2f9   : > { %11096 = vmatpush3.msra.mxu1 %v2618_v23  ;;  %11130 = vmatpush3.msra.mxu0 %v2859_v24  ;;  %v2888_v22 = vld [vmem:[#allocation11 + $0x730] sm:$0xff]  ;;  %v2903_v23 = vld [vmem:[#allocation11 + $0x7a8] sm:$0xff] }
 0x2fa   : > { %11097 = vmatprep.subr.mxu1 %v2633_v27  ;;  %11131 = vmatprep.subr.mxu0 %v2874_v28  ;;  %v2887_v24 = vld [vmem:[#allocation11 + $0x728] sm:$0xff]  ;;  %v2902_v27 = vld [vmem:[#allocation11 + $0x7a0] sm:$0xff] }
 0x2fb   : > { %11098 = vmatpush3.msra.mxu1 %v2617_v30  ;;  %11132 = vmatpush3.msra.mxu0 %v2858_v31  ;;  %v2886_v28 = vld [vmem:[#allocation11 + $0x720] sm:$0xff]  ;;  %v2901_v30 = vld [vmem:[#allocation11 + $0x798] sm:$0xff] }
 0x2fc   : > { %11099 = vmatprep.subr.mxu1 %v2632_v32  ;;  %11133 = vmatprep.subr.mxu0 %v2873_v33  ;;  %v2885_v31 = vld [vmem:[#allocation11 + $0x718] sm:$0xff]  ;;  %v2900_v32 = vld [vmem:[#allocation11 + $0x790] sm:$0xff] }
 0x2fd   : > { %11100 = vmatpush3.msra.mxu1 %v2616_v34  ;;  %11134 = vmatpush3.msra.mxu0 %v2857_v35  ;;  %v2884_v33 = vld [vmem:[#allocation11 + $0x710] sm:$0xff]  ;;  %v2899_v34 = vld [vmem:[#allocation11 + $0x788] sm:$0xff] }
 0x2fe   : > { %11101 = vmatprep.subr.mxu1 %v2631_v36  ;;  %11135 = vmatprep.subr.mxu0 %v2872_v37  ;;  %v2883_v35 = vld [vmem:[#allocation11 + $0x708] sm:$0xff]  ;;  %v4087_v36 = vld [vmem:[#allocation13 + $0xf8] sm:$0xff]  ;;  %v2898_v37 = vld [vmem:[#allocation11 + $0x780] sm:$0xff] }
 0x2ff   : > { %11102 = vmatpush3.msra.mxu1 %v2615_v39  ;;  %11136 = vmatpush3.msra.mxu0 %v2856_v40  ;;  %v2882_v39 = vld [vmem:[#allocation11 + $0x700] sm:$0xff]  ;;  %v11884_v40 = vld [vmem:[#allocation3 + $0x11] ss:$8 sps:$4 sm:$0xff]  }
 0x300   : > { %11103 = vmatprep.subr.mxu1 %v2630_v41  ;;  %11137 = vmatprep.subr.mxu0 %v2871_v42  ;;  %v11885_v41 = vld [vmem:[#allocation3 + $0x22] ss:$8 sps:$4 sm:$0xff]  }
 0x301   : > { %11104 = vmatpush3.msra.mxu1 %v2614_v21  ;;  %11138 = vmatpush3.msra.mxu0 %v2855_v43  ;;  %v11886_v42 = vld [vmem:[#allocation3 + $0x21] ss:$8 sps:$4 sm:$0xff]   ;;  %v4086_v43 = vld [vmem:[#allocation13 + $0xf0] sm:$0xff] }
 0x302   : > { %11105 = vmatprep.subr.mxu1 %v2629_v61  ;;  %11139 = vmatprep.subr.mxu0 %v2870_v44  ;;  %v4071_v21 = vld [vmem:[#allocation13 + $0x78] sm:$0xff]  ;;  %v4070_v61 = vld [vmem:[#allocation13 + $0x70] sm:$0xff]  ;;  %v4085_v44 = vld [vmem:[#allocation13 + $0xe8] sm:$0xff] }
 0x303   : > { %11106 = vmatpush3.msra.mxu1 %v2613_v45  ;;  %11140 = vmatpush3.msra.mxu0 %v2854_v46  ;;  %v4069_v45 = vld [vmem:[#allocation13 + $0x68] sm:$0xff]  ;;  %v4084_v46 = vld [vmem:[#allocation13 + $0xe0] sm:$0xff] }
 0x304   : > { %11107 = vmatprep.subr.mxu1 %v2628_v47  ;;  %11141 = vmatprep.subr.mxu0 %v2869_v48  ;;  %v4068_v47 = vld [vmem:[#allocation13 + $0x60] sm:$0xff]  ;;  %v4083_v48 = vld [vmem:[#allocation13 + $0xd8] sm:$0xff] }
 0x305   : > { %11108 = vmatpush3.msra.mxu1 %v2612_v49  ;;  %11142 = vmatpush3.msra.mxu0 %v2853_v50  ;;  %v4119_v49 = vld [vmem:[#allocation13 + $0x1f8] sm:$0xff] }
 0x306   : > { %11109 = vmatprep.subr.mxu1 %v2627_v51  ;;  %11143 = vmatprep.subr.mxu0 %v2868_v54  ;;  %v4103_v50 = vld [vmem:[#allocation13 + $0x178] sm:$0xff]  ;;  %v4118_v51 = vld [vmem:[#allocation13 + $0x1f0] sm:$0xff] }
 0x307   : > { %11110 = vmatpush3.msra.mxu1 %v2611_v56  ;;  %11144 = vmatpush3.msra.mxu0 %v2852_v57  ;;  %v4102_v54 = vld [vmem:[#allocation13 + $0x170] sm:$0xff]  ;;  %v4117_v56 = vld [vmem:[#allocation13 + $0x1e8] sm:$0xff]  ;;  %v4067_v57 = vld [vmem:[#allocation13 + $0x58] sm:$0xff] }
 0x308   : > { %2823 = vmatmul.mubr.f32.vlgmr.msra.gmra.mxu1 %v11877_v59  ;;  %11145 = vmatprep.subr.mxu0 %v2867_v58  ;;  %v4082_v58 = vld [vmem:[#allocation13 + $0xd0] sm:$0xff] }
 0x309   : > { %11155 = vmatprep.subr.mxu1 %v2913_v60  ;;  %2827 = vmatprep.mubr.f32.mxu1 %v11878_v62  ;;  %v4066_v59 = vld [vmem:[#allocation13 + $0x50] sm:$0xff]  ;;  %v4081_v60 = vld [vmem:[#allocation13 + $0xc8] sm:$0xff] }
 0x30a   : > { %11146 = vmatpush3.msra.mxu0 %v2851_v63  ;;  %11156 = vmatpush3.msra.mxu1 %v2897_v0  ;;  %v4065_v62 = vld [vmem:[#allocation13 + $0x48] sm:$0xff]  ;;  %v4080_v0 = vld [vmem:[#allocation13 + $0xc0] sm:$0xff] }
 0x30b   : > { %11147 = vmatprep.subr.mxu0 %v2866_v1  ;;  %11157 = vmatprep.subr.mxu1 %v2912_v26  ;;  %v4101_v63 = vld [vmem:[#allocation13 + $0x168] sm:$0xff]  ;;  %v4116_v1 = vld [vmem:[#allocation13 + $0x1e0] sm:$0xff] }
 0x30c   : > { %11148 = vmatpush3.msra.mxu0 %v2850_v2  ;;  %11158 = vmatpush3.msra.mxu1 %v2896_v29  ;;  %v4064_v26 = vld [vmem:[#allocation13 + $0x40] sm:$0xff]  ;;  %v4079_v29 = vld [vmem:[#allocation13 + $0xb8] sm:$0xff] }
 0x30d   : > { %2828 = vmatmul.mubr.f32.gmra.mxu1 %v11879_v3  ;;  %3019 = vmatmul.mubr.f32.vlgmr.msra.gmra.mxu0 %v11880_v4  ;;  %v4100_v2 = vld [vmem:[#allocation13 + $0x160] sm:$0xff]  ;;  %v4115_v3 = vld [vmem:[#allocation13 + $0x1d8] sm:$0xff] }
 0x30e   : > { %11159 = vmatprep.subr.mxu1 %v2911_v5  ;;  %3023 = vmatprep.mubr.f32.mxu0 %v11881_v6  ;;  %v4063_v4 = vld [vmem:[#allocation13 + $0x38] sm:$0xff]  ;;  %v4078_v6 = vld [vmem:[#allocation13 + $0xb0] sm:$0xff] }
 0x30f   : > { %11160 = vmatpush3.msra.mxu1 %v2895_v7  ;;  %3093 = vmatprep.mubr.f32.mxu1 %v11882_v8  ;;  %v4099_v5 = vld [vmem:[#allocation13 + $0x158] sm:$0xff]  ;;  %v4114_v7 = vld [vmem:[#allocation13 + $0x1d0] sm:$0xff] }
 0x310   : > { %11161 = vmatprep.subr.mxu1 %v2910_v9  ;;  %11193 = vmatprep.subr.mxu0 %v4087_v36  ;;  %v4062_v8 = vld [vmem:[#allocation13 + $0x30] sm:$0xff]  ;;  %v4107_v36 = vld [vmem:[#allocation13 + $0x198] sm:$0xff] }
 0x311   : > { %11162 = vmatpush3.msra.mxu1 %v2894_v10  ;;  %3024 = vmatmul.mubr.f32.gmra.mxu0 %v11883_v11  ;;  %v4098_v9 = vld [vmem:[#allocation13 + $0x150] sm:$0xff]  ;;  %v4077_v10 = vld [vmem:[#allocation13 + $0xa8] sm:$0xff] }
 0x312   : > { %11163 = vmatprep.subr.mxu1 %v2909_v12  ;;  %11194 = vmatpush3.msra.mxu0 %v4071_v21  ;;  %v4113_v11 = vld [vmem:[#allocation13 + $0x1c8] sm:$0xff] }
 0x313   : > { %11164 = vmatpush3.msra.mxu1 %v2893_v13  ;;  %11195 = vmatprep.subr.mxu0 %v4086_v43  ;;  %v4061_v12 = vld [vmem:[#allocation13 + $0x28] sm:$0xff] }
 0x314   : > { %11165 = vmatprep.subr.mxu1 %v2908_v14  ;;  %11196 = vmatpush3.msra.mxu0 %v4070_v61  ;;  %v4097_v13 = vld [vmem:[#allocation13 + $0x148] sm:$0xff]  ;;  %v4076_v14 = vld [vmem:[#allocation13 + $0xa0] sm:$0xff] }
 0x315   : > { %11166 = vmatpush3.msra.mxu1 %v2892_v15  ;;  %11197 = vmatprep.subr.mxu0 %v4085_v44  ;;  %v4112_v15 = vld [vmem:[#allocation13 + $0x1c0] sm:$0xff]  ;;  %v4105_v21 = vld [vmem:[#allocation13 + $0x188] sm:$0xff] }
 0x316   : > { %11167 = vmatprep.subr.mxu1 %v2907_v53  ;;  %11198 = vmatpush3.msra.mxu0 %v4069_v45  ;;  %v4060_v53 = vld [vmem:[#allocation13 + $0x20] sm:$0xff]  ;;  %v4089_v43 = vld [vmem:[#allocation13 + $0x108] sm:$0xff] }
 0x317   : > { %11168 = vmatpush3.msra.mxu1 %v2891_v16  ;;  %11199 = vmatprep.subr.mxu0 %v4084_v46  ;;  %v4096_v16 = vld [vmem:[#allocation13 + $0x140] sm:$0xff] }
 0x318   : > { %11169 = vmatprep.subr.mxu1 %v2906_v17  ;;  %11200 = vmatpush3.msra.mxu0 %v4068_v47  ;;  %v4111_v17 = vld [vmem:[#allocation13 + $0x1b8] sm:$0xff]  ;;  %v4104_v61 = vld [vmem:[#allocation13 + $0x180] sm:$0xff] }
 0x319   : > { %11170 = vmatpush3.msra.mxu1 %v2890_v55  ;;  %11201 = vmatprep.subr.mxu0 %v4083_v48  ;;  %v4095_v55 = vld [vmem:[#allocation13 + $0x138] sm:$0xff]  ;;  %v4088_v44 = vld [vmem:[#allocation13 + $0x100] sm:$0xff] }
 0x31a   : > { %11171 = vmatprep.subr.mxu1 %v2905_v18  ;;  %11202 = vmatpush3.msra.mxu0 %v4067_v57  ;;  %v4110_v18 = vld [vmem:[#allocation13 + $0x1b0] sm:$0xff] }
 0x31b   : > { %11172 = vmatpush3.msra.mxu1 %v2889_v19  ;;  %11203 = vmatprep.subr.mxu0 %v4082_v58  ;;  %v4075_v19 = vld [vmem:[#allocation13 + $0x98] sm:$0xff] }
 0x31c   : > { %11173 = vmatprep.subr.mxu1 %v2904_v20  ;;  %11204 = vmatpush3.msra.mxu0 %v4066_v59  ;;  %v4094_v20 = vld [vmem:[#allocation13 + $0x130] sm:$0xff] }
 0x31d   : > { %11174 = vmatpush3.msra.mxu1 %v2888_v22  ;;  %11205 = vmatprep.subr.mxu0 %v4081_v60  ;;  %v4059_v22 = vld [vmem:[#allocation13 + $0x18] sm:$0xff]  ;;  %v4377_v59 = vld [vmem:[#allocation13 + $0x270] sm:$0xff] }
 0x31e   : > { %11175 = vmatprep.subr.mxu1 %v2903_v23  ;;  %11206 = vmatpush3.msra.mxu0 %v4065_v62  ;;  %v4109_v23 = vld [vmem:[#allocation13 + $0x1a8] sm:$0xff]  ;;  %v4426_v60 = vld [vmem:[#allocation13 + $0x3f8] sm:$0xff] }
 0x31f   : > { %11176 = vmatpush3.msra.mxu1 %v2887_v24  ;;  %11207 = vmatprep.subr.mxu0 %v4080_v0  ;;  %v4074_v24 = vld [vmem:[#allocation13 + $0x90] sm:$0xff]  ;;  %v4392_v62 = vld [vmem:[#allocation13 + $0x2e8] sm:$0xff] }
 0x320   : > { %11177 = vmatprep.subr.mxu1 %v2902_v27  ;;  %11208 = vmatpush3.msra.mxu0 %v4064_v26  ;;  %v4058_v27 = vld [vmem:[#allocation13 + $0x10] sm:$0xff] }
 0x321   : > { %11178 = vmatpush3.msra.mxu1 %v2886_v28  ;;  %11209 = vmatprep.subr.mxu0 %v4079_v29  ;;  %v4093_v28 = vld [vmem:[#allocation13 + $0x128] sm:$0xff] }
 0x322   : > { %11179 = vmatprep.subr.mxu1 %v2901_v30  ;;  %11210 = vmatpush3.msra.mxu0 %v4063_v4  ;;  %v4073_v30 = vld [vmem:[#allocation13 + $0x88] sm:$0xff] }
 0x323   : > { %11180 = vmatpush3.msra.mxu1 %v2885_v31  ;;  %11211 = vmatprep.subr.mxu0 %v4078_v6  ;;  %v4108_v31 = vld [vmem:[#allocation13 + $0x1a0] sm:$0xff]  ;;  %v4374_v6 = vld [vmem:[#allocation13 + $0x258] sm:$0xff] }
 0x324   : > { %11181 = vmatprep.subr.mxu1 %v2900_v32  ;;  %11212 = vmatpush3.msra.mxu0 %v4062_v8  ;;  %v4057_v32 = vld [vmem:[#allocation13 + $0x8] sm:$0xff]  ;;  %v4389_v8 = vld [vmem:[#allocation13 + $0x2d0] sm:$0xff] }
 0x325   : > { %11182 = vmatpush3.msra.mxu1 %v2884_v33  ;;  %11213 = vmatprep.subr.mxu0 %v4077_v10  ;;  %v4072_v33 = vld [vmem:[#allocation13 + $0x80] sm:$0xff] }
 0x326   : > { %11183 = vmatprep.subr.mxu1 %v2899_v34  ;;  %11214 = vmatpush3.msra.mxu0 %v4061_v12  ;;  %v4092_v34 = vld [vmem:[#allocation13 + $0x120] sm:$0xff]  ;;  %v4388_v12 = vld [vmem:[#allocation13 + $0x2c8] sm:$0xff] }
 0x327   : > { %11184 = vmatpush3.msra.mxu1 %v2883_v35  ;;  %11215 = vmatprep.subr.mxu0 %v4076_v14  ;;  %v4056_v35 = vld [vmem:[#allocation13] sm:$0xff]  ;;  %v4372_v14 = vld [vmem:[#allocation13 + $0x248] sm:$0xff] }
 0x328   : > { %11185 = vmatprep.subr.mxu1 %v2898_v37  ;;  %11216 = vmatpush3.msra.mxu0 %v4060_v53  ;;  %v4032_v37 = vld [vmem:[#allocation4 + $0x1] sm:$0xff] }
 0x329   : > { %11186 = vmatpush3.msra.mxu1 %v2882_v39  ;;  %11217 = vmatprep.subr.mxu0 %v4075_v19  ;;  %v4091_v39 = vld [vmem:[#allocation13 + $0x118] sm:$0xff] }
 0x32a   : > { %3094 = vmatmul.mubr.f32.vlgmr.msra.gmra.mxu1 %v11884_v40  ;;  %11249 = vmatprep.subr.mxu1 %v4119_v49  ;;  %v4106_v40 = vld [vmem:[#allocation13 + $0x190] sm:$0xff] }
 0x32b   : > { %3098 = vmatprep.mubr.f32.mxu1 %v11885_v41  ;;  %11250 = vmatpush3.msra.mxu1 %v4103_v50  ;;  %v4090_v41 = vld [vmem:[#allocation13 + $0x110] sm:$0xff] }
 0x32c   : > { %11251 = vmatprep.subr.mxu1 %v4118_v51  ;;  %11218 = vmatpush3.msra.mxu0 %v4059_v22  ;;  %v4394_v51 = vld [vmem:[#allocation13 + $0x2f8] sm:$0xff] }
 0x32d   : > { %11252 = vmatpush3.msra.mxu1 %v4102_v54  ;;  %11219 = vmatprep.subr.mxu0 %v4074_v24  ;;  %v4378_v54 = vld [vmem:[#allocation13 + $0x278] sm:$0xff] }
 0x32e   : > { %3099 = vmatmul.mubr.f32.gmra.mxu1 %v11886_v42  ;;  %11253 = vmatprep.subr.mxu1 %v4117_v56  ;;  %v11887_v42 = vld [vmem:[#allocation4] sm:$0xff]  ;;  %v4386_v22 = vld [vmem:[#allocation13 + $0x2b8] sm:$0xff] }
 0x32f   : > { %11254 = vmatpush3.msra.mxu1 %v4101_v63  ;;  %11220 = vmatpush3.msra.mxu0 %v4058_v27  ;;  %v4393_v56 = vld [vmem:[#allocation13 + $0x2f0] sm:$0xff] }
 0x330   : > { %11255 = vmatprep.subr.mxu1 %v4116_v1  ;;  %11221 = vmatprep.subr.mxu0 %v4073_v30  ;;  %v4376_v1 = vld [vmem:[#allocation13 + $0x268] sm:$0xff]  ;;  %v4385_v30 = vld [vmem:[#allocation13 + $0x2b0] sm:$0xff] }
 0x331   : > { %11256 = vmatpush3.msra.mxu1 %v4100_v2  ;;  %11222 = vmatpush3.msra.mxu0 %v4057_v32  ;;  %v4391_v2 = vld [vmem:[#allocation13 + $0x2e0] sm:$0xff] }
 0x332   : > { %11257 = vmatprep.subr.mxu1 %v4115_v3  ;;  %11223 = vmatprep.subr.mxu0 %v4072_v33  ;;  %v4375_v3 = vld [vmem:[#allocation13 + $0x260] sm:$0xff] }
 0x333   : > { %11258 = vmatpush3.msra.mxu1 %v4099_v5  ;;  %11224 = vmatpush3.msra.mxu0 %v4056_v35  ;;  %v4390_v5 = vld [vmem:[#allocation13 + $0x2d8] sm:$0xff] }
 0x334   : > { %11259 = vmatprep.subr.mxu1 %v4114_v7  ;;  %4184 = vmatprep.mubr.f32.mxu0 %v4032_v37 }
 0x335   : > { %11260 = vmatpush3.msra.mxu1 %v4098_v9  ;;  %4185 = vmatmul.mubr.f32.vlgmr.msra.gmra.mxu0 %v11887_v42 }
 0x336   : > { %11261 = vmatprep.subr.mxu1 %v4113_v11  ;;  %11305 = vmatprep.subr.mxu0 %v4394_v51  ;;  %v4373_v11 = vld [vmem:[#allocation13 + $0x250] sm:$0xff]  ;;  %v4367_v51 = vld [vmem:[#allocation13 + $0x220] sm:$0xff] }
 0x337   : > { %11262 = vmatpush3.msra.mxu1 %v4097_v13  ;;  %11306 = vmatpush3.msra.mxu0 %v4378_v54  ;;  %v10600_v13 = vld [vmem:[%s15163_s6] ss:$0 sm:$0xff] }
 0x338   : > { %11263 = vmatprep.subr.mxu1 %v4112_v15  ;;  %11307 = vmatprep.subr.mxu0 %v4393_v56  ;;  %v12538_v33 = vrot.slane %v10600_v13, %v12425_v52 }
 0x339   : > { %11264 = vmatpush3.msra.mxu1 %v4096_v16  ;;  %11308 = vmatpush3.msra.mxu0 %v4377_v59  ;;  %v4387_v16 = vld [vmem:[#allocation13 + $0x2c0] sm:$0xff]  ;;  %v4382_v59 = vld [vmem:[#allocation13 + $0x298] sm:$0xff] }
 0x33a   : > { %11265 = vmatprep.subr.mxu1 %v4111_v17  ;;  %11309 = vmatprep.subr.mxu0 %v4392_v62 }
 0x33b   : > { %11266 = vmatpush3.msra.mxu1 %v4095_v55  ;;  %11310 = vmatpush3.msra.mxu0 %v4376_v1 }
 0x33c   : > { %11267 = vmatprep.subr.mxu1 %v4110_v18  ;;  %11311 = vmatprep.subr.mxu0 %v4391_v2  ;;  %v4371_v18 = vld [vmem:[#allocation13 + $0x240] sm:$0xff] }
 0x33d   : > { %11268 = vmatpush3.msra.mxu1 %v4094_v20  ;;  %11312 = vmatpush3.msra.mxu0 %v4375_v3  ;;  %v3734_v20 = vcombine.high %v10600_v13, %v10600_v13 }
 0x33e   : > { %11269 = vmatprep.subr.mxu1 %v4109_v23  ;;  %11313 = vmatprep.subr.mxu0 %v4390_v5  ;;  %v4370_v23 = vld [vmem:[#allocation13 + $0x238] sm:$0xff]  ;;  %v4381_v5 = vld [vmem:[#allocation13 + $0x290] sm:$0xff] }
 0x33f   : > { %11270 = vmatpush3.msra.mxu1 %v4093_v28  ;;  %v10921_v46 = vpop.f32.mrf.mxu0  ;;  %11314 = vmatpush3.msra.mxu0 %v4374_v6  ;;  %v12541_v37 = vrot.slane %v3734_v20, %v12425_v52 }
 0x340   : > { %11271 = vmatprep.subr.mxu1 %v4108_v31  ;;  %11315 = vmatprep.subr.mxu0 %v4389_v8 }
 0x341   : > { %11272 = vmatpush3.msra.mxu1 %v4092_v34  ;;  %v10922_v48 = vpop.f32.mrf.mxu0  ;;  %11316 = vmatpush3.msra.mxu0 %v4373_v11  ;;  %v4369_v34 = vld [vmem:[#allocation13 + $0x230] sm:$0xff] }
 0x342   : > { %11273 = vmatprep.subr.mxu1 %v4107_v36  ;;  %v10923_v63 = vadd.f32 %v10922_v48, %v10921_v46  ;;  %11317 = vmatprep.subr.mxu0 %v4388_v12 }
 0x343   : > { %11274 = vmatpush3.msra.mxu1 %v4091_v39  ;;  %11318 = vmatpush3.msra.mxu0 %v4372_v14  ;;  %v4384_v39 = vld [vmem:[#allocation13 + $0x2a8] sm:$0xff] }
 0x344   : > { %11275 = vmatprep.subr.mxu1 %v4106_v40  ;;  %11319 = vmatprep.subr.mxu0 %v4387_v16 }
 0x345   : > { %11276 = vmatpush3.msra.mxu1 %v4090_v41  ;;  %11320 = vmatpush3.msra.mxu0 %v4371_v18  ;;  %v4364_v18 = vld [vmem:[#allocation13 + $0x208] sm:$0xff] }
 0x346   : > { %11277 = vmatprep.subr.mxu1 %v4105_v21  ;;  %11321 = vmatprep.subr.mxu0 %v4386_v22 }
 0x347   : > { %11278 = vmatpush3.msra.mxu1 %v4089_v43  ;;  %11322 = vmatpush3.msra.mxu0 %v4370_v23  ;;  %v4368_v43 = vld [vmem:[#allocation13 + $0x228] sm:$0xff] }
 0x348   : > { %11279 = vmatprep.subr.mxu1 %v4104_v61  ;;  %11323 = vmatprep.subr.mxu0 %v4385_v30 }
 0x349   : > { %11280 = vmatpush3.msra.mxu1 %v4088_v44  ;;  %11324 = vmatpush3.msra.mxu0 %v4369_v34 }
 0x34a   : > { %11361 = vmatprep.subr.mxu1 %v4426_v60  ;;  %11325 = vmatprep.subr.mxu0 %v4384_v39 }
 0x34b   : > { %11326 = vmatpush3.msra.mxu0 %v4368_v43 }
 0x381   : > { %v10924_v50 = vpop.f32.mrf.mxu0 }
 0x382   : > { %v10959_v45 = vpop.f32.mrf.mxu1 }
 0x383   : > { %v10925_v0 = vpop.f32.mrf.mxu0 }
 0x384   : > { %v10960_v47 = vpop.f32.mrf.mxu1  ;;  %v10926_v4 = vadd.f32 %v10925_v0, %v10924_v50 }
 0x385   : > { %v10961_v57 = vadd.f32 %v10960_v47, %v10959_v45  ;;  %v10997_v10 = vpop.f32.mrf.mxu0  ;;  %v4383_v45 = vld [vmem:[#allocation13 + $0x2a0] sm:$0xff] }
 0x386   : > { %v10962_v49 = vpop.f32.mrf.mxu1  ;;  %11327 = vmatprep.subr.mxu0 %v4383_v45 }
 0x387   : > { %v2282_v29 = vadd.f32 %v10961_v57, %v10923_v63  ;;  %v10998_v55 = vpop.f32.mrf.mxu0  ;;  %11328 = vmatpush3.msra.mxu0 %v4367_v51 }
 0x388   : > { %v10963_v58 = vpop.f32.mrf.mxu1  ;;  %v10999_v42 = vadd.f32 %v10998_v55, %v10997_v10  ;;  %11329 = vmatprep.subr.mxu0 %v4382_v59  ;;  %v4365_v10 = vld [vmem:[#allocation13 + $0x210] sm:$0xff] }
 0x389   : > { %v10964_v26 = vadd.f32 %v10963_v58, %v10962_v49  ;;  %v3106_v9 = vcombine.high %v2282_v29, %v2282_v29  ;;  %v3113_v15 = vrot.slane %v2282_v29, %v12482_v38  ;;  %v12557_v49 = vcombine.high %v12538_v33, %v12538_v33 }
 0x38a   : > { %v12570_v58 = vcombine.high %v12541_v37, %v12541_v37 }
 0x38b   : > { %v2287_v7 = vadd.f32 %v10964_v26, %v10926_v4  ;;  %v3120_v17 = vrot.slane %v3106_v9, %v12482_v38  ;;  %v3121_v24 = vcombine.high %v3113_v15, %v3113_v15  ;;  %v12544_v40 = vrot.slane %v3113_v15, %v12482_v38  ;;  %v4366_v26 = vld [vmem:[#allocation13 + $0x218] sm:$0xff]  ;;  %v4380_v15 = vld [vmem:[#allocation13 + $0x288] sm:$0xff] }
 0x38c   : > { %v11000_v32 = vpop.f32.mrf.mxu0  ;;  %11330 = vmatpush3.msra.mxu0 %v4366_v26 }
 0x38d   : > { %v3155_v53 = vcombine.high %v2287_v7, %v2287_v7  ;;  %v3162_v19 = vrot.slane %v2287_v7, %v12482_v38  ;;  %v3122_v31 = vcombine.high %v3120_v17, %v3120_v17  ;;  %v12547_v41 = vrot.slane %v3120_v17, %v12482_v38  ;;  %11331 = vmatprep.subr.mxu0 %v4381_v5 }
 0x38e   : > { %v12550_v61 = vrot.slane %v3121_v24, %v12482_v38  ;;  %v11001_v47 = vpop.f32.mrf.mxu0  ;;  %v3151_v60 = vcombine.high %v12544_v40, %v12544_v40  ;;  %11332 = vmatpush3.msra.mxu0 %v4365_v10  ;;  %v4379_v24 = vld [vmem:[#allocation13 + $0x280] sm:$0xff] }
 0x38f   : > { %v3169_v27 = vrot.slane %v3155_v53, %v12482_v38  ;;  %v3170_v35 = vcombine.high %v3162_v19, %v3162_v19  ;;  %v12553_v46 = vrot.slane %v3122_v31, %v12482_v38  ;;  %v12560_v54 = vrot.slane %v3162_v19, %v12482_v38  ;;  %11333 = vmatprep.subr.mxu0 %v4380_v15 }
 0x390   : > { %v3152_v62 = vcombine.high %v12547_v41, %v12547_v41  ;;  %v3153_v2 = vcombine.high %v12550_v61, %v12550_v61  ;;  %v11002_v3 = vadd.f32 %v11001_v47, %v11000_v32  ;;  %v4363_v32 = vld [vmem:[#allocation13 + $0x200] sm:$0xff]  ;;  %11334 = vmatpush3.msra.mxu0 %v4364_v18 }
 0x391   : > { %v3171_v44 = vcombine.high %v3169_v27, %v3169_v27  ;;  %v12563_v56 = vrot.slane %v3169_v27, %v12482_v38  ;;  %v12566_v57 = vrot.slane %v3170_v35, %v12482_v38  ;;  %v3154_v6 = vcombine.high %v12553_v46, %v12553_v46  ;;  %11335 = vmatprep.subr.mxu0 %v4379_v24 }
 0x392   : > { %v3200_v11 = vcombine.high %v12560_v54, %v12560_v54  ;;  %11336 = vmatpush3.msra.mxu0 %v4363_v32 }
 0x393   : > { %v12580_v29 = vrot.slane %v3171_v44, %v12482_v38  ;;  %v3201_v12 = vcombine.high %v12563_v56, %v12563_v56  ;;  %v3202_v13 = vcombine.high %v12566_v57, %v12566_v57 }
 0x395   : > { %v3203_v19 = vcombine.high %v12580_v29, %v12580_v29 }
 0x3a4   : > { %v11035_v28 = vpop.f32.mrf.mxu1 }
 0x3a6   : > { %v11036_v36 = vpop.f32.mrf.mxu1 }
 0x3a7   : > { %v11037_v21 = vadd.f32 %v11036_v36, %v11035_v28 }
 0x3a9   : > { %v2553_v48 = vadd.f32 %v11037_v21, %v10999_v42  ;;  %v11038_v50 = vpop.f32.mrf.mxu1  ;;  %v4702_v42 = vld [vmem:[#allocation13 + $0x4f8] sm:$0xff] }
 0x3aa   : > { %11417 = vmatprep.subr.mxu0 %v4702_v42 }
 0x3ab   : > { %v3222_v63 = vcombine.high %v2553_v48, %v2553_v48  ;;  %v3229_v0 = vrot.slane %v2553_v48, %v12482_v38  ;;  %v11039_v1 = vpop.f32.mrf.mxu1 }
 0x3ac   : > { %v11040_v4 = vadd.f32 %v11039_v1, %v11038_v50 }
 0x3ad   : > { %v3236_v7 = vrot.slane %v3222_v63, %v12482_v38  ;;  %v3237_v8 = vcombine.high %v3229_v0, %v3229_v0  ;;  %v3245_v9 = vrot.slane %v3229_v0, %v12482_v38 }
 0x3ae   : > { %v2558_v14 = vadd.f32 %v11040_v4, %v11002_v3 }
 0x3af   : > { %v3238_v53 = vcombine.high %v3236_v7, %v3236_v7  ;;  %v3252_v16 = vrot.slane %v3236_v7, %v12482_v38  ;;  %v3259_v17 = vrot.slane %v3237_v8, %v12482_v38  ;;  %v3267_v55 = vcombine.high %v3245_v9, %v3245_v9 }
 0x3b0   : > { %v3323_v20 = vrot.slane %v3245_v9, %v12416_v25  ;;  %v3271_v22 = vcombine.high %v2558_v14, %v2558_v14  ;;  %v3278_v23 = vrot.slane %v2558_v14, %v12482_v38 }
 0x3b1   : > { %v3266_v27 = vrot.slane %v3238_v53, %v12482_v38  ;;  %v3268_v28 = vcombine.high %v3252_v16, %v3252_v16  ;;  %v3269_v30 = vcombine.high %v3259_v17, %v3259_v17  ;;  %v3327_v31 = vrot.slane %v3259_v17, %v12416_v25 }
 0x3b2   : > { %v3331_v34 = vrot.slane %v3267_v55, %v12416_v25  ;;  %v3339_v35 = vrot.slane %v3252_v16, %v12416_v25  ;;  %v3400_v36 = vsel %vm654_vm1, %v12544_v40, %v3323_v20  ;;  %v3285_v39 = vrot.slane %v3271_v22, %v12482_v38 }
 0x3b3   : > { %v3270_v21 = vcombine.high %v3266_v27, %v3266_v27  ;;  %v3335_v43 = vrot.slane %v3269_v30, %v12416_v25  ;;  %v3343_v44 = vrot.slane %v3266_v27, %v12416_v25  ;;  %v3347_v45 = vrot.slane %v3268_v28, %v12416_v25 }
 0x3b4   : > { %v3401_v47 = vsel %vm654_vm1, %v12550_v61, %v3327_v31  ;;  %v3402_v48 = vsel %vm654_vm1, %v3151_v60, %v3331_v34  ;;  %v3404_v40 = vsel %vm654_vm1, %v12547_v41, %v3339_v35  ;;  %v3755_v50 = vadd.f32 %v12538_v33, %v3400_v36 }
 0x3b5   : > { %v3351_v51 = vrot.slane %v3270_v21, %v12416_v25  ;;  %v3403_v59 = vsel %vm654_vm1, %v3153_v2, %v3335_v43  ;;  %v3405_v63 = vsel %vm654_vm1, %v12553_v46, %v3343_v44  ;;  %v3406_v0 = vsel %vm654_vm1, %v3152_v62, %v3347_v45 }
 0x3b6   : > { %v3756_v61 = vadd.f32 %v12557_v49, %v3401_v47  ;;  %v3757_v60 = vadd.f32 %v12541_v37, %v3402_v48  ;;  %v3758_v1 = vadd.f32 %v12570_v58, %v3403_v59  ;;  %v3763_v41 = vadd.f32 %v12538_v33, %v3404_v40 }
 0x3b7   : > { %v3407_v26 = vsel %vm654_vm1, %v3154_v6, %v3351_v51  ;;  %v3764_v3 = vadd.f32 %v12557_v49, %v3405_v63  ;;  %v3765_v2 = vadd.f32 %v12541_v37, %v3406_v0  ;;  %v3807_v4 = vmax.f32 %v3755_v50, 0.0 }
 0x3b8   : > { %v3766_v46 = vadd.f32 %v12570_v58, %v3407_v26  ;;  %v3808_v5 = vmax.f32 %v3756_v61, 0.0  ;;  %v3809_v62 = vmax.f32 %v3757_v60, 0.0  ;;  %v3810_v7 = vmax.f32 %v3758_v1, 0.0 }
 0x3b9   : > { %v3815_v8 = vmax.f32 %v3763_v41, 0.0  ;;  %v3816_v9 = vmax.f32 %v3764_v3, 0.0  ;;  %v3817_v10 = vmax.f32 %v3765_v2, 0.0  ;;  %v3286_v14 = vcombine.high %v3278_v23, %v3278_v23 }
 0x3ba   : > { %v3818_v15 = vmax.f32 %v3766_v46, 0.0  ;;  %v3871_v53 = vcombine.low %v3807_v4, %v3808_v5  ;;  %v3872_v16 = vcombine.low %v3809_v62, %v3810_v7  ;;  %v3287_v17 = vcombine.high %v3285_v39, %v3285_v39  ;;  %v4410_v7 = vld [vmem:[#allocation13 + $0x378] sm:$0xff] }
 0x3bb   : > { %v3905_v55 = vcombine.low %v3815_v8, %v3816_v9  ;;  %v3294_v6 = vrot.slane %v3278_v23, %v12482_v38  ;;  %v3301_v18 = vrot.slane %v3285_v39, %v12482_v38  ;;  %v3308_v20 = vrot.slane %v3286_v14, %v12482_v38  ;;  %v4425_v14 = vld [vmem:[#allocation13 + $0x3f0] sm:$0xff] }
 0x3bc   : > { %v3879_v22 = vrot.slane %v3871_v53, %v12425_v52  ;;  %v3886_v24 = vrot.slane %v3872_v16, %v12425_v52  ;;  %v3906_v27 = vcombine.low %v3817_v10, %v3818_v15  ;;  %v3315_v28 = vrot.slane %v3287_v17, %v12482_v38  ;;  %v4409_v16 = vld [vmem:[#allocation13 + $0x370] sm:$0xff] }
 0x3bd   : > { %v3913_v30 = vrot.slane %v3905_v55, %v12425_v52  ;;  %v3316_v31 = vcombine.high %v3294_v6, %v3294_v6  ;;  %v3317_v32 = vcombine.high %v3301_v18, %v3301_v18  ;;  %v3318_v34 = vcombine.high %v3308_v20, %v3308_v20 }
 0x3be   : > { %v3887_v35 = vcombine.low %v3879_v22, %v3886_v24  ;;  %v3920_v36 = vrot.slane %v3906_v27, %v12425_v52  ;;  %v3319_v23 = vcombine.high %v3315_v28, %v3315_v28  ;;  %v3355_v39 = vrot.slane %v3294_v6, %v12416_v25  ;;  %v4424_v6 = vld [vmem:[#allocation13 + $0x3e8] sm:$0xff]  ;;  %v4423_v27 = vld [vmem:[#allocation13 + $0x3e0] sm:$0xff] }
 0x3bf   : > { %v3359_v42 = vrot.slane %v3308_v20, %v12416_v25  ;;  %v3363_v21 = vrot.slane %v3316_v31, %v12416_v25  ;;  %v3367_v43 = vrot.slane %v3318_v34, %v12416_v25  ;;  %v3371_v44 = vrot.slane %v3301_v18, %v12416_v25  ;;  %v4408_v22 = vld [vmem:[#allocation13 + $0x368] sm:$0xff]  ;;  %v4422_v31 = vld [vmem:[#allocation13 + $0x3d8] sm:$0xff] }
 0x3c0   : > { %v12640_v45 = vcombine.low %v3913_v30, %v3920_v36  ;;  %4016 = vst [vmem:[#allocation4 + $0x11] sm:$0xff] %v3887_v35  ;;  %v3375_v47 = vrot.slane %v3315_v28, %v12416_v25  ;;  %v3379_v48 = vrot.slane %v3317_v32, %v12416_v25  ;;  %v3383_v40 = vrot.slane %v3319_v23, %v12416_v25  ;;  %v4407_v30 = vld [vmem:[#allocation13 + $0x360] sm:$0xff]  ;;  %v4406_v32 = vld [vmem:[#allocation13 + $0x358] sm:$0xff]  ;;  %v4405_v36 = vld [vmem:[#allocation13 + $0x350] sm:$0xff]  ;;  %v11073_v23 = vpop.f32.mrf.mxu0 }
 0x3c1   : > { %4189 = vmatprep.mubr.f32.mxu0 %v3887_v35  ;;  %v3408_v50 = vsel %vm654_vm1, %v12560_v54, %v3355_v39  ;;  %v3409_v51 = vsel %vm654_vm1, %v12566_v57, %v3359_v42  ;;  %v3410_v59 = vsel %vm654_vm1, %v3200_v11, %v3363_v21  ;;  %v3411_v63 = vsel %vm654_vm1, %v3202_v13, %v3367_v43  ;;  %v4420_v39 = vld [vmem:[#allocation13 + $0x3c8] sm:$0xff]  ;;  %v4419_v43 = vld [vmem:[#allocation13 + $0x3c0] sm:$0xff] }
 0x3c2   : > { %4289 = vmatprep.mubr.f32.mxu1 %v3887_v35  ;;  %4018 = vst [vmem:[#allocation4 + $0x31] sm:$0xff] %v12640_v45  ;;  %v3412_v0 = vsel %vm654_vm1, %v12563_v56, %v3371_v44  ;;  %v3413_v61 = vsel %vm654_vm1, %v12580_v29, %v3375_v47  ;;  %v3414_v54 = vsel %vm654_vm1, %v3201_v12, %v3379_v48  ;;  %v4421_v35 = vld [vmem:[#allocation13 + $0x3d0] sm:$0xff]  ;;  %v4404_v42 = vld [vmem:[#allocation13 + $0x348] sm:$0xff]  ;;  %v4403_v44 = vld [vmem:[#allocation13 + $0x340] sm:$0xff]  ;;  %v11074_v47 = vpop.f32.mrf.mxu0 }
 0x3c3   : > { %v3415_v57 = vsel %vm654_vm1, %v3203_v19, %v3383_v40  ;;  %v3771_v11 = vadd.f32 %v12538_v33, %v3408_v50  ;;  %v3772_v13 = vadd.f32 %v12557_v49, %v3409_v51  ;;  %v3773_v60 = vadd.f32 %v12541_v37, %v3410_v59  ;;  %v4418_v48 = vld [vmem:[#allocation13 + $0x3b8] sm:$0xff]  ;;  %v4417_v51 = vld [vmem:[#allocation13 + $0x3b0] sm:$0xff] }
 0x3c4   : > { %v3774_v1 = vadd.f32 %v12570_v58, %v3411_v63  ;;  %v3779_v41 = vadd.f32 %v12538_v33, %v3412_v0  ;;  %v3780_v26 = vadd.f32 %v12557_v49, %v3413_v61  ;;  %v3781_v56 = vadd.f32 %v12541_v37, %v3414_v54  ;;  %v4402_v40 = vld [vmem:[#allocation13 + $0x338] sm:$0xff]  ;;  %v4401_v59 = vld [vmem:[#allocation13 + $0x330] sm:$0xff]  ;;  %v11076_v63 = vpop.f32.mrf.mxu0  ;;  %v4416_v0 = vld [vmem:[#allocation13 + $0x3a8] sm:$0xff] }
 0x3c5   : > { %v3782_v12 = vadd.f32 %v12570_v58, %v3415_v57  ;;  %v3823_v3 = vmax.f32 %v3771_v11, 0.0  ;;  %v3824_v29 = vmax.f32 %v3772_v13, 0.0  ;;  %v3825_v2 = vmax.f32 %v3773_v60, 0.0  ;;  %v4400_v61 = vld [vmem:[#allocation13 + $0x328] sm:$0xff]  ;;  %v4415_v57 = vld [vmem:[#allocation13 + $0x3a0] sm:$0xff] }
 0x3c6   : > { %v3826_v19 = vmax.f32 %v3774_v1, 0.0  ;;  %v3831_v4 = vmax.f32 %v3779_v41, 0.0  ;;  %v3832_v46 = vmax.f32 %v3780_v26, 0.0  ;;  %v3833_v5 = vmax.f32 %v3781_v56, 0.0  ;;  %v4399_v13 = vld [vmem:[#allocation13 + $0x320] sm:$0xff]  ;;  %v11077_v60 = vpop.f32.mrf.mxu0  ;;  %v4414_v1 = vld [vmem:[#allocation13 + $0x398] sm:$0xff] }
 0x3c7   : > { %v3834_v62 = vmax.f32 %v3782_v12, 0.0  ;;  %v3939_v8 = vcombine.low %v3823_v3, %v3824_v29  ;;  %v4025_v10 = vld [vmem:[#allocation4 + $0x10] sm:$0xff]  ;;  %v11075_v41 = vadd.f32 %v11074_v47, %v11073_v23  ;;  %v4413_v12 = vld [vmem:[#allocation13 + $0x390] sm:$0xff]  ;;  %v11078_v3 = vadd.f32 %v11077_v60, %v11076_v63 }
 0x3c8   : > { %v3940_v9 = vcombine.low %v3825_v2, %v3826_v19  ;;  %v3973_v15 = vcombine.low %v3831_v4, %v3832_v46  ;;  %4190 = vmatmul.mubr.f32.gmra.mxu0 %v4025_v10  ;;  %4290 = vmatmul.mubr.f32.vlgmr.msra.gmra.mxu1 %v4025_v10  ;;  %v11111_v34 = vpop.f32.mrf.mxu1  ;;  %v4398_v56 = vld [vmem:[#allocation13 + $0x318] sm:$0xff]  ;;  %v4397_v2 = vld [vmem:[#allocation13 + $0x310] sm:$0xff]  ;;  %v4412_v19 = vld [vmem:[#allocation13 + $0x388] sm:$0xff] }
 0x3c9   : > { %v3974_v53 = vcombine.low %v3833_v5, %v3834_v62  ;;  %v3947_v17 = vrot.slane %v3939_v8, %v12425_v52  ;;  %11362 = vmatpush3.msra.mxu1 %v4410_v7  ;;  %v4396_v5 = vld [vmem:[#allocation13 + $0x308] sm:$0xff]  ;;  %v4411_v62 = vld [vmem:[#allocation13 + $0x380] sm:$0xff] }
 0x3ca   : > { %v3954_v55 = vrot.slane %v3940_v9, %v12425_v52  ;;  %v3981_v18 = vrot.slane %v3973_v15, %v12425_v52  ;;  %11363 = vmatprep.subr.mxu1 %v4425_v14  ;;  %v11112_v21 = vpop.f32.mrf.mxu1  ;;  %v4395_v8 = vld [vmem:[#allocation13 + $0x300] sm:$0xff]  ;;  %v4734_v9 = vld [vmem:[#allocation13 + $0x5f8] sm:$0xff] }
 0x3cb   : > { %v3988_v20 = vrot.slane %v3974_v53, %v12425_v52  ;;  %11364 = vmatpush3.msra.mxu1 %v4409_v16  ;;  %v11113_v11 = vadd.f32 %v11112_v21, %v11111_v34 }
 0x3cc   : > { %v12682_v24 = vcombine.low %v3947_v17, %v3954_v55  ;;  %11365 = vmatprep.subr.mxu1 %v4424_v6 }
 0x3cd   : > { %v12684_v28 = vcombine.low %v3981_v18, %v3988_v20  ;;  %11366 = vmatpush3.msra.mxu1 %v4408_v22  ;;  %v11114_v50 = vpop.f32.mrf.mxu1  ;;  %v2825_v29 = vadd.f32 %v11113_v11, %v11075_v41  ;;  %v11149_v4 = vpop.f32.mrf.mxu0 }
 0x3ce   : > { %4020 = vst [vmem:[#allocation4 + $0x51] sm:$0xff] %v12682_v24  ;;  %11367 = vmatprep.subr.mxu1 %v4423_v27 }
 0x3cf   : > { %4022 = vst [vmem:[#allocation4 + $0x71] sm:$0xff] %v12684_v28  ;;  %11368 = vmatpush3.msra.mxu1 %v4407_v30  ;;  %v11115_v54 = vpop.f32.mrf.mxu1  ;;  %v3418_v7 = vcombine.high %v2825_v29, %v2825_v29  ;;  %v3425_v10 = vrot.slane %v2825_v29, %v12482_v38  ;;  %v11150_v15 = vpop.f32.mrf.mxu0 }
 0x3d0   : > { %11369 = vmatprep.subr.mxu1 %v4422_v31  ;;  %v11116_v26 = vadd.f32 %v11115_v54, %v11114_v50  ;;  %v11151_v30 = vadd.f32 %v11150_v15, %v11149_v4 }
 0x3d1   : > { %11370 = vmatpush3.msra.mxu1 %v4406_v32  ;;  %v3432_v53 = vrot.slane %v3418_v7, %v12482_v38  ;;  %v3433_v17 = vcombine.high %v3425_v10, %v3425_v10  ;;  %v11152_v6 = vpop.f32.mrf.mxu0  ;;  %v3441_v32 = vrot.slane %v3425_v10, %v12482_v38 }
 0x3d2   : > { %11371 = vmatprep.subr.mxu1 %v4421_v35  ;;  %v2830_v46 = vadd.f32 %v11116_v26, %v11078_v3 }
 0x3d3   : > { %11372 = vmatpush3.msra.mxu1 %v4405_v36  ;;  %v3434_v20 = vcombine.high %v3432_v53, %v3432_v53  ;;  %v3448_v34 = vrot.slane %v3432_v53, %v12482_v38  ;;  %v3455_v35 = vrot.slane %v3433_v17, %v12482_v38  ;;  %v11153_v23 = vpop.f32.mrf.mxu0  ;;  %v3463_v63 = vcombine.high %v3441_v32, %v3441_v32 }
 0x3d4   : > { %11373 = vmatprep.subr.mxu1 %v4420_v39  ;;  %v3467_v14 = vcombine.high %v2830_v46, %v2830_v46  ;;  %v3474_v16 = vrot.slane %v2830_v46, %v12482_v38 }
 0x3d5   : > { %11374 = vmatpush3.msra.mxu1 %v4404_v42  ;;  %v3462_v21 = vrot.slane %v3434_v20, %v12482_v38 }
 0x3d6   : > { %11375 = vmatprep.subr.mxu1 %v4419_v43  ;;  %v3481_v55 = vrot.slane %v3467_v14, %v12482_v38  ;;  %v3482_v22 = vcombine.high %v3474_v16, %v3474_v16  ;;  %v12697_v43 = vrot.slane %v3474_v16, %v12482_v38 }
 0x3d7   : > { %11376 = vmatpush3.msra.mxu1 %v4403_v44 }
 0x3d8   : > { %11377 = vmatprep.subr.mxu1 %v4418_v48  ;;  %v3483_v36 = vcombine.high %v3481_v55, %v3481_v55  ;;  %v12700_v44 = vrot.slane %v3481_v55, %v12482_v38  ;;  %v12703_v47 = vrot.slane %v3482_v22, %v12482_v38  ;;  %v3512_v41 = vcombine.high %v12697_v43, %v12697_v43 }
 0x3d9   : > { %11378 = vmatpush3.msra.mxu1 %v4402_v40  ;;  %v11154_v40 = vadd.f32 %v11153_v23, %v11152_v6 }
 0x3da   : > { %11379 = vmatprep.subr.mxu1 %v4417_v51  ;;  %v12707_v54 = vrot.slane %v3483_v36, %v12482_v38  ;;  %v3513_v26 = vcombine.high %v12700_v44, %v12700_v44 }
 0x3db   : > { %11380 = vmatpush3.msra.mxu1 %v4401_v59 }
 0x3dc   : > { %11381 = vmatprep.subr.mxu1 %v4416_v0  ;;  %v3464_v0 = vcombine.high %v3448_v34, %v3448_v34 }
 0x3dd   : > { %11382 = vmatpush3.msra.mxu1 %v4400_v61  ;;  %v3465_v61 = vcombine.high %v3455_v35, %v3455_v35 }
 0x3de   : > { %11383 = vmatprep.subr.mxu1 %v4415_v57 }
 0x3df   : > { %11384 = vmatpush3.msra.mxu1 %v4399_v13 }
 0x3e0   : > { %11385 = vmatprep.subr.mxu1 %v4414_v1  ;;  %v3466_v1 = vcombine.high %v3462_v21, %v3462_v21 }
 0x3e1   : > { %11386 = vmatpush3.msra.mxu1 %v4398_v56  ;;  %v3514_v56 = vcombine.high %v12703_v47, %v12703_v47 }
 0x3e2   : > { %11387 = vmatprep.subr.mxu1 %v4413_v12 }
 0x3e3   : > { %11388 = vmatpush3.msra.mxu1 %v4397_v2 }
 0x3e4   : > { %11389 = vmatprep.subr.mxu1 %v4412_v19  ;;  %v3515_v19 = vcombine.high %v12707_v54, %v12707_v54 }
 0x3e5   : > { %11390 = vmatpush3.msra.mxu1 %v4396_v5 }
 0x3e6   : > { %11391 = vmatprep.subr.mxu1 %v4411_v62 }
 0x3e7   : > { %11392 = vmatpush3.msra.mxu1 %v4395_v8 }
 0x3e8   : > { %11473 = vmatprep.subr.mxu1 %v4734_v9 }
 0x3ea   : > { %v11187_v18 = vpop.f32.mrf.mxu1 }
 0x3ec   : > { %v11188_v27 = vpop.f32.mrf.mxu1 }
 0x3ed   : > { %v11189_v31 = vadd.f32 %v11188_v27, %v11187_v18 }
 0x3ee   : > { %v11190_v39 = vpop.f32.mrf.mxu1 }
 0x3ef   : > { %v3096_v42 = vadd.f32 %v11189_v31, %v11151_v30 }
 0x3f0   : > { %v11191_v48 = vpop.f32.mrf.mxu1 }
 0x3f1   : > { %v3534_v50 = vcombine.high %v3096_v42, %v3096_v42  ;;  %v3541_v51 = vrot.slane %v3096_v42, %v12482_v38  ;;  %v11192_v59 = vadd.f32 %v11191_v48, %v11190_v39 }
 0x3f3   : > { %v3548_v57 = vrot.slane %v3534_v50, %v12482_v38  ;;  %v3549_v11 = vcombine.high %v3541_v51, %v3541_v51  ;;  %v3557_v13 = vrot.slane %v3541_v51, %v12482_v38  ;;  %v3101_v60 = vadd.f32 %v11192_v59, %v11154_v40 }
 0x3f5   : > { %v3550_v12 = vcombine.high %v3548_v57, %v3548_v57  ;;  %v3564_v3 = vrot.slane %v3548_v57, %v12482_v38  ;;  %v3571_v29 = vrot.slane %v3549_v11, %v12482_v38  ;;  %v3579_v2 = vcombine.high %v3557_v13, %v3557_v13 }
 0x3f6   : > { %v3635_v4 = vrot.slane %v3557_v13, %v12416_v25  ;;  %v3583_v46 = vcombine.high %v3101_v60, %v3101_v60  ;;  %v3590_v5 = vrot.slane %v3101_v60, %v12482_v38 }
 0x3f7   : > { %v3578_v62 = vrot.slane %v3550_v12, %v12482_v38  ;;  %v3580_v7 = vcombine.high %v3564_v3, %v3564_v3  ;;  %v3581_v8 = vcombine.high %v3571_v29, %v3571_v29  ;;  %v3639_v9 = vrot.slane %v3571_v29, %v12416_v25 }
 0x3f8   : > { %v3643_v10 = vrot.slane %v3579_v2, %v12416_v25  ;;  %v3651_v14 = vrot.slane %v3564_v3, %v12416_v25  ;;  %v3712_v15 = vsel %vm654_vm1, %v3441_v32, %v3635_v4  ;;  %v3597_v53 = vrot.slane %v3583_v46, %v12482_v38 }
 0x3f9   : > { %v3582_v16 = vcombine.high %v3578_v62, %v3578_v62  ;;  %v3647_v17 = vrot.slane %v3581_v8, %v12416_v25  ;;  %v3655_v55 = vrot.slane %v3578_v62, %v12416_v25  ;;  %v3659_v6 = vrot.slane %v3580_v7, %v12416_v25 }
 0x3fa   : > { %v3713_v18 = vsel %vm654_vm1, %v3455_v35, %v3639_v9  ;;  %v3714_v20 = vsel %vm654_vm1, %v3463_v63, %v3643_v10  ;;  %v3716_v22 = vsel %vm654_vm1, %v3448_v34, %v3651_v14  ;;  %v3759_v27 = vadd.f32 %v12538_v33, %v3712_v15 }
 0x3fb   : > { %v3663_v30 = vrot.slane %v3582_v16, %v12416_v25  ;;  %v3715_v31 = vsel %vm654_vm1, %v3465_v61, %v3647_v17  ;;  %v3717_v32 = vsel %vm654_vm1, %v3462_v21, %v3655_v55  ;;  %v3718_v36 = vsel %vm654_vm1, %v3464_v0, %v3659_v6 }
 0x3fc   : > { %v3760_v23 = vadd.f32 %v12557_v49, %v3713_v18  ;;  %v3761_v39 = vadd.f32 %v12541_v37, %v3714_v20  ;;  %v3762_v35 = vadd.f32 %v12570_v58, %v3715_v31  ;;  %v3767_v42 = vadd.f32 %v12538_v33, %v3716_v22 }
 0x3fd   : > { %v3719_v34 = vsel %vm654_vm1, %v3466_v1, %v3663_v30  ;;  %v3768_v48 = vadd.f32 %v12557_v49, %v3717_v32  ;;  %v3769_v40 = vadd.f32 %v12541_v37, %v3718_v36  ;;  %v3811_v50 = vmax.f32 %v3759_v27, 0.0 }
 0x3fe   : > { %v3770_v51 = vadd.f32 %v12570_v58, %v3719_v34  ;;  %v3812_v21 = vmax.f32 %v3760_v23, 0.0  ;;  %v3813_v59 = vmax.f32 %v3761_v39, 0.0  ;;  %v3814_v63 = vmax.f32 %v3762_v35, 0.0 }
 0x3ff   : > { %v3819_v0 = vmax.f32 %v3767_v42, 0.0  ;;  %v3820_v61 = vmax.f32 %v3768_v48, 0.0  ;;  %v3821_v57 = vmax.f32 %v3769_v40, 0.0  ;;  %v3598_v11 = vcombine.high %v3590_v5, %v3590_v5 }
 0x400   : > { %v3822_v13 = vmax.f32 %v3770_v51, 0.0  ;;  %v3888_v60 = vcombine.low %v3811_v50, %v3812_v21  ;;  %v3889_v12 = vcombine.low %v3813_v59, %v3814_v63  ;;  %v3599_v3 = vcombine.high %v3597_v53, %v3597_v53 }
 0x401   : > { %v3922_v29 = vcombine.low %v3819_v0, %v3820_v61  ;;  %v3606_v1 = vrot.slane %v3590_v5, %v12482_v38  ;;  %v3613_v2 = vrot.slane %v3597_v53, %v12482_v38  ;;  %v3620_v4 = vrot.slane %v3598_v11, %v12482_v38 }
 0x402   : > { %v3896_v46 = vrot.slane %v3888_v60, %v12425_v52  ;;  %v3903_v62 = vrot.slane %v3889_v12, %v12425_v52  ;;  %v3923_v7 = vcombine.low %v3821_v57, %v3822_v13  ;;  %v3627_v8 = vrot.slane %v3599_v3, %v12482_v38 }
 0x403   : > { %v3930_v9 = vrot.slane %v3922_v29, %v12425_v52  ;;  %v3628_v10 = vcombine.high %v3606_v1, %v3606_v1  ;;  %v3629_v14 = vcombine.high %v3613_v2, %v3613_v2  ;;  %v3630_v15 = vcombine.high %v3620_v4, %v3620_v4  ;;  %v12816_v29 = vld [vmem:[#allocation4 + $0x30] sm:$0xff] }
 0x404   : > { %v12755_v16 = vcombine.low %v3896_v46, %v3903_v62  ;;  %v3937_v5 = vrot.slane %v3923_v7, %v12425_v52  ;;  %v3631_v17 = vcombine.high %v3627_v8, %v3627_v8  ;;  %v3667_v53 = vrot.slane %v3606_v1, %v12416_v25  ;;  %v12844_v46 = vld [vmem:[#allocation4 + $0x70] sm:$0xff] }
 0x405   : > { %v3671_v55 = vrot.slane %v3620_v4, %v12416_v25  ;;  %v3675_v6 = vrot.slane %v3628_v10, %v12416_v25  ;;  %v3679_v18 = vrot.slane %v3630_v15, %v12416_v25  ;;  %v3683_v20 = vrot.slane %v3613_v2, %v12416_v25  ;;  %v12832_v2 = vld [vmem:[#allocation4 + $0x50] sm:$0xff]  ;;  %v4685_v10 = vld [vmem:[#allocation13 + $0x470] sm:$0xff] }
 0x406   : > { %v12763_v22 = vcombine.low %v3930_v9, %v3937_v5  ;;  %4017 = vst [vmem:[#allocation4 + $0x21] sm:$0xff] %v12755_v16  ;;  %v3687_v27 = vrot.slane %v3627_v8, %v12416_v25  ;;  %v3691_v30 = vrot.slane %v3629_v14, %v12416_v25  ;;  %v3695_v31 = vrot.slane %v3631_v17, %v12416_v25  ;;  %v4686_v7 = vld [vmem:[#allocation13 + $0x478] sm:$0xff]  ;;  %v11888_v8 = vld [vmem:[#allocation4 + $0x1] sm:$0xff]  ;;  %v12852_v9 = vld [vmem:[#allocation4 + $0x12] sm:$0xff] }
 0x407   : > { %4194 = vmatprep.mubr.f32.mxu0 %v12755_v16  ;;  %v3720_v32 = vsel %vm654_vm1, %v12697_v43, %v3667_v53  ;;  %v3721_v36 = vsel %vm654_vm1, %v12703_v47, %v3671_v55  ;;  %v3722_v23 = vsel %vm654_vm1, %v3512_v41, %v3675_v6  ;;  %v3723_v39 = vsel %vm654_vm1, %v3514_v56, %v3679_v18  ;;  %v4700_v14 = vld [vmem:[#allocation13 + $0x4e8] sm:$0xff]  ;;  %v12856_v15 = vld [vmem:[#allocation4 + $0x11] sm:$0xff]  ;;  %v4733_v55 = vld [vmem:[#allocation13 + $0x5f0] sm:$0xff] }
 0x408   : > { %4294 = vmatprep.mubr.f32.mxu1 %v12755_v16  ;;  %4019 = vst [vmem:[#allocation4 + $0x41] sm:$0xff] %v12763_v22  ;;  %v3724_v35 = vsel %vm654_vm1, %v12700_v44, %v3683_v20  ;;  %v3725_v42 = vsel %vm654_vm1, %v12707_v54, %v3687_v27  ;;  %v3726_v43 = vsel %vm654_vm1, %v3513_v26, %v3691_v30  ;;  %v4718_v5 = vld [vmem:[#allocation13 + $0x578] sm:$0xff]  ;;  %v4684_v17 = vld [vmem:[#allocation13 + $0x468] sm:$0xff]  ;;  %v4699_v6 = vld [vmem:[#allocation13 + $0x4e0] sm:$0xff] }
 0x409   : > { %v3727_v47 = vsel %vm654_vm1, %v3515_v19, %v3695_v31  ;;  %v3775_v41 = vadd.f32 %v12538_v33, %v3720_v32  ;;  %v3776_v56 = vadd.f32 %v12557_v49, %v3721_v36  ;;  %v3777_v34 = vadd.f32 %v12541_v37, %v3722_v23  ;;  %v4717_v18 = vld [vmem:[#allocation13 + $0x570] sm:$0xff]  ;;  %v4683_v20 = vld [vmem:[#allocation13 + $0x460] sm:$0xff]  ;;  %v4732_v27 = vld [vmem:[#allocation13 + $0x5e8] sm:$0xff] }
 0x40a   : > { %v3778_v48 = vadd.f32 %v12570_v58, %v3723_v39  ;;  %v3783_v40 = vadd.f32 %v12538_v33, %v3724_v35  ;;  %v3784_v50 = vadd.f32 %v12557_v49, %v3725_v42  ;;  %v3785_v44 = vadd.f32 %v12541_v37, %v3726_v43  ;;  %v4698_v30 = vld [vmem:[#allocation13 + $0x4d8] sm:$0xff]  ;;  %v4716_v31 = vld [vmem:[#allocation13 + $0x568] sm:$0xff]  ;;  %v12866_v36 = vld [vmem:[#allocation4 + $0x32] sm:$0xff] }
 0x40b   : > { %v3786_v26 = vadd.f32 %v12570_v58, %v3727_v47  ;;  %v3827_v51 = vmax.f32 %v3775_v41, 0.0  ;;  %v3828_v54 = vmax.f32 %v3776_v56, 0.0  ;;  %v3829_v21 = vmax.f32 %v3777_v34, 0.0  ;;  %v4682_v32 = vld [vmem:[#allocation13 + $0x458] sm:$0xff]  ;;  %v4731_v23 = vld [vmem:[#allocation13 + $0x5e0] sm:$0xff]  ;;  %v4697_v39 = vld [vmem:[#allocation13 + $0x4d0] sm:$0xff] }
 0x40c   : > { %v3830_v19 = vmax.f32 %v3778_v48, 0.0  ;;  %v3835_v59 = vmax.f32 %v3783_v40, 0.0  ;;  %v3836_v63 = vmax.f32 %v3784_v50, 0.0  ;;  %v3837_v0 = vmax.f32 %v3785_v44, 0.0  ;;  %v4715_v35 = vld [vmem:[#allocation13 + $0x560] sm:$0xff]  ;;  %v4681_v42 = vld [vmem:[#allocation13 + $0x450] sm:$0xff] }
 0x40d   : > { %v3838_v61 = vmax.f32 %v3786_v26, 0.0  ;;  %v3956_v57 = vcombine.low %v3827_v51, %v3828_v54  ;;  %v12804_v13 = vld [vmem:[#allocation4 + $0x20] sm:$0xff]  ;;  %v4730_v43 = vld [vmem:[#allocation13 + $0x5d8] sm:$0xff]  ;;  %v4695_v50 = vld [vmem:[#allocation13 + $0x4c0] sm:$0xff] }
 0x40e   : > { %v3957_v11 = vcombine.low %v3829_v21, %v3830_v19  ;;  %v3990_v60 = vcombine.low %v3835_v59, %v3836_v63  ;;  %4195 = vmatmul.mubr.f32.gmra.mxu0 %v12804_v13  ;;  %4295 = vmatmul.mubr.f32.gmra.mxu1 %v12804_v13  ;;  %v12860_v53 = vld [vmem:[#allocation4 + $0x22] sm:$0xff]  ;;  %v4696_v47 = vld [vmem:[#allocation13 + $0x4c8] sm:$0xff]  ;;  %v12870_v41 = vld [vmem:[#allocation4 + $0x31] sm:$0xff] }
 0x40f   : > { %v3991_v33 = vcombine.low %v3837_v0, %v3838_v61  ;;  %v3964_v37 = vrot.slane %v3956_v57, %v12425_v52  ;;  %4199 = vmatprep.mubr.f32.mxu0 %v12640_v45  ;;  %4299 = vmatprep.mubr.f32.mxu1 %v12640_v45  ;;  %v12826_v45 = vld [vmem:[#allocation4 + $0x40] sm:$0xff]  ;;  %v4714_v56 = vld [vmem:[#allocation13 + $0x558] sm:$0xff]  ;;  %v4679_v26 = vld [vmem:[#allocation13 + $0x440] sm:$0xff] }
 0x410   : > { %v3971_v49 = vrot.slane %v3957_v11, %v12425_v52  ;;  %v3998_v58 = vrot.slane %v3990_v60, %v12425_v52  ;;  %v4680_v34 = vld [vmem:[#allocation13 + $0x448] sm:$0xff]  ;;  %v12874_v48 = vld [vmem:[#allocation4 + $0x42] sm:$0xff]  ;;  %v4694_v54 = vld [vmem:[#allocation13 + $0x4b8] sm:$0xff] }
 0x411   : > { %v4005_v12 = vrot.slane %v3991_v33, %v12425_v52  ;;  %v4729_v40 = vld [vmem:[#allocation13 + $0x5d0] sm:$0xff]  ;;  %v4728_v51 = vld [vmem:[#allocation13 + $0x5c8] sm:$0xff]  ;;  %v4678_v19 = vld [vmem:[#allocation13 + $0x438] sm:$0xff] }
 0x412   : > { %v12814_v3 = vcombine.low %v3964_v37, %v3971_v49  ;;  %4200 = vmatmul.mubr.f32.gmra.mxu0 %v12816_v29  ;;  %4300 = vmatmul.mubr.f32.gmra.mxu1 %v12816_v29  ;;  %v4713_v44 = vld [vmem:[#allocation13 + $0x550] sm:$0xff]  ;;  %v4712_v21 = vld [vmem:[#allocation13 + $0x548] sm:$0xff]  ;;  %v12880_v59 = vld [vmem:[#allocation4 + $0x52] sm:$0xff] }
 0x413   : > { %v12818_v1 = vcombine.low %v3998_v58, %v4005_v12  ;;  %4204 = vmatprep.mubr.f32.mxu0 %v12763_v22  ;;  %4304 = vmatprep.mubr.f32.mxu1 %v12763_v22  ;;  %v4727_v63 = vld [vmem:[#allocation13 + $0x5c0] sm:$0xff]  ;;  %v4693_v0 = vld [vmem:[#allocation13 + $0x4b0] sm:$0xff]  ;;  %v4726_v11 = vld [vmem:[#allocation13 + $0x5b8] sm:$0xff] }
 0x414   : > { %4021 = vst [vmem:[#allocation4 + $0x61] sm:$0xff] %v12814_v3  ;;  %v4711_v61 = vld [vmem:[#allocation13 + $0x540] sm:$0xff]  ;;  %v4677_v57 = vld [vmem:[#allocation13 + $0x430] sm:$0xff]  ;;  %v4692_v60 = vld [vmem:[#allocation13 + $0x4a8] sm:$0xff] }
 0x415   : > { %4023 = vst [vmem:[#allocation4 + $0x81] sm:$0xff] %v12818_v1  ;;  %v12884_v33 = vld [vmem:[#allocation4 + $0x51] sm:$0xff]  ;;  %v4676_v49 = vld [vmem:[#allocation13 + $0x428] sm:$0xff]  ;;  %v4725_v12 = vld [vmem:[#allocation13 + $0x5b0] sm:$0xff] }
 0x416   : > { %4205 = vmatmul.mubr.f32.gmra.mxu0 %v12826_v45  ;;  %4305 = vmatmul.mubr.f32.gmra.mxu1 %v12826_v45  ;;  %v4710_v37 = vld [vmem:[#allocation13 + $0x538] sm:$0xff] }
 0x417   : > { %4209 = vmatprep.mubr.f32.mxu0 %v12682_v24  ;;  %4309 = vmatprep.mubr.f32.mxu1 %v12682_v24  ;;  %v4338_v24 = vld [vmem:[#allocation4 + $0x2] sm:$0xff] }
 0x41a   : > { %4210 = vmatmul.mubr.f32.gmra.mxu0 %v12832_v2  ;;  %4310 = vmatmul.mubr.f32.gmra.mxu1 %v12832_v2 }
 0x41b   : > { %4214 = vmatprep.mubr.f32.mxu0 %v12814_v3  ;;  %4314 = vmatprep.mubr.f32.mxu1 %v12814_v3  ;;  %v12838_v4 = vld [vmem:[#allocation4 + $0x60] sm:$0xff] }
 0x41c   : > { %v12849_v62 = vld [vmem:[#allocation4 + $0x80] sm:$0xff] }
 0x41d   : > { %v12888_v58 = vld [vmem:[#allocation4 + $0x62] sm:$0xff] }
 0x41e   : > { %4215 = vmatmul.mubr.f32.gmra.mxu0 %v12838_v4  ;;  %4315 = vmatmul.mubr.f32.gmra.mxu1 %v12838_v4 }
 0x41f   : > { %4219 = vmatprep.mubr.f32.mxu0 %v12684_v28  ;;  %4319 = vmatprep.mubr.f32.mxu1 %v12684_v28  ;;  %v4701_v28 = vld [vmem:[#allocation13 + $0x4f0] sm:$0xff] }
 0x422   : > { %4220 = vmatmul.mubr.f32.gmra.mxu0 %v12844_v46  ;;  %4320 = vmatmul.mubr.f32.gmra.mxu1 %v12844_v46 }
 0x423   : > { %4324 = vmatprep.mubr.f32.mxu1 %v12818_v1  ;;  %4491 = vmatprep.mubr.f32.mxu0 %v4338_v24  ;;  %v4691_v24 = vld [vmem:[#allocation13 + $0x4a0] sm:$0xff] }
 0x426   : > { %4325 = vmatmul.mubr.f32.gmra.mxu1 %v12849_v62  ;;  %4492 = vmatmul.mubr.f32.vlgmr.msra.gmra.mxu0 %v11888_v8  ;;  %v4675_v8 = vld [vmem:[#allocation13 + $0x420] sm:$0xff] }
 0x427   : > { %4496 = vmatprep.mubr.f32.mxu0 %v12852_v9  ;;  %4596 = vmatprep.mubr.f32.mxu1 %v12852_v9 }
 0x428   : > { %11418 = vmatpush3.msra.mxu0 %v4686_v7  ;;  %v4709_v7 = vld [vmem:[#allocation13 + $0x530] sm:$0xff] }
 0x429   : > { %11419 = vmatprep.subr.mxu0 %v4701_v28  ;;  %v4724_v28 = vld [vmem:[#allocation13 + $0x5a8] sm:$0xff] }
 0x42a   : > { %11420 = vmatpush3.msra.mxu0 %v4685_v10  ;;  %4597 = vmatmul.mubr.f32.vlgmr.msra.gmra.mxu1 %v12856_v15  ;;  %v4690_v10 = vld [vmem:[#allocation13 + $0x498] sm:$0xff] }
 0x42b   : > { %4497 = vmatmul.mubr.f32.gmra.mxu0 %v12856_v15  ;;  %11421 = vmatprep.subr.mxu0 %v4700_v14  ;;  %v4708_v14 = vld [vmem:[#allocation13 + $0x528] sm:$0xff] }
 0x42c   : > { %11474 = vmatpush3.msra.mxu1 %v4718_v5  ;;  %4501 = vmatprep.mubr.f32.mxu0 %v12860_v53  ;;  %v4674_v5 = vld [vmem:[#allocation13 + $0x418] sm:$0xff] }
 0x42d   : > { %4601 = vmatprep.mubr.f32.mxu1 %v12860_v53  ;;  %11422 = vmatpush3.msra.mxu0 %v4684_v17  ;;  %v12894_v17 = vld [vmem:[#allocation4 + $0x72] sm:$0xff] }
 0x42e   : > { %11475 = vmatprep.subr.mxu1 %v4733_v55  ;;  %11423 = vmatprep.subr.mxu0 %v4699_v6  ;;  %v4723_v55 = vld [vmem:[#allocation13 + $0x5a0] sm:$0xff]  ;;  %v4689_v6 = vld [vmem:[#allocation13 + $0x490] sm:$0xff] }
 0x42f   : > { %11476 = vmatpush3.msra.mxu1 %v4717_v18  ;;  %11424 = vmatpush3.msra.mxu0 %v4683_v20  ;;  %v4707_v18 = vld [vmem:[#allocation13 + $0x520] sm:$0xff]  ;;  %v4673_v20 = vld [vmem:[#allocation13 + $0x410] sm:$0xff] }
 0x430   : > { %11477 = vmatprep.subr.mxu1 %v4732_v27  ;;  %4502 = vmatmul.mubr.f32.gmra.mxu0 %v12755_v16  ;;  %v4722_v27 = vld [vmem:[#allocation13 + $0x598] sm:$0xff] }
 0x431   : > { %4602 = vmatmul.mubr.f32.gmra.mxu1 %v12755_v16  ;;  %11425 = vmatprep.subr.mxu0 %v4698_v30  ;;  %v4688_v30 = vld [vmem:[#allocation13 + $0x488] sm:$0xff] }
 0x432   : > { %11478 = vmatpush3.msra.mxu1 %v4716_v31  ;;  %4506 = vmatprep.mubr.f32.mxu0 %v12866_v36  ;;  %v12898_v31 = vld [vmem:[#allocation4 + $0x71] sm:$0xff] }
 0x433   : > { %4606 = vmatprep.mubr.f32.mxu1 %v12866_v36  ;;  %11426 = vmatpush3.msra.mxu0 %v4682_v32  ;;  %v4706_v32 = vld [vmem:[#allocation13 + $0x518] sm:$0xff] }
 0x434   : > { %11479 = vmatprep.subr.mxu1 %v4731_v23  ;;  %11427 = vmatprep.subr.mxu0 %v4697_v39  ;;  %v4672_v23 = vld [vmem:[#allocation13 + $0x408] sm:$0xff]  ;;  %v12902_v39 = vld [vmem:[#allocation4 + $0x82] sm:$0xff] }
 0x435   : > { %11480 = vmatpush3.msra.mxu1 %v4715_v35  ;;  %11428 = vmatpush3.msra.mxu0 %v4681_v42  ;;  %v4721_v35 = vld [vmem:[#allocation13 + $0x590] sm:$0xff]  ;;  %v4687_v42 = vld [vmem:[#allocation13 + $0x480] sm:$0xff] }
 0x436   : > { %11481 = vmatprep.subr.mxu1 %v4730_v43  ;;  %4507 = vmatmul.mubr.f32.gmra.mxu0 %v12870_v41  ;;  %v4705_v43 = vld [vmem:[#allocation13 + $0x510] sm:$0xff] }
 0x437   : > { %4607 = vmatmul.mubr.f32.gmra.mxu1 %v12870_v41  ;;  %11429 = vmatprep.subr.mxu0 %v4696_v47  ;;  %v4671_v47 = vld [vmem:[#allocation13 + $0x400] sm:$0xff] }
 0x438   : > { %11482 = vmatpush3.msra.mxu1 %v4714_v56  ;;  %4511 = vmatprep.mubr.f32.mxu0 %v12874_v48  ;;  %v4720_v56 = vld [vmem:[#allocation13 + $0x588] sm:$0xff] }
 0x439   : > { %4611 = vmatprep.mubr.f32.mxu1 %v12874_v48  ;;  %11430 = vmatpush3.msra.mxu0 %v4680_v34  ;;  %v4704_v34 = vld [vmem:[#allocation13 + $0x508] sm:$0xff] }
 0x43a   : > { %11483 = vmatprep.subr.mxu1 %v4729_v40  ;;  %11431 = vmatprep.subr.mxu0 %v4695_v50  ;;  %v5009_v40 = vld [vmem:[#allocation13 + $0x6f8] sm:$0xff] }
 0x43b   : > { %11484 = vmatpush3.msra.mxu1 %v4713_v44  ;;  %11432 = vmatpush3.msra.mxu0 %v4679_v26  ;;  %v4637_v50 = vld [vmem:[#allocation4 + $0x10] sm:$0xff] }
 0x43c   : > { %11485 = vmatprep.subr.mxu1 %v4728_v51  ;;  %4512 = vmatmul.mubr.f32.gmra.mxu0 %v12763_v22  ;;  %v4719_v44 = vld [vmem:[#allocation13 + $0x580] sm:$0xff]  ;;  %v4993_v26 = vld [vmem:[#allocation13 + $0x678] sm:$0xff] }
 0x43d   : > { %4612 = vmatmul.mubr.f32.gmra.mxu1 %v12763_v22  ;;  %11433 = vmatprep.subr.mxu0 %v4694_v54  ;;  %v4703_v51 = vld [vmem:[#allocation13 + $0x500] sm:$0xff]  ;;  %v5008_v54 = vld [vmem:[#allocation13 + $0x6f0] sm:$0xff] }
 0x43e   : > { %11486 = vmatpush3.msra.mxu1 %v4712_v21  ;;  %4516 = vmatprep.mubr.f32.mxu0 %v12880_v59  ;;  %v5041_v21 = vld [vmem:[#allocation13 + $0x7f8] sm:$0xff] }
 0x43f   : > { %4616 = vmatprep.mubr.f32.mxu1 %v12880_v59  ;;  %11434 = vmatpush3.msra.mxu0 %v4678_v19  ;;  %v4992_v19 = vld [vmem:[#allocation13 + $0x670] sm:$0xff] }
 0x440   : > { %11487 = vmatprep.subr.mxu1 %v4727_v63  ;;  %11435 = vmatprep.subr.mxu0 %v4693_v0  ;;  %v5007_v63 = vld [vmem:[#allocation13 + $0x6e8] sm:$0xff] }
 0x441   : > { %11488 = vmatpush3.msra.mxu1 %v4711_v61  ;;  %11436 = vmatpush3.msra.mxu0 %v4677_v57  ;;  %v4991_v0 = vld [vmem:[#allocation13 + $0x668] sm:$0xff]  ;;  %v5040_v61 = vld [vmem:[#allocation13 + $0x7f0] sm:$0xff]  ;;  %v5006_v57 = vld [vmem:[#allocation13 + $0x6e0] sm:$0xff] }
 0x442   : > { %11489 = vmatprep.subr.mxu1 %v4726_v11  ;;  %4517 = vmatmul.mubr.f32.gmra.mxu0 %v12884_v33  ;;  %v4990_v11 = vld [vmem:[#allocation13 + $0x660] sm:$0xff] }
 0x443   : > { %4617 = vmatmul.mubr.f32.gmra.mxu1 %v12884_v33  ;;  %11437 = vmatprep.subr.mxu0 %v4692_v60  ;;  %v5039_v60 = vld [vmem:[#allocation13 + $0x7e8] sm:$0xff] }
 0x444   : > { %11490 = vmatpush3.msra.mxu1 %v4710_v37  ;;  %4521 = vmatprep.mubr.f32.mxu0 %v12888_v58  ;;  %v5005_v37 = vld [vmem:[#allocation13 + $0x6d8] sm:$0xff] }
 0x445   : > { %4621 = vmatprep.mubr.f32.mxu1 %v12888_v58  ;;  %11438 = vmatpush3.msra.mxu0 %v4676_v49  ;;  %v5023_v49 = vld [vmem:[#allocation13 + $0x768] sm:$0xff] }
 0x446   : > { %11491 = vmatprep.subr.mxu1 %v4725_v12  ;;  %11439 = vmatprep.subr.mxu0 %v4691_v24  ;;  %v5038_v12 = vld [vmem:[#allocation13 + $0x7e0] sm:$0xff]  ;;  %v5004_v24 = vld [vmem:[#allocation13 + $0x6d0] sm:$0xff] }
 0x447   : > { %11492 = vmatpush3.msra.mxu1 %v4709_v7  ;;  %11440 = vmatpush3.msra.mxu0 %v4675_v8  ;;  %v5022_v7 = vld [vmem:[#allocation13 + $0x760] sm:$0xff]  ;;  %v4988_v8 = vld [vmem:[#allocation13 + $0x650] sm:$0xff] }
 0x448   : > { %11493 = vmatprep.subr.mxu1 %v4724_v28  ;;  %4522 = vmatmul.mubr.f32.gmra.mxu0 %v12814_v3  ;;  %v5037_v28 = vld [vmem:[#allocation13 + $0x7d8] sm:$0xff] }
 0x449   : > { %4622 = vmatmul.mubr.f32.gmra.mxu1 %v12814_v3  ;;  %11441 = vmatprep.subr.mxu0 %v4690_v10  ;;  %v5003_v10 = vld [vmem:[#allocation13 + $0x6c8] sm:$0xff] }
 0x44a   : > { %11494 = vmatpush3.msra.mxu1 %v4708_v14  ;;  %4526 = vmatprep.mubr.f32.mxu0 %v12894_v17  ;;  %v5021_v14 = vld [vmem:[#allocation13 + $0x758] sm:$0xff] }
 0x44b   : > { %4626 = vmatprep.mubr.f32.mxu1 %v12894_v17  ;;  %11442 = vmatpush3.msra.mxu0 %v4674_v5  ;;  %v5036_v5 = vld [vmem:[#allocation13 + $0x7d0] sm:$0xff] }
 0x44c   : > { %11495 = vmatprep.subr.mxu1 %v4723_v55  ;;  %11443 = vmatprep.subr.mxu0 %v4689_v6  ;;  %v5002_v55 = vld [vmem:[#allocation13 + $0x6c0] sm:$0xff] }
 0x44d   : > { %11496 = vmatpush3.msra.mxu1 %v4707_v18  ;;  %11444 = vmatpush3.msra.mxu0 %v4673_v20  ;;  %v4986_v6 = vld [vmem:[#allocation13 + $0x640] sm:$0xff]  ;;  %v5035_v18 = vld [vmem:[#allocation13 + $0x7c8] sm:$0xff]  ;;  %v5001_v20 = vld [vmem:[#allocation13 + $0x6b8] sm:$0xff] }
 0x44e   : > { %11497 = vmatprep.subr.mxu1 %v4722_v27  ;;  %4527 = vmatmul.mubr.f32.gmra.mxu0 %v12898_v31  ;;  %v5019_v27 = vld [vmem:[#allocation13 + $0x748] sm:$0xff] }
 0x44f   : > { %4627 = vmatmul.mubr.f32.gmra.mxu1 %v12898_v31  ;;  %11445 = vmatprep.subr.mxu0 %v4688_v30  ;;  %v5034_v30 = vld [vmem:[#allocation13 + $0x7c0] sm:$0xff] }
 0x450   : > { %11498 = vmatpush3.msra.mxu1 %v4706_v32  ;;  %4631 = vmatprep.mubr.f32.mxu1 %v12902_v39  ;;  %v5000_v32 = vld [vmem:[#allocation13 + $0x6b0] sm:$0xff] }
 0x451   : > { %11446 = vmatpush3.msra.mxu0 %v4672_v23  ;;  %4799 = vmatprep.mubr.f32.mxu0 %v12856_v15  ;;  %v5018_v23 = vld [vmem:[#allocation13 + $0x740] sm:$0xff] }
 0x452   : > { %11499 = vmatprep.subr.mxu1 %v4721_v35  ;;  %11447 = vmatprep.subr.mxu0 %v4687_v42  ;;  %v4984_v35 = vld [vmem:[#allocation13 + $0x630] sm:$0xff]  ;;  %v5033_v42 = vld [vmem:[#allocation13 + $0x7b8] sm:$0xff] }
 0x453   : > { %11500 = vmatpush3.msra.mxu1 %v4705_v43  ;;  %11448 = vmatpush3.msra.mxu0 %v4671_v47  ;;  %v4999_v43 = vld [vmem:[#allocation13 + $0x6a8] sm:$0xff]  ;;  %v5017_v47 = vld [vmem:[#allocation13 + $0x738] sm:$0xff] }
 0x454   : > { %11501 = vmatprep.subr.mxu1 %v4720_v56  ;;  %4632 = vmatmul.mubr.f32.gmra.mxu1 %v12818_v1  ;;  %v5025_v1 = vld [vmem:[#allocation13 + $0x778] sm:$0xff]  ;;  %v5032_v56 = vld [vmem:[#allocation13 + $0x7b0] sm:$0xff] }
 0x455   : > { %4800 = vmatmul.mubr.f32.vlgmr.msra.gmra.mxu0 %v4637_v50  ;;  %11502 = vmatpush3.msra.mxu1 %v4704_v34  ;;  %v4998_v34 = vld [vmem:[#allocation13 + $0x6a0] sm:$0xff]  ;;  %v5031_v50 = vld [vmem:[#allocation13 + $0x7a8] sm:$0xff] }
 0x456   : > { %11529 = vmatprep.subr.mxu0 %v5009_v40  ;;  %4804 = vmatprep.mubr.f32.mxu0 %v12755_v16  ;;  %v4982_v40 = vld [vmem:[#allocation13 + $0x620] sm:$0xff] }
 0x457   : > { %11503 = vmatprep.subr.mxu1 %v4719_v44  ;;  %4904 = vmatprep.mubr.f32.mxu1 %v12755_v16  ;;  %v5024_v16 = vld [vmem:[#allocation13 + $0x770] sm:$0xff]  ;;  %v4997_v44 = vld [vmem:[#allocation13 + $0x698] sm:$0xff] }
 0x458   : > { %11530 = vmatpush3.msra.mxu0 %v4993_v26  ;;  %11504 = vmatpush3.msra.mxu1 %v4703_v51  ;;  %v5015_v26 = vld [vmem:[#allocation13 + $0x728] sm:$0xff] }
 0x459   : > { %11531 = vmatprep.subr.mxu0 %v5008_v54  ;;  %11585 = vmatprep.subr.mxu1 %v5041_v21  ;;  %v12931_v51 = vld [vmem:[#allocation4 + $0x81] sm:$0xff]  ;;  %v5030_v54 = vld [vmem:[#allocation13 + $0x7a0] sm:$0xff] }
 0x45a   : > { %11532 = vmatpush3.msra.mxu0 %v4992_v19  ;;  %4905 = vmatmul.mubr.f32.vlgmr.msra.gmra.mxu1 %v12804_v13  ;;  %v4996_v21 = vld [vmem:[#allocation13 + $0x690] sm:$0xff]  ;;  %v5014_v19 = vld [vmem:[#allocation13 + $0x720] sm:$0xff] }
 0x45b   : > { %4805 = vmatmul.mubr.f32.gmra.mxu0 %v12804_v13  ;;  %11533 = vmatprep.subr.mxu0 %v5007_v63  ;;  %v4989_v13 = vld [vmem:[#allocation13 + $0x658] sm:$0xff]  ;;  %v4980_v63 = vld [vmem:[#allocation13 + $0x610] sm:$0xff] }
 0x45c   : > { %11586 = vmatpush3.msra.mxu1 %v5025_v1  ;;  %4809 = vmatprep.mubr.f32.mxu0 %v12870_v41  ;;  %v5029_v1 = vld [vmem:[#allocation13 + $0x798] sm:$0xff] }
 0x45d   : > { %4909 = vmatprep.mubr.f32.mxu1 %v12870_v41  ;;  %11534 = vmatpush3.msra.mxu0 %v4991_v0  ;;  %v4995_v0 = vld [vmem:[#allocation13 + $0x688] sm:$0xff] }
 0x45e   : > { %11587 = vmatprep.subr.mxu1 %v5040_v61  ;;  %11535 = vmatprep.subr.mxu0 %v5006_v57  ;;  %v4979_v61 = vld [vmem:[#allocation13 + $0x608] sm:$0xff]  ;;  %v5028_v57 = vld [vmem:[#allocation13 + $0x790] sm:$0xff] }
 0x45f   : > { %11588 = vmatpush3.msra.mxu1 %v5024_v16  ;;  %11536 = vmatpush3.msra.mxu0 %v4990_v11  ;;  %v4994_v16 = vld [vmem:[#allocation13 + $0x680] sm:$0xff]  ;;  %v5012_v11 = vld [vmem:[#allocation13 + $0x710] sm:$0xff] }
 0x460   : > { %11589 = vmatprep.subr.mxu1 %v5039_v60  ;;  %4810 = vmatmul.mubr.f32.gmra.mxu0 %v12816_v29  ;;  %v12937_v60 = vld [vmem:[#allocation4 + $0x91] sm:$0xff] }
 0x461   : > { %4910 = vmatmul.mubr.f32.gmra.mxu1 %v12816_v29  ;;  %11537 = vmatprep.subr.mxu0 %v5005_v37  ;;  %v4987_v29 = vld [vmem:[#allocation13 + $0x648] sm:$0xff]  ;;  %v4978_v37 = vld [vmem:[#allocation13 + $0x600] sm:$0xff] }
 0x462   : > { %11590 = vmatpush3.msra.mxu1 %v5023_v49  ;;  %4814 = vmatprep.mubr.f32.mxu0 %v12763_v22  ;;  %v5027_v49 = vld [vmem:[#allocation13 + $0x788] sm:$0xff] }
 0x463   : > { %4914 = vmatprep.mubr.f32.mxu1 %v12763_v22  ;;  %11538 = vmatpush3.msra.mxu0 %v4989_v13  ;;  %v5020_v22 = vld [vmem:[#allocation13 + $0x750] sm:$0xff]  ;;  %v5011_v13 = vld [vmem:[#allocation13 + $0x708] sm:$0xff] }
 0x464   : > { %11591 = vmatprep.subr.mxu1 %v5038_v12  ;;  %11539 = vmatprep.subr.mxu0 %v5004_v24  ;;  %v5026_v12 = vld [vmem:[#allocation13 + $0x780] sm:$0xff] }
 0x465   : > { %11592 = vmatpush3.msra.mxu1 %v5022_v7  ;;  %11540 = vmatpush3.msra.mxu0 %v4988_v8  ;;  %v5010_v24 = vld [vmem:[#allocation13 + $0x700] sm:$0xff]  ;;  %v9126_v7 = vld [vmem:[#allocation14 + $0x78] sm:$0xff]  ;;  %v9125_v8 = vld [vmem:[#allocation14 + $0x70] sm:$0xff] }
 0x466   : > { %11593 = vmatprep.subr.mxu1 %v5037_v28  ;;  %4815 = vmatmul.mubr.f32.gmra.mxu0 %v12826_v45  ;;  %v4948_v28 = vld [vmem:[#allocation4 + $0x41] sm:$0xff] }
 0x467   : > { %4915 = vmatmul.mubr.f32.gmra.mxu1 %v12826_v45  ;;  %11541 = vmatprep.subr.mxu0 %v5003_v10  ;;  %v4985_v45 = vld [vmem:[#allocation13 + $0x638] sm:$0xff] }
 0x468   : > { %11594 = vmatpush3.msra.mxu1 %v5021_v14  ;;  %4819 = vmatprep.mubr.f32.mxu0 %v12884_v33  ;;  %v9122_v10 = vld [vmem:[#allocation14 + $0x58] sm:$0xff]  ;;  %v9120_v14 = vld [vmem:[#allocation14 + $0x48] sm:$0xff] }
 0x469   : > { %4919 = vmatprep.mubr.f32.mxu1 %v12884_v33  ;;  %11542 = vmatpush3.msra.mxu0 %v4987_v29  ;;  %v4976_v29 = vld [vmem:[#allocation4 + $0x92] sm:$0xff] }
 0x46a   : > { %11595 = vmatprep.subr.mxu1 %v5036_v5  ;;  %11543 = vmatprep.subr.mxu0 %v5002_v55  ;;  %v9118_v5 = vld [vmem:[#allocation14 + $0x38] sm:$0xff]  ;;  %v9117_v55 = vld [vmem:[#allocation14 + $0x30] sm:$0xff] }
 0x46b   : > { %11596 = vmatpush3.msra.mxu1 %v5020_v22  ;;  %11544 = vmatpush3.msra.mxu0 %v4986_v6  ;;  %v9153_v22 = vld [vmem:[#allocation14 + $0x150] sm:$0xff]  ;;  %v9115_v6 = vld [vmem:[#allocation14 + $0x20] sm:$0xff] }
 0x46c   : > { %11597 = vmatprep.subr.mxu1 %v5035_v18  ;;  %4820 = vmatmul.mubr.f32.gmra.mxu0 %v12832_v2  ;;  %v9152_v18 = vld [vmem:[#allocation14 + $0x148] sm:$0xff] }
 0x46d   : > { %4920 = vmatmul.mubr.f32.gmra.mxu1 %v12832_v2  ;;  %11545 = vmatprep.subr.mxu0 %v5001_v20  ;;  %v4983_v2 = vld [vmem:[#allocation13 + $0x628] sm:$0xff]  ;;  %v9114_v20 = vld [vmem:[#allocation14 + $0x18] sm:$0xff] }
 0x46e   : > { %11598 = vmatpush3.msra.mxu1 %v5019_v27  ;;  %4824 = vmatprep.mubr.f32.mxu0 %v12814_v3  ;;  %v9151_v27 = vld [vmem:[#allocation14 + $0x140] sm:$0xff] }
 0x46f   : > { %4924 = vmatprep.mubr.f32.mxu1 %v12814_v3  ;;  %11546 = vmatpush3.msra.mxu0 %v4985_v45  ;;  %v5016_v3 = vld [vmem:[#allocation13 + $0x730] sm:$0xff] }
 0x470   : > { %11599 = vmatprep.subr.mxu1 %v5034_v30  ;;  %11547 = vmatprep.subr.mxu0 %v5000_v32  ;;  %v9113_v45 = vld [vmem:[#allocation14 + $0x10] sm:$0xff]  ;;  %v9150_v30 = vld [vmem:[#allocation14 + $0x138] sm:$0xff]  ;;  %v9112_v32 = vld [vmem:[#allocation14 + $0x8] sm:$0xff] }
 0x471   : > { %11600 = vmatpush3.msra.mxu1 %v5018_v23  ;;  %11548 = vmatpush3.msra.mxu0 %v4984_v35  ;;  %v9149_v23 = vld [vmem:[#allocation14 + $0x130] sm:$0xff]  ;;  %v9111_v35 = vld [vmem:[#allocation14] sm:$0xff] }
 0x472   : > { %11601 = vmatprep.subr.mxu1 %v5033_v42  ;;  %4825 = vmatmul.mubr.f32.gmra.mxu0 %v12838_v4  ;;  %v9148_v42 = vld [vmem:[#allocation14 + $0x128] sm:$0xff] }
 0x473   : > { %4925 = vmatmul.mubr.f32.gmra.mxu1 %v12838_v4  ;;  %11549 = vmatprep.subr.mxu0 %v4999_v43  ;;  %v4981_v4 = vld [vmem:[#allocation13 + $0x618] sm:$0xff] }
 0x474   : > { %11602 = vmatpush3.msra.mxu1 %v5017_v47  ;;  %4829 = vmatprep.mubr.f32.mxu0 %v12898_v31  ;;  %v9142_v43 = vld [vmem:[#allocation14 + $0xf8] sm:$0xff]  ;;  %v9147_v47 = vld [vmem:[#allocation14 + $0x120] sm:$0xff] }
 0x475   : > { %4929 = vmatprep.mubr.f32.mxu1 %v12898_v31  ;;  %11550 = vmatpush3.msra.mxu0 %v4983_v2  ;;  %v9141_v2 = vld [vmem:[#allocation14 + $0xf0] sm:$0xff] }
 0x476   : > { %11603 = vmatprep.subr.mxu1 %v5032_v56  ;;  %11551 = vmatprep.subr.mxu0 %v4998_v34  ;;  %v9146_v56 = vld [vmem:[#allocation14 + $0x118] sm:$0xff]  ;;  %v9140_v34 = vld [vmem:[#allocation14 + $0xe8] sm:$0xff] }
 0x477   : > { %11604 = vmatpush3.msra.mxu1 %v5016_v3  ;;  %11552 = vmatpush3.msra.mxu0 %v4982_v40  ;;  %v9145_v3 = vld [vmem:[#allocation14 + $0x110] sm:$0xff]  ;;  %v9139_v40 = vld [vmem:[#allocation14 + $0xe0] sm:$0xff] }
 0x478   : > { %11605 = vmatprep.subr.mxu1 %v5031_v50  ;;  %4830 = vmatmul.mubr.f32.gmra.mxu0 %v12844_v46  ;;  %v9144_v50 = vld [vmem:[#allocation14 + $0x108] sm:$0xff] }
 0x479   : > { %4930 = vmatmul.mubr.f32.gmra.mxu1 %v12844_v46  ;;  %11553 = vmatprep.subr.mxu0 %v4997_v44  ;;  %v5013_v46 = vld [vmem:[#allocation13 + $0x718] sm:$0xff] }
 0x47a   : > { %11606 = vmatpush3.msra.mxu1 %v5015_v26  ;;  %4834 = vmatprep.mubr.f32.mxu0 %v12931_v51  ;;  %v9138_v44 = vld [vmem:[#allocation14 + $0xd8] sm:$0xff]  ;;  %v9143_v26 = vld [vmem:[#allocation14 + $0x100] sm:$0xff] }
 0x47b   : > { %4934 = vmatprep.mubr.f32.mxu1 %v12931_v51  ;;  %11554 = vmatpush3.msra.mxu0 %v4981_v4  ;;  %v9137_v4 = vld [vmem:[#allocation14 + $0xd0] sm:$0xff] }
 0x47c   : > { %11607 = vmatprep.subr.mxu1 %v5030_v54  ;;  %11555 = vmatprep.subr.mxu0 %v4996_v21  ;;  %v9136_v54 = vld [vmem:[#allocation14 + $0xc8] sm:$0xff]  ;;  %v9173_v21 = vld [vmem:[#allocation14 + $0x1f0] sm:$0xff] }
 0x47d   : > { %11608 = vmatpush3.msra.mxu1 %v5014_v19  ;;  %11556 = vmatpush3.msra.mxu0 %v4980_v63  ;;  %v9135_v63 = vld [vmem:[#allocation14 + $0xc0] sm:$0xff] }
 0x47e   : > { %11609 = vmatprep.subr.mxu1 %v5029_v1  ;;  %4835 = vmatmul.mubr.f32.gmra.mxu0 %v12849_v62  ;;  %v9172_v1 = vld [vmem:[#allocation14 + $0x1e8] sm:$0xff] }
 0x47f   : > { %4935 = vmatmul.mubr.f32.gmra.mxu1 %v12849_v62  ;;  %11557 = vmatprep.subr.mxu0 %v4995_v0  ;;  %v12941_v62 = vld [vmem:[#allocation4] sm:$0xff]  ;;  %v11225_v0 = vpop.f32.mrf.mxu0 }
 0x480   : > { %11610 = vmatpush3.msra.mxu1 %v5013_v46  ;;  %11558 = vmatpush3.msra.mxu0 %v4979_v61  ;;  %v9134_v46 = vld [vmem:[#allocation14 + $0xb8] sm:$0xff]  ;;  %v9171_v61 = vld [vmem:[#allocation14 + $0x1e0] sm:$0xff] }
 0x481   : > { %5106 = vmatprep.mubr.f32.mxu0 %v12852_v9  ;;  %11611 = vmatprep.subr.mxu1 %v5028_v57  ;;  %v4946_v9 = vld [vmem:[#allocation4 + $0x21] sm:$0xff] }
 0x482   : > { %11559 = vmatprep.subr.mxu0 %v4994_v16  ;;  %11612 = vmatpush3.msra.mxu1 %v5012_v11  ;;  %v9133_v16 = vld [vmem:[#allocation14 + $0xb0] sm:$0xff]  ;;  %v9170_v11 = vld [vmem:[#allocation14 + $0x1d8] sm:$0xff] }
 0x483   : > { %4939 = vmatprep.mubr.f32.mxu1 %v12937_v60  ;;  %11560 = vmatpush3.msra.mxu0 %v4978_v37  ;;  %v9132_v37 = vld [vmem:[#allocation14 + $0xa8] sm:$0xff] }
 0x484   : > { %11613 = vmatprep.subr.mxu1 %v5027_v49  ;;  %4940 = vmatmul.mubr.f32.gmra.mxu1 %v12941_v62 }
 0x485   : > { %5107 = vmatmul.mubr.f32.vlgmr.msra.gmra.mxu0 %v12856_v15  ;;  %11614 = vmatpush3.msra.mxu1 %v5011_v13  ;;  %v9124_v15 = vld [vmem:[#allocation14 + $0x68] sm:$0xff] }
 0x486   : > { %5111 = vmatprep.mubr.f32.mxu0 %v12860_v53  ;;  %11615 = vmatprep.subr.mxu1 %v5026_v12  ;;  %v9169_v12 = vld [vmem:[#allocation14 + $0x1d0] sm:$0xff] }
 0x487   : > { %5211 = vmatprep.mubr.f32.mxu1 %v12860_v53  ;;  %11616 = vmatpush3.msra.mxu1 %v5010_v24  ;;  %v9158_v53 = vld [vmem:[#allocation14 + $0x178] sm:$0xff]  ;;  %v9131_v24 = vld [vmem:[#allocation14 + $0xa0] sm:$0xff] }
 0x488   : > { %5212 = vmatmul.mubr.f32.vlgmr.msra.gmra.mxu1 %v4946_v9  ;;  %9262 = vmatprep.subr.mxu0 %v12941_v62  ;;  %v11281_v19 = vpop.f32.mrf.mxu1 }
 0x489   : > { %5112 = vmatmul.mubr.f32.gmra.mxu0 %v4946_v9  ;;  %5216 = vmatprep.mubr.f32.mxu1 %v12866_v36  ;;  %v9168_v9 = vld [vmem:[#allocation14 + $0x1c8] sm:$0xff] }
 0x48a   : > { %5116 = vmatprep.mubr.f32.mxu0 %v12866_v36  ;;  %9263 = vmatpush1.msra.mxu0 %v9126_v7  ;;  %v9123_v36 = vld [vmem:[#allocation14 + $0x60] sm:$0xff]  ;;  %v11282_v57 = vpop.f32.mrf.mxu1  ;;  %v9130_v7 = vld [vmem:[#allocation14 + $0x98] sm:$0xff] }
 0x48b   : > { %9264 = vmatprep.subr.mxu0 %v12941_v62  ;;  %9487 = vmatprep.subr.mxu1 %v12941_v62  ;;  %v11283_v13 = vadd.f32 %v11282_v57, %v11281_v19 }
 0x48c   : > { %5217 = vmatmul.mubr.f32.gmra.mxu1 %v12870_v41  ;;  %9265 = vmatpush1.msra.mxu0 %v9125_v8 }
 0x48d   : > { %5117 = vmatmul.mubr.f32.gmra.mxu0 %v12870_v41  ;;  %5221 = vmatprep.mubr.f32.mxu1 %v12874_v48  ;;  %v9121_v41 = vld [vmem:[#allocation14 + $0x50] sm:$0xff] }
 0x48e   : > { %5121 = vmatprep.mubr.f32.mxu0 %v12874_v48  ;;  %9266 = vmatprep.subr.mxu0 %v12941_v62  ;;  %v4950_v48 = vld [vmem:[#allocation4 + $0x61] sm:$0xff] }
 0x48f   : > { %9267 = vmatpush1.msra.mxu0 %v9124_v15  ;;  %9488 = vmatpush1.msra.mxu1 %v9158_v53  ;;  %v9167_v53 = vld [vmem:[#allocation14 + $0x1c0] sm:$0xff] }
 0x490   : > { %5222 = vmatmul.mubr.f32.gmra.mxu1 %v4948_v28  ;;  %9268 = vmatprep.subr.mxu0 %v12941_v62 }
 0x491   : > { %5122 = vmatmul.mubr.f32.gmra.mxu0 %v4948_v28  ;;  %5226 = vmatprep.mubr.f32.mxu1 %v12880_v59  ;;  %v9129_v28 = vld [vmem:[#allocation14 + $0x90] sm:$0xff] }
 0x492   : > { %5126 = vmatprep.mubr.f32.mxu0 %v12880_v59  ;;  %9269 = vmatpush1.msra.mxu0 %v9123_v36  ;;  %v9157_v59 = vld [vmem:[#allocation14 + $0x170] sm:$0xff]  ;;  %v9166_v36 = vld [vmem:[#allocation14 + $0x1b8] sm:$0xff] }
 0x493   : > { %9270 = vmatprep.subr.mxu0 %v12941_v62  ;;  %9489 = vmatprep.subr.mxu1 %v12941_v62 }
 0x494   : > { %5227 = vmatmul.mubr.f32.gmra.mxu1 %v12884_v33  ;;  %9271 = vmatpush1.msra.mxu0 %v9122_v10  ;;  %v9128_v10 = vld [vmem:[#allocation14 + $0x88] sm:$0xff] }
 0x495   : > { %5127 = vmatmul.mubr.f32.gmra.mxu0 %v12884_v33  ;;  %5231 = vmatprep.mubr.f32.mxu1 %v12888_v58  ;;  %v9156_v33 = vld [vmem:[#allocation14 + $0x168] sm:$0xff] }
 0x496   : > { %5131 = vmatprep.mubr.f32.mxu0 %v12888_v58  ;;  %9272 = vmatprep.subr.mxu0 %v12941_v62  ;;  %v9119_v58 = vld [vmem:[#allocation14 + $0x40] sm:$0xff] }
 0x497   : > { %9273 = vmatpush1.msra.mxu0 %v9121_v41  ;;  %9490 = vmatpush1.msra.mxu1 %v9157_v59  ;;  %v9165_v59 = vld [vmem:[#allocation14 + $0x1b0] sm:$0xff] }
 0x498   : > { %5232 = vmatmul.mubr.f32.gmra.mxu1 %v4950_v48  ;;  %9274 = vmatprep.subr.mxu0 %v12941_v62 }
 0x499   : > { %5132 = vmatmul.mubr.f32.gmra.mxu0 %v4950_v48  ;;  %5236 = vmatprep.mubr.f32.mxu1 %v12894_v17 }
 0x49a   : > { %5136 = vmatprep.mubr.f32.mxu0 %v12894_v17  ;;  %9491 = vmatprep.subr.mxu1 %v12941_v62  ;;  %v9155_v17 = vld [vmem:[#allocation14 + $0x160] sm:$0xff] }
 0x49b   : > { %9275 = vmatpush1.msra.mxu0 %v9120_v14  ;;  %9492 = vmatpush1.msra.mxu1 %v9156_v33  ;;  %v9127_v14 = vld [vmem:[#allocation14 + $0x80] sm:$0xff] }
 0x49c   : > { %5237 = vmatmul.mubr.f32.gmra.mxu1 %v12898_v31  ;;  %9276 = vmatprep.subr.mxu0 %v12941_v62 }
 0x49d   : > { %5137 = vmatmul.mubr.f32.gmra.mxu0 %v12898_v31  ;;  %5241 = vmatprep.mubr.f32.mxu1 %v12902_v39  ;;  %v9154_v31 = vld [vmem:[#allocation14 + $0x158] sm:$0xff] }
 0x49e   : > { %5141 = vmatprep.mubr.f32.mxu0 %v12902_v39  ;;  %9493 = vmatprep.subr.mxu1 %v12941_v62  ;;  %v9116_v39 = vld [vmem:[#allocation14 + $0x28] sm:$0xff] }
 0x49f   : > { %9277 = vmatpush1.msra.mxu0 %v9119_v58  ;;  %9494 = vmatpush1.msra.mxu1 %v9155_v17  ;;  %v8854_v17 = vld [vmem:[#allocation5 + $0x1] sm:$0xff] }
 0x4a0   : > { %5242 = vmatmul.mubr.f32.gmra.mxu1 %v12931_v51  ;;  %9278 = vmatprep.subr.mxu0 %v12941_v62 }
 0x4a1   : > { %5142 = vmatmul.mubr.f32.gmra.mxu0 %v12931_v51  ;;  %5246 = vmatprep.mubr.f32.mxu1 %v4976_v29  ;;  %v9174_v51 = vld [vmem:[#allocation14 + $0x1f8] sm:$0xff]  ;;  %v9164_v29 = vld [vmem:[#allocation14 + $0x1a8] sm:$0xff] }
 0x4a2   : > { %9279 = vmatpush1.msra.mxu0 %v9118_v5  ;;  %9495 = vmatprep.subr.mxu1 %v12941_v62  ;;  %v10601_v5 = vld [vmem:[%s15165_s8] ss:$0 sm:$0xff] }
 0x4a3   : > { %9280 = vmatprep.subr.mxu0 %v12941_v62  ;;  %9496 = vmatpush1.msra.mxu1 %v9154_v31 }
 0x4a4   : > { %5247 = vmatmul.mubr.f32.gmra.mxu1 %v12937_v60  ;;  %9281 = vmatpush1.msra.mxu0 %v9117_v55  ;;  %v11226_v60 = vpop.f32.mrf.mxu0 }
 0x4a5   : > { %9282 = vmatprep.subr.mxu0 %v12941_v62  ;;  %9497 = vmatprep.subr.mxu1 %v12941_v62  ;;  %v11227_v49 = vadd.f32 %v11226_v60, %v11225_v0 }
 0x4a6   : > { %9283 = vmatpush1.msra.mxu0 %v9116_v39  ;;  %9498 = vmatpush1.msra.mxu1 %v9153_v22  ;;  %v11228_v8 = vpop.f32.mrf.mxu0 }
 0x4a7   : > { %9284 = vmatprep.subr.mxu0 %v12941_v62  ;;  %9499 = vmatprep.subr.mxu1 %v12941_v62  ;;  %v4292_v15 = vadd.f32 %v11283_v13, %v11227_v49 }
 0x4a8   : > { %9285 = vmatpush1.msra.mxu0 %v9115_v6  ;;  %9500 = vmatpush1.msra.mxu1 %v9152_v18  ;;  %v11229_v41 = vpop.f32.mrf.mxu0  ;;  %v9163_v6 = vld [vmem:[#allocation14 + $0x1a0] sm:$0xff] }
 0x4a9   : > { %9286 = vmatprep.subr.mxu0 %v12941_v62  ;;  %9501 = vmatprep.subr.mxu1 %v12941_v62  ;;  %v5260_v48 = vcombine.high %v4292_v15, %v4292_v15  ;;  %v5267_v55 = vrot.slane %v4292_v15, %v12482_v38  ;;  %v11230_v18 = vadd.f32 %v11229_v41, %v11228_v8 }
 0x4aa   : > { %9287 = vmatpush1.msra.mxu0 %v9114_v20  ;;  %9502 = vmatpush1.msra.mxu1 %v9151_v27 }
 0x4ab   : > { %9288 = vmatprep.subr.mxu0 %v12941_v62  ;;  %9503 = vmatprep.subr.mxu1 %v12941_v62  ;;  %v5274_v31 = vrot.slane %v5260_v48, %v12482_v38 }
 0x4ac   : > { %9289 = vmatpush1.msra.mxu0 %v9113_v45  ;;  %9504 = vmatpush1.msra.mxu1 %v9150_v30  ;;  %v7754_v30 = vcombine.high %v10601_v5, %v10601_v5 }
 0x4ad   : > { %9290 = vmatprep.subr.mxu0 %v12941_v62  ;;  %9505 = vmatprep.subr.mxu1 %v12941_v62 }
 0x4ae   : > { %9291 = vmatpush1.msra.mxu0 %v9112_v32  ;;  %9506 = vmatpush1.msra.mxu1 %v9149_v23  ;;  %v5275_v23 = vcombine.high %v5267_v55, %v5267_v55 }
 0x4af   : > { %9292 = vmatprep.subr.mxu0 %v12941_v62  ;;  %9507 = vmatprep.subr.mxu1 %v12941_v62 }
 0x4b0   : > { %9293 = vmatpush1.msra.mxu0 %v9111_v35  ;;  %9508 = vmatpush1.msra.mxu1 %v9148_v42  ;;  %v5276_v35 = vcombine.high %v5274_v31, %v5274_v31  ;;  %v13052_v0 = vrot.slane %v5275_v23, %v12482_v38 }
 0x4b1   : > { %9294 = vmatprep.subr.mxu0 %v12941_v62  ;;  %9509 = vmatprep.subr.mxu1 %v12941_v62 }
 0x4b2   : > { %9295 = vmatpush2.msra.mxu0 %v9142_v43  ;;  %9510 = vmatpush1.msra.mxu1 %v9147_v47  ;;  %v13036_v47 = vrot.slane %v10601_v5, %v12425_v52 }
 0x4b3   : > { %9296 = vmatprep.subr.mxu0 %v12941_v62  ;;  %9511 = vmatprep.subr.mxu1 %v12941_v62 }
 0x4b4   : > { %9297 = vmatpush2.msra.mxu0 %v9141_v2  ;;  %9512 = vmatpush1.msra.mxu1 %v9146_v56  ;;  %v13056_v57 = vcombine.high %v13036_v47, %v13036_v47 }
 0x4b5   : > { %9298 = vmatprep.subr.mxu0 %v12941_v62  ;;  %9513 = vmatprep.subr.mxu1 %v12941_v62 }
 0x4b6   : > { %9299 = vmatpush2.msra.mxu0 %v9140_v34  ;;  %9514 = vmatpush1.msra.mxu1 %v9145_v3 }
 0x4b7   : > { %9300 = vmatprep.subr.mxu0 %v12941_v62  ;;  %9515 = vmatprep.subr.mxu1 %v12941_v62 }
 0x4b8   : > { %9301 = vmatpush2.msra.mxu0 %v9139_v40  ;;  %9516 = vmatpush1.msra.mxu1 %v9144_v50  ;;  %v9162_v40 = vld [vmem:[#allocation14 + $0x198] sm:$0xff]  ;;  %v13041_v50 = vrot.slane %v5267_v55, %v12482_v38 }
 0x4b9   : > { %9302 = vmatprep.subr.mxu0 %v12941_v62  ;;  %9517 = vmatprep.subr.mxu1 %v12941_v62 }
 0x4ba   : > { %9303 = vmatpush2.msra.mxu0 %v9138_v44  ;;  %9518 = vmatpush1.msra.mxu1 %v9143_v26  ;;  %v5305_v8 = vcombine.high %v13041_v50, %v13041_v50 }
 0x4bb   : > { %9304 = vmatprep.subr.mxu0 %v12941_v62  ;;  %9519 = vmatprep.subr.mxu1 %v12941_v62 }
 0x4bc   : > { %9305 = vmatpush2.msra.mxu0 %v9137_v4  ;;  %9520 = vmatpush2.msra.mxu1 %v9174_v51  ;;  %v13044_v4 = vrot.slane %v7754_v30, %v12425_v52  ;;  %v13047_v51 = vrot.slane %v5274_v31, %v12482_v38 }
 0x4bd   : > { %9306 = vmatprep.subr.mxu0 %v12941_v62  ;;  %9521 = vmatprep.subr.mxu1 %v12941_v62 }
 0x4be   : > { %9307 = vmatpush2.msra.mxu0 %v9136_v54  ;;  %9522 = vmatpush2.msra.mxu1 %v9173_v21  ;;  %v5306_v15 = vcombine.high %v13047_v51, %v13047_v51 }
 0x4bf   : > { %9308 = vmatprep.subr.mxu0 %v12941_v62  ;;  %9523 = vmatprep.subr.mxu1 %v12941_v62 }
 0x4c0   : > { %9309 = vmatpush2.msra.mxu0 %v9135_v63  ;;  %9524 = vmatpush2.msra.mxu1 %v9172_v1  ;;  %v8855_v63 = vld [vmem:[#allocation5 + $0x9] sm:$0xff] }
 0x4c1   : > { %9310 = vmatprep.subr.mxu0 %v12941_v62  ;;  %9525 = vmatprep.subr.mxu1 %v12941_v62  ;;  %v9161_v1 = vld [vmem:[#allocation14 + $0x190] sm:$0xff] }
 0x4c2   : > { %9311 = vmatpush2.msra.mxu0 %v9134_v46  ;;  %9526 = vmatpush2.msra.mxu1 %v9171_v61 }
 0x4c3   : > { %9312 = vmatprep.subr.mxu0 %v12941_v62  ;;  %9527 = vmatprep.subr.mxu1 %v12941_v62 }
 0x4c4   : > { %9313 = vmatpush2.msra.mxu0 %v9133_v16  ;;  %9528 = vmatpush2.msra.mxu1 %v9170_v11  ;;  %v13059_v16 = vrot.slane %v5276_v35, %v12482_v38 }
 0x4c5   : > { %9314 = vmatprep.subr.mxu0 %v12941_v62  ;;  %9529 = vmatprep.subr.mxu1 %v12941_v62 }
 0x4c6   : > { %9315 = vmatpush2.msra.mxu0 %v9132_v37  ;;  %9530 = vmatpush2.msra.mxu1 %v9169_v12 }
 0x4c7   : > { %9316 = vmatprep.subr.mxu0 %v12941_v62  ;;  %9531 = vmatprep.subr.mxu1 %v12941_v62 }
 0x4c8   : > { %9317 = vmatpush2.msra.mxu0 %v9131_v24  ;;  %9532 = vmatpush2.msra.mxu1 %v9168_v9 }
 0x4c9   : > { %9318 = vmatprep.subr.mxu0 %v12941_v62  ;;  %9533 = vmatprep.subr.mxu1 %v12941_v62 }
 0x4ca   : > { %9319 = vmatpush2.msra.mxu0 %v9130_v7  ;;  %9534 = vmatpush2.msra.mxu1 %v9167_v53 }
 0x4cb   : > { %9320 = vmatprep.subr.mxu0 %v12941_v62  ;;  %9535 = vmatprep.subr.mxu1 %v12941_v62 }
 0x4cc   : > { %9321 = vmatpush2.msra.mxu0 %v9129_v28  ;;  %9536 = vmatpush2.msra.mxu1 %v9166_v36  ;;  %v13079_v28 = vcombine.high %v13044_v4, %v13044_v4 }
 0x4cd   : > { %9322 = vmatprep.subr.mxu0 %v12941_v62  ;;  %9537 = vmatprep.subr.mxu1 %v12941_v62 }
 0x4ce   : > { %v11231_v33 = vpop.f32.mrf.mxu0  ;;  %v11284_v58 = vpop.f32.mrf.mxu1  ;;  %9323 = vmatpush2.msra.mxu0 %v9128_v10  ;;  %9538 = vmatpush2.msra.mxu1 %v9165_v59 }
 0x4cf   : > { %9324 = vmatprep.subr.mxu0 %v12941_v62  ;;  %9539 = vmatprep.subr.mxu1 %v12941_v62 }
 0x4d0   : > { %v11232_v39 = vpop.f32.mrf.mxu0  ;;  %v11285_v22 = vpop.f32.mrf.mxu1  ;;  %9325 = vmatpush2.msra.mxu0 %v9127_v14  ;;  %9540 = vmatpush2.msra.mxu1 %v9164_v29 }
 0x4d1   : > { %v11286_v20 = vadd.f32 %v11285_v22, %v11284_v58  ;;  %9326 = vmatprep.mubr.f32.mxu0 %v8854_v17  ;;  %9541 = vmatprep.subr.mxu1 %v12941_v62  ;;  %v11233_v2 = vadd.f32 %v11232_v39, %v11231_v33  ;;  %v5307_v33 = vcombine.high %v13052_v0, %v13052_v0 }
 0x4d2   : > { %v11234_v27 = vpop.f32.mrf.mxu0  ;;  %v11287_v45 = vpop.f32.mrf.mxu1  ;;  %9327 = vmatmul.mubr.f32.vlgmr.msra.gmra.mxu0 %v12941_v62  ;;  %9542 = vmatpush2.msra.mxu1 %v9163_v6 }
 0x4d3   : > { %v4297_v32 = vadd.f32 %v11286_v20, %v11230_v18  ;;  %9712 = vmatprep.subr.mxu0 %v12941_v62  ;;  %9543 = vmatprep.subr.mxu1 %v12941_v62 }
 0x4d4   : > { %v11235_v42 = vpop.f32.mrf.mxu0  ;;  %v11288_v43 = vpop.f32.mrf.mxu1  ;;  %9544 = vmatpush2.msra.mxu1 %v9162_v40  ;;  %9331 = vmatprep.mubr.f32.mxu0 %v8855_v63 }
 0x4d5   : > { %v5309_v56 = vcombine.high %v4297_v32, %v4297_v32  ;;  %v5316_v34 = vrot.slane %v4297_v32, %v12482_v38  ;;  %v11289_v3 = vadd.f32 %v11288_v43, %v11287_v45  ;;  %9545 = vmatprep.subr.mxu1 %v12941_v62  ;;  %v11236_v37 = vadd.f32 %v11235_v42, %v11234_v27 }
 0x4d6   : > { %v11237_v44 = vpop.f32.mrf.mxu0  ;;  %v11290_v26 = vpop.f32.mrf.mxu1  ;;  %9546 = vmatpush2.msra.mxu1 %v9161_v1  ;;  %9332 = vmatmul.mubr.f32.gmra.mxu0 %v12941_v62 }
 0x4d7   : > { %v5323_v54 = vrot.slane %v5309_v56, %v12482_v38  ;;  %v5324_v21 = vcombine.high %v5316_v34, %v5316_v34  ;;  %v4302_v19 = vadd.f32 %v11289_v3, %v11233_v2  ;;  %v13062_v60 = vrot.slane %v5316_v34, %v12482_v38  ;;  %9547 = vmatprep.subr.mxu1 %v12941_v62 }
 0x4d8   : > { %v11238_v46 = vpop.f32.mrf.mxu0  ;;  %v11291_v61 = vpop.f32.mrf.mxu1 }
 0x4d9   : > { %v5325_v11 = vcombine.high %v5323_v54, %v5323_v54  ;;  %v13066_v49 = vrot.slane %v5323_v54, %v12482_v38  ;;  %v5358_v13 = vcombine.high %v4302_v19, %v4302_v19  ;;  %v5365_v12 = vrot.slane %v4302_v19, %v12482_v38 }
 0x4da   : > { %v11292_v24 = vadd.f32 %v11291_v61, %v11290_v26  ;;  %v11240_v9 = vpop.f32.mrf.mxu0  ;;  %v11293_v7 = vpop.f32.mrf.mxu1  ;;  %v13075_v53 = vrot.slane %v5324_v21, %v12482_v38  ;;  %v11239_v29 = vadd.f32 %v11238_v46, %v11237_v44 }
 0x4db   : > { %v13082_v36 = vrot.slane %v5325_v11, %v12482_v38  ;;  %v5372_v10 = vrot.slane %v5358_v13, %v12482_v38  ;;  %v5373_v41 = vcombine.high %v5365_v12, %v5365_v12  ;;  %v13094_v39 = vrot.slane %v5365_v12, %v12482_v38  ;;  %v9160_v11 = vld [vmem:[#allocation14 + $0x188] sm:$0xff] }
 0x4dc   : > { %v4307_v48 = vadd.f32 %v11292_v24, %v11236_v37  ;;  %v11241_v59 = vpop.f32.mrf.mxu0  ;;  %v11294_v14 = vpop.f32.mrf.mxu1  ;;  %9548 = vmatpush2.msra.mxu1 %v9160_v11 }
 0x4dd   : > { %v11295_v17 = vadd.f32 %v11294_v14, %v11293_v7  ;;  %v5374_v31 = vcombine.high %v5372_v10, %v5372_v10  ;;  %v13097_v18 = vrot.slane %v5372_v10, %v12482_v38  ;;  %v13105_v23 = vrot.slane %v5373_v41, %v12482_v38  ;;  %9549 = vmatprep.subr.mxu1 %v12941_v62  ;;  %v9159_v14 = vld [vmem:[#allocation14 + $0x180] sm:$0xff] }
 0x4de   : > { %v11243_v22 = vpop.f32.mrf.mxu0  ;;  %v11296_v6 = vpop.f32.mrf.mxu1  ;;  %v5407_v20 = vcombine.high %v4307_v48, %v4307_v48  ;;  %v5414_v27 = vrot.slane %v4307_v48, %v12482_v38  ;;  %v11242_v44 = vadd.f32 %v11241_v59, %v11240_v9  ;;  %9550 = vmatpush2.msra.mxu1 %v9159_v14 }
 0x4df   : > { %v4312_v45 = vadd.f32 %v11295_v17, %v11239_v29  ;;  %v13108_v35 = vrot.slane %v5374_v31, %v12482_v38  ;;  %9937 = vmatprep.subr.mxu1 %v12941_v62 }
 0x4e0   : > { %v11244_v42 = vpop.f32.mrf.mxu0  ;;  %v11297_v43 = vpop.f32.mrf.mxu1  ;;  %v5421_v2 = vrot.slane %v5407_v20, %v12482_v38  ;;  %v5422_v56 = vcombine.high %v5414_v27, %v5414_v27  ;;  %v13112_v34 = vrot.slane %v5414_v27, %v12482_v38 }
 0x4e1   : > { %v5456_v3 = vcombine.high %v4312_v45, %v4312_v45  ;;  %v5463_v26 = vrot.slane %v4312_v45, %v12482_v38  ;;  %v11298_v54 = vadd.f32 %v11297_v43, %v11296_v6  ;;  %v11245_v59 = vadd.f32 %v11244_v42, %v11243_v22 }
 0x4e2   : > { %v11246_v21 = vpop.f32.mrf.mxu0  ;;  %v11299_v19 = vpop.f32.mrf.mxu1  ;;  %v5423_v1 = vcombine.high %v5421_v2, %v5421_v2  ;;  %v13120_v46 = vrot.slane %v5421_v2, %v12482_v38  ;;  %v13123_v61 = vrot.slane %v5422_v56, %v12482_v38 }
 0x4e3   : > { %v5470_v37 = vrot.slane %v5456_v3, %v12482_v38  ;;  %v5471_v13 = vcombine.high %v5463_v26, %v5463_v26  ;;  %v13127_v12 = vrot.slane %v5463_v26, %v12482_v38  ;;  %v4317_v24 = vadd.f32 %v11298_v54, %v11242_v44 }
 0x4e4   : > { %v11247_v9 = vpop.f32.mrf.mxu0  ;;  %v11300_v7 = vpop.f32.mrf.mxu1  ;;  %v13137_v29 = vrot.slane %v5423_v1, %v12482_v38 }
 0x4e5   : > { %v5472_v17 = vcombine.high %v5470_v37, %v5470_v37  ;;  %v13140_v31 = vrot.slane %v5470_v37, %v12482_v38  ;;  %v13143_v6 = vrot.slane %v5471_v13, %v12482_v38  ;;  %v5505_v22 = vcombine.high %v4317_v24, %v4317_v24 }
 0x4e6   : > { %v11302_v20 = vpop.f32.mrf.mxu1  ;;  %v11337_v27 = vpop.f32.mrf.mxu0  ;;  %v5512_v42 = vrot.slane %v4317_v24, %v12482_v38  ;;  %v11301_v43 = vadd.f32 %v11300_v7, %v11299_v19  ;;  %v11248_v44 = vadd.f32 %v11247_v9, %v11246_v21 }
 0x4e7   : > { %v13152_v56 = vrot.slane %v5472_v17, %v12482_v38  ;;  %v5519_v1 = vrot.slane %v5505_v22, %v12482_v38 }
 0x4e8   : > { %v11303_v26 = vpop.f32.mrf.mxu1  ;;  %v11338_v54 = vpop.f32.mrf.mxu0  ;;  %v5520_v11 = vcombine.high %v5512_v42, %v5512_v42  ;;  %v13158_v37 = vrot.slane %v5512_v42, %v12482_v38  ;;  %v4322_v19 = vadd.f32 %v11301_v43, %v11245_v59 }
 0x4e9   : > { %v11304_v7 = vadd.f32 %v11303_v26, %v11302_v20  ;;  %v5521_v14 = vcombine.high %v5519_v1, %v5519_v1  ;;  %v13169_v17 = vrot.slane %v5519_v1, %v12482_v38  ;;  %v11339_v3 = vadd.f32 %v11338_v54, %v11337_v27 }
 0x4ea   : > { %v11393_v21 = vpop.f32.mrf.mxu1  ;;  %v13172_v59 = vrot.slane %v5520_v11, %v12482_v38  ;;  %v5554_v42 = vcombine.high %v4322_v19, %v4322_v19  ;;  %v5561_v43 = vrot.slane %v4322_v19, %v12482_v38 }
 0x4eb   : > { %v11340_v22 = vpop.f32.mrf.mxu0  ;;  %v4327_v13 = vadd.f32 %v11304_v7, %v11248_v44  ;;  %v13176_v20 = vrot.slane %v5521_v14, %v12482_v38 }
 0x4ec   : > { %v11394_v62 = vpop.f32.mrf.mxu1  ;;  %v5568_v11 = vrot.slane %v5554_v42, %v12482_v38  ;;  %v5569_v2 = vcombine.high %v5561_v43, %v5561_v43  ;;  %v13184_v45 = vrot.slane %v5561_v43, %v12482_v38 }
 0x4ed   : > { %v11341_v9 = vpop.f32.mrf.mxu0  ;;  %v11395_v24 = vadd.f32 %v11394_v62, %v11393_v21  ;;  %v5603_v44 = vcombine.high %v4327_v13, %v4327_v13  ;;  %v5610_v19 = vrot.slane %v4327_v13, %v12482_v38 }
 0x4ee   : > { %v5570_v14 = vcombine.high %v5568_v11, %v5568_v11  ;;  %v13192_v1 = vrot.slane %v5568_v11, %v12482_v38  ;;  %v13195_v62 = vrot.slane %v5569_v2, %v12482_v38  ;;  %v11342_v21 = vadd.f32 %v11341_v9, %v11340_v22 }
 0x4ef   : > { %v4599_v7 = vadd.f32 %v11395_v24, %v11339_v3  ;;  %v5617_v43 = vrot.slane %v5603_v44, %v12482_v38  ;;  %v5618_v26 = vcombine.high %v5610_v19, %v5610_v19  ;;  %v13199_v27 = vrot.slane %v5610_v19, %v12482_v38 }
 0x4f0   : > { %v11343_v42 = vpop.f32.mrf.mxu0  ;;  %v13202_v13 = vrot.slane %v5570_v14, %v12482_v38 }
 0x4f1   : > { %v5724_v48 = vcombine.high %v4599_v7, %v4599_v7  ;;  %v11396_v54 = vpop.f32.mrf.mxu1  ;;  %v5731_v24 = vrot.slane %v4599_v7, %v12482_v38  ;;  %v5619_v22 = vcombine.high %v5617_v43, %v5617_v43  ;;  %v13212_v11 = vrot.slane %v5617_v43, %v12482_v38 }
 0x4f2   : > { %v13215_v44 = vrot.slane %v5618_v26, %v12482_v38  ;;  %v11344_v41 = vpop.f32.mrf.mxu0 }
 0x4f3   : > { %v5738_v14 = vrot.slane %v5724_v48, %v12482_v38  ;;  %v5739_v3 = vcombine.high %v5731_v24, %v5731_v24  ;;  %v5747_v2 = vrot.slane %v5731_v24, %v12482_v38  ;;  %v11397_v7 = vpop.f32.mrf.mxu1  ;;  %v13224_v10 = vrot.slane %v5619_v22, %v12482_v38 }
 0x4f4   : > { %v13235_v32 = vadd.f32 %v11344_v41, %v11343_v42  ;;  %v11398_v22 = vadd.f32 %v11397_v7, %v11396_v54 }
 0x4f5   : > { %15187 = vst [vmem:[#allocation21_spill] sm:$0xff] %v13224_v10  ;;  %v5740_v19 = vcombine.high %v5738_v14, %v5738_v14  ;;  %v5754_v48 = vrot.slane %v5738_v14, %v12482_v38  ;;  %v5761_v63 = vrot.slane %v5739_v3, %v12482_v38  ;;  %v5769_v24 = vcombine.high %v5747_v2, %v5747_v2 }
 0x4f6   : > { %v6119_v9 = vrot.slane %v5747_v2, %v12416_v25  ;;  %v4604_v58 = vadd.f32 %v11398_v22, %v11342_v21 }
 0x4f7   : > { %v5768_v30 = vrot.slane %v5740_v19, %v12482_v38  ;;  %v5770_v26 = vcombine.high %v5754_v48, %v5754_v48  ;;  %v5771_v55 = vcombine.high %v5761_v63, %v5761_v63  ;;  %v6123_v43 = vrot.slane %v5761_v63, %v12416_v25  ;;  %v11399_v7 = vpop.f32.mrf.mxu1 }
 0x4f8   : > { %v6127_v5 = vrot.slane %v5769_v24, %v12416_v25  ;;  %v6135_v14 = vrot.slane %v5754_v48, %v12416_v25  ;;  %v6436_v3 = vsel %vm654_vm1, %v13041_v50, %v6119_v9  ;;  %v11346_v9 = vpop.f32.mrf.mxu0 }
 0x4f9   : > { %v5772_v40 = vcombine.high %v5768_v30, %v5768_v30  ;;  %v6131_v2 = vrot.slane %v5771_v55, %v12416_v25  ;;  %v6139_v41 = vrot.slane %v5768_v30, %v12416_v25  ;;  %v6143_v54 = vrot.slane %v5770_v26, %v12416_v25 }
 0x4fa   : > { %v6437_v42 = vsel %vm654_vm1, %v13052_v0, %v6123_v43  ;;  %v6438_v63 = vsel %vm654_vm1, %v5305_v8, %v6127_v5  ;;  %v6440_v19 = vsel %vm654_vm1, %v13047_v51, %v6135_v14  ;;  %v7775_v21 = vadd.f32 %v13036_v47, %v6436_v3 }
 0x4fb   : > { %v6147_v55 = vrot.slane %v5772_v40, %v12416_v25  ;;  %v6439_v30 = vsel %vm654_vm1, %v5307_v33, %v6131_v2  ;;  %v6441_v26 = vsel %vm654_vm1, %v13059_v16, %v6139_v41  ;;  %v6442_v50 = vsel %vm654_vm1, %v5306_v15, %v6143_v54  ;;  %v11347_v2 = vpop.f32.mrf.mxu0  ;;  %v11400_v41 = vpop.f32.mrf.mxu1 }
 0x4fc   : > { %v7776_v8 = vadd.f32 %v13056_v57, %v6437_v42  ;;  %v7777_v5 = vadd.f32 %v13044_v4, %v6438_v63  ;;  %v7778_v43 = vadd.f32 %v13079_v28, %v6439_v30  ;;  %v7779_v40 = vadd.f32 %v13036_v47, %v6440_v19 }
 0x4fd   : > { %v15188_v0 = vcombine.high %v13059_v16, %v13059_v16  ;;  %v7780_v48 = vadd.f32 %v13056_v57, %v6441_v26  ;;  %v7781_v24 = vadd.f32 %v13044_v4, %v6442_v50  ;;  %v7957_v51 = vmax.f32 %v7775_v21, 0.0 }
 0x4fe   : > { %v7958_v22 = vmax.f32 %v7776_v8, 0.0  ;;  %v7959_v14 = vmax.f32 %v7777_v5, 0.0  ;;  %v7960_v3 = vmax.f32 %v7778_v43, 0.0  ;;  %v7961_v54 = vmax.f32 %v7779_v40, 0.0 }
 0x4ff   : > { %v6443_v33 = vsel %vm654_vm1, %v15188_v0, %v6147_v55  ;;  %v7962_v42 = vmax.f32 %v7780_v48, 0.0  ;;  %v7963_v63 = vmax.f32 %v7781_v24, 0.0  ;;  %v5773_v19 = vcombine.high %v4604_v58, %v4604_v58 }
 0x500   : > { %v7782_v15 = vadd.f32 %v13079_v28, %v6443_v33  ;;  %v8213_v16 = vcombine.low %v7957_v51, %v7958_v22  ;;  %v8214_v10 = vcombine.low %v7959_v14, %v7960_v3  ;;  %v5780_v55 = vrot.slane %v4604_v58, %v12482_v38  ;;  %v11349_v58 = vpop.f32.mrf.mxu0 }
 0x501   : > { %v8230_v26 = vcombine.low %v7961_v54, %v7962_v42  ;;  %v5787_v50 = vrot.slane %v5773_v19, %v12482_v38  ;;  %v13279_v21 = vadd.f32 %v11347_v2, %v11346_v9  ;;  %v11401_v0 = vadd.f32 %v11400_v41, %v11399_v7 }
 0x502   : > { %v7964_v30 = vmax.f32 %v7782_v15, 0.0  ;;  %v8221_v8 = vrot.slane %v8213_v16, %v12425_v52  ;;  %v8228_v5 = vrot.slane %v8214_v10, %v12425_v52  ;;  %v5788_v40 = vcombine.high %v5780_v55, %v5780_v55  ;;  %v13286_v15 = vpop.f32.mrf.mxu1 }
 0x503   : > { %v8238_v33 = vrot.slane %v8230_v26, %v12425_v52  ;;  %v5789_v48 = vcombine.high %v5787_v50, %v5787_v50  ;;  %v5796_v24 = vrot.slane %v5780_v55, %v12482_v38  ;;  %v5803_v51 = vrot.slane %v5787_v50, %v12482_v38  ;;  %v11350_v26 = vpop.f32.mrf.mxu0 }
 0x504   : > { %v8231_v43 = vcombine.low %v7963_v63, %v7964_v30  ;;  %v8229_v22 = vcombine.low %v8221_v8, %v8228_v5  ;;  %v5810_v7 = vrot.slane %v5788_v40, %v12482_v38  ;;  %v13291_v14 = vadd.f32 %v11401_v0, %v13235_v32  ;;  %v11403_v50 = vpop.f32.mrf.mxu1 }
 0x505   : > { %v5817_v10 = vrot.slane %v5789_v48, %v12482_v38  ;;  %v5818_v3 = vcombine.high %v5796_v24, %v5796_v24  ;;  %v5819_v2 = vcombine.high %v5803_v51, %v5803_v51  ;;  %v6151_v41 = vrot.slane %v5796_v24, %v12416_v25 }
 0x506   : > { %v8245_v9 = vrot.slane %v8231_v43, %v12425_v52  ;;  %8790 = vst [vmem:[#allocation5 + $0x19] sm:$0xff] %v8229_v22  ;;  %v5820_v42 = vcombine.high %v5810_v7, %v5810_v7  ;;  %v6155_v63 = vrot.slane %v5810_v7, %v12416_v25  ;;  %v6167_v19 = vrot.slane %v5803_v51, %v12416_v25 }
 0x507   : > { %v5821_v30 = vcombine.high %v5817_v10, %v5817_v10  ;;  %v6159_v16 = vrot.slane %v5818_v3, %v12416_v25  ;;  %v6171_v55 = vrot.slane %v5817_v10, %v12416_v25  ;;  %v6175_v32 = vrot.slane %v5819_v2, %v12416_v25 }
 0x508   : > { %v8246_v54 = vcombine.low %v8238_v33, %v8245_v9  ;;  %v6163_v0 = vrot.slane %v5820_v42, %v12416_v25  ;;  %v6444_v8 = vsel %vm654_vm1, %v13062_v60, %v6151_v41  ;;  %v6445_v5 = vsel %vm654_vm1, %v13075_v53, %v6155_v63  ;;  %v13334_v63 = vpop.f32.mrf.mxu1 }
 0x509   : > { %v6448_v43 = vsel %vm654_vm1, %v13066_v49, %v6167_v19  ;;  %v6179_v40 = vrot.slane %v5821_v30, %v12416_v25  ;;  %v15189_v33 = vcombine.high %v13062_v60, %v13062_v60  ;;  %v6449_v24 = vsel %vm654_vm1, %v13082_v36, %v6171_v55 }
 0x50a   : > { %8791 = vst [vmem:[#allocation5 + $0x21] sm:$0xff] %v8246_v54  ;;  %v15190_v51 = vcombine.high %v13066_v49, %v13066_v49  ;;  %v15191_v9 = vcombine.high %v13075_v53, %v13075_v53  ;;  %v7791_v10 = vadd.f32 %v13036_v47, %v6444_v8  ;;  %v7792_v3 = vadd.f32 %v13056_v57, %v6445_v5  ;;  %v13332_v53 = vpop.f32.mrf.mxu0 }
 0x50b   : > { %v6446_v48 = vsel %vm654_vm1, %v15189_v33, %v6159_v16  ;;  %v15192_v2 = vcombine.high %v13082_v36, %v13082_v36  ;;  %v7795_v54 = vadd.f32 %v13036_v47, %v6448_v43  ;;  %v7796_v42 = vadd.f32 %v13056_v57, %v6449_v24 }
 0x50c   : > { %v6450_v22 = vsel %vm654_vm1, %v15190_v51, %v6175_v32  ;;  %v6447_v7 = vsel %vm654_vm1, %v15191_v9, %v6163_v0  ;;  %v7793_v60 = vadd.f32 %v13044_v4, %v6446_v48  ;;  %v7973_v16 = vmax.f32 %v7791_v10, 0.0  ;;  %v8886_v32 = vld [vmem:[#allocation5 + $0x2] sm:$0xff] }
 0x50d   : > { %v6451_v41 = vsel %vm654_vm1, %v15192_v2, %v6179_v40  ;;  %v7794_v49 = vadd.f32 %v13079_v28, %v6447_v7  ;;  %v7797_v19 = vadd.f32 %v13044_v4, %v6450_v22  ;;  %v7974_v55 = vmax.f32 %v7792_v3, 0.0  ;;  %v8856_v40 = vld [vmem:[#allocation5 + $0x19] sm:$0xff]  ;;  %v13344_v3 = vpop.f32.mrf.mxu0 }
 0x50e   : > { %v7798_v30 = vadd.f32 %v13079_v28, %v6451_v41  ;;  %v7975_v36 = vmax.f32 %v7793_v60, 0.0  ;;  %v7977_v8 = vmax.f32 %v7795_v54, 0.0  ;;  %v7978_v5 = vmax.f32 %v7796_v42, 0.0  ;;  %v8918_v33 = vld [vmem:[#allocation5 + $0x18] sm:$0xff]  ;;  %9336 = vmatprep.mubr.f32.mxu0 %v8856_v40  ;;  %v13346_v60 = vpop.f32.mrf.mxu1 }
 0x50f   : > { %v7976_v0 = vmax.f32 %v7794_v49, 0.0  ;;  %v7979_v43 = vmax.f32 %v7797_v19, 0.0  ;;  %v8281_v24 = vcombine.low %v7973_v16, %v7974_v55  ;;  %v5822_v51 = vcombine.high %v13291_v14, %v13291_v14  ;;  %9551 = vmatprep.mubr.f32.mxu1 %v8918_v33  ;;  %9337 = vmatmul.mubr.f32.gmra.mxu0 %v8918_v33 }
 0x510   : > { %v7980_v48 = vmax.f32 %v7798_v30, 0.0  ;;  %v8298_v9 = vcombine.low %v7977_v8, %v7978_v5  ;;  %v5829_v7 = vrot.slane %v13291_v14, %v12482_v38  ;;  %v13342_v10 = vadd.f32 %v11350_v26, %v11349_v58  ;;  %9552 = vmatmul.mubr.f32.vlgmr.msra.gmra.mxu1 %v8886_v32  ;;  %v13359_v5 = vpop.f32.mrf.mxu0  ;;  %v13361_v40 = vpop.f32.mrf.mxu1 }
 0x511   : > { %v8282_v22 = vcombine.low %v7975_v36, %v7976_v0  ;;  %v8857_v2 = vld [vmem:[#allocation5 + $0x21] sm:$0xff]  ;;  %v8289_v49 = vrot.slane %v8281_v24, %v12425_v52  ;;  %v5836_v42 = vrot.slane %v5822_v51, %v12482_v38  ;;  %v11404_v19 = vadd.f32 %v11403_v50, %v13286_v15 }
 0x512   : > { %v8919_v41 = vld [vmem:[#allocation5 + $0x20] sm:$0xff]  ;;  %v8299_v54 = vcombine.low %v7979_v43, %v7980_v48  ;;  %v8306_v58 = vrot.slane %v8298_v9, %v12425_v52  ;;  %v5837_v14 = vcombine.high %v5829_v7, %v5829_v7  ;;  %v5845_v26 = vrot.slane %v5829_v7, %v12482_v38  ;;  %9341 = vmatprep.mubr.f32.mxu0 %v8857_v2 }
 0x513   : > { %v8296_v30 = vrot.slane %v8282_v22, %v12425_v52  ;;  %v5838_v55 = vcombine.high %v5836_v42, %v5836_v42  ;;  %v5852_v36 = vrot.slane %v5836_v42, %v12482_v38  ;;  %v4614_v0 = vadd.f32 %v11404_v19, %v13279_v21  ;;  %9556 = vmatprep.mubr.f32.mxu1 %v8919_v41 }
 0x514   : > { %v8313_v16 = vrot.slane %v8299_v54, %v12425_v52  ;;  %v5859_v15 = vrot.slane %v5837_v14, %v12482_v38  ;;  %v5867_v50 = vcombine.high %v5845_v26, %v5845_v26  ;;  %v6183_v32 = vrot.slane %v5845_v26, %v12416_v25  ;;  %9342 = vmatmul.mubr.f32.gmra.mxu0 %v8919_v41  ;;  %v13381_v14 = vpop.f32.mrf.mxu0  ;;  %v13383_v26 = vpop.f32.mrf.mxu1 }
 0x515   : > { %v8297_v8 = vcombine.low %v8289_v49, %v8296_v30  ;;  %v5866_v43 = vrot.slane %v5838_v55, %v12482_v38  ;;  %v5868_v48 = vcombine.high %v5852_v36, %v5852_v36  ;;  %v6199_v24 = vrot.slane %v5852_v36, %v12416_v25 }
 0x516   : > { %v8314_v33 = vcombine.low %v8306_v58, %v8313_v16  ;;  %v5869_v21 = vcombine.high %v5859_v15, %v5859_v15  ;;  %v6187_v51 = vrot.slane %v5859_v15, %v12416_v25  ;;  %v6191_v22 = vrot.slane %v5867_v50, %v12416_v25 }
 0x517   : > { %8794 = vst [vmem:[#allocation5 + $0x49] sm:$0xff] %v8297_v8  ;;  %v6452_v9 = vsel %vm654_vm1, %v13094_v39, %v6183_v32  ;;  %v5870_v7 = vcombine.high %v5866_v43, %v5866_v43  ;;  %v6203_v2 = vrot.slane %v5866_v43, %v12416_v25  ;;  %v6207_v41 = vrot.slane %v5868_v48, %v12416_v25 }
 0x518   : > { %8795 = vst [vmem:[#allocation5 + $0x51] sm:$0xff] %v8314_v33  ;;  %v6456_v49 = vsel %vm654_vm1, %v13097_v18, %v6199_v24  ;;  %v6195_v54 = vrot.slane %v5869_v21, %v12416_v25  ;;  %v6453_v42 = vsel %vm654_vm1, %v13105_v23, %v6187_v51  ;;  %v15193_v19 = vcombine.high %v13094_v39, %v13094_v39 }
 0x519   : > { %v7807_v58 = vadd.f32 %v13036_v47, %v6452_v9  ;;  %v6211_v16 = vrot.slane %v5870_v7, %v12416_v25  ;;  %v6457_v55 = vsel %vm654_vm1, %v13108_v35, %v6203_v2  ;;  %v15194_v36 = vcombine.high %v13097_v18, %v13097_v18  ;;  %v13407_v2 = vpop.f32.mrf.mxu0 }
 0x51a   : > { %v6454_v30 = vsel %vm654_vm1, %v15193_v19, %v6191_v22  ;;  %v7808_v39 = vadd.f32 %v13056_v57, %v6453_v42  ;;  %v15195_v15 = vcombine.high %v13105_v23, %v13105_v23  ;;  %v7811_v33 = vadd.f32 %v13036_v47, %v6456_v49 }
 0x51b   : > { %v6458_v8 = vsel %vm654_vm1, %v15194_v36, %v6207_v41  ;;  %v7809_v32 = vadd.f32 %v13044_v4, %v6454_v30  ;;  %v7812_v43 = vadd.f32 %v13056_v57, %v6457_v55  ;;  %v15196_v48 = vcombine.high %v13108_v35, %v13108_v35  ;;  %v13409_v41 = vpop.f32.mrf.mxu1 }
 0x51c   : > { %v6455_v50 = vsel %vm654_vm1, %v15195_v15, %v6195_v54  ;;  %v7813_v21 = vadd.f32 %v13044_v4, %v6458_v8  ;;  %v7989_v51 = vmax.f32 %v7807_v58, 0.0  ;;  %v7990_v22 = vmax.f32 %v7808_v39, 0.0 }
 0x51d   : > { %v6459_v18 = vsel %vm654_vm1, %v15196_v48, %v6211_v16  ;;  %v7810_v24 = vadd.f32 %v13079_v28, %v6455_v50  ;;  %v7991_v9 = vmax.f32 %v7809_v32, 0.0  ;;  %v7993_v7 = vmax.f32 %v7811_v33, 0.0  ;;  %v13421_v48 = vpop.f32.mrf.mxu1 }
 0x51e   : > { %v7814_v23 = vadd.f32 %v13079_v28, %v6459_v18  ;;  %v7994_v54 = vmax.f32 %v7812_v43, 0.0  ;;  %v7995_v42 = vmax.f32 %v7813_v21, 0.0  ;;  %v5871_v35 = vcombine.high %v4614_v0, %v4614_v0  ;;  %v11359_v43 = vpop.f32.mrf.mxu0 }
 0x51f   : > { %v7992_v49 = vmax.f32 %v7810_v24, 0.0  ;;  %v8349_v30 = vcombine.low %v7989_v51, %v7990_v22  ;;  %v5878_v16 = vrot.slane %v4614_v0, %v12482_v38  ;;  %v13414_v58 = vadd.f32 %v13344_v3, %v13332_v53 }
 0x520   : > { %v7996_v19 = vmax.f32 %v7814_v23, 0.0  ;;  %v8366_v36 = vcombine.low %v7993_v7, %v7994_v54  ;;  %v5885_v8 = vrot.slane %v5871_v35, %v12482_v38  ;;  %v11407_v39 = vadd.f32 %v13346_v60, %v13334_v63  ;;  %v13433_v35 = vpop.f32.mrf.mxu1 }
 0x521   : > { %v8350_v55 = vcombine.low %v7991_v9, %v7992_v49  ;;  %v8357_v15 = vrot.slane %v8349_v30, %v12425_v52  ;;  %v5886_v32 = vcombine.high %v5878_v16, %v5878_v16  ;;  %v5894_v33 = vrot.slane %v5878_v16, %v12482_v38 }
 0x522   : > { %v8367_v50 = vcombine.low %v7995_v42, %v7996_v19  ;;  %v8374_v53 = vrot.slane %v8366_v36, %v12425_v52  ;;  %v5887_v3 = vcombine.high %v5885_v8, %v5885_v8  ;;  %v5901_v18 = vrot.slane %v5885_v8, %v12482_v38  ;;  %v13435_v19 = vpop.f32.mrf.mxu0 }
 0x523   : > { %v8364_v0 = vrot.slane %v8350_v55, %v12425_v52  ;;  %v5908_v63 = vrot.slane %v5886_v32, %v12482_v38  ;;  %v5916_v60 = vcombine.high %v5894_v33, %v5894_v33  ;;  %v6215_v21 = vrot.slane %v5894_v33, %v12416_v25 }
 0x524   : > { %v8381_v24 = vrot.slane %v8367_v50, %v12425_v52  ;;  %v5915_v23 = vrot.slane %v5887_v3, %v12482_v38  ;;  %v5917_v22 = vcombine.high %v5901_v18, %v5901_v18  ;;  %v6231_v9 = vrot.slane %v5901_v18, %v12416_v25 }
 0x525   : > { %v8365_v51 = vcombine.low %v8357_v15, %v8364_v0  ;;  %v5918_v49 = vcombine.high %v5908_v63, %v5908_v63  ;;  %v6219_v54 = vrot.slane %v5908_v63, %v12416_v25  ;;  %v6223_v42 = vrot.slane %v5916_v60, %v12416_v25 }
 0x526   : > { %v8382_v7 = vcombine.low %v8374_v53, %v8381_v24  ;;  %v5919_v30 = vcombine.high %v5915_v23, %v5915_v23  ;;  %v6235_v16 = vrot.slane %v5915_v23, %v12416_v25  ;;  %v6239_v55 = vrot.slane %v5917_v22, %v12416_v25  ;;  %v13465_v23 = vpop.f32.mrf.mxu1  ;;  %v13467_v22 = vpop.f32.mrf.mxu0 }
 0x527   : > { %8798 = vst [vmem:[#allocation5 + $0x79] sm:$0xff] %v8365_v51  ;;  %v6460_v36 = vsel %vm654_vm1, %v13112_v34, %v6215_v21  ;;  %v6227_v8 = vrot.slane %v5918_v49, %v12416_v25  ;;  %v6461_v15 = vsel %vm654_vm1, %v13123_v61, %v6219_v54  ;;  %v15197_v50 = vcombine.high %v13112_v34, %v13112_v34 }
 0x528   : > { %8799 = vst [vmem:[#allocation5 + $0x81] sm:$0xff] %v8382_v7  ;;  %v6464_v33 = vsel %vm654_vm1, %v13120_v46, %v6231_v9  ;;  %v6243_v0 = vrot.slane %v5919_v30, %v12416_v25  ;;  %v6465_v53 = vsel %vm654_vm1, %v13137_v29, %v6235_v16  ;;  %v15198_v3 = vcombine.high %v13120_v46, %v13120_v46 }
 0x529   : > { %v6462_v32 = vsel %vm654_vm1, %v15197_v50, %v6223_v42  ;;  %v7823_v24 = vadd.f32 %v13036_v47, %v6460_v36  ;;  %v15199_v34 = vcombine.high %v13123_v61, %v13123_v61  ;;  %v7824_v60 = vadd.f32 %v13056_v57, %v6461_v15 }
 0x52a   : > { %v6466_v18 = vsel %vm654_vm1, %v15198_v3, %v6239_v55  ;;  %v7825_v21 = vadd.f32 %v13044_v4, %v6462_v32  ;;  %v7827_v51 = vadd.f32 %v13036_v47, %v6464_v33  ;;  %v15200_v46 = vcombine.high %v13137_v29, %v13137_v29 }
 0x52b   : > { %v6463_v63 = vsel %vm654_vm1, %v15199_v34, %v6227_v8  ;;  %v7828_v61 = vadd.f32 %v13056_v57, %v6465_v53  ;;  %v7829_v49 = vadd.f32 %v13044_v4, %v6466_v18  ;;  %v8005_v42 = vmax.f32 %v7823_v24, 0.0  ;;  %v13482_v53 = vpop.f32.mrf.mxu1 }
 0x52c   : > { %v6467_v9 = vsel %vm654_vm1, %v15200_v46, %v6243_v0  ;;  %v7826_v7 = vadd.f32 %v13079_v28, %v6463_v63  ;;  %v8006_v30 = vmax.f32 %v7824_v60, 0.0  ;;  %v8007_v16 = vmax.f32 %v7825_v21, 0.0  ;;  %v13480_v0 = vpop.f32.mrf.mxu0 }
 0x52d   : > { %v7830_v54 = vadd.f32 %v13079_v28, %v6467_v9  ;;  %v8009_v36 = vmax.f32 %v7827_v51, 0.0  ;;  %v8010_v8 = vmax.f32 %v7828_v61, 0.0  ;;  %v8011_v15 = vmax.f32 %v7829_v49, 0.0  ;;  %v13501_v9 = vpop.f32.mrf.mxu1 }
 0x52e   : > { %v8008_v55 = vmax.f32 %v7826_v7, 0.0  ;;  %v8417_v32 = vcombine.low %v8005_v42, %v8006_v30  ;;  %v4619_v29 = vadd.f32 %v11407_v39, %v13342_v10  ;;  %v11357_v33 = vadd.f32 %v13381_v14, %v13359_v5  ;;  %v13499_v46 = vpop.f32.mrf.mxu0 }
 0x52f   : > { %v8012_v50 = vmax.f32 %v7830_v54, 0.0  ;;  %v8434_v18 = vcombine.low %v8009_v36, %v8010_v8  ;;  %v11410_v24 = vadd.f32 %v13383_v26, %v13361_v40  ;;  %v13487_v34 = vadd.f32 %v11359_v43, %v13407_v2 }
 0x530   : > { %v8418_v3 = vcombine.low %v8007_v16, %v8008_v55  ;;  %v8425_v63 = vrot.slane %v8417_v32, %v12425_v52  ;;  %v5920_v21 = vcombine.high %v4619_v29, %v4619_v29  ;;  %v5927_v10 = vrot.slane %v4619_v29, %v12482_v38  ;;  %v13512_v29 = vpop.f32.mrf.mxu0 }
 0x531   : > { %v8435_v60 = vcombine.low %v8011_v15, %v8012_v50  ;;  %v8442_v14 = vrot.slane %v8434_v18, %v12425_v52  ;;  %v4624_v39 = vadd.f32 %v11410_v24, %v13414_v58  ;;  %v11413_v51 = vadd.f32 %v13421_v48, %v13409_v41 }
 0x532   : > { %v8432_v5 = vrot.slane %v8418_v3, %v12425_v52  ;;  %v5934_v26 = vrot.slane %v5920_v21, %v12482_v38  ;;  %v5935_v2 = vcombine.high %v5927_v10, %v5927_v10  ;;  %v5943_v43 = vrot.slane %v5927_v10, %v12482_v38 }
 0x533   : > { %v8449_v40 = vrot.slane %v8435_v60, %v12425_v52  ;;  %v5969_v61 = vcombine.high %v4624_v39, %v4624_v39  ;;  %v5976_v49 = vrot.slane %v4624_v39, %v12482_v38  ;;  %v13504_v54 = vadd.f32 %v11413_v51, %v11357_v33  ;;  %v13514_v33 = vpop.f32.mrf.mxu1 }
 0x534   : > { %v8433_v7 = vcombine.low %v8425_v63, %v8432_v5  ;;  %v5936_v42 = vcombine.high %v5934_v26, %v5934_v26  ;;  %v5950_v41 = vrot.slane %v5934_v26, %v12482_v38  ;;  %v5957_v48 = vrot.slane %v5935_v2, %v12482_v38 }
 0x535   : > { %v8450_v58 = vcombine.low %v8442_v14, %v8449_v40  ;;  %v5965_v30 = vcombine.high %v5943_v43, %v5943_v43  ;;  %v6247_v16 = vrot.slane %v5943_v43, %v12416_v25  ;;  %v5983_v55 = vrot.slane %v5969_v61, %v12482_v38 }
 0x536   : > { %8802 = vst [vmem:[#allocation5 + $0xa9] sm:$0xff] %v8433_v7  ;;  %v5984_v36 = vcombine.high %v5976_v49, %v5976_v49  ;;  %v5964_v8 = vrot.slane %v5936_v42, %v12482_v38  ;;  %v5966_v15 = vcombine.high %v5950_v41, %v5950_v41  ;;  %v5967_v50 = vcombine.high %v5957_v48, %v5957_v48  ;;  %v13543_v42 = vpop.f32.mrf.mxu0 }
 0x537   : > { %8803 = vst [vmem:[#allocation5 + $0xb1] sm:$0xff] %v8450_v58  ;;  %v6251_v32 = vrot.slane %v5957_v48, %v12416_v25  ;;  %v6255_v3 = vrot.slane %v5965_v30, %v12416_v25  ;;  %v6263_v18 = vrot.slane %v5950_v41, %v12416_v25  ;;  %v6468_v24 = vsel %vm654_vm1, %v13127_v12, %v6247_v16  ;;  %v13545_v41 = vpop.f32.mrf.mxu1 }
 0x538   : > { %v5985_v63 = vcombine.high %v5983_v55, %v5983_v55  ;;  %v5968_v60 = vcombine.high %v5964_v8, %v5964_v8  ;;  %v6259_v21 = vrot.slane %v5967_v50, %v12416_v25  ;;  %v6267_v10 = vrot.slane %v5964_v8, %v12416_v25 }
 0x539   : > { %v6271_v5 = vrot.slane %v5966_v15, %v12416_v25  ;;  %v6469_v14 = vsel %vm654_vm1, %v13143_v6, %v6251_v32  ;;  %v15201_v39 = vcombine.high %v13127_v12, %v13127_v12  ;;  %v6472_v40 = vsel %vm654_vm1, %v13140_v31, %v6263_v18 }
 0x53a   : > { %v7839_v26 = vadd.f32 %v13036_v47, %v6468_v24  ;;  %v6275_v2 = vrot.slane %v5968_v60, %v12416_v25  ;;  %v15202_v43 = vcombine.high %v13143_v6, %v13143_v6  ;;  %v6473_v61 = vsel %vm654_vm1, %v13152_v56, %v6267_v10 }
 0x53b   : > { %v6470_v51 = vsel %vm654_vm1, %v15201_v39, %v6255_v3  ;;  %v15203_v12 = vcombine.high %v13140_v31, %v13140_v31  ;;  %v7840_v48 = vadd.f32 %v13056_v57, %v6469_v14  ;;  %v7843_v16 = vadd.f32 %v13036_v47, %v6472_v40  ;;  %v13559_v39 = vpop.f32.mrf.mxu0 }
 0x53c   : > { %v6471_v7 = vsel %vm654_vm1, %v15202_v43, %v6259_v21  ;;  %v7841_v30 = vadd.f32 %v13044_v4, %v6470_v51  ;;  %v15204_v8 = vcombine.high %v13152_v56, %v13152_v56  ;;  %v7844_v31 = vadd.f32 %v13056_v57, %v6473_v61  ;;  %v13561_v56 = vpop.f32.mrf.mxu1 }
 0x53d   : > { %v6474_v58 = vsel %vm654_vm1, %v15203_v12, %v6271_v5  ;;  %v7842_v6 = vadd.f32 %v13079_v28, %v6471_v7  ;;  %v8021_v32 = vmax.f32 %v7839_v26, 0.0  ;;  %v8022_v18 = vmax.f32 %v7840_v48, 0.0 }
 0x53e   : > { %v6475_v15 = vsel %vm654_vm1, %v15204_v8, %v6275_v2  ;;  %v7845_v50 = vadd.f32 %v13044_v4, %v6474_v58  ;;  %v8023_v24 = vmax.f32 %v7841_v30, 0.0  ;;  %v8025_v21 = vmax.f32 %v7843_v16, 0.0 }
 0x53f   : > { %v7846_v3 = vadd.f32 %v13079_v28, %v6475_v15  ;;  %v8024_v60 = vmax.f32 %v7842_v6, 0.0  ;;  %v8026_v10 = vmax.f32 %v7844_v31, 0.0  ;;  %v5992_v14 = vrot.slane %v5976_v49, %v12482_v38  ;;  %v13570_v31 = vpop.f32.mrf.mxu0 }
 0x540   : > { %v8027_v5 = vmax.f32 %v7845_v50, 0.0  ;;  %v8485_v40 = vcombine.low %v8021_v32, %v8022_v18  ;;  %v5999_v43 = vrot.slane %v5983_v55, %v12482_v38  ;;  %v6006_v7 = vrot.slane %v5984_v36, %v12482_v38  ;;  %v13572_v55 = vpop.f32.mrf.mxu1 }
 0x541   : > { %v8028_v51 = vmax.f32 %v7846_v3, 0.0  ;;  %v8486_v2 = vcombine.low %v8023_v24, %v8024_v60  ;;  %v8502_v26 = vcombine.low %v8025_v21, %v8026_v10  ;;  %v6013_v61 = vrot.slane %v5985_v63, %v12482_v38 }
 0x542   : > { %v6014_v12 = vcombine.high %v5992_v14, %v5992_v14  ;;  %v8493_v58 = vrot.slane %v8485_v40, %v12425_v52  ;;  %v6015_v30 = vcombine.high %v5999_v43, %v5999_v43  ;;  %v6016_v16 = vcombine.high %v6006_v7, %v6006_v7 }
 0x543   : > { %v8500_v48 = vrot.slane %v8486_v2, %v12425_v52  ;;  %v8503_v49 = vcombine.low %v8027_v5, %v8028_v51  ;;  %v8510_v6 = vrot.slane %v8502_v26, %v12425_v52  ;;  %v6017_v8 = vcombine.high %v6013_v61, %v6013_v61 }
 0x544   : > { %v6279_v15 = vrot.slane %v5992_v14, %v12416_v25  ;;  %v6283_v50 = vrot.slane %v6006_v7, %v12416_v25  ;;  %v6287_v32 = vrot.slane %v6014_v12, %v12416_v25  ;;  %v6291_v3 = vrot.slane %v6016_v16, %v12416_v25  ;;  %v13600_v12 = vpop.f32.mrf.mxu1 }
 0x545   : > { %v8501_v36 = vcombine.low %v8493_v58, %v8500_v48  ;;  %v8517_v63 = vrot.slane %v8503_v49, %v12425_v52  ;;  %v6295_v18 = vrot.slane %v5999_v43, %v12416_v25  ;;  %v6299_v24 = vrot.slane %v6013_v61, %v12416_v25  ;;  %v13598_v61 = vpop.f32.mrf.mxu0 }
 0x546   : > { %v6303_v60 = vrot.slane %v6015_v30, %v12416_v25  ;;  %v6307_v10 = vrot.slane %v6017_v8, %v12416_v25  ;;  %v6476_v5 = vsel %vm654_vm1, %v13158_v37, %v6279_v15  ;;  %v6477_v14 = vsel %vm654_vm1, %v13172_v59, %v6283_v50 }
 0x547   : > { %v8518_v21 = vcombine.low %v8510_v6, %v8517_v63  ;;  %8806 = vst [vmem:[#allocation5 + $0xd9] sm:$0xff] %v8501_v36  ;;  %v15205_v51 = vcombine.high %v13158_v37, %v13158_v37  ;;  %v15206_v2 = vcombine.high %v13172_v59, %v13172_v59  ;;  %v6480_v26 = vsel %vm654_vm1, %v13169_v17, %v6295_v18 }
 0x548   : > { %v6481_v7 = vsel %vm654_vm1, %v13176_v20, %v6299_v24  ;;  %v15207_v37 = vcombine.high %v13169_v17, %v13169_v17  ;;  %v15208_v59 = vcombine.high %v13176_v20, %v13176_v20  ;;  %v7855_v49 = vadd.f32 %v13036_v47, %v6476_v5  ;;  %v13618_v24 = vpop.f32.mrf.mxu0 }
 0x549   : > { %v6478_v40 = vsel %vm654_vm1, %v15205_v51, %v6287_v32  ;;  %v6479_v43 = vsel %vm654_vm1, %v15206_v2, %v6291_v3  ;;  %8807 = vst [vmem:[#allocation5 + $0xe1] sm:$0xff] %v8518_v21  ;;  %v7856_v30 = vadd.f32 %v13056_v57, %v6477_v14  ;;  %v7859_v8 = vadd.f32 %v13036_v47, %v6480_v26 }
 0x54a   : > { %v6482_v58 = vsel %vm654_vm1, %v15207_v37, %v6303_v60  ;;  %v6483_v48 = vsel %vm654_vm1, %v15208_v59, %v6307_v10  ;;  %v7857_v6 = vadd.f32 %v13044_v4, %v6478_v40  ;;  %v7858_v16 = vadd.f32 %v13079_v28, %v6479_v43  ;;  %v13620_v60 = vpop.f32.mrf.mxu1 }
 0x54b   : > { %v7860_v15 = vadd.f32 %v13056_v57, %v6481_v7  ;;  %v7861_v17 = vadd.f32 %v13044_v4, %v6482_v58  ;;  %v7862_v36 = vadd.f32 %v13079_v28, %v6483_v48  ;;  %v8037_v63 = vmax.f32 %v7855_v49, 0.0 }
 0x54c   : > { %v8038_v20 = vmax.f32 %v7856_v30, 0.0  ;;  %v8039_v50 = vmax.f32 %v7857_v6, 0.0  ;;  %v8040_v32 = vmax.f32 %v7858_v16, 0.0  ;;  %v8041_v3 = vmax.f32 %v7859_v8, 0.0  ;;  %v13639_v6 = vpop.f32.mrf.mxu1 }
 0x54d   : > { %v8042_v18 = vmax.f32 %v7860_v15, 0.0  ;;  %v8043_v21 = vmax.f32 %v7861_v17, 0.0  ;;  %v8044_v10 = vmax.f32 %v7862_v36, 0.0  ;;  %v6018_v14 = vcombine.high %v13504_v54, %v13504_v54 }
 0x54e   : > { %v8553_v5 = vcombine.low %v8037_v63, %v8038_v20  ;;  %v8554_v51 = vcombine.low %v8039_v50, %v8040_v32  ;;  %v6025_v2 = vrot.slane %v13504_v54, %v12482_v38  ;;  %v11416_v43 = vadd.f32 %v13465_v23, %v13433_v35  ;;  %v13637_v54 = vpop.f32.mrf.mxu0 }
 0x54f   : > { %v8570_v40 = vcombine.low %v8041_v3, %v8042_v18  ;;  %v8571_v7 = vcombine.low %v8043_v21, %v8044_v10  ;;  %v6032_v37 = vrot.slane %v6018_v14, %v12482_v38  ;;  %v13632_v58 = vadd.f32 %v13467_v22, %v13435_v19  ;;  %v13654_v10 = vpop.f32.mrf.mxu1 }
 0x550   : > { %v8561_v26 = vrot.slane %v8553_v5, %v12425_v52  ;;  %v8568_v59 = vrot.slane %v8554_v51, %v12425_v52  ;;  %v6033_v49 = vcombine.high %v6025_v2, %v6025_v2  ;;  %v6041_v30 = vrot.slane %v6025_v2, %v12482_v38  ;;  %v13652_v21 = vpop.f32.mrf.mxu0 }
 0x551   : > { %v8578_v48 = vrot.slane %v8570_v40, %v12425_v52  ;;  %v8585_v35 = vrot.slane %v8571_v7, %v12425_v52  ;;  %v6034_v23 = vcombine.high %v6032_v37, %v6032_v37  ;;  %v6048_v16 = vrot.slane %v6032_v37, %v12482_v38 }
 0x552   : > { %v4634_v8 = vadd.f32 %v11416_v43, %v13487_v34  ;;  %v8569_v19 = vcombine.low %v8561_v26, %v8568_v59  ;;  %v6055_v22 = vrot.slane %v6033_v49, %v12482_v38  ;;  %v6063_v15 = vcombine.high %v6041_v30, %v6041_v30 }
 0x553   : > { %v6311_v17 = vrot.slane %v6041_v30, %v12416_v25  ;;  %v8586_v36 = vcombine.low %v8578_v48, %v8585_v35  ;;  %v6062_v63 = vrot.slane %v6034_v23, %v12482_v38  ;;  %v6064_v20 = vcombine.high %v6048_v16, %v6048_v16 }
 0x554   : > { %v6327_v50 = vrot.slane %v6048_v16, %v12416_v25  ;;  %8810 = vst [vmem:[#allocation5 + $0x109] sm:$0xff] %v8569_v19  ;;  %v6065_v32 = vcombine.high %v6055_v22, %v6055_v22  ;;  %v6315_v3 = vrot.slane %v6055_v22, %v12416_v25  ;;  %v6319_v18 = vrot.slane %v6063_v15, %v12416_v25  ;;  %v13683_v15 = vpop.f32.mrf.mxu0 }
 0x555   : > { %v6484_v34 = vsel %vm654_vm1, %v13184_v45, %v6311_v17  ;;  %8811 = vst [vmem:[#allocation5 + $0x111] sm:$0xff] %v8586_v36  ;;  %v6066_v5 = vcombine.high %v6062_v63, %v6062_v63  ;;  %v6331_v14 = vrot.slane %v6062_v63, %v12416_v25  ;;  %v6335_v51 = vrot.slane %v6064_v20, %v12416_v25  ;;  %v13685_v17 = vpop.f32.mrf.mxu1 }
 0x556   : > { %v6488_v40 = vsel %vm654_vm1, %v13192_v1, %v6327_v50  ;;  %v6323_v2 = vrot.slane %v6065_v32, %v12416_v25  ;;  %v6485_v43 = vsel %vm654_vm1, %v13195_v62, %v6315_v3  ;;  %v15209_v26 = vcombine.high %v13184_v45, %v13184_v45 }
 0x557   : > { %v7871_v37 = vadd.f32 %v13036_v47, %v6484_v34  ;;  %v6339_v59 = vrot.slane %v6066_v5, %v12416_v25  ;;  %v6489_v48 = vsel %vm654_vm1, %v13202_v13, %v6331_v14  ;;  %v15210_v49 = vcombine.high %v13192_v1, %v13192_v1 }
 0x558   : > { %v6486_v7 = vsel %vm654_vm1, %v15209_v26, %v6319_v18  ;;  %v7872_v35 = vadd.f32 %v13056_v57, %v6485_v43  ;;  %v15211_v23 = vcombine.high %v13195_v62, %v13195_v62  ;;  %v7875_v19 = vadd.f32 %v13036_v47, %v6488_v40  ;;  %v13699_v26 = vpop.f32.mrf.mxu0 }
 0x559   : > { %v6490_v30 = vsel %vm654_vm1, %v15210_v49, %v6335_v51  ;;  %v7873_v16 = vadd.f32 %v13044_v4, %v6486_v7  ;;  %v7876_v22 = vadd.f32 %v13056_v57, %v6489_v48  ;;  %v15212_v1 = vcombine.high %v13202_v13, %v13202_v13  ;;  %v13701_v7 = vpop.f32.mrf.mxu1 }
 0x55a   : > { %v6487_v45 = vsel %vm654_vm1, %v15211_v23, %v6323_v2  ;;  %v7877_v62 = vadd.f32 %v13044_v4, %v6490_v30  ;;  %v8053_v20 = vmax.f32 %v7871_v37, 0.0  ;;  %v8054_v32 = vmax.f32 %v7872_v35, 0.0 }
 0x55b   : > { %v6491_v36 = vsel %vm654_vm1, %v15212_v1, %v6339_v59  ;;  %v7874_v63 = vadd.f32 %v13079_v28, %v6487_v45  ;;  %v8055_v3 = vmax.f32 %v7873_v16, 0.0  ;;  %v8057_v18 = vmax.f32 %v7875_v19, 0.0 }
 0x55c   : > { %v7878_v50 = vadd.f32 %v13079_v28, %v6491_v36  ;;  %v8058_v5 = vmax.f32 %v7876_v22, 0.0  ;;  %v8059_v14 = vmax.f32 %v7877_v62, 0.0  ;;  %v6067_v51 = vcombine.high %v4634_v8, %v4634_v8  ;;  %v9190_v22 = vld [vmem:[#allocation14 + $0x278] sm:$0xff]  ;;  %v13718_v62 = vpop.f32.mrf.mxu1 }
 0x55d   : > { %v8056_v34 = vmax.f32 %v7874_v63, 0.0  ;;  %v8621_v2 = vcombine.low %v8053_v20, %v8054_v32  ;;  %v6074_v13 = vrot.slane %v4634_v8, %v12482_v38  ;;  %v13697_v43 = vadd.f32 %v13499_v46, %v13480_v0  ;;  %v8887_v0 = vld [vmem:[#allocation5 + $0xa] sm:$0xff]  ;;  %v13716_v63 = vpop.f32.mrf.mxu0  ;;  %9713 = vmatpush1.msra.mxu0 %v9190_v22 }
 0x55e   : > { %v8060_v40 = vmax.f32 %v7878_v50, 0.0  ;;  %v8638_v59 = vcombine.low %v8057_v18, %v8058_v5  ;;  %v6081_v48 = vrot.slane %v6067_v51, %v12482_v38  ;;  %v13706_v49 = vadd.f32 %v13501_v9, %v13482_v53  ;;  %9557 = vmatmul.mubr.f32.gmra.mxu1 %v8887_v0  ;;  %v13722_v18 = vld [vmem:[#allocation4] sm:$0xff]  ;;  %v13742_v0 = vpop.f32.mrf.mxu1 }
 0x55f   : > { %v8622_v37 = vcombine.low %v8055_v3, %v8056_v34  ;;  %v8629_v30 = vrot.slane %v8621_v2, %v12425_v52  ;;  %v6082_v8 = vcombine.high %v6074_v13, %v6074_v13  ;;  %v6090_v23 = vrot.slane %v6074_v13, %v12482_v38  ;;  %9714 = vmatprep.subr.mxu0 %v13722_v18 }
 0x560   : > { %v8639_v35 = vcombine.low %v8059_v14, %v8060_v40  ;;  %v8646_v45 = vrot.slane %v8638_v59, %v12425_v52  ;;  %v6083_v16 = vcombine.high %v6081_v48, %v6081_v48  ;;  %v6097_v19 = vrot.slane %v6081_v48, %v12482_v38 }
 0x561   : > { %v8636_v46 = vrot.slane %v8622_v37, %v12425_v52  ;;  %v6104_v53 = vrot.slane %v6082_v8, %v12482_v38  ;;  %v6112_v9 = vcombine.high %v6090_v23, %v6090_v23  ;;  %v6343_v36 = vrot.slane %v6090_v23, %v12416_v25  ;;  %v13740_v23 = vpop.f32.mrf.mxu0 }
 0x562   : > { %v8653_v1 = vrot.slane %v8639_v35, %v12425_v52  ;;  %v6111_v50 = vrot.slane %v6083_v16, %v12482_v38  ;;  %v6113_v32 = vcombine.high %v6097_v19, %v6097_v19  ;;  %v6359_v3 = vrot.slane %v6097_v19, %v12416_v25 }
 0x563   : > { %v8637_v20 = vcombine.low %v8629_v30, %v8636_v46  ;;  %v6114_v5 = vcombine.high %v6104_v53, %v6104_v53  ;;  %v6347_v14 = vrot.slane %v6104_v53, %v12416_v25  ;;  %v6351_v51 = vrot.slane %v6112_v9, %v12416_v25 }
 0x564   : > { %v8654_v34 = vcombine.low %v8646_v45, %v8653_v1  ;;  %v6115_v40 = vcombine.high %v6111_v50, %v6111_v50  ;;  %v6363_v2 = vrot.slane %v6111_v50, %v12416_v25  ;;  %v6367_v13 = vrot.slane %v6113_v32, %v12416_v25  ;;  %v15214_v45 = vld [vmem:[#allocation21_spill] sm:$0xff] }
 0x565   : > { %8814 = vst [vmem:[#allocation5 + $0x139] sm:$0xff] %v8637_v20  ;;  %v6492_v37 = vsel %vm654_vm1, %v13199_v27, %v6343_v36  ;;  %v6355_v59 = vrot.slane %v6114_v5, %v12416_v25  ;;  %v6493_v48 = vsel %vm654_vm1, %v13215_v44, %v6347_v14  ;;  %v15213_v30 = vcombine.high %v13199_v27, %v13199_v27 }
 0x566   : > { %8815 = vst [vmem:[#allocation5 + $0x141] sm:$0xff] %v8654_v34  ;;  %v6496_v8 = vsel %vm654_vm1, %v13212_v11, %v6359_v3  ;;  %v6371_v46 = vrot.slane %v6115_v40, %v12416_v25  ;;  %v6497_v16 = vsel %vm654_vm1, %v15214_v45, %v6363_v2  ;;  %v15215_v19 = vcombine.high %v13212_v11, %v13212_v11  ;;  %v13767_v40 = vpop.f32.mrf.mxu1  ;;  %v13769_v2 = vpop.f32.mrf.mxu0 }
 0x567   : > { %v6494_v35 = vsel %vm654_vm1, %v15213_v30, %v6351_v51  ;;  %v7887_v27 = vadd.f32 %v13036_v47, %v6492_v37  ;;  %v15216_v1 = vcombine.high %v13215_v44, %v13215_v44  ;;  %v7888_v9 = vadd.f32 %v13056_v57, %v6493_v48 }
 0x568   : > { %v6498_v22 = vsel %vm654_vm1, %v15215_v19, %v6367_v13  ;;  %v7889_v36 = vadd.f32 %v13044_v4, %v6494_v35  ;;  %v7891_v20 = vadd.f32 %v13036_v47, %v6496_v8  ;;  %v15217_v50 = vcombine.high %v15214_v45, %v15214_v45  ;;  %v9189_v45 = vld [vmem:[#allocation14 + $0x270] sm:$0xff] }
 0x569   : > { %v6495_v53 = vsel %vm654_vm1, %v15216_v1, %v6355_v59  ;;  %v7892_v3 = vadd.f32 %v13056_v57, %v6497_v16  ;;  %v7893_v34 = vadd.f32 %v13044_v4, %v6498_v22  ;;  %v8069_v5 = vmax.f32 %v7887_v27, 0.0  ;;  %9715 = vmatpush1.msra.mxu0 %v9189_v45 }
 0x56a   : > { %v6499_v11 = vsel %vm654_vm1, %v15217_v50, %v6371_v46  ;;  %v7890_v32 = vadd.f32 %v13079_v28, %v6495_v53  ;;  %v8070_v14 = vmax.f32 %v7888_v9, 0.0  ;;  %v8071_v51 = vmax.f32 %v7889_v36, 0.0  ;;  %9716 = vmatprep.subr.mxu0 %v13722_v18 }
 0x56b   : > { %v7894_v44 = vadd.f32 %v13079_v28, %v6499_v11  ;;  %v8073_v37 = vmax.f32 %v7891_v20, 0.0  ;;  %v8074_v59 = vmax.f32 %v7892_v3, 0.0  ;;  %v8075_v48 = vmax.f32 %v7893_v34, 0.0 }
 0x56c   : > { %v8072_v13 = vmax.f32 %v7890_v32, 0.0  ;;  %v8689_v35 = vcombine.low %v8069_v5, %v8070_v14  ;;  %v4907_v8 = vadd.f32 %v13706_v49, %v13632_v58  ;;  %v11457_v46 = vadd.f32 %v13543_v42, %v13512_v29  ;;  %v13781_v58 = vpop.f32.mrf.mxu1  ;;  %v13783_v49 = vpop.f32.mrf.mxu0 }
 0x56d   : > { %v8076_v30 = vmax.f32 %v7894_v44, 0.0  ;;  %v8706_v19 = vcombine.low %v8073_v37, %v8074_v59  ;;  %v11510_v22 = vadd.f32 %v13545_v41, %v13514_v33  ;;  %v11460_v27 = vadd.f32 %v13570_v31, %v13559_v39 }
 0x56e   : > { %v8690_v16 = vcombine.low %v8071_v51, %v8072_v13  ;;  %v8697_v1 = vrot.slane %v8689_v35, %v12425_v52  ;;  %v6508_v9 = vcombine.high %v4907_v8, %v4907_v8  ;;  %v6515_v36 = vrot.slane %v4907_v8, %v12482_v38  ;;  %v13805_v14 = vpop.f32.mrf.mxu1 }
 0x56f   : > { %v8707_v53 = vcombine.low %v8075_v48, %v8076_v30  ;;  %v8714_v33 = vrot.slane %v8706_v19, %v12425_v52  ;;  %v4912_v42 = vadd.f32 %v11510_v22, %v13697_v43  ;;  %v11513_v41 = vadd.f32 %v13572_v55, %v13561_v56  ;;  %v13803_v55 = vpop.f32.mrf.mxu0 }
 0x570   : > { %v8704_v29 = vrot.slane %v8690_v16, %v12425_v52  ;;  %v6522_v31 = vrot.slane %v6508_v9, %v12482_v38  ;;  %v6523_v20 = vcombine.high %v6515_v36, %v6515_v36  ;;  %v13794_v50 = vrot.slane %v6515_v36, %v12482_v38 }
 0x571   : > { %v8721_v39 = vrot.slane %v8707_v53, %v12425_v52  ;;  %v6557_v32 = vcombine.high %v4912_v42, %v4912_v42  ;;  %v6564_v3 = vrot.slane %v4912_v42, %v12482_v38  ;;  %v4917_v34 = vadd.f32 %v11513_v41, %v11457_v46  ;;  %v13834_v36 = vpop.f32.mrf.mxu0  ;;  %v9186_v41 = vld [vmem:[#allocation14 + $0x258] sm:$0xff] }
 0x572   : > { %v8705_v11 = vcombine.low %v8697_v1, %v8704_v29  ;;  %v6524_v5 = vcombine.high %v6522_v31, %v6522_v31  ;;  %v13798_v43 = vrot.slane %v6522_v31, %v12482_v38  ;;  %v13801_v56 = vrot.slane %v6523_v20, %v12482_v38  ;;  %v13836_v29 = vpop.f32.mrf.mxu1 }
 0x573   : > { %v8722_v44 = vcombine.low %v8714_v33, %v8721_v39  ;;  %v6571_v13 = vrot.slane %v6557_v32, %v12482_v38  ;;  %v6572_v37 = vcombine.high %v6564_v3, %v6564_v3  ;;  %v13811_v59 = vrot.slane %v6564_v3, %v12482_v38 }
 0x574   : > { %8818 = vst [vmem:[#allocation5 + $0x169] sm:$0xff] %v8705_v11  ;;  %v13814_v48 = vrot.slane %v6524_v5, %v12482_v38  ;;  %v6606_v8 = vcombine.high %v4917_v34, %v4917_v34  ;;  %v6613_v1 = vrot.slane %v4917_v34, %v12482_v38  ;;  %v11463_v9 = vadd.f32 %v13618_v24, %v13598_v61 }
 0x575   : > { %8819 = vst [vmem:[#allocation5 + $0x171] sm:$0xff] %v8722_v44  ;;  %v6573_v46 = vcombine.high %v6571_v13, %v6571_v13  ;;  %v13821_v45 = vrot.slane %v6571_v13, %v12482_v38  ;;  %v13824_v16 = vrot.slane %v6572_v37, %v12482_v38  ;;  %v11516_v39 = vadd.f32 %v13620_v60, %v13600_v12  ;;  %v9188_v44 = vld [vmem:[#allocation14 + $0x268] sm:$0xff]  ;;  %v13871_v37 = vpop.f32.mrf.mxu1 }
 0x576   : > { %v6620_v53 = vrot.slane %v6606_v8, %v12482_v38  ;;  %v6621_v31 = vcombine.high %v6613_v1, %v6613_v1  ;;  %v13848_v61 = vrot.slane %v6613_v1, %v12482_v38  ;;  %v11466_v3 = vadd.f32 %v13652_v21, %v13637_v54  ;;  %9717 = vmatpush1.msra.mxu0 %v9188_v44 }
 0x577   : > { %v13839_v33 = vrot.slane %v6573_v46, %v12482_v38  ;;  %v4922_v32 = vadd.f32 %v11516_v39, %v11460_v27  ;;  %v11519_v34 = vadd.f32 %v13654_v10, %v13639_v6  ;;  %v13869_v27 = vpop.f32.mrf.mxu0  ;;  %v11469_v10 = vadd.f32 %v13699_v26, %v13683_v15  ;;  %9718 = vmatprep.subr.mxu0 %v13722_v18 }
 0x578   : > { %v6622_v20 = vcombine.high %v6620_v53, %v6620_v53  ;;  %v13851_v24 = vrot.slane %v6620_v53, %v12482_v38  ;;  %v13860_v12 = vrot.slane %v6621_v31, %v12482_v38  ;;  %v11522_v1 = vadd.f32 %v13701_v7, %v13685_v17  ;;  %v13896_v7 = vpop.f32.mrf.mxu1 }
 0x579   : > { %v6655_v54 = vcombine.high %v4922_v32, %v4922_v32  ;;  %v6662_v6 = vrot.slane %v4922_v32, %v12482_v38  ;;  %v4927_v21 = vadd.f32 %v11519_v34, %v11463_v9  ;;  %v11472_v53 = vadd.f32 %v13740_v23, %v13716_v63  ;;  %v13894_v17 = vpop.f32.mrf.mxu0 }
 0x57a   : > { %v13863_v60 = vrot.slane %v6622_v20, %v12482_v38  ;;  %v4932_v20 = vadd.f32 %v11522_v1, %v11466_v3  ;;  %v11525_v32 = vadd.f32 %v13742_v0, %v13718_v62  ;;  %v11528_v34 = vadd.f32 %v13781_v58, %v13767_v40  ;;  %v13928_v3 = vpop.f32.mrf.mxu1 }
 0x57b   : > { %v6669_v39 = vrot.slane %v6655_v54, %v12482_v38  ;;  %v6670_v9 = vcombine.high %v6662_v6, %v6662_v6  ;;  %v13887_v31 = vrot.slane %v6662_v6, %v12482_v38  ;;  %v6704_v15 = vcombine.high %v4927_v21, %v4927_v21 }
 0x57c   : > { %v6711_v26 = vrot.slane %v4927_v21, %v12482_v38  ;;  %v6753_v40 = vcombine.high %v4932_v20, %v4932_v20  ;;  %v6760_v1 = vrot.slane %v4932_v20, %v12482_v38  ;;  %v4937_v13 = vadd.f32 %v11525_v32, %v11469_v10 }
 0x57d   : > { %v6671_v63 = vcombine.high %v6669_v39, %v6669_v39  ;;  %v13899_v23 = vrot.slane %v6669_v39, %v12482_v38  ;;  %v13902_v44 = vrot.slane %v6670_v9, %v12482_v38  ;;  %v6718_v54 = vrot.slane %v6704_v15, %v12482_v38 }
 0x57e   : > { %v6719_v62 = vcombine.high %v6711_v26, %v6711_v26  ;;  %v13908_v0 = vrot.slane %v6711_v26, %v12482_v38  ;;  %v6767_v21 = vrot.slane %v6753_v40, %v12482_v38  ;;  %v6768_v20 = vcombine.high %v6760_v1, %v6760_v1  ;;  %v11624_v26 = vpop.f32.mrf.mxu1 }
 0x57f   : > { %v13911_v58 = vrot.slane %v6671_v63, %v12482_v38  ;;  %v6720_v39 = vcombine.high %v6718_v54, %v6718_v54  ;;  %v13919_v9 = vrot.slane %v6718_v54, %v12482_v38  ;;  %v13926_v63 = vpop.f32.mrf.mxu0  ;;  %v13934_v46 = vrot.slane %v6760_v1, %v12482_v38 }
 0x580   : > { %v13922_v15 = vrot.slane %v6719_v62, %v12482_v38  ;;  %v6769_v8 = vcombine.high %v6767_v21, %v6767_v21  ;;  %v13944_v5 = vrot.slane %v6767_v21, %v12482_v38  ;;  %v13947_v40 = vrot.slane %v6768_v20, %v12482_v38  ;;  %v11626_v22 = vpop.f32.mrf.mxu1 }
 0x581   : > { %v13937_v54 = vrot.slane %v6720_v39, %v12482_v38  ;;  %v6802_v6 = vcombine.high %v4937_v13, %v4937_v13  ;;  %v6809_v62 = vrot.slane %v4937_v13, %v12482_v38  ;;  %v4942_v11 = vadd.f32 %v11528_v34, %v11472_v53  ;;  %v11571_v42 = vpop.f32.mrf.mxu0  ;;  %v9187_v34 = vld [vmem:[#allocation14 + $0x260] sm:$0xff] }
 0x582   : > { %v13955_v10 = vrot.slane %v6769_v8, %v12482_v38  ;;  %v11563_v20 = vadd.f32 %v13783_v49, %v13769_v2  ;;  %v11566_v21 = vadd.f32 %v13834_v36, %v13803_v55  ;;  %v11619_v2 = vadd.f32 %v13836_v29, %v13805_v14  ;;  %9719 = vmatpush1.msra.mxu0 %v9187_v34  ;;  %v11627_v34 = vpop.f32.mrf.mxu1 }
 0x583   : > { %v6816_v1 = vrot.slane %v6802_v6, %v12482_v38  ;;  %v6817_v39 = vcombine.high %v6809_v62, %v6809_v62  ;;  %v13965_v13 = vrot.slane %v6809_v62, %v12482_v38  ;;  %v6851_v53 = vcombine.high %v4942_v11, %v4942_v11  ;;  %v11573_v8 = vpop.f32.mrf.mxu0  ;;  %9720 = vmatprep.subr.mxu0 %v13722_v18 }
 0x584   : > { %v6858_v32 = vrot.slane %v4942_v11, %v12482_v38  ;;  %v9185_v11 = vld [vmem:[#allocation14 + $0x250] sm:$0xff]  ;;  %v5214_v29 = vadd.f32 %v11619_v2, %v11563_v20  ;;  %9721 = vmatpush1.msra.mxu0 %v9186_v41  ;;  %v11569_v19 = vadd.f32 %v13894_v17, %v13869_v27  ;;  %v11622_v17 = vadd.f32 %v13896_v7, %v13871_v37 }
 0x585   : > { %v6818_v49 = vcombine.high %v6816_v1, %v6816_v1  ;;  %v13975_v6 = vrot.slane %v6816_v1, %v12482_v38  ;;  %v13978_v62 = vrot.slane %v6817_v39, %v12482_v38  ;;  %v6865_v55 = vrot.slane %v6851_v53, %v12482_v38  ;;  %9722 = vmatprep.subr.mxu0 %v13722_v18  ;;  %v9184_v53 = vld [vmem:[#allocation14 + $0x248] sm:$0xff]  ;;  %v11574_v39 = vpop.f32.mrf.mxu0 }
 0x586   : > { %v6866_v36 = vcombine.high %v6858_v32, %v6858_v32  ;;  %v13985_v14 = vrot.slane %v6858_v32, %v12482_v38  ;;  %9723 = vmatpush1.msra.mxu0 %v9185_v11  ;;  %v6979_v27 = vrot.slane %v5214_v29, %v12482_v38  ;;  %v14019_v2 = vadd.f32 %v11571_v42, %v13926_v63 }
 0x587   : > { %v13988_v1 = vrot.slane %v6818_v49, %v12482_v38  ;;  %v6867_v30 = vcombine.high %v6865_v55, %v6865_v55  ;;  %v13998_v32 = vrot.slane %v6865_v55, %v12482_v38  ;;  %v6972_v49 = vcombine.high %v5214_v29, %v5214_v29  ;;  %9724 = vmatprep.subr.mxu0 %v13722_v18  ;;  %v9183_v55 = vld [vmem:[#allocation14 + $0x240] sm:$0xff] }
 0x588   : > { %v14001_v41 = vrot.slane %v6866_v36, %v12482_v38  ;;  %9725 = vmatpush1.msra.mxu0 %v9184_v53  ;;  %v6987_v7 = vcombine.high %v6979_v27, %v6979_v27  ;;  %v6995_v29 = vrot.slane %v6979_v27, %v12482_v38  ;;  %v5219_v35 = vadd.f32 %v11622_v17, %v11566_v21  ;;  %v9181_v21 = vld [vmem:[#allocation14 + $0x230] sm:$0xff] }
 0x589   : > { %15218 = vst [vmem:[#allocation21_spill] sm:$0xff] %v13998_v32  ;;  %v14012_v36 = vrot.slane %v6867_v30, %v12482_v38  ;;  %v6986_v37 = vrot.slane %v6972_v49, %v12482_v38  ;;  %9726 = vmatprep.subr.mxu0 %v13722_v18  ;;  %v9182_v30 = vld [vmem:[#allocation14 + $0x238] sm:$0xff]  ;;  %v11625_v11 = vadd.f32 %v11624_v26, %v13928_v3 }
 0x58a   : > { %v14027_v32 = vadd.f32 %v11574_v39, %v11573_v8  ;;  %v14029_v20 = vadd.f32 %v11627_v34, %v11626_v22  ;;  %9727 = vmatpush1.msra.mxu0 %v9183_v55  ;;  %v7009_v53 = vrot.slane %v6987_v7, %v12482_v38  ;;  %v7017_v49 = vcombine.high %v6995_v29, %v6995_v29  ;;  %v9180_v34 = vld [vmem:[#allocation14 + $0x228] sm:$0xff] }
 0x58b   : > { %v6988_v42 = vcombine.high %v6986_v37, %v6986_v37  ;;  %v7002_v63 = vrot.slane %v6986_v37, %v12482_v38  ;;  %9728 = vmatprep.subr.mxu0 %v13722_v18  ;;  %v7367_v27 = vrot.slane %v6995_v29, %v12416_v25  ;;  %v7021_v17 = vcombine.high %v5219_v35, %v5219_v35 }
 0x58c   : > { %v14036_v51 = vrot.slane %v5219_v35, %v12482_v38  ;;  %v14038_v3 = vadd.f32 %v11625_v11, %v11569_v19  ;;  %9729 = vmatpush1.msra.mxu0 %v9182_v30  ;;  %v7019_v8 = vcombine.high %v7009_v53, %v7009_v53  ;;  %v7371_v39 = vrot.slane %v7009_v53, %v12416_v25 }
 0x58d   : > { %v7016_v22 = vrot.slane %v6988_v42, %v12482_v38  ;;  %v7018_v26 = vcombine.high %v7002_v63, %v7002_v63  ;;  %9730 = vmatprep.subr.mxu0 %v13722_v18  ;;  %v7375_v55 = vrot.slane %v7017_v49, %v12416_v25  ;;  %v7383_v37 = vrot.slane %v7002_v63, %v12416_v25  ;;  %v9179_v42 = vld [vmem:[#allocation14 + $0x220] sm:$0xff] }
 0x58e   : > { %v7684_v35 = vsel %vm654_vm1, %v13794_v50, %v7367_v27  ;;  %v14048_v19 = vrot.slane %v7021_v17, %v12482_v38  ;;  %9731 = vmatpush1.msra.mxu0 %v9181_v21  ;;  %v7379_v7 = vrot.slane %v7019_v8, %v12416_v25  ;;  %v7685_v63 = vsel %vm654_vm1, %v13801_v56, %v7371_v39  ;;  %v9222_v17 = vld [vmem:[#allocation14 + $0x378] sm:$0xff] }
 0x58f   : > { %v7020_v11 = vcombine.high %v7016_v22, %v7016_v22  ;;  %v7387_v29 = vrot.slane %v7016_v22, %v12416_v25  ;;  %v7391_v30 = vrot.slane %v7018_v26, %v12416_v25  ;;  %9732 = vmatprep.subr.mxu0 %v13722_v18  ;;  %v15219_v53 = vcombine.high %v13794_v50, %v13794_v50 }
 0x590   : > { %v7688_v21 = vsel %vm654_vm1, %v13798_v43, %v7383_v37  ;;  %v7783_v27 = vadd.f32 %v13036_v47, %v7684_v35  ;;  %9733 = vmatpush1.msra.mxu0 %v9180_v34  ;;  %v15220_v26 = vcombine.high %v13801_v56, %v13801_v56  ;;  %v15221_v50 = vcombine.high %v13798_v43, %v13798_v43  ;;  %v9178_v37 = vld [vmem:[#allocation14 + $0x218] sm:$0xff] }
 0x591   : > { %v7686_v49 = vsel %vm654_vm1, %v15219_v53, %v7375_v55  ;;  %v7395_v22 = vrot.slane %v7020_v11, %v12416_v25  ;;  %v7689_v39 = vsel %vm654_vm1, %v13814_v48, %v7387_v29  ;;  %9734 = vmatprep.subr.mxu0 %v13722_v18  ;;  %v7784_v34 = vadd.f32 %v13056_v57, %v7685_v63  ;;  %v9177_v63 = vld [vmem:[#allocation14 + $0x210] sm:$0xff] }
 0x592   : > { %v7687_v8 = vsel %vm654_vm1, %v15220_v26, %v7379_v7  ;;  %v7690_v55 = vsel %vm654_vm1, %v15221_v50, %v7391_v30  ;;  %v7785_v35 = vadd.f32 %v13044_v4, %v7686_v49  ;;  %v7787_v56 = vadd.f32 %v13036_v47, %v7688_v21  ;;  %9735 = vmatpush1.msra.mxu0 %v9179_v42  ;;  %v9221_v7 = vld [vmem:[#allocation14 + $0x370] sm:$0xff]  ;;  %v14087_v50 = vpop.f32.mrf.mxu0 }
 0x593   : > { %v7786_v11 = vadd.f32 %v13079_v28, %v7687_v8  ;;  %v15222_v29 = vcombine.high %v13814_v48, %v13814_v48  ;;  %v7788_v30 = vadd.f32 %v13056_v57, %v7689_v39  ;;  %v7789_v53 = vadd.f32 %v13044_v4, %v7690_v55  ;;  %9736 = vmatprep.subr.mxu0 %v13722_v18  ;;  %v9176_v55 = vld [vmem:[#allocation14 + $0x208] sm:$0xff] }
 0x594   : > { %v7965_v26 = vmax.f32 %v7783_v27, 0.0  ;;  %9938 = vmatpush1.msra.mxu1 %v9222_v17  ;;  %v7966_v8 = vmax.f32 %v7784_v34, 0.0  ;;  %v7967_v21 = vmax.f32 %v7785_v35, 0.0  ;;  %9737 = vmatpush1.msra.mxu0 %v9178_v37  ;;  %v7969_v48 = vmax.f32 %v7787_v56, 0.0 }
 0x595   : > { %v7691_v43 = vsel %vm654_vm1, %v15222_v29, %v7395_v22  ;;  %v7968_v42 = vmax.f32 %v7786_v11, 0.0  ;;  %9939 = vmatprep.subr.mxu1 %v13722_v18  ;;  %v7970_v22 = vmax.f32 %v7788_v30, 0.0  ;;  %v7971_v39 = vmax.f32 %v7789_v53, 0.0  ;;  %9738 = vmatprep.subr.mxu0 %v13722_v18 }
 0x596   : > { %v7790_v49 = vadd.f32 %v13079_v28, %v7691_v43  ;;  %v7036_v27 = vcombine.high %v14036_v51, %v14036_v51  ;;  %9940 = vmatpush1.msra.mxu1 %v9221_v7  ;;  %v8247_v29 = vcombine.low %v7965_v26, %v7966_v8  ;;  %v7037_v35 = vcombine.high %v14048_v19, %v14048_v19  ;;  %v9175_v7 = vld [vmem:[#allocation14 + $0x200] sm:$0xff] }
 0x597   : > { %v8248_v34 = vcombine.low %v7967_v21, %v7968_v42  ;;  %9739 = vmatpush1.msra.mxu0 %v9177_v63  ;;  %9941 = vmatprep.subr.mxu1 %v13722_v18  ;;  %v8264_v37 = vcombine.low %v7969_v48, %v7970_v22  ;;  %v7044_v11 = vrot.slane %v14036_v51, %v12482_v38 }
 0x598   : > { %v7972_v17 = vmax.f32 %v7790_v49, 0.0  ;;  %v7051_v56 = vrot.slane %v14048_v19, %v12482_v38  ;;  %v7058_v43 = vrot.slane %v7036_v27, %v12482_v38  ;;  %9740 = vmatprep.subr.mxu0 %v13722_v18  ;;  %v8255_v30 = vrot.slane %v8247_v29, %v12425_v52  ;;  %v14105_v49 = vpop.f32.mrf.mxu0 }
 0x599   : > { %v8262_v53 = vrot.slane %v8248_v34, %v12425_v52  ;;  %v7065_v63 = vrot.slane %v7037_v35, %v12482_v38  ;;  %9741 = vmatpush1.msra.mxu0 %v9176_v55  ;;  %v8272_v51 = vrot.slane %v8264_v37, %v12425_v52  ;;  %v7066_v8 = vcombine.high %v7044_v11, %v7044_v11 }
 0x59a   : > { %v8265_v26 = vcombine.low %v7971_v39, %v7972_v17  ;;  %v7067_v21 = vcombine.high %v7051_v56, %v7051_v56  ;;  %v7068_v19 = vcombine.high %v7058_v43, %v7058_v43  ;;  %9742 = vmatprep.subr.mxu0 %v13722_v18  ;;  %v7399_v27 = vrot.slane %v7044_v11, %v12416_v25  ;;  %v9206_v39 = vld [vmem:[#allocation14 + $0x2f8] sm:$0xff] }
 0x59b   : > { %v8263_v42 = vcombine.low %v8255_v30, %v8262_v53  ;;  %v7069_v22 = vcombine.high %v7065_v63, %v7065_v63  ;;  %9743 = vmatpush1.msra.mxu0 %v9175_v7  ;;  %v7403_v17 = vrot.slane %v7058_v43, %v12416_v25  ;;  %v7407_v29 = vrot.slane %v7066_v8, %v12416_v25  ;;  %v14121_v7 = vpop.f32.mrf.mxu0  ;;  %v9205_v43 = vld [vmem:[#allocation14 + $0x2f0] sm:$0xff] }
 0x59c   : > { %v8279_v48 = vrot.slane %v8265_v26, %v12425_v52  ;;  %v7411_v55 = vrot.slane %v7068_v19, %v12416_v25  ;;  %v7415_v34 = vrot.slane %v7051_v56, %v12416_v25  ;;  %9744 = vmatprep.subr.mxu0 %v13722_v18  ;;  %v7419_v37 = vrot.slane %v7065_v63, %v12416_v25 }
 0x59d   : > { %8792 = vst [vmem:[#allocation5 + $0x31] sm:$0xff] %v8263_v42  ;;  %v7423_v30 = vrot.slane %v7067_v21, %v12416_v25  ;;  %v7427_v11 = vrot.slane %v7069_v22, %v12416_v25  ;;  %9346 = vmatprep.mubr.f32.mxu0 %v8263_v42  ;;  %v7692_v53 = vsel %vm654_vm1, %v13811_v59, %v7399_v27  ;;  %v9204_v22 = vld [vmem:[#allocation14 + $0x2e8] sm:$0xff] }
 0x59e   : > { %v14116_v35 = vcombine.low %v8272_v51, %v8279_v48  ;;  %v7693_v56 = vsel %vm654_vm1, %v13824_v16, %v7403_v17  ;;  %v15223_v26 = vcombine.high %v13811_v59, %v13811_v59  ;;  %v15224_v63 = vcombine.high %v13824_v16, %v13824_v16  ;;  %9745 = vmatpush2.msra.mxu0 %v9206_v39  ;;  %v9220_v27 = vld [vmem:[#allocation14 + $0x368] sm:$0xff] }
 0x59f   : > { %v7696_v21 = vsel %vm654_vm1, %v13821_v45, %v7415_v34  ;;  %v7697_v19 = vsel %vm654_vm1, %v13839_v33, %v7419_v37  ;;  %v15225_v42 = vcombine.high %v13821_v45, %v13821_v45  ;;  %v15226_v48 = vcombine.high %v13839_v33, %v13839_v33  ;;  %9746 = vmatprep.subr.mxu0 %v13722_v18 }
 0x5a0   : > { %v7694_v51 = vsel %vm654_vm1, %v15223_v26, %v7407_v29  ;;  %v7695_v8 = vsel %vm654_vm1, %v15224_v63, %v7411_v55  ;;  %8793 = vst [vmem:[#allocation5 + $0x39] sm:$0xff] %v14116_v35  ;;  %v7799_v39 = vadd.f32 %v13036_v47, %v7692_v53  ;;  %v7800_v17 = vadd.f32 %v13056_v57, %v7693_v56 }
 0x5a1   : > { %v7698_v59 = vsel %vm654_vm1, %v15225_v42, %v7423_v30  ;;  %v7699_v16 = vsel %vm654_vm1, %v15226_v48, %v7427_v11  ;;  %v7801_v29 = vadd.f32 %v13044_v4, %v7694_v51  ;;  %v7802_v55 = vadd.f32 %v13079_v28, %v7695_v8  ;;  %9747 = vmatpush2.msra.mxu0 %v9205_v43  ;;  %v14157_v30 = vpop.f32.mrf.mxu0  ;;  %v9203_v11 = vld [vmem:[#allocation14 + $0x2e0] sm:$0xff] }
 0x5a2   : > { %v7803_v45 = vadd.f32 %v13036_v47, %v7696_v21  ;;  %v7804_v34 = vadd.f32 %v13056_v57, %v7697_v19  ;;  %v7805_v33 = vadd.f32 %v13044_v4, %v7698_v59  ;;  %v7806_v37 = vadd.f32 %v13079_v28, %v7699_v16  ;;  %9748 = vmatprep.subr.mxu0 %v13722_v18  ;;  %v14166_v16 = vpop.f32.mrf.mxu1 }
 0x5a3   : > { %v7981_v53 = vmax.f32 %v7799_v39, 0.0  ;;  %v7982_v56 = vmax.f32 %v7800_v17, 0.0  ;;  %v7983_v26 = vmax.f32 %v7801_v29, 0.0  ;;  %v7984_v51 = vmax.f32 %v7802_v55, 0.0  ;;  %9749 = vmatpush2.msra.mxu0 %v9204_v22  ;;  %9942 = vmatpush1.msra.mxu1 %v9220_v27  ;;  %v14174_v55 = vpop.f32.mrf.mxu0 }
 0x5a4   : > { %v7985_v43 = vmax.f32 %v7803_v45, 0.0  ;;  %v7986_v63 = vmax.f32 %v7804_v34, 0.0  ;;  %v7987_v8 = vmax.f32 %v7805_v33, 0.0  ;;  %v7988_v21 = vmax.f32 %v7806_v37, 0.0  ;;  %9750 = vmatprep.subr.mxu0 %v13722_v18  ;;  %9943 = vmatprep.subr.mxu1 %v13722_v18  ;;  %v8920_v22 = vld [vmem:[#allocation5 + $0x30] sm:$0xff]  ;;  %v8888_v37 = vld [vmem:[#allocation5 + $0x1a] sm:$0xff] }
 0x5a5   : > { %v8315_v19 = vcombine.low %v7981_v53, %v7982_v56  ;;  %v8316_v42 = vcombine.low %v7983_v26, %v7984_v51  ;;  %v7070_v59 = vcombine.high %v14038_v3, %v14038_v3  ;;  %v7077_v48 = vrot.slane %v14038_v3, %v12482_v38  ;;  %9751 = vmatpush2.msra.mxu0 %v9203_v11 }
 0x5a6   : > { %v8332_v27 = vcombine.low %v7985_v43, %v7986_v63  ;;  %v8333_v39 = vcombine.low %v7987_v8, %v7988_v21  ;;  %v5229_v17 = vadd.f32 %v14029_v20, %v14019_v2  ;;  %v14172_v29 = vadd.f32 %v14105_v49, %v14087_v50  ;;  %9561 = vmatprep.mubr.f32.mxu1 %v8920_v22  ;;  %v14186_v43 = vpop.f32.mrf.mxu1 }
 0x5a7   : > { %v8323_v45 = vrot.slane %v8315_v19, %v12425_v52  ;;  %v8330_v3 = vrot.slane %v8316_v42, %v12425_v52  ;;  %v7084_v34 = vrot.slane %v7070_v59, %v12482_v38  ;;  %v7085_v33 = vcombine.high %v7077_v48, %v7077_v48  ;;  %9347 = vmatmul.mubr.f32.gmra.mxu0 %v8920_v22  ;;  %v8921_v11 = vld [vmem:[#allocation5 + $0x38] sm:$0xff]  ;;  %v14195_v42 = vpop.f32.mrf.mxu0 }
 0x5a8   : > { %v8340_v53 = vrot.slane %v8332_v27, %v12425_v52  ;;  %v8347_v20 = vrot.slane %v8333_v39, %v12425_v52  ;;  %v7093_v2 = vrot.slane %v7077_v48, %v12482_v38  ;;  %v7119_v50 = vcombine.high %v5229_v17, %v5229_v17  ;;  %9562 = vmatmul.mubr.f32.gmra.mxu1 %v8888_v37 }
 0x5a9   : > { %v14182_v49 = vcombine.low %v8323_v45, %v8330_v3  ;;  %v7086_v56 = vcombine.high %v7084_v34, %v7084_v34  ;;  %v7100_v26 = vrot.slane %v7084_v34, %v12482_v38  ;;  %v7107_v51 = vrot.slane %v7085_v33, %v12482_v38  ;;  %9351 = vmatprep.mubr.f32.mxu0 %v14116_v35  ;;  %v8889_v35 = vld [vmem:[#allocation5 + $0x22] sm:$0xff]  ;;  %v14208_v33 = vpop.f32.mrf.mxu0 }
 0x5aa   : > { %v14189_v63 = vcombine.low %v8340_v53, %v8347_v20  ;;  %v7115_v8 = vcombine.high %v7093_v2, %v7093_v2  ;;  %v7431_v21 = vrot.slane %v7093_v2, %v12416_v25  ;;  %v14193_v19 = vrot.slane %v5229_v17, %v12482_v38  ;;  %9566 = vmatprep.mubr.f32.mxu1 %v8921_v11  ;;  %v8860_v34 = vld [vmem:[#allocation5 + $0x49] sm:$0xff]  ;;  %v14213_v2 = vpop.f32.mrf.mxu1 }
 0x5ab   : > { %8796 = vst [vmem:[#allocation5 + $0x61] sm:$0xff] %v14182_v49  ;;  %v7114_v59 = vrot.slane %v7086_v56, %v12482_v38  ;;  %v7116_v48 = vcombine.high %v7100_v26, %v7100_v26  ;;  %v7117_v22 = vcombine.high %v7107_v51, %v7107_v51  ;;  %v7435_v27 = vrot.slane %v7107_v51, %v12416_v25  ;;  %v8922_v56 = vld [vmem:[#allocation5 + $0x48] sm:$0xff] }
 0x5ac   : > { %9352 = vmatmul.mubr.f32.gmra.mxu0 %v8921_v11  ;;  %8797 = vst [vmem:[#allocation5 + $0x69] sm:$0xff] %v14189_v63  ;;  %v7439_v39 = vrot.slane %v7115_v8, %v12416_v25  ;;  %v7447_v17 = vrot.slane %v7100_v26, %v12416_v25  ;;  %v7700_v45 = vsel %vm654_vm1, %v13848_v61, %v7431_v21 }
 0x5ad   : > { %v14206_v3 = vrot.slane %v7119_v50, %v12482_v38  ;;  %9567 = vmatmul.mubr.f32.gmra.mxu1 %v8889_v35  ;;  %v7118_v37 = vcombine.high %v7114_v59, %v7114_v59  ;;  %v7443_v11 = vrot.slane %v7117_v22, %v12416_v25  ;;  %v7451_v53 = vrot.slane %v7114_v59, %v12416_v25  ;;  %v9330_v59 = vpop.f32.mrf.mxu0 }
 0x5ae   : > { %v7455_v20 = vrot.slane %v7116_v48, %v12416_v25  ;;  %9356 = vmatprep.mubr.f32.mxu0 %v8860_v34  ;;  %v7701_v26 = vsel %vm654_vm1, %v13860_v12, %v7435_v27  ;;  %v15227_v50 = vcombine.high %v13848_v61, %v13848_v61  ;;  %v7704_v8 = vsel %vm654_vm1, %v13851_v24, %v7447_v17  ;;  %v8890_v17 = vld [vmem:[#allocation5 + $0x32] sm:$0xff] }
 0x5af   : > { %v7815_v21 = vadd.f32 %v13036_v47, %v7700_v45  ;;  %9571 = vmatprep.mubr.f32.mxu1 %v8922_v56  ;;  %v7459_v48 = vrot.slane %v7118_v37, %v12416_v25  ;;  %v15228_v22 = vcombine.high %v13860_v12, %v13860_v12  ;;  %v7705_v27 = vsel %vm654_vm1, %v13863_v60, %v7451_v53  ;;  %v9219_v45 = vld [vmem:[#allocation14 + $0x360] sm:$0xff]  ;;  %v14239_v53 = vpop.f32.mrf.mxu0 }
 0x5b0   : > { %v7702_v51 = vsel %vm654_vm1, %v15227_v50, %v7439_v39  ;;  %v15229_v61 = vcombine.high %v13851_v24, %v13851_v24  ;;  %9357 = vmatmul.mubr.f32.gmra.mxu0 %v8922_v56  ;;  %v7816_v34 = vadd.f32 %v13056_v57, %v7701_v26  ;;  %v7819_v12 = vadd.f32 %v13036_v47, %v7704_v8  ;;  %v8923_v59 = vld [vmem:[#allocation5 + $0x50] sm:$0xff] }
 0x5b1   : > { %v7703_v35 = vsel %vm654_vm1, %v15228_v22, %v7443_v11  ;;  %v7817_v37 = vadd.f32 %v13044_v4, %v7702_v51  ;;  %9572 = vmatmul.mubr.f32.gmra.mxu1 %v8890_v17  ;;  %v8861_v11 = vld [vmem:[#allocation5 + $0x51] sm:$0xff]  ;;  %15230 = vst [vmem:[#allocation22_spill] sm:$0xff] %v14239_v53  ;;  %v15231_v24 = vcombine.high %v13863_v60, %v13863_v60  ;;  %v7997_v22 = vmax.f32 %v7815_v21, 0.0  ;;  %v14247_v51 = vpop.f32.mrf.mxu1  ;;  %v9335_v60 = vpop.f32.mrf.mxu0  ;;  %v8891_v21 = vld [vmem:[#allocation5 + $0x3a] sm:$0xff] }
 0x5b2   : > { %v7706_v39 = vsel %vm654_vm1, %v15229_v61, %v7455_v20  ;;  %v7818_v50 = vadd.f32 %v13079_v28, %v7703_v35  ;;  %v7820_v56 = vadd.f32 %v13056_v57, %v7705_v27  ;;  %9361 = vmatprep.mubr.f32.mxu0 %v8861_v11  ;;  %9576 = vmatprep.mubr.f32.mxu1 %v8923_v59  ;;  %v7998_v35 = vmax.f32 %v7816_v34, 0.0 }
 0x5b3   : > { %v7707_v20 = vsel %vm654_vm1, %v15231_v24, %v7459_v48  ;;  %v7821_v26 = vadd.f32 %v13044_v4, %v7706_v39  ;;  %v7999_v61 = vmax.f32 %v7817_v37, 0.0  ;;  %9944 = vmatpush1.msra.mxu1 %v9219_v45  ;;  %9752 = vmatprep.subr.mxu0 %v13722_v18  ;;  %v8001_v53 = vmax.f32 %v7819_v12, 0.0  ;;  %v9202_v39 = vld [vmem:[#allocation14 + $0x2d8] sm:$0xff]  ;;  %v8924_v37 = vld [vmem:[#allocation5 + $0x60] sm:$0xff] }
 0x5b4   : > { %v7822_v8 = vadd.f32 %v13079_v28, %v7707_v20  ;;  %v8000_v17 = vmax.f32 %v7818_v50, 0.0  ;;  %v8002_v48 = vmax.f32 %v7820_v56, 0.0  ;;  %v7134_v27 = vcombine.high %v14193_v19, %v14193_v19  ;;  %9362 = vmatmul.mubr.f32.gmra.mxu0 %v8923_v59  ;;  %9945 = vmatprep.subr.mxu1 %v13722_v18  ;;  %v14262_v56 = vpop.f32.mrf.mxu1 }
 0x5b5   : > { %v8003_v24 = vmax.f32 %v7821_v26, 0.0  ;;  %v8383_v20 = vcombine.low %v7997_v22, %v7998_v35  ;;  %v7135_v45 = vcombine.high %v14206_v3, %v14206_v3  ;;  %9577 = vmatmul.mubr.f32.gmra.mxu1 %v8891_v21  ;;  %9366 = vmatprep.mubr.f32.mxu0 %v14182_v49  ;;  %v7142_v12 = vrot.slane %v14193_v19, %v12482_v38 }
 0x5b6   : > { %v8004_v11 = vmax.f32 %v7822_v8, 0.0  ;;  %v8384_v34 = vcombine.low %v7999_v61, %v8000_v17  ;;  %v8400_v50 = vcombine.low %v8001_v53, %v8002_v48  ;;  %v7149_v59 = vrot.slane %v14206_v3, %v12482_v38  ;;  %9581 = vmatprep.mubr.f32.mxu1 %v8924_v37  ;;  %9753 = vmatpush2.msra.mxu0 %v9202_v39  ;;  %v8892_v3 = vld [vmem:[#allocation5 + $0x4a] sm:$0xff] }
 0x5b7   : > { %v7156_v18 = vrot.slane %v7134_v27, %v12482_v38  ;;  %v8391_v26 = vrot.slane %v8383_v20, %v12425_v52  ;;  %v7163_v49 = vrot.slane %v7135_v45, %v12482_v38  ;;  %v7164_v35 = vcombine.high %v7142_v12, %v7142_v12  ;;  %v14276_v20 = vpop.f32.mrf.mxu1 }
 0x5b8   : > { %v8398_v22 = vrot.slane %v8384_v34, %v12425_v52  ;;  %v8401_v8 = vcombine.low %v8003_v24, %v8004_v11  ;;  %v8408_v53 = vrot.slane %v8400_v50, %v12425_v52  ;;  %v7165_v19 = vcombine.high %v7149_v59, %v7149_v59  ;;  %9367 = vmatmul.mubr.f32.gmra.mxu0 %v8924_v37  ;;  %v8925_v34 = vld [vmem:[#allocation5 + $0x68] sm:$0xff] }
 0x5b9   : > { %v7166_v61 = vcombine.high %v7156_v18, %v7156_v18  ;;  %v7167_v48 = vcombine.high %v7163_v49, %v7163_v49  ;;  %v7463_v27 = vrot.slane %v7142_v12, %v12416_v25  ;;  %9582 = vmatmul.mubr.f32.gmra.mxu1 %v8892_v3  ;;  %v7467_v24 = vrot.slane %v7156_v18, %v12416_v25  ;;  %v8864_v3 = vld [vmem:[#allocation5 + $0x79] sm:$0xff] }
 0x5ba   : > { %v14268_v17 = vcombine.low %v8391_v26, %v8398_v22  ;;  %v8415_v60 = vrot.slane %v8401_v8, %v12425_v52  ;;  %v7471_v21 = vrot.slane %v7164_v35, %v12416_v25  ;;  %v7479_v11 = vrot.slane %v7149_v59, %v12416_v25  ;;  %9371 = vmatprep.mubr.f32.mxu0 %v14189_v63 }
 0x5bb   : > { %v7475_v39 = vrot.slane %v7166_v61, %v12416_v25  ;;  %v7483_v37 = vrot.slane %v7163_v49, %v12416_v25  ;;  %v7487_v50 = vrot.slane %v7165_v19, %v12416_v25  ;;  %v7491_v12 = vrot.slane %v7167_v48, %v12416_v25  ;;  %9586 = vmatprep.mubr.f32.mxu1 %v8925_v34  ;;  %v8893_v49 = vld [vmem:[#allocation5 + $0x52] sm:$0xff] }
 0x5bc   : > { %v14279_v45 = vcombine.low %v8408_v53, %v8415_v60  ;;  %8800 = vst [vmem:[#allocation5 + $0x91] sm:$0xff] %v14268_v17  ;;  %v7708_v18 = vsel %vm654_vm1, %v13887_v31, %v7463_v27  ;;  %v7709_v59 = vsel %vm654_vm1, %v13902_v44, %v7467_v24  ;;  %v15232_v63 = vcombine.high %v13887_v31, %v13887_v31  ;;  %v9218_v60 = vld [vmem:[#allocation14 + $0x358] sm:$0xff] }
 0x5bd   : > { %v15233_v22 = vcombine.high %v13902_v44, %v13902_v44  ;;  %9372 = vmatmul.mubr.f32.gmra.mxu0 %v8925_v34  ;;  %v7712_v53 = vsel %vm654_vm1, %v13899_v23, %v7479_v11  ;;  %v7713_v35 = vsel %vm654_vm1, %v13911_v58, %v7483_v37  ;;  %v15234_v31 = vcombine.high %v13899_v23, %v13899_v23  ;;  %v8926_v23 = vld [vmem:[#allocation5 + $0x78] sm:$0xff] }
 0x5be   : > { %v7710_v26 = vsel %vm654_vm1, %v15232_v63, %v7471_v21  ;;  %8801 = vst [vmem:[#allocation5 + $0x99] sm:$0xff] %v14279_v45  ;;  %v15235_v44 = vcombine.high %v13911_v58, %v13911_v58  ;;  %9587 = vmatmul.mubr.f32.gmra.mxu1 %v8893_v49  ;;  %v7831_v48 = vadd.f32 %v13036_v47, %v7708_v18  ;;  %v8894_v63 = vld [vmem:[#allocation5 + $0x62] sm:$0xff] }
 0x5bf   : > { %v7711_v8 = vsel %vm654_vm1, %v15233_v22, %v7475_v39  ;;  %v7714_v19 = vsel %vm654_vm1, %v15234_v31, %v7487_v50  ;;  %v7832_v27 = vadd.f32 %v13056_v57, %v7709_v59  ;;  %v7833_v24 = vadd.f32 %v13044_v4, %v7710_v26  ;;  %v11638_v39 = vpop.f32.mrf.mxu1  ;;  %9376 = vmatprep.mubr.f32.mxu0 %v8864_v3  ;;  %v8865_v26 = vld [vmem:[#allocation5 + $0x81] sm:$0xff] }
 0x5c0   : > { %v7715_v61 = vsel %vm654_vm1, %v15235_v44, %v7491_v12  ;;  %v7834_v21 = vadd.f32 %v13079_v28, %v7711_v8  ;;  %v7835_v11 = vadd.f32 %v13036_v47, %v7712_v53  ;;  %v7836_v58 = vadd.f32 %v13056_v57, %v7713_v35  ;;  %9591 = vmatprep.mubr.f32.mxu1 %v8926_v23  ;;  %v8927_v53 = vld [vmem:[#allocation5 + $0x80] sm:$0xff] }
 0x5c1   : > { %v7837_v34 = vadd.f32 %v13044_v4, %v7714_v19  ;;  %v7838_v37 = vadd.f32 %v13079_v28, %v7715_v61  ;;  %v8013_v50 = vmax.f32 %v7831_v48, 0.0  ;;  %v8014_v12 = vmax.f32 %v7832_v27, 0.0  ;;  %9377 = vmatmul.mubr.f32.gmra.mxu0 %v8926_v23  ;;  %9946 = vmatpush1.msra.mxu1 %v9218_v60  ;;  %v11639_v3 = vpop.f32.mrf.mxu1 }
 0x5c2   : > { %v8015_v18 = vmax.f32 %v7833_v24, 0.0  ;;  %v8016_v59 = vmax.f32 %v7834_v21, 0.0  ;;  %v8017_v22 = vmax.f32 %v7835_v11, 0.0  ;;  %v8018_v8 = vmax.f32 %v7836_v58, 0.0  ;;  %9592 = vmatmul.mubr.f32.gmra.mxu1 %v8894_v63  ;;  %9381 = vmatprep.mubr.f32.mxu0 %v8865_v26  ;;  %v14326_v21 = vld [vmem:[#allocation4] sm:$0xff] }
 0x5c3   : > { %v8019_v49 = vmax.f32 %v7837_v34, 0.0  ;;  %v8020_v31 = vmax.f32 %v7838_v37, 0.0  ;;  %v8451_v35 = vcombine.low %v8013_v50, %v8014_v12  ;;  %v11631_v44 = vadd.f32 %v14186_v43, %v14166_v16  ;;  %9596 = vmatprep.mubr.f32.mxu1 %v8927_v53  ;;  %9947 = vmatprep.subr.mxu1 %v14326_v21  ;;  %v8895_v43 = vld [vmem:[#allocation5 + $0x6a] sm:$0xff] }
 0x5c4   : > { %v8452_v19 = vcombine.low %v8015_v18, %v8016_v59  ;;  %v11581_v61 = vadd.f32 %v14157_v30, %v14121_v7  ;;  %v8468_v48 = vcombine.low %v8017_v22, %v8018_v8  ;;  %v11634_v60 = vadd.f32 %v14247_v51, %v14213_v2  ;;  %9754 = vmatprep.subr.mxu0 %v14326_v21 }
 0x5c5   : > { %v8469_v27 = vcombine.low %v8019_v49, %v8020_v31  ;;  %v11584_v24 = vadd.f32 %v14195_v42, %v14174_v55  ;;  %v8459_v23 = vrot.slane %v8451_v35, %v12425_v52  ;;  %v5234_v7 = vadd.f32 %v11631_v44, %v14027_v32  ;;  %9382 = vmatmul.mubr.f32.gmra.mxu0 %v8927_v53  ;;  %v8928_v32 = vld [vmem:[#allocation5 + $0x90] sm:$0xff] }
 0x5c6   : > { %v8466_v16 = vrot.slane %v8452_v19, %v12425_v52  ;;  %v11637_v30 = vadd.f32 %v14276_v20, %v14262_v56  ;;  %v8476_v2 = vrot.slane %v8468_v48, %v12425_v52  ;;  %v5239_v55 = vadd.f32 %v11634_v60, %v14172_v29  ;;  %9597 = vmatmul.mubr.f32.gmra.mxu1 %v8895_v43  ;;  %v8929_v19 = vld [vmem:[#allocation5 + $0x98] sm:$0xff] }
 0x5c7   : > { %v8483_v51 = vrot.slane %v8469_v27, %v12425_v52  ;;  %v11640_v42 = vadd.f32 %v11639_v3, %v11638_v39  ;;  %v7168_v58 = vcombine.high %v5234_v7, %v5234_v7  ;;  %v7175_v34 = vrot.slane %v5234_v7, %v12482_v38  ;;  %9386 = vmatprep.mubr.f32.mxu0 %v14268_v17  ;;  %v8896_v17 = vld [vmem:[#allocation5 + $0x7a] sm:$0xff] }
 0x5c8   : > { %v14337_v11 = vcombine.low %v8459_v23, %v8466_v16  ;;  %v14340_v37 = vadd.f32 %v11637_v30, %v11581_v61  ;;  %v7217_v20 = vcombine.high %v5239_v55, %v5239_v55  ;;  %v7224_v50 = vrot.slane %v5239_v55, %v12482_v38  ;;  %9601 = vmatprep.mubr.f32.mxu1 %v8928_v32  ;;  %v8897_v16 = vld [vmem:[#allocation5 + $0x82] sm:$0xff] }
 0x5c9   : > { %v14343_v56 = vcombine.low %v8476_v2, %v8483_v51  ;;  %v14346_v12 = vadd.f32 %v11640_v42, %v11584_v24  ;;  %v7182_v29 = vrot.slane %v7168_v58, %v12482_v38  ;;  %v7183_v39 = vcombine.high %v7175_v34, %v7175_v34  ;;  %9387 = vmatmul.mubr.f32.gmra.mxu0 %v8928_v32  ;;  %v8868_v2 = vld [vmem:[#allocation5 + $0xa9] sm:$0xff] }
 0x5ca   : > { %8804 = vst [vmem:[#allocation5 + $0xc1] sm:$0xff] %v14337_v11  ;;  %v7191_v18 = vrot.slane %v7175_v34, %v12482_v38  ;;  %v7266_v59 = vcombine.high %v14340_v37, %v14340_v37  ;;  %v7231_v63 = vrot.slane %v7217_v20, %v12482_v38  ;;  %v7232_v26 = vcombine.high %v7224_v50, %v7224_v50  ;;  %v8930_v34 = vld [vmem:[#allocation5 + $0xa8] sm:$0xff] }
 0x5cb   : > { %8805 = vst [vmem:[#allocation5 + $0xc9] sm:$0xff] %v14343_v56  ;;  %v14356_v22 = vrot.slane %v7224_v50, %v12482_v38  ;;  %v14360_v8 = vrot.slane %v14340_v37, %v12482_v38  ;;  %9602 = vmatmul.mubr.f32.gmra.mxu1 %v8896_v17  ;;  %v7184_v49 = vcombine.high %v7182_v29, %v7182_v29 }
 0x5cc   : > { %v7198_v31 = vrot.slane %v7182_v29, %v12482_v38  ;;  %v7205_v53 = vrot.slane %v7183_v39, %v12482_v38  ;;  %v7213_v35 = vcombine.high %v7191_v18, %v7191_v18  ;;  %9391 = vmatprep.mubr.f32.mxu0 %v14279_v45  ;;  %v7495_v44 = vrot.slane %v7191_v18, %v12416_v25 }
 0x5cd   : > { %v7233_v61 = vcombine.high %v7231_v63, %v7231_v63  ;;  %v14367_v3 = vrot.slane %v7231_v63, %v12482_v38  ;;  %v14370_v48 = vrot.slane %v7232_v26, %v12482_v38  ;;  %9606 = vmatprep.mubr.f32.mxu1 %v8929_v19  ;;  %v7212_v27 = vrot.slane %v7184_v49, %v12482_v38 }
 0x5ce   : > { %v7214_v60 = vcombine.high %v7198_v31, %v7198_v31  ;;  %v7215_v24 = vcombine.high %v7205_v53, %v7205_v53  ;;  %v7499_v23 = vrot.slane %v7205_v53, %v12416_v25  ;;  %9392 = vmatmul.mubr.f32.gmra.mxu0 %v8929_v19  ;;  %v7503_v45 = vrot.slane %v7213_v35, %v12416_v25  ;;  %v9217_v53 = vld [vmem:[#allocation14 + $0x350] sm:$0xff] }
 0x5cf   : > { %v7511_v7 = vrot.slane %v7198_v31, %v12416_v25  ;;  %v7716_v30 = vsel %vm654_vm1, %v13908_v0, %v7495_v44  ;;  %v14379_v43 = vrot.slane %v7233_v61, %v12482_v38  ;;  %9607 = vmatmul.mubr.f32.gmra.mxu1 %v8897_v16  ;;  %v7216_v51 = vcombine.high %v7212_v27, %v7212_v27  ;;  %v14404_v31 = vld [vmem:[#allocation5 + $0x92] sm:$0xff] }
 0x5d0   : > { %v7507_v55 = vrot.slane %v7215_v24, %v12416_v25  ;;  %v7515_v42 = vrot.slane %v7212_v27, %v12416_v25  ;;  %v7519_v58 = vrot.slane %v7214_v60, %v12416_v25  ;;  %9396 = vmatprep.mubr.f32.mxu0 %v8868_v2  ;;  %v7717_v32 = vsel %vm654_vm1, %v13922_v15, %v7499_v23  ;;  %v8869_v61 = vld [vmem:[#allocation5 + $0xb1] sm:$0xff] }
 0x5d1   : > { %v15236_v20 = vcombine.high %v13908_v0, %v13908_v0  ;;  %v7720_v29 = vsel %vm654_vm1, %v13919_v9, %v7511_v7  ;;  %v7847_v39 = vadd.f32 %v13036_v47, %v7716_v30  ;;  %9611 = vmatprep.mubr.f32.mxu1 %v8930_v34  ;;  %v7523_v18 = vrot.slane %v7216_v51, %v12416_v25  ;;  %v8931_v27 = vld [vmem:[#allocation5 + $0xb0] sm:$0xff] }
 0x5d2   : > { %v15237_v17 = vcombine.high %v13922_v15, %v13922_v15  ;;  %v7721_v26 = vsel %vm654_vm1, %v13937_v54, %v7515_v42  ;;  %v15238_v0 = vcombine.high %v13919_v9, %v13919_v9  ;;  %9397 = vmatmul.mubr.f32.gmra.mxu0 %v8930_v34  ;;  %v7848_v35 = vadd.f32 %v13056_v57, %v7717_v32  ;;  %v14423_v34 = vld [vmem:[#allocation5 + $0x9a] sm:$0xff]  ;;  %v9201_v32 = vld [vmem:[#allocation14 + $0x2d0] sm:$0xff] }
 0x5d3   : > { %v7718_v50 = vsel %vm654_vm1, %v15236_v20, %v7503_v45  ;;  %v7851_v44 = vadd.f32 %v13036_v47, %v7720_v29  ;;  %9612 = vmatmul.mubr.f32.gmra.mxu1 %v14404_v31  ;;  %v15239_v9 = vcombine.high %v13937_v54, %v13937_v54  ;;  %v7852_v24 = vadd.f32 %v13056_v57, %v7721_v26  ;;  %v14417_v45 = vpop.f32.mrf.mxu0 }
 0x5d4   : > { %v7719_v63 = vsel %vm654_vm1, %v15237_v17, %v7507_v55  ;;  %v7722_v49 = vsel %vm654_vm1, %v15238_v0, %v7519_v58  ;;  %v7849_v19 = vadd.f32 %v13044_v4, %v7718_v50  ;;  %v8029_v16 = vmax.f32 %v7847_v39, 0.0  ;;  %9401 = vmatprep.mubr.f32.mxu0 %v8869_v61  ;;  %9616 = vmatprep.mubr.f32.mxu1 %v8931_v27  ;;  %v14430_v17 = vld [vmem:[#allocation5 + $0xc0] sm:$0xff] }
 0x5d5   : > { %v7850_v15 = vadd.f32 %v13079_v28, %v7719_v63  ;;  %v7723_v60 = vsel %vm654_vm1, %v15239_v9, %v7523_v18  ;;  %v7853_v23 = vadd.f32 %v13044_v4, %v7722_v49  ;;  %v8030_v30 = vmax.f32 %v7848_v35, 0.0  ;;  %9948 = vmatpush1.msra.mxu1 %v9217_v53  ;;  %v9340_v20 = vpop.f32.mrf.mxu0  ;;  %9755 = vmatpush2.msra.mxu0 %v9201_v32  ;;  %v14451_v9 = vld [vmem:[#allocation5 + $0xaa] sm:$0xff] }
 0x5d6   : > { %v7854_v7 = vadd.f32 %v13079_v28, %v7723_v60  ;;  %v8031_v2 = vmax.f32 %v7849_v19, 0.0  ;;  %v8033_v54 = vmax.f32 %v7851_v44, 0.0  ;;  %v8034_v55 = vmax.f32 %v7852_v24, 0.0  ;;  %9402 = vmatmul.mubr.f32.gmra.mxu0 %v8931_v27  ;;  %9949 = vmatprep.subr.mxu1 %v14326_v21 }
 0x5d7   : > { %v8032_v51 = vmax.f32 %v7850_v15, 0.0  ;;  %v8035_v42 = vmax.f32 %v7853_v23, 0.0  ;;  %v7262_v58 = vcombine.high %v14356_v22, %v14356_v22  ;;  %v8519_v29 = vcombine.low %v8029_v16, %v8030_v30  ;;  %9617 = vmatmul.mubr.f32.gmra.mxu1 %v14423_v34  ;;  %9406 = vmatprep.mubr.f32.mxu0 %v14337_v11  ;;  %v14439_v53 = vpop.f32.mrf.mxu0 }
 0x5d8   : > { %v8036_v50 = vmax.f32 %v7854_v7, 0.0  ;;  %v7263_v18 = vcombine.high %v14367_v3, %v14367_v3  ;;  %v8536_v63 = vcombine.low %v8033_v54, %v8034_v55  ;;  %v7264_v26 = vcombine.high %v14370_v48, %v14370_v48  ;;  %9621 = vmatprep.mubr.f32.mxu1 %v14430_v17  ;;  %9756 = vmatprep.subr.mxu0 %v14326_v21 }
 0x5d9   : > { %v8520_v39 = vcombine.low %v8031_v2, %v8032_v51  ;;  %v7265_v0 = vcombine.high %v14379_v43, %v14379_v43  ;;  %v7527_v49 = vrot.slane %v14356_v22, %v12416_v25  ;;  %v8527_v35 = vrot.slane %v8519_v29, %v12425_v52  ;;  %v9345_v60 = vpop.f32.mrf.mxu0 }
 0x5da   : > { %v8537_v19 = vcombine.low %v8035_v42, %v8036_v50  ;;  %v7531_v15 = vrot.slane %v14370_v48, %v12416_v25  ;;  %v8544_v44 = vrot.slane %v8536_v63, %v12425_v52  ;;  %v7535_v61 = vrot.slane %v7262_v58, %v12416_v25  ;;  %9407 = vmatmul.mubr.f32.gmra.mxu0 %v14430_v17 }
 0x5db   : > { %v8534_v11 = vrot.slane %v8520_v39, %v12425_v52  ;;  %v7539_v27 = vrot.slane %v7264_v26, %v12416_v25  ;;  %v7543_v22 = vrot.slane %v14367_v3, %v12416_v25  ;;  %v7547_v48 = vrot.slane %v14379_v43, %v12416_v25  ;;  %9622 = vmatmul.mubr.f32.gmra.mxu1 %v14451_v9  ;;  %v14470_v43 = vld [vmem:[#allocation5 + $0xc8] sm:$0xff]  ;;  %v14495_v39 = vld [vmem:[#allocation5 + $0xb2] sm:$0xff] }
 0x5dc   : > { %v8551_v23 = vrot.slane %v8537_v19, %v12425_v52  ;;  %v7551_v16 = vrot.slane %v7263_v18, %v12416_v25  ;;  %v7555_v7 = vrot.slane %v7265_v0, %v12416_v25  ;;  %v7724_v3 = vsel %vm654_vm1, %v13934_v46, %v7527_v49  ;;  %9411 = vmatprep.mubr.f32.mxu0 %v14343_v56  ;;  %v9216_v18 = vld [vmem:[#allocation14 + $0x348] sm:$0xff] }
 0x5dd   : > { %v14453_v24 = vcombine.low %v8527_v35, %v8534_v11  ;;  %v7725_v30 = vsel %vm654_vm1, %v13947_v40, %v7531_v15  ;;  %v15240_v2 = vcombine.high %v13934_v46, %v13934_v46  ;;  %v15241_v55 = vcombine.high %v13947_v40, %v13947_v40  ;;  %9626 = vmatprep.mubr.f32.mxu1 %v14470_v43  ;;  %v14503_v0 = vld [vmem:[#allocation5 + $0xd9] sm:$0xff] }
 0x5de   : > { %v14472_v54 = vcombine.low %v8544_v44, %v8551_v23  ;;  %v7728_v58 = vsel %vm654_vm1, %v13944_v5, %v7543_v22  ;;  %v7729_v46 = vsel %vm654_vm1, %v13955_v10, %v7547_v48  ;;  %v15242_v56 = vcombine.high %v13944_v5, %v13944_v5  ;;  %9412 = vmatmul.mubr.f32.gmra.mxu0 %v14470_v43  ;;  %v14505_v49 = vld [vmem:[#allocation5 + $0xd8] sm:$0xff] }
 0x5df   : > { %v7726_v51 = vsel %vm654_vm1, %v15240_v2, %v7535_v61  ;;  %8808 = vst [vmem:[#allocation5 + $0xf1] sm:$0xff] %v14453_v24  ;;  %v7727_v42 = vsel %vm654_vm1, %v15241_v55, %v7539_v27  ;;  %v15243_v20 = vcombine.high %v13955_v10, %v13955_v10  ;;  %v7863_v50 = vadd.f32 %v13036_v47, %v7724_v3  ;;  %v14525_v55 = vld [vmem:[#allocation5 + $0xe1] sm:$0xff] }
 0x5e0   : > { %v7730_v32 = vsel %vm654_vm1, %v15242_v56, %v7551_v16  ;;  %v7864_v29 = vadd.f32 %v13056_v57, %v7725_v30  ;;  %8809 = vst [vmem:[#allocation5 + $0xf9] sm:$0xff] %v14472_v54  ;;  %v7865_v5 = vadd.f32 %v13044_v4, %v7726_v51  ;;  %v7866_v63 = vadd.f32 %v13079_v28, %v7727_v42 }
 0x5e1   : > { %v7731_v40 = vsel %vm654_vm1, %v15243_v20, %v7555_v7  ;;  %v7867_v26 = vadd.f32 %v13036_v47, %v7728_v58  ;;  %v7868_v10 = vadd.f32 %v13056_v57, %v7729_v46  ;;  %9627 = vmatmul.mubr.f32.gmra.mxu1 %v14495_v39  ;;  %v7869_v35 = vadd.f32 %v13044_v4, %v7730_v32  ;;  %v14517_v7 = vld [vmem:[#allocation5 + $0xc2] sm:$0xff] }
 0x5e2   : > { %v7870_v11 = vadd.f32 %v13079_v28, %v7731_v40  ;;  %v8045_v19 = vmax.f32 %v7863_v50, 0.0  ;;  %v8046_v15 = vmax.f32 %v7864_v29, 0.0  ;;  %9416 = vmatprep.mubr.f32.mxu0 %v14503_v0  ;;  %9631 = vmatprep.mubr.f32.mxu1 %v14505_v49  ;;  %v8047_v44 = vmax.f32 %v7865_v5, 0.0  ;;  %v14530_v46 = vld [vmem:[#allocation5 + $0xe0] sm:$0xff]  ;;  %v14540_v5 = vld [vmem:[#allocation5 + $0xca] sm:$0xff] }
 0x5e3   : > { %v8048_v61 = vmax.f32 %v7866_v63, 0.0  ;;  %v8049_v27 = vmax.f32 %v7867_v26, 0.0  ;;  %v8050_v22 = vmax.f32 %v7868_v10, 0.0  ;;  %9950 = vmatpush1.msra.mxu1 %v9216_v18  ;;  %v8051_v60 = vmax.f32 %v7869_v35, 0.0  ;;  %9417 = vmatmul.mubr.f32.gmra.mxu0 %v14505_v49 }
 0x5e4   : > { %v8052_v23 = vmax.f32 %v7870_v11, 0.0  ;;  %v8587_v48 = vcombine.low %v8045_v19, %v8046_v15  ;;  %v7280_v16 = vrot.slane %v7266_v59, %v12482_v38  ;;  %9951 = vmatprep.subr.mxu1 %v14326_v21  ;;  %v7281_v2 = vcombine.high %v14360_v8, %v14360_v8  ;;  %9421 = vmatprep.mubr.f32.mxu0 %v14525_v55 }
 0x5e5   : > { %v8588_v3 = vcombine.low %v8047_v44, %v8048_v61  ;;  %v8604_v30 = vcombine.low %v8049_v27, %v8050_v22  ;;  %v7289_v51 = vrot.slane %v14360_v8, %v12482_v38  ;;  %9632 = vmatmul.mubr.f32.gmra.mxu1 %v14517_v7 }
 0x5e6   : > { %v8595_v37 = vrot.slane %v8587_v48, %v12425_v52  ;;  %v8605_v59 = vcombine.low %v8051_v60, %v8052_v23  ;;  %v7282_v42 = vcombine.high %v7280_v16, %v7280_v16  ;;  %v7296_v58 = vrot.slane %v7280_v16, %v12482_v38  ;;  %9636 = vmatprep.mubr.f32.mxu1 %v14530_v46  ;;  %v14552_v61 = vld [vmem:[#allocation5 + $0xf0] sm:$0xff]  ;;  %v14562_v48 = vpop.f32.mrf.mxu1 }
 0x5e7   : > { %v8602_v56 = vrot.slane %v8588_v3, %v12425_v52  ;;  %v8612_v32 = vrot.slane %v8604_v30, %v12425_v52  ;;  %v7303_v8 = vrot.slane %v7281_v2, %v12482_v38  ;;  %v7311_v20 = vcombine.high %v7289_v51, %v7289_v51  ;;  %9422 = vmatmul.mubr.f32.gmra.mxu0 %v14530_v46 }
 0x5e8   : > { %v8619_v40 = vrot.slane %v8605_v59, %v12425_v52  ;;  %v7310_v50 = vrot.slane %v7282_v42, %v12482_v38  ;;  %v7312_v29 = vcombine.high %v7296_v58, %v7296_v58  ;;  %v7559_v18 = vrot.slane %v7289_v51, %v12416_v25  ;;  %9426 = vmatprep.mubr.f32.mxu0 %v14453_v24  ;;  %v14575_v51 = vld [vmem:[#allocation5 + $0xda] sm:$0xff] }
 0x5e9   : > { %v14542_v63 = vcombine.low %v8595_v37, %v8602_v56  ;;  %v7313_v26 = vcombine.high %v7303_v8, %v7303_v8  ;;  %v7563_v10 = vrot.slane %v7303_v8, %v12416_v25  ;;  %v7567_v35 = vrot.slane %v7311_v20, %v12416_v25  ;;  %9637 = vmatmul.mubr.f32.gmra.mxu1 %v14540_v5  ;;  %v9215_v37 = vld [vmem:[#allocation14 + $0x340] sm:$0xff]  ;;  %v9555_v8 = vpop.f32.mrf.mxu1 }
 0x5ea   : > { %v14547_v11 = vcombine.low %v8612_v32, %v8619_v40  ;;  %v7314_v19 = vcombine.high %v7310_v50, %v7310_v50  ;;  %v7575_v15 = vrot.slane %v7296_v58, %v12416_v25  ;;  %v7579_v44 = vrot.slane %v7310_v50, %v12416_v25  ;;  %9641 = vmatprep.mubr.f32.mxu1 %v14552_v61 }
 0x5eb   : > { %8812 = vst [vmem:[#allocation5 + $0x121] sm:$0xff] %v14542_v63  ;;  %v7571_v27 = vrot.slane %v7313_v26, %v12416_v25  ;;  %v7583_v22 = vrot.slane %v7312_v29, %v12416_v25  ;;  %v7732_v60 = vsel %vm654_vm1, %v13965_v13, %v7559_v18  ;;  %v7733_v23 = vsel %vm654_vm1, %v13978_v62, %v7563_v10  ;;  %v14596_v29 = vld [vmem:[#allocation5 + $0xf8] sm:$0xff] }
 0x5ec   : > { %8813 = vst [vmem:[#allocation5 + $0x129] sm:$0xff] %v14547_v11  ;;  %v7587_v24 = vrot.slane %v7314_v19, %v12416_v25  ;;  %v15244_v16 = vcombine.high %v13965_v13, %v13965_v13  ;;  %v7736_v30 = vsel %vm654_vm1, %v13975_v6, %v7575_v15  ;;  %v7737_v2 = vsel %vm654_vm1, %v13988_v1, %v7579_v44  ;;  %v9200_v19 = vld [vmem:[#allocation14 + $0x2c8] sm:$0xff] }
 0x5ed   : > { %9427 = vmatmul.mubr.f32.gmra.mxu0 %v14552_v61  ;;  %v15245_v59 = vcombine.high %v13978_v62, %v13978_v62  ;;  %v15246_v13 = vcombine.high %v13975_v6, %v13975_v6  ;;  %v7879_v56 = vadd.f32 %v13036_v47, %v7732_v60  ;;  %v7880_v32 = vadd.f32 %v13056_v57, %v7733_v23  ;;  %v9214_v60 = vld [vmem:[#allocation14 + $0x338] sm:$0xff] }
 0x5ee   : > { %v7734_v3 = vsel %vm654_vm1, %v15244_v16, %v7567_v35  ;;  %9642 = vmatmul.mubr.f32.gmra.mxu1 %v14575_v51  ;;  %v15247_v20 = vcombine.high %v13988_v1, %v13988_v1  ;;  %v7883_v6 = vadd.f32 %v13036_v47, %v7736_v30  ;;  %9431 = vmatprep.mubr.f32.mxu0 %v14472_v54  ;;  %v14602_v1 = vld [vmem:[#allocation5 + $0xe2] sm:$0xff] }
 0x5ef   : > { %v7735_v42 = vsel %vm654_vm1, %v15245_v59, %v7571_v27  ;;  %v7738_v58 = vsel %vm654_vm1, %v15246_v13, %v7583_v22  ;;  %v7881_v62 = vadd.f32 %v13044_v4, %v7734_v3  ;;  %v7884_v18 = vadd.f32 %v13056_v57, %v7737_v2  ;;  %9646 = vmatprep.mubr.f32.mxu1 %v14596_v29  ;;  %v14605_v54 = vld [vmem:[#allocation5 + $0x109] sm:$0xff] }
 0x5f0   : > { %v7739_v40 = vsel %vm654_vm1, %v15247_v20, %v7587_v24  ;;  %v7882_v50 = vadd.f32 %v13079_v28, %v7735_v42  ;;  %v7885_v26 = vadd.f32 %v13044_v4, %v7738_v58  ;;  %v8061_v35 = vmax.f32 %v7879_v56, 0.0  ;;  %9952 = vmatpush1.msra.mxu1 %v9215_v37  ;;  %v14612_v30 = vld [vmem:[#allocation5 + $0x108] sm:$0xff]  ;;  %9757 = vmatpush2.msra.mxu0 %v9200_v19 }
 0x5f1   : > { %v7886_v10 = vadd.f32 %v13079_v28, %v7739_v40  ;;  %v8062_v15 = vmax.f32 %v7880_v32, 0.0  ;;  %v8063_v44 = vmax.f32 %v7881_v62, 0.0  ;;  %v8065_v22 = vmax.f32 %v7883_v6, 0.0  ;;  %9432 = vmatmul.mubr.f32.gmra.mxu0 %v14596_v29  ;;  %9953 = vmatprep.subr.mxu1 %v14326_v21 }
 0x5f2   : > { %v8064_v27 = vmax.f32 %v7882_v50, 0.0  ;;  %v8066_v23 = vmax.f32 %v7884_v18, 0.0  ;;  %v8067_v24 = vmax.f32 %v7885_v26, 0.0  ;;  %v7315_v3 = vcombine.high %v14346_v12, %v14346_v12  ;;  %9647 = vmatmul.mubr.f32.gmra.mxu1 %v14602_v1  ;;  %9436 = vmatprep.mubr.f32.mxu0 %v14605_v54  ;;  %v14629_v18 = vld [vmem:[#allocation5 + $0x111] sm:$0xff] }
 0x5f3   : > { %v8068_v16 = vmax.f32 %v7886_v10, 0.0  ;;  %v8655_v2 = vcombine.low %v8061_v35, %v8062_v15  ;;  %v7322_v59 = vrot.slane %v14346_v12, %v12482_v38  ;;  %9651 = vmatprep.mubr.f32.mxu1 %v14612_v30  ;;  %9954 = vmatpush1.msra.mxu1 %v9214_v60  ;;  %v14623_v12 = vld [vmem:[#allocation5 + $0xf2] sm:$0xff] }
 0x5f4   : > { %v8656_v37 = vcombine.low %v8063_v44, %v8064_v27  ;;  %v8672_v42 = vcombine.low %v8065_v22, %v8066_v23  ;;  %v7329_v58 = vrot.slane %v7315_v3, %v12482_v38  ;;  %9758 = vmatprep.subr.mxu0 %v14326_v21  ;;  %v14636_v15 = vld [vmem:[#allocation5 + $0x110] sm:$0xff]  ;;  %v9213_v44 = vld [vmem:[#allocation14 + $0x330] sm:$0xff]  ;;  %9955 = vmatprep.subr.mxu1 %v14326_v21 }
 0x5f5   : > { %v8673_v13 = vcombine.low %v8067_v24, %v8068_v16  ;;  %v8663_v56 = vrot.slane %v8655_v2, %v12425_v52  ;;  %v7330_v8 = vcombine.high %v7322_v59, %v7322_v59  ;;  %v7338_v20 = vrot.slane %v7322_v59, %v12482_v38  ;;  %9437 = vmatmul.mubr.f32.gmra.mxu0 %v14612_v30 }
 0x5f6   : > { %v8670_v32 = vrot.slane %v8656_v37, %v12425_v52  ;;  %v8680_v40 = vrot.slane %v8672_v42, %v12425_v52  ;;  %v7331_v50 = vcombine.high %v7329_v58, %v7329_v58  ;;  %v7345_v6 = vrot.slane %v7329_v58, %v12482_v38  ;;  %9652 = vmatmul.mubr.f32.gmra.mxu1 %v14623_v12  ;;  %v15248_v42 = vld [vmem:[#allocation21_spill] sm:$0xff] }
 0x5f7   : > { %v8687_v62 = vrot.slane %v8673_v13, %v12425_v52  ;;  %v7352_v10 = vrot.slane %v7330_v8, %v12482_v38  ;;  %v7360_v35 = vcombine.high %v7338_v20, %v7338_v20  ;;  %v7591_v19 = vrot.slane %v7338_v20, %v12416_v25  ;;  %9441 = vmatprep.mubr.f32.mxu0 %v14629_v18  ;;  %v9199_v58 = vld [vmem:[#allocation14 + $0x2c0] sm:$0xff] }
 0x5f8   : > { %v14631_v26 = vcombine.low %v8663_v56, %v8670_v32  ;;  %v7359_v22 = vrot.slane %v7331_v50, %v12482_v38  ;;  %v7361_v60 = vcombine.high %v7345_v6, %v7345_v6  ;;  %v7607_v23 = vrot.slane %v7345_v6, %v12416_v25  ;;  %9656 = vmatprep.mubr.f32.mxu1 %v14636_v15 }
 0x5f9   : > { %v14638_v27 = vcombine.low %v8680_v40, %v8687_v62  ;;  %v7362_v24 = vcombine.high %v7352_v10, %v7352_v10  ;;  %v7595_v16 = vrot.slane %v7352_v10, %v12416_v25  ;;  %v7599_v3 = vrot.slane %v7360_v35, %v12416_v25  ;;  %9956 = vmatpush1.msra.mxu1 %v9213_v44  ;;  %v14663_v62 = vld [vmem:[#allocation5 + $0xfa] sm:$0xff] }
 0x5fa   : > { %8816 = vst [vmem:[#allocation5 + $0x151] sm:$0xff] %v14631_v26  ;;  %v7740_v2 = vsel %vm654_vm1, %v13985_v14, %v7591_v19  ;;  %v7363_v38 = vcombine.high %v7359_v22, %v7359_v22  ;;  %v7611_v37 = vrot.slane %v7359_v22, %v12416_v25  ;;  %v7615_v59 = vrot.slane %v7361_v60, %v12416_v25  ;;  %v9212_v19 = vld [vmem:[#allocation14 + $0x328] sm:$0xff] }
 0x5fb   : > { %8817 = vst [vmem:[#allocation5 + $0x159] sm:$0xff] %v14638_v27  ;;  %v7744_v13 = vsel %vm654_vm1, %v15248_v42, %v7607_v23  ;;  %v7603_v56 = vrot.slane %v7362_v24, %v12416_v25  ;;  %v7741_v32 = vsel %vm654_vm1, %v14001_v41, %v7595_v16  ;;  %v15249_v8 = vcombine.high %v13985_v14, %v13985_v14 }
 0x5fc   : > { %v7895_v40 = vadd.f32 %v13036_v47, %v7740_v2  ;;  %9442 = vmatmul.mubr.f32.gmra.mxu0 %v14636_v15  ;;  %v7619_v50 = vrot.slane %v7363_v38, %v12416_v25  ;;  %v7745_v6 = vsel %vm654_vm1, %v14012_v36, %v7611_v37  ;;  %v15250_v10 = vcombine.high %v15248_v42, %v15248_v42  ;;  %v9211_v38 = vld [vmem:[#allocation14 + $0x320] sm:$0xff] }
 0x5fd   : > { %v7742_v20 = vsel %vm654_vm1, %v15249_v8, %v7599_v3  ;;  %v7896_v14 = vadd.f32 %v13056_v57, %v7741_v32  ;;  %9657 = vmatmul.mubr.f32.gmra.mxu1 %v14663_v62  ;;  %v15251_v44 = vcombine.high %v14001_v41, %v14001_v41  ;;  %v7899_v60 = vadd.f32 %v13036_v47, %v7744_v13  ;;  %v14689_v41 = vld [vmem:[#allocation5 + $0x120] sm:$0xff]  ;;  %v9210_v32 = vld [vmem:[#allocation14 + $0x318] sm:$0xff] }
 0x5fe   : > { %v7746_v35 = vsel %vm654_vm1, %v15250_v10, %v7615_v59  ;;  %v7897_v25 = vadd.f32 %v13044_v4, %v7742_v20  ;;  %v7900_v23 = vadd.f32 %v13056_v57, %v7745_v6  ;;  %9759 = vmatpush2.msra.mxu0 %v9199_v58  ;;  %v15252_v24 = vcombine.high %v14012_v36, %v14012_v36  ;;  %v9198_v36 = vld [vmem:[#allocation14 + $0x2b8] sm:$0xff]  ;;  %v9209_v6 = vld [vmem:[#allocation14 + $0x310] sm:$0xff] }
 0x5ff   : > { %v7743_v22 = vsel %vm654_vm1, %v15251_v44, %v7603_v56  ;;  %v7901_v2 = vadd.f32 %v13044_v4, %v7746_v35  ;;  %9957 = vmatprep.subr.mxu1 %v14326_v21  ;;  %9446 = vmatprep.mubr.f32.mxu0 %v14542_v63  ;;  %v8077_v57 = vmax.f32 %v7895_v40, 0.0  ;;  %v8078_v37 = vmax.f32 %v7896_v14, 0.0  ;;  %v9197_v14 = vld [vmem:[#allocation14 + $0x2b0] sm:$0xff] }
 0x600   : > { %v7747_v16 = vsel %vm654_vm1, %v15252_v24, %v7619_v50  ;;  %v7898_v3 = vadd.f32 %v13079_v28, %v7743_v22  ;;  %9661 = vmatprep.mubr.f32.mxu1 %v14689_v41  ;;  %9958 = vmatpush1.msra.mxu1 %v9212_v19  ;;  %v8079_v59 = vmax.f32 %v7897_v25, 0.0  ;;  %v8081_v13 = vmax.f32 %v7899_v60, 0.0  ;;  %v14701_v50 = vld [vmem:[#allocation5 + $0x128] sm:$0xff]  ;;  %v14711_v22 = vld [vmem:[#allocation5 + $0x112] sm:$0xff]  ;;  %v9208_v25 = vld [vmem:[#allocation14 + $0x308] sm:$0xff] }
 0x601   : > { %v7902_v47 = vadd.f32 %v13079_v28, %v7747_v16  ;;  %v8082_v58 = vmax.f32 %v7900_v23, 0.0  ;;  %9959 = vmatprep.subr.mxu1 %v14326_v21  ;;  %9760 = vmatprep.subr.mxu0 %v14326_v21  ;;  %v8083_v4 = vmax.f32 %v7901_v2, 0.0  ;;  %v8723_v56 = vcombine.low %v8077_v57, %v8078_v37  ;;  %v14696_v28 = vld [vmem:[#allocation5 + $0x10a] sm:$0xff]  ;;  %v14714_v23 = vld [vmem:[#allocation5 + $0x139] sm:$0xff]  ;;  %v9237_v57 = vld [vmem:[#allocation14 + $0x3f0] sm:$0xff] }
 0x602   : > { %v8080_v42 = vmax.f32 %v7898_v3, 0.0  ;;  %9960 = vmatpush1.msra.mxu1 %v9211_v38  ;;  %9447 = vmatmul.mubr.f32.gmra.mxu0 %v14689_v41  ;;  %v9207_v24 = vld [vmem:[#allocation14 + $0x300] sm:$0xff]  ;;  %v9196_v16 = vld [vmem:[#allocation14 + $0x2a8] sm:$0xff]  ;;  %v14724_v3 = vld [vmem:[#allocation5 + $0x122] sm:$0xff] }
 0x603   : > { %v8084_v63 = vmax.f32 %v7902_v47, 0.0  ;;  %v8740_v20 = vcombine.low %v8081_v13, %v8082_v58  ;;  %9662 = vmatmul.mubr.f32.gmra.mxu1 %v14696_v28  ;;  %9761 = vmatpush2.msra.mxu0 %v9198_v36  ;;  %v8731_v10 = vrot.slane %v8723_v56, %v12425_v52  ;;  %v9238_v2 = vld [vmem:[#allocation14 + $0x3f8] sm:$0xff]  ;;  %v14727_v38 = vld [vmem:[#allocation5 + $0x141] sm:$0xff]  ;;  %v9195_v37 = vld [vmem:[#allocation14 + $0x2a0] sm:$0xff] }
 0x604   : > { %v8724_v8 = vcombine.low %v8079_v59, %v8080_v42  ;;  %9961 = vmatprep.subr.mxu1 %v14326_v21  ;;  %9451 = vmatprep.mubr.f32.mxu0 %v14547_v11  ;;  %v14731_v47 = vld [vmem:[#allocation5 + $0x140] sm:$0xff]  ;;  %v14737_v36 = vld [vmem:[#allocation5 + $0x12a] sm:$0xff]  ;;  %v9235_v13 = vld [vmem:[#allocation14 + $0x3e0] sm:$0xff] }
 0x605   : > { %v8741_v40 = vcombine.low %v8083_v4, %v8084_v63  ;;  %9666 = vmatprep.mubr.f32.mxu1 %v14701_v50  ;;  %9962 = vmatpush1.msra.mxu1 %v9210_v32  ;;  %v8748_v19 = vrot.slane %v8740_v20, %v12425_v52  ;;  %v9236_v59 = vld [vmem:[#allocation14 + $0x3e8] sm:$0xff]  ;;  %v14742_v42 = vld [vmem:[#allocation5 + $0x150] sm:$0xff]  ;;  %v9233_v56 = vld [vmem:[#allocation14 + $0x3d0] sm:$0xff] }
 0x606   : > { %v8738_v35 = vrot.slane %v8724_v8, %v12425_v52  ;;  %9963 = vmatprep.subr.mxu1 %v14326_v21  ;;  %9762 = vmatprep.subr.mxu0 %v14326_v21  ;;  %v9194_v58 = vld [vmem:[#allocation14 + $0x298] sm:$0xff]  ;;  %v14748_v4 = vld [vmem:[#allocation5 + $0x13a] sm:$0xff]  ;;  %v9193_v32 = vld [vmem:[#allocation14 + $0x290] sm:$0xff] }
 0x607   : > { %v8755_v44 = vrot.slane %v8741_v40, %v12425_v52  ;;  %9964 = vmatpush1.msra.mxu1 %v9209_v6  ;;  %9452 = vmatmul.mubr.f32.gmra.mxu0 %v14701_v50  ;;  %v14718_v52 = vld [vmem:[#allocation5 + $0x138] sm:$0xff]  ;;  %v9234_v63 = vld [vmem:[#allocation14 + $0x3d8] sm:$0xff]  ;;  %v14759_v8 = vld [vmem:[#allocation5 + $0x142] sm:$0xff] }
 0x608   : > { %v8739_v11 = vcombine.low %v8731_v10, %v8738_v35  ;;  %9667 = vmatmul.mubr.f32.gmra.mxu1 %v14711_v22  ;;  %9763 = vmatpush2.msra.mxu0 %v9197_v14  ;;  %v9232_v20 = vld [vmem:[#allocation14 + $0x3c8] sm:$0xff]  ;;  %v14766_v40 = vld [vmem:[#allocation5 + $0x168] sm:$0xff]  ;;  %v9231_v6 = vld [vmem:[#allocation14 + $0x3c0] sm:$0xff] }
 0x609   : > { %v8756_v60 = vcombine.low %v8748_v19, %v8755_v44  ;;  %9965 = vmatprep.subr.mxu1 %v14326_v21  ;;  %9456 = vmatprep.mubr.f32.mxu0 %v14714_v23  ;;  %v9192_v10 = vld [vmem:[#allocation14 + $0x288] sm:$0xff]  ;;  %v14772_v35 = vld [vmem:[#allocation5 + $0x152] sm:$0xff]  ;;  %v9230_v14 = vld [vmem:[#allocation14 + $0x3b8] sm:$0xff] }
 0x60a   : > { %8820 = vst [vmem:[#allocation5 + $0x181] sm:$0xff] %v8739_v11  ;;  %9671 = vmatprep.mubr.f32.mxu1 %v14718_v52  ;;  %9966 = vmatpush1.msra.mxu1 %v9208_v25  ;;  %v14775_v19 = vld [vmem:[#allocation5 + $0x171] sm:$0xff]  ;;  %v9229_v11 = vld [vmem:[#allocation14 + $0x3b0] sm:$0xff] }
 0x60b   : > { %8821 = vst [vmem:[#allocation5 + $0x189] sm:$0xff] %v8756_v60  ;;  %9967 = vmatprep.subr.mxu1 %v14326_v21  ;;  %9764 = vmatprep.subr.mxu0 %v14326_v21  ;;  %v14779_v44 = vld [vmem:[#allocation5 + $0x170] sm:$0xff] }
 0x60c   : > { %9968 = vmatpush1.msra.mxu1 %v9207_v24  ;;  %9457 = vmatmul.mubr.f32.gmra.mxu0 %v14718_v52  ;;  %v9191_v25 = vld [vmem:[#allocation14 + $0x280] sm:$0xff]  ;;  %v14787_v24 = vld [vmem:[#allocation5 + $0x15a] sm:$0xff] }
 0x60d   : > { %9672 = vmatmul.mubr.f32.gmra.mxu1 %v14724_v3  ;;  %9765 = vmatpush2.msra.mxu0 %v9196_v16  ;;  %v9228_v16 = vld [vmem:[#allocation14 + $0x3a8] sm:$0xff] }
 0x60e   : > { %9969 = vmatprep.subr.mxu1 %v14326_v21  ;;  %9461 = vmatprep.mubr.f32.mxu0 %v14727_v38 }
 0x60f   : > { %9676 = vmatprep.mubr.f32.mxu1 %v14731_v47  ;;  %9970 = vmatpush2.msra.mxu1 %v9238_v2 }
 0x610   : > { %9971 = vmatprep.subr.mxu1 %v14326_v21  ;;  %9766 = vmatprep.subr.mxu0 %v14326_v21 }
 0x611   : > { %9972 = vmatpush2.msra.mxu1 %v9237_v57  ;;  %9462 = vmatmul.mubr.f32.gmra.mxu0 %v14731_v47  ;;  %v14790_v57 = vld [vmem:[#allocation5 + $0x180] sm:$0xff] }
 0x612   : > { %9677 = vmatmul.mubr.f32.gmra.mxu1 %v14737_v36  ;;  %9767 = vmatpush2.msra.mxu0 %v9195_v37  ;;  %v9254_v37 = vld [vmem:[#allocation14 + $0x478] sm:$0xff] }
 0x613   : > { %9973 = vmatprep.subr.mxu1 %v14326_v21  ;;  %9466 = vmatprep.mubr.f32.mxu0 %v14631_v26  ;;  %v14753_v26 = vld [vmem:[#allocation5 + $0x158] sm:$0xff] }
 0x614   : > { %9681 = vmatprep.mubr.f32.mxu1 %v14742_v42  ;;  %9974 = vmatpush2.msra.mxu1 %v9236_v59  ;;  %v9227_v59 = vld [vmem:[#allocation14 + $0x3a0] sm:$0xff] }
 0x615   : > { %9975 = vmatprep.subr.mxu1 %v14326_v21  ;;  %9768 = vmatprep.subr.mxu0 %v14326_v21 }
 0x616   : > { %9976 = vmatpush2.msra.mxu1 %v9235_v13  ;;  %9467 = vmatmul.mubr.f32.gmra.mxu0 %v14742_v42  ;;  %v11892_v13 = vld [vmem:[#allocation5 + $0x1a] sm:$0xff] }
 0x617   : > { %9682 = vmatmul.mubr.f32.gmra.mxu1 %v14748_v4  ;;  %9769 = vmatpush2.msra.mxu0 %v9194_v58  ;;  %v8950_v58 = vld [vmem:[#allocation5 + $0x19] sm:$0xff] }
 0x618   : > { %9977 = vmatprep.subr.mxu1 %v14326_v21  ;;  %9471 = vmatprep.mubr.f32.mxu0 %v14638_v27  ;;  %v14762_v27 = vld [vmem:[#allocation5 + $0x169] sm:$0xff] }
 0x619   : > { %9686 = vmatprep.mubr.f32.mxu1 %v14753_v26  ;;  %9978 = vmatpush2.msra.mxu1 %v9234_v63  ;;  %v14795_v63 = vld [vmem:[#allocation5 + $0x16a] sm:$0xff] }
 0x61a   : > { %9979 = vmatprep.subr.mxu1 %v14326_v21  ;;  %9770 = vmatprep.subr.mxu0 %v14326_v21 }
 0x61b   : > { %9980 = vmatpush2.msra.mxu1 %v9233_v56  ;;  %9472 = vmatmul.mubr.f32.gmra.mxu0 %v14753_v26  ;;  %v9226_v56 = vld [vmem:[#allocation14 + $0x398] sm:$0xff] }
 0x61c   : > { %9687 = vmatmul.mubr.f32.gmra.mxu1 %v14759_v8  ;;  %9771 = vmatpush2.msra.mxu0 %v9193_v32  ;;  %v14799_v32 = vld [vmem:[#allocation5 + $0x188] sm:$0xff] }
 0x61d   : > { %9981 = vmatprep.subr.mxu1 %v14326_v21  ;;  %9476 = vmatprep.mubr.f32.mxu0 %v14762_v27 }
 0x61e   : > { %9691 = vmatprep.mubr.f32.mxu1 %v14766_v40  ;;  %9982 = vmatpush2.msra.mxu1 %v9232_v20  ;;  %v14782_v60 = vpop.f32.mrf.mxu1  ;;  %v9225_v20 = vld [vmem:[#allocation14 + $0x390] sm:$0xff] }
 0x61f   : > { %9983 = vmatprep.subr.mxu1 %v14326_v21  ;;  %9772 = vmatprep.subr.mxu0 %v14326_v21 }
 0x620   : > { %9984 = vmatpush2.msra.mxu1 %v9231_v6  ;;  %9477 = vmatmul.mubr.f32.gmra.mxu0 %v14766_v40  ;;  %v9560_v2 = vpop.f32.mrf.mxu1  ;;  %v11893_v6 = vld [vmem:[#allocation5 + $0x22] sm:$0xff] }
 0x621   : > { %9692 = vmatmul.mubr.f32.gmra.mxu1 %v14772_v35  ;;  %9773 = vmatpush2.msra.mxu0 %v9192_v10  ;;  %v8951_v10 = vld [vmem:[#allocation5 + $0x21] sm:$0xff]  ;;  %v9047_v2 = vld [vmem:[#allocation5 + $0x31] sm:$0xff] }
 0x622   : > { %9985 = vmatprep.subr.mxu1 %v14326_v21  ;;  %9481 = vmatprep.mubr.f32.mxu0 %v14775_v19 }
 0x623   : > { %9696 = vmatprep.mubr.f32.mxu1 %v14779_v44  ;;  %9986 = vmatpush2.msra.mxu1 %v9230_v14  ;;  %v9224_v14 = vld [vmem:[#allocation14 + $0x388] sm:$0xff] }
 0x624   : > { %9987 = vmatprep.subr.mxu1 %v14326_v21  ;;  %9774 = vmatprep.subr.mxu0 %v14326_v21 }
 0x625   : > { %9988 = vmatpush2.msra.mxu1 %v9229_v11  ;;  %9482 = vmatmul.mubr.f32.gmra.mxu0 %v14779_v44  ;;  %v14803_v11 = vld [vmem:[#allocation5 + $0x172] sm:$0xff] }
 0x626   : > { %9697 = vmatmul.mubr.f32.gmra.mxu1 %v14787_v24  ;;  %9775 = vmatpush2.msra.mxu0 %v9191_v25  ;;  %v11894_v25 = vld [vmem:[#allocation5 + $0x32] sm:$0xff] }
 0x627   : > { %9989 = vmatprep.subr.mxu1 %v14326_v21  ;;  %9701 = vmatprep.mubr.f32.mxu1 %v14790_v57 }
 0x628   : > { %9776 = vmatprep.mubr.f32.mxu0 %v11892_v13  ;;  %9990 = vmatpush2.msra.mxu1 %v9228_v16  ;;  %v9253_v16 = vld [vmem:[#allocation14 + $0x470] sm:$0xff]  ;;  %v9252_v13 = vld [vmem:[#allocation14 + $0x468] sm:$0xff] }
 0x629   : > { %9991 = vmatprep.subr.mxu1 %v14326_v21  ;;  %11689 = vmatprep.subr.mxu0 %v9254_v37 }
 0x62a   : > { %9992 = vmatpush2.msra.mxu1 %v9227_v59  ;;  %9777 = vmatmul.mubr.f32.vlgmr.msra.gmra.mxu0 %v8950_v58  ;;  %v14807_v59 = vld [vmem:[#allocation4] sm:$0xff]  ;;  %v11896_v58 = vld [vmem:[#allocation5 + $0x30] sm:$0xff] }
 0x62b   : > { %9702 = vmatmul.mubr.f32.gmra.mxu1 %v14795_v63  ;;  %9993 = vmatprep.subr.mxu1 %v14326_v21 }
 0x62c   : > { %11690 = vmatpush3.msra.mxu0 %v9254_v37  ;;  %9706 = vmatprep.mubr.f32.mxu1 %v14799_v32  ;;  %v9223_v37 = vld [vmem:[#allocation14 + $0x380] sm:$0xff] }
 0x62d   : > { %9781 = vmatprep.mubr.f32.mxu0 %v11893_v6  ;;  %9994 = vmatpush2.msra.mxu1 %v9226_v56  ;;  %v9048_v56 = vld [vmem:[#allocation5 + $0x39] sm:$0xff] }
 0x62e   : > { %9995 = vmatprep.subr.mxu1 %v14326_v21  ;;  %9782 = vmatmul.mubr.f32.gmra.mxu0 %v8951_v10  ;;  %v11898_v6 = vld [vmem:[#allocation5 + $0x38] sm:$0xff]  ;;  %v11899_v10 = vld [vmem:[#allocation5 + $0x4a] sm:$0xff] }
 0x62f   : > { %9996 = vmatpush2.msra.mxu1 %v9225_v20  ;;  %9786 = vmatprep.mubr.f32.mxu0 %v11894_v25  ;;  %v11897_v20 = vld [vmem:[#allocation5 + $0x3a] sm:$0xff]  ;;  %v9250_v25 = vld [vmem:[#allocation14 + $0x458] sm:$0xff] }
 0x630   : > { %9707 = vmatmul.mubr.f32.gmra.mxu1 %v14803_v11  ;;  %9997 = vmatprep.subr.mxu1 %v14326_v21  ;;  %v9251_v21 = vld [vmem:[#allocation14 + $0x460] sm:$0xff] }
 0x631   : > { %9998 = vmatpush2.msra.mxu1 %v9224_v14  ;;  %10001 = vmatprep.mubr.f32.mxu1 %v9047_v2  ;;  %v11900_v14 = vld [vmem:[#allocation5 + $0x49] sm:$0xff] }
 0x632   : > { %9999 = vmatprep.subr.mxu1 %v14807_v59  ;;  %11691 = vmatprep.subr.mxu0 %v9253_v16 }
 0x633   : > { %10000 = vmatpush2.msra.mxu1 %v9223_v37  ;;  %9787 = vmatmul.mubr.f32.gmra.mxu0 %v9047_v2  ;;  %v11901_v2 = vld [vmem:[#allocation5 + $0x48] sm:$0xff]  ;;  %v11903_v37 = vld [vmem:[#allocation5 + $0x51] sm:$0xff] }
 0x634   : > { %10002 = vmatmul.mubr.f32.vlgmr.msra.gmra.mxu1 %v11896_v58  ;;  %11692 = vmatpush3.msra.mxu0 %v9253_v16  ;;  %v11902_v16 = vld [vmem:[#allocation5 + $0x52] sm:$0xff]  ;;  %v9249_v58 = vld [vmem:[#allocation14 + $0x450] sm:$0xff] }
 0x635   : > { %9791 = vmatprep.mubr.f32.mxu0 %v11897_v20  ;;  %10006 = vmatprep.mubr.f32.mxu1 %v9048_v56  ;;  %v11905_v20 = vld [vmem:[#allocation5 + $0x62] sm:$0xff] }
 0x636   : > { %11693 = vmatprep.subr.mxu0 %v9252_v13 }
 0x637   : > { %9792 = vmatmul.mubr.f32.gmra.mxu0 %v9048_v56  ;;  %v11904_v56 = vld [vmem:[#allocation5 + $0x50] sm:$0xff] }
 0x638   : > { %10007 = vmatmul.mubr.f32.gmra.mxu1 %v11898_v6  ;;  %9796 = vmatprep.mubr.f32.mxu0 %v11899_v10  ;;  %v9051_v6 = vld [vmem:[#allocation5 + $0x61] sm:$0xff] }
 0x639   : > { %10011 = vmatprep.mubr.f32.mxu1 %v11900_v14  ;;  %11694 = vmatpush3.msra.mxu0 %v9252_v13  ;;  %v9248_v13 = vld [vmem:[#allocation14 + $0x448] sm:$0xff] }
 0x63a   : > { %11695 = vmatprep.subr.mxu0 %v9251_v21  ;;  %v11906_v10 = vld [vmem:[#allocation5 + $0x60] sm:$0xff] }
 0x63b   : > { %9797 = vmatmul.mubr.f32.gmra.mxu0 %v11900_v14  ;;  %v11907_v14 = vld [vmem:[#allocation5 + $0x6a] sm:$0xff] }
 0x63c   : > { %10012 = vmatmul.mubr.f32.gmra.mxu1 %v11901_v2  ;;  %9801 = vmatprep.mubr.f32.mxu0 %v11902_v16  ;;  %v9052_v2 = vld [vmem:[#allocation5 + $0x69] sm:$0xff] }
 0x63d   : > { %10016 = vmatprep.mubr.f32.mxu1 %v11903_v37  ;;  %11696 = vmatpush3.msra.mxu0 %v9251_v21  ;;  %v9247_v21 = vld [vmem:[#allocation14 + $0x440] sm:$0xff]  ;;  %v11908_v16 = vld [vmem:[#allocation5 + $0x68] sm:$0xff] }
 0x63e   : > { %11697 = vmatprep.subr.mxu0 %v9250_v25 }
 0x63f   : > { %9802 = vmatmul.mubr.f32.gmra.mxu0 %v11903_v37  ;;  %v11909_v37 = vld [vmem:[#allocation5 + $0x7a] sm:$0xff] }
 0x640   : > { %10017 = vmatmul.mubr.f32.gmra.mxu1 %v11904_v56  ;;  %9806 = vmatprep.mubr.f32.mxu0 %v11905_v20  ;;  %v11910_v56 = vld [vmem:[#allocation5 + $0x79] sm:$0xff] }
 0x641   : > { %10021 = vmatprep.mubr.f32.mxu1 %v9051_v6  ;;  %11698 = vmatpush3.msra.mxu0 %v9250_v25  ;;  %v9246_v25 = vld [vmem:[#allocation14 + $0x438] sm:$0xff]  ;;  %v11911_v20 = vld [vmem:[#allocation5 + $0x78] sm:$0xff] }
 0x642   : > { %11699 = vmatprep.subr.mxu0 %v9249_v58 }
 0x643   : > { %9807 = vmatmul.mubr.f32.gmra.mxu0 %v9051_v6  ;;  %v11912_v6 = vld [vmem:[#allocation5 + $0x82] sm:$0xff] }
 0x644   : > { %10022 = vmatmul.mubr.f32.gmra.mxu1 %v11906_v10  ;;  %9811 = vmatprep.mubr.f32.mxu0 %v11907_v14  ;;  %v11913_v10 = vld [vmem:[#allocation5 + $0x81] sm:$0xff] }
 0x645   : > { %10026 = vmatprep.mubr.f32.mxu1 %v9052_v2  ;;  %11700 = vmatpush3.msra.mxu0 %v9249_v58  ;;  %v9245_v58 = vld [vmem:[#allocation14 + $0x430] sm:$0xff] }
 0x646   : > { %11701 = vmatprep.subr.mxu0 %v9248_v13  ;;  %v11914_v14 = vld [vmem:[#allocation5 + $0x80] sm:$0xff] }
 0x647   : > { %9812 = vmatmul.mubr.f32.gmra.mxu0 %v9052_v2  ;;  %v9055_v2 = vld [vmem:[#allocation5 + $0x91] sm:$0xff] }
 0x648   : > { %10027 = vmatmul.mubr.f32.gmra.mxu1 %v11908_v16  ;;  %9816 = vmatprep.mubr.f32.mxu0 %v11909_v37  ;;  %v11915_v16 = vld [vmem:[#allocation5 + $0x90] sm:$0xff]  ;;  %v9056_v37 = vld [vmem:[#allocation5 + $0x99] sm:$0xff] }
 0x649   : > { %10031 = vmatprep.mubr.f32.mxu1 %v11910_v56  ;;  %11702 = vmatpush3.msra.mxu0 %v9248_v13  ;;  %v9244_v13 = vld [vmem:[#allocation14 + $0x428] sm:$0xff] }
 0x64a   : > { %11703 = vmatprep.subr.mxu0 %v9247_v21 }
 0x64b   : > { %9817 = vmatmul.mubr.f32.gmra.mxu0 %v11910_v56  ;;  %v11916_v56 = vld [vmem:[#allocation5 + $0x98] sm:$0xff] }
 0x64c   : > { %10032 = vmatmul.mubr.f32.gmra.mxu1 %v11911_v20  ;;  %9821 = vmatprep.mubr.f32.mxu0 %v11912_v6  ;;  %v11918_v20 = vld [vmem:[#allocation5 + $0xa8] sm:$0xff] }
 0x64d   : > { %10036 = vmatprep.mubr.f32.mxu1 %v11913_v10  ;;  %11704 = vmatpush3.msra.mxu0 %v9247_v21  ;;  %v9243_v21 = vld [vmem:[#allocation14 + $0x420] sm:$0xff]  ;;  %v9241_v6 = vld [vmem:[#allocation14 + $0x410] sm:$0xff] }
 0x64e   : > { %11705 = vmatprep.subr.mxu0 %v9246_v25 }
 0x64f   : > { %9822 = vmatmul.mubr.f32.gmra.mxu0 %v11913_v10  ;;  %v11920_v10 = vld [vmem:[#allocation5 + $0xb0] sm:$0xff] }
 0x650   : > { %10037 = vmatmul.mubr.f32.gmra.mxu1 %v11914_v14  ;;  %9826 = vmatprep.mubr.f32.mxu0 %v14404_v31  ;;  %v11917_v31 = vld [vmem:[#allocation5 + $0xa9] sm:$0xff]  ;;  %v9239_v14 = vld [vmem:[#allocation14 + $0x400] sm:$0xff] }
 0x651   : > { %10041 = vmatprep.mubr.f32.mxu1 %v9055_v2  ;;  %11706 = vmatpush3.msra.mxu0 %v9246_v25  ;;  %v9242_v25 = vld [vmem:[#allocation14 + $0x418] sm:$0xff] }
 0x652   : > { %11707 = vmatprep.subr.mxu0 %v9245_v58 }
 0x653   : > { %9827 = vmatmul.mubr.f32.gmra.mxu0 %v9055_v2 }
 0x654   : > { %10042 = vmatmul.mubr.f32.gmra.mxu1 %v11915_v16  ;;  %9831 = vmatprep.mubr.f32.mxu0 %v14423_v34  ;;  %v11919_v34 = vld [vmem:[#allocation5 + $0xb1] sm:$0xff] }
 0x655   : > { %10046 = vmatprep.mubr.f32.mxu1 %v9056_v37  ;;  %11708 = vmatpush3.msra.mxu0 %v9245_v58  ;;  %v9240_v58 = vld [vmem:[#allocation14 + $0x408] sm:$0xff] }
 0x656   : > { %11709 = vmatprep.subr.mxu0 %v9244_v13 }
 0x657   : > { %9832 = vmatmul.mubr.f32.gmra.mxu0 %v9056_v37 }
 0x658   : > { %10047 = vmatmul.mubr.f32.gmra.mxu1 %v11916_v56  ;;  %9836 = vmatprep.mubr.f32.mxu0 %v14451_v9  ;;  %v9059_v9 = vld [vmem:[#allocation5 + $0xc1] sm:$0xff] }
 0x659   : > { %10051 = vmatprep.mubr.f32.mxu1 %v11917_v31  ;;  %11710 = vmatpush3.msra.mxu0 %v9244_v13 }
 0x65a   : > { %11711 = vmatprep.subr.mxu0 %v9243_v21 }
 0x65b   : > { %9837 = vmatmul.mubr.f32.gmra.mxu0 %v11917_v31 }
 0x65c   : > { %10052 = vmatmul.mubr.f32.gmra.mxu1 %v11918_v20  ;;  %9841 = vmatprep.mubr.f32.mxu0 %v14495_v39  ;;  %v9060_v39 = vld [vmem:[#allocation5 + $0xc9] sm:$0xff] }
 0x65d   : > { %10056 = vmatprep.mubr.f32.mxu1 %v11919_v34  ;;  %11712 = vmatpush3.msra.mxu0 %v9243_v21 }
 0x65e   : > { %11713 = vmatprep.subr.mxu0 %v9242_v25 }
 0x65f   : > { %9842 = vmatmul.mubr.f32.gmra.mxu0 %v11919_v34 }
 0x660   : > { %10057 = vmatmul.mubr.f32.gmra.mxu1 %v11920_v10  ;;  %9846 = vmatprep.mubr.f32.mxu0 %v14517_v7  ;;  %v14820_v7 = vld [vmem:[#allocation16] ss:$0 sm:$0xff] }
 0x661   : > { %10061 = vmatprep.mubr.f32.mxu1 %v9059_v9  ;;  %11714 = vmatpush3.msra.mxu0 %v9242_v25  ;;  %v9344_v2 = vadd.f32 %v14820_v7, %v14439_v53 }
 0x662   : > { %11715 = vmatprep.subr.mxu0 %v9241_v6 }
 0x663   : > { %9847 = vmatmul.mubr.f32.gmra.mxu0 %v9059_v9 }
 0x664   : > { %10062 = vmatmul.mubr.f32.gmra.mxu1 %v14430_v17  ;;  %9851 = vmatprep.mubr.f32.mxu0 %v14540_v5  ;;  %v9339_v17 = vadd.f32 %v14820_v7, %v14417_v45 }
 0x665   : > { %10066 = vmatprep.mubr.f32.mxu1 %v9060_v39  ;;  %11716 = vmatpush3.msra.mxu0 %v9241_v6 }
 0x666   : > { %11717 = vmatprep.subr.mxu0 %v9240_v58 }
 0x667   : > { %9852 = vmatmul.mubr.f32.gmra.mxu0 %v9060_v39 }
 0x668   : > { %10067 = vmatmul.mubr.f32.gmra.mxu1 %v14470_v43  ;;  %9856 = vmatprep.mubr.f32.mxu0 %v14575_v51  ;;  %v9348_v43 = vpop.f32.mrf.mxu0  ;;  %v9563_v5 = vpop.f32.mrf.mxu1  ;;  %v9063_v51 = vld [vmem:[#allocation5 + $0xf1] sm:$0xff] }
 0x669   : > { %10071 = vmatprep.mubr.f32.mxu1 %v14503_v0  ;;  %11718 = vmatpush3.msra.mxu0 %v9240_v58  ;;  %v9349_v37 = vadd.f32 %v14820_v7, %v9348_v43 }
 0x66a   : > { %11719 = vmatprep.subr.mxu0 %v9239_v14 }
 0x66b   : > { %9857 = vmatmul.mubr.f32.gmra.mxu0 %v14503_v0  ;;  %v14831_v0 = vadd.f32 %v9563_v5, %v9339_v17 }
 0x66c   : > { %10072 = vmatmul.mubr.f32.gmra.mxu1 %v14505_v49  ;;  %9861 = vmatprep.mubr.f32.mxu0 %v14602_v1  ;;  %v9350_v49 = vpop.f32.mrf.mxu0  ;;  %v9565_v1 = vpop.f32.mrf.mxu1 }
 0x66d   : > { %10076 = vmatprep.mubr.f32.mxu1 %v14525_v55  ;;  %11720 = vmatpush3.msra.mxu0 %v9239_v14 }
 0x66e   : > { %v9353_v13 = vpop.f32.mrf.mxu0  ;;  %v9568_v45 = vpop.f32.mrf.mxu1 }
 0x66f   : > { %9862 = vmatmul.mubr.f32.gmra.mxu0 %v14525_v55  ;;  %v9064_v55 = vld [vmem:[#allocation5 + $0xf9] sm:$0xff]  ;;  %v9354_v31 = vadd.f32 %v14820_v7, %v9353_v13 }
 0x670   : > { %10077 = vmatmul.mubr.f32.gmra.mxu1 %v14530_v46  ;;  %9866 = vmatprep.mubr.f32.mxu0 %v14623_v12  ;;  %v14837_v46 = vadd.f32 %v9568_v45, %v9344_v2  ;;  %v9355_v12 = vpop.f32.mrf.mxu0  ;;  %v9570_v16 = vpop.f32.mrf.mxu1 }
 0x671   : > { %10081 = vmatprep.mubr.f32.mxu1 %v9063_v51 }
 0x672   : > { %v9358_v21 = vpop.f32.mrf.mxu0  ;;  %v9573_v56 = vpop.f32.mrf.mxu1 }
 0x673   : > { %9867 = vmatmul.mubr.f32.gmra.mxu0 %v9063_v51  ;;  %v14842_v53 = vadd.f32 %v9573_v56, %v9349_v37  ;;  %v9359_v6 = vadd.f32 %v14820_v7, %v9358_v21 }
 0x674   : > { %10082 = vmatmul.mubr.f32.gmra.mxu1 %v14552_v61  ;;  %9871 = vmatprep.mubr.f32.mxu0 %v14663_v62  ;;  %v9360_v61 = vpop.f32.mrf.mxu0  ;;  %v9575_v62 = vpop.f32.mrf.mxu1 }
 0x675   : > { %10086 = vmatprep.mubr.f32.mxu1 %v9064_v55 }
 0x676   : > { %v9363_v25 = vpop.f32.mrf.mxu0  ;;  %v9578_v20 = vpop.f32.mrf.mxu1 }
 0x677   : > { %9872 = vmatmul.mubr.f32.gmra.mxu0 %v9064_v55  ;;  %v14849_v34 = vadd.f32 %v9578_v20, %v9354_v31  ;;  %v9364_v39 = vadd.f32 %v14820_v7, %v9363_v25 }
 0x678   : > { %10087 = vmatmul.mubr.f32.gmra.mxu1 %v14596_v29  ;;  %9876 = vmatprep.mubr.f32.mxu0 %v14696_v28  ;;  %v9365_v29 = vpop.f32.mrf.mxu0  ;;  %v9580_v28 = vpop.f32.mrf.mxu1 }
 0x679   : > { %10091 = vmatprep.mubr.f32.mxu1 %v14605_v54 }
 0x67a   : > { %v9368_v10 = vpop.f32.mrf.mxu0  ;;  %v9583_v9 = vpop.f32.mrf.mxu1 }
 0x67b   : > { %9877 = vmatmul.mubr.f32.gmra.mxu0 %v14605_v54  ;;  %v9067_v54 = vld [vmem:[#allocation5 + $0x121] sm:$0xff]  ;;  %v9369_v5 = vadd.f32 %v14820_v7, %v9368_v10 }
 0x67c   : > { %10092 = vmatmul.mubr.f32.gmra.mxu1 %v14612_v30  ;;  %9881 = vmatprep.mubr.f32.mxu0 %v14711_v22  ;;  %v14856_v30 = vadd.f32 %v9583_v9, %v9359_v6  ;;  %v9370_v22 = vpop.f32.mrf.mxu0  ;;  %v9585_v58 = vpop.f32.mrf.mxu1 }
 0x67d   : > { %10096 = vmatprep.mubr.f32.mxu1 %v14629_v18 }
 0x67e   : > { %v9373_v14 = vpop.f32.mrf.mxu0  ;;  %v9588_v17 = vpop.f32.mrf.mxu1 }
 0x67f   : > { %9882 = vmatmul.mubr.f32.gmra.mxu0 %v14629_v18  ;;  %v9068_v18 = vld [vmem:[#allocation5 + $0x129] sm:$0xff]  ;;  %v14861_v43 = vadd.f32 %v9588_v17, %v9364_v39  ;;  %v9374_v2 = vadd.f32 %v14820_v7, %v9373_v14 }
 0x680   : > { %10097 = vmatmul.mubr.f32.gmra.mxu1 %v14636_v15  ;;  %9886 = vmatprep.mubr.f32.mxu0 %v14724_v3  ;;  %v9375_v15 = vpop.f32.mrf.mxu0  ;;  %v9590_v3 = vpop.f32.mrf.mxu1  ;;  %v14902_v39 = vld [vmem:[#allocation5 + $0x182] sm:$0xff] }
 0x681   : > { %10101 = vmatprep.mubr.f32.mxu1 %v9067_v54  ;;  %v14909_v3 = vld [vmem:[#allocation5 + $0x18a] sm:$0xff] }
 0x682   : > { %v9378_v51 = vpop.f32.mrf.mxu0  ;;  %v9593_v49 = vpop.f32.mrf.mxu1 }
 0x683   : > { %9887 = vmatmul.mubr.f32.gmra.mxu0 %v9067_v54  ;;  %v14866_v1 = vadd.f32 %v9593_v49, %v9369_v5  ;;  %v9379_v12 = vadd.f32 %v14820_v7, %v9378_v51 }
 0x684   : > { %10102 = vmatmul.mubr.f32.gmra.mxu1 %v14689_v41  ;;  %9891 = vmatprep.mubr.f32.mxu0 %v14737_v36  ;;  %v9380_v41 = vpop.f32.mrf.mxu0  ;;  %v9595_v36 = vpop.f32.mrf.mxu1 }
 0x685   : > { %10106 = vmatprep.mubr.f32.mxu1 %v9068_v18  ;;  %v9077_v41 = vld [vmem:[#allocation5 + $0x199] sm:$0xff] }
 0x686   : > { %v9383_v13 = vpop.f32.mrf.mxu0  ;;  %v9598_v45 = vpop.f32.mrf.mxu1 }
 0x687   : > { %9892 = vmatmul.mubr.f32.gmra.mxu0 %v9068_v18  ;;  %v14873_v55 = vadd.f32 %v9598_v45, %v9374_v2  ;;  %v9384_v56 = vadd.f32 %v14820_v7, %v9383_v13  ;;  %v9079_v13 = vld [vmem:[#allocation5 + $0x32] sm:$0xff] }
 0x688   : > { %10107 = vmatmul.mubr.f32.gmra.mxu1 %v14701_v50  ;;  %9896 = vmatprep.mubr.f32.mxu0 %v14748_v4  ;;  %v9385_v50 = vpop.f32.mrf.mxu0  ;;  %v9600_v4 = vpop.f32.mrf.mxu1 }
 0x689   : > { %10111 = vmatprep.mubr.f32.mxu1 %v14714_v23 }
 0x68a   : > { %v9388_v16 = vpop.f32.mrf.mxu0 }
 0x68b   : > { %9897 = vmatmul.mubr.f32.gmra.mxu0 %v14714_v23  ;;  %v9603_v37 = vpop.f32.mrf.mxu1  ;;  %v9071_v23 = vld [vmem:[#allocation5 + $0x151] sm:$0xff]  ;;  %v9389_v25 = vadd.f32 %v14820_v7, %v9388_v16  ;;  %v9078_v16 = vld [vmem:[#allocation5 + $0x1a1] sm:$0xff] }
 0x68c   : > { %10112 = vmatmul.mubr.f32.gmra.mxu1 %v14718_v52  ;;  %9901 = vmatprep.mubr.f32.mxu0 %v14759_v8  ;;  %v14880_v52 = vadd.f32 %v9603_v37, %v9379_v12  ;;  %v9390_v8 = vpop.f32.mrf.mxu0  ;;  %v9080_v12 = vld [vmem:[#allocation5 + $0x3a] sm:$0xff] }
 0x68d   : > { %10116 = vmatprep.mubr.f32.mxu1 %v14727_v38  ;;  %v9605_v21 = vpop.f32.mrf.mxu1  ;;  %v9081_v8 = vld [vmem:[#allocation5 + $0x4a] sm:$0xff] }
 0x68e   : > { %v9393_v61 = vpop.f32.mrf.mxu0 }
 0x68f   : > { %9902 = vmatmul.mubr.f32.gmra.mxu0 %v14727_v38  ;;  %v9608_v62 = vpop.f32.mrf.mxu1  ;;  %v9072_v38 = vld [vmem:[#allocation5 + $0x159] sm:$0xff]  ;;  %v9394_v6 = vadd.f32 %v14820_v7, %v9393_v61 }
 0x690   : > { %10117 = vmatmul.mubr.f32.gmra.mxu1 %v14731_v47  ;;  %9906 = vmatprep.mubr.f32.mxu0 %v14772_v35  ;;  %v14885_v31 = vadd.f32 %v9608_v62, %v9384_v56  ;;  %v9395_v47 = vpop.f32.mrf.mxu0  ;;  %v9082_v62 = vld [vmem:[#allocation5 + $0x52] sm:$0xff] }
 0x691   : > { %10121 = vmatprep.mubr.f32.mxu1 %v9071_v23  ;;  %v9610_v35 = vpop.f32.mrf.mxu1 }
 0x692   : > { %v9398_v20 = vpop.f32.mrf.mxu0  ;;  %v9083_v35 = vld [vmem:[#allocation5 + $0x62] sm:$0xff] }
 0x693   : > { %9907 = vmatmul.mubr.f32.gmra.mxu0 %v9071_v23  ;;  %v9613_v29 = vpop.f32.mrf.mxu1  ;;  %v9399_v22 = vadd.f32 %v14820_v7, %v9398_v20 }
 0x694   : > { %10122 = vmatmul.mubr.f32.gmra.mxu1 %v14742_v42  ;;  %9911 = vmatprep.mubr.f32.mxu0 %v14787_v24  ;;  %v14890_v28 = vadd.f32 %v9613_v29, %v9389_v25  ;;  %v9400_v42 = vpop.f32.mrf.mxu0 }
 0x695   : > { %10126 = vmatprep.mubr.f32.mxu1 %v9072_v38  ;;  %v9615_v24 = vpop.f32.mrf.mxu1 }
 0x696   : > { %v9403_v10 = vpop.f32.mrf.mxu0  ;;  %v9084_v24 = vld [vmem:[#allocation5 + $0x6a] sm:$0xff] }
 0x697   : > { %9912 = vmatmul.mubr.f32.gmra.mxu0 %v9072_v38  ;;  %v9618_v9 = vpop.f32.mrf.mxu1  ;;  %v9404_v18 = vadd.f32 %v14820_v7, %v9403_v10 }
 0x698   : > { %10127 = vmatmul.mubr.f32.gmra.mxu1 %v14753_v26  ;;  %9916 = vmatprep.mubr.f32.mxu0 %v14795_v63  ;;  %v14897_v54 = vadd.f32 %v9618_v9, %v9394_v6  ;;  %v9405_v26 = vpop.f32.mrf.mxu0  ;;  %v9085_v9 = vld [vmem:[#allocation5 + $0x7a] sm:$0xff] }
 0x699   : > { %10131 = vmatprep.mubr.f32.mxu1 %v14762_v27  ;;  %v9620_v63 = vpop.f32.mrf.mxu1 }
 0x69a   : > { %v9408_v58 = vpop.f32.mrf.mxu0 }
 0x69b   : > { %9917 = vmatmul.mubr.f32.gmra.mxu0 %v14762_v27  ;;  %v9623_v14 = vpop.f32.mrf.mxu1  ;;  %v9075_v27 = vld [vmem:[#allocation5 + $0x181] sm:$0xff]  ;;  %v9409_v36 = vadd.f32 %v14820_v7, %v9408_v58 }
 0x69c   : > { %10132 = vmatmul.mubr.f32.gmra.mxu1 %v14766_v40  ;;  %9921 = vmatprep.mubr.f32.mxu0 %v14803_v11  ;;  %v14906_v40 = vadd.f32 %v9623_v14, %v9399_v22  ;;  %v9410_v11 = vpop.f32.mrf.mxu0  ;;  %v9086_v14 = vld [vmem:[#allocation5 + $0x82] sm:$0xff] }
 0x69d   : > { %10136 = vmatprep.mubr.f32.mxu1 %v14775_v19  ;;  %v9625_v17 = vpop.f32.mrf.mxu1  ;;  %v9087_v11 = vld [vmem:[#allocation5 + $0x92] sm:$0xff] }
 0x69e   : > { %v9413_v15 = vpop.f32.mrf.mxu0 }
 0x69f   : > { %9922 = vmatmul.mubr.f32.gmra.mxu0 %v14775_v19  ;;  %v9414_v37 = vadd.f32 %v14820_v7, %v9413_v15 }
 0x6a0   : > { %10137 = vmatmul.mubr.f32.gmra.mxu1 %v14779_v44  ;;  %9926 = vmatprep.mubr.f32.mxu0 %v14902_v39  ;;  %v9076_v44 = vld [vmem:[#allocation5 + $0x189] sm:$0xff]  ;;  %v9415_v51 = vpop.f32.mrf.mxu0 }
 0x6a1   : > { %10141 = vmatprep.mubr.f32.mxu1 %v9075_v27  ;;  %v9628_v19 = vpop.f32.mrf.mxu1  ;;  %v9089_v51 = vld [vmem:[#allocation5 + $0xaa] sm:$0xff] }
 0x6a2   : > { %v14913_v5 = vadd.f32 %v9628_v19, %v9404_v18 }
 0x6a3   : > { %9927 = vmatmul.mubr.f32.gmra.mxu0 %v9075_v27  ;;  %v9630_v49 = vpop.f32.mrf.mxu1  ;;  %v9418_v2 = vpop.f32.mrf.mxu0 }
 0x6a4   : > { %10142 = vmatmul.mubr.f32.gmra.mxu1 %v14790_v57  ;;  %9931 = vmatprep.mubr.f32.mxu0 %v14909_v3  ;;  %v9419_v38 = vadd.f32 %v14820_v7, %v9418_v2  ;;  %v9090_v2 = vld [vmem:[#allocation5 + $0xb2] sm:$0xff] }
 0x6a5   : > { %10146 = vmatprep.mubr.f32.mxu1 %v9076_v44  ;;  %v9633_v45 = vpop.f32.mrf.mxu1  ;;  %v9420_v57 = vpop.f32.mrf.mxu0 }
 0x6a6   : > { %v14917_v50 = vadd.f32 %v9633_v45, %v9409_v36  ;;  %v9091_v57 = vld [vmem:[#allocation5 + $0xc2] sm:$0xff] }
 0x6a7   : > { %9932 = vmatmul.mubr.f32.gmra.mxu0 %v9076_v44  ;;  %v9635_v4 = vpop.f32.mrf.mxu1  ;;  %v9423_v23 = vpop.f32.mrf.mxu0  ;;  %v9088_v44 = vld [vmem:[#allocation5 + $0x9a] sm:$0xff] }
 0x6a8   : > { %10147 = vmatmul.mubr.f32.gmra.mxu1 %v14799_v32  ;;  %11721 = vmatprep.mubr.f32.mxu0 %v9079_v13  ;;  %v9424_v6 = vadd.f32 %v14820_v7, %v9423_v23  ;;  %v9093_v23 = vld [vmem:[#allocation5 + $0xda] sm:$0xff] }
 0x6a9   : > { %10151 = vmatprep.mubr.f32.mxu1 %v9077_v41  ;;  %v9638_v21 = vpop.f32.mrf.mxu1  ;;  %v9425_v32 = vpop.f32.mrf.mxu0 }
 0x6aa   : > { %v14921_v56 = vadd.f32 %v9638_v21, %v9414_v37 }
 0x6ab   : > { %11722 = vmatmul.mubr.f32.vlgmr.msra.gmra.mxu0 %v9080_v12  ;;  %v9640_v61 = vpop.f32.mrf.mxu1 }
 0x6ac   : > { %10152 = vmatmul.mubr.f32.gmra.mxu1 %v14807_v59  ;;  %11724 = vmatprep.mubr.f32.mxu0 %v9081_v8 }
 0x6ad   : > { %10156 = vmatprep.mubr.f32.mxu1 %v9078_v16  ;;  %v9428_v47 = vpop.f32.mrf.mxu0  ;;  %v9092_v16 = vld [vmem:[#allocation5 + $0xca] sm:$0xff] }
 0x6ae   : > { %v9643_v25 = vpop.f32.mrf.mxu1 }
 0x6af   : > { %11725 = vmatmul.mubr.f32.gmra.mxu0 %v9082_v62  ;;  %v14925_v20 = vadd.f32 %v9643_v25, %v9419_v38  ;;  %v9430_v29 = vpop.f32.mrf.mxu0  ;;  %v9094_v62 = vld [vmem:[#allocation5 + $0xe2] sm:$0xff] }
 0x6b0   : > { %10157 = vmatmul.mubr.f32.gmra.mxu1 %v14807_v59  ;;  %11727 = vmatprep.mubr.f32.mxu0 %v9083_v35  ;;  %v9645_v42 = vpop.f32.mrf.mxu1  ;;  %v9429_v59 = vadd.f32 %v14820_v7, %v9428_v47  ;;  %v9095_v47 = vld [vmem:[#allocation5 + $0xf2] sm:$0xff] }
 0x6b1   : > { %v9433_v10 = vpop.f32.mrf.mxu0 }
 0x6b2   : > { %v9648_v26 = vpop.f32.mrf.mxu1  ;;  %v9434_v49 = vadd.f32 %v14820_v7, %v9433_v10  ;;  %v9097_v10 = vld [vmem:[#allocation5 + $0x10a] sm:$0xff] }
 0x6b3   : > { %11728 = vmatmul.mubr.f32.gmra.mxu0 %v9084_v24  ;;  %v14928_v63 = vadd.f32 %v9648_v26, %v9424_v6  ;;  %v9435_v22 = vpop.f32.mrf.mxu0  ;;  %v9096_v24 = vld [vmem:[#allocation5 + $0xfa] sm:$0xff] }
 0x6b4   : > { %11730 = vmatprep.mubr.f32.mxu0 %v9085_v9  ;;  %v9650_v58 = vpop.f32.mrf.mxu1 }
 0x6b5   : > { %v9438_v27 = vpop.f32.mrf.mxu0  ;;  %v9098_v58 = vld [vmem:[#allocation5 + $0x112] sm:$0xff] }
 0x6b6   : > { %v9653_v17 = vpop.f32.mrf.mxu1  ;;  %v9439_v12 = vadd.f32 %v14820_v7, %v9438_v27  ;;  %v9099_v27 = vld [vmem:[#allocation5 + $0x122] sm:$0xff] }
 0x6b7   : > { %11731 = vmatmul.mubr.f32.gmra.mxu0 %v9086_v14  ;;  %v14931_v18 = vadd.f32 %v9653_v17, %v9429_v59  ;;  %v9440_v15 = vpop.f32.mrf.mxu0 }
 0x6b8   : > { %11733 = vmatprep.mubr.f32.mxu0 %v9087_v11  ;;  %v9655_v19 = vpop.f32.mrf.mxu1 }
 0x6b9   : > { %v9100_v19 = vld [vmem:[#allocation5 + $0x12a] sm:$0xff] }
 0x6bb   : > { %11734 = vmatmul.mubr.f32.gmra.mxu0 %v9088_v44 }
 0x6bc   : > { %11736 = vmatprep.mubr.f32.mxu0 %v9089_v51  ;;  %v9443_v41 = vpop.f32.mrf.mxu0  ;;  %v9101_v51 = vld [vmem:[#allocation5 + $0x13a] sm:$0xff] }
 0x6bd   : > { %v9658_v36 = vpop.f32.mrf.mxu1  ;;  %v9444_v38 = vadd.f32 %v14820_v7, %v9443_v41 }
 0x6be   : > { %v14934_v13 = vadd.f32 %v9658_v36, %v9434_v49  ;;  %v9445_v45 = vpop.f32.mrf.mxu0 }
 0x6bf   : > { %11737 = vmatmul.mubr.f32.gmra.mxu0 %v9090_v2  ;;  %v9660_v4 = vpop.f32.mrf.mxu1  ;;  %v9102_v45 = vld [vmem:[#allocation5 + $0x142] sm:$0xff] }
 0x6c0   : > { %11739 = vmatprep.mubr.f32.mxu0 %v9091_v57  ;;  %v9103_v4 = vld [vmem:[#allocation5 + $0x152] sm:$0xff] }
 0x6c2   : > { %v9448_v37 = vpop.f32.mrf.mxu0 }
 0x6c3   : > { %11740 = vmatmul.mubr.f32.gmra.mxu0 %v9092_v16  ;;  %v9663_v8 = vpop.f32.mrf.mxu1  ;;  %v9449_v9 = vadd.f32 %v14820_v7, %v9448_v37 }
 0x6c4   : > { %11742 = vmatprep.mubr.f32.mxu0 %v9093_v23  ;;  %v14937_v21 = vadd.f32 %v9663_v8, %v9439_v12  ;;  %v9450_v32 = vpop.f32.mrf.mxu0  ;;  %v9104_v8 = vld [vmem:[#allocation5 + $0x15a] sm:$0xff] }
 0x6c5   : > { %v9665_v61 = vpop.f32.mrf.mxu1 }
 0x6c6   : > { %v9105_v61 = vld [vmem:[#allocation5 + $0x16a] sm:$0xff] }
 0x6c7   : > { %11743 = vmatmul.mubr.f32.gmra.mxu0 %v9094_v62  ;;  %v9453_v35 = vpop.f32.mrf.mxu0 }
 0x6c8   : > { %11745 = vmatprep.mubr.f32.mxu0 %v9095_v47  ;;  %v9668_v25 = vpop.f32.mrf.mxu1  ;;  %v9454_v17 = vadd.f32 %v14820_v7, %v9453_v35 }
 0x6c9   : > { %v14940_v29 = vadd.f32 %v9668_v25, %v9444_v38  ;;  %v9455_v42 = vpop.f32.mrf.mxu0  ;;  %v9106_v25 = vld [vmem:[#allocation5 + $0x172] sm:$0xff] }
 0x6ca   : > { %v9670_v6 = vpop.f32.mrf.mxu1 }
 0x6cb   : > { %11746 = vmatmul.mubr.f32.gmra.mxu0 %v9096_v24 }
 0x6cc   : > { %11748 = vmatprep.mubr.f32.mxu0 %v9097_v10  ;;  %v9458_v26 = vpop.f32.mrf.mxu0 }
 0x6cd   : > { %v9673_v22 = vpop.f32.mrf.mxu1  ;;  %v9459_v2 = vadd.f32 %v14820_v7, %v9458_v26 }
 0x6ce   : > { %v14943_v14 = vadd.f32 %v9673_v22, %v9449_v9  ;;  %v9460_v59 = vpop.f32.mrf.mxu0  ;;  %v9109_v9 = vld [vmem:[#allocation5 + $0x19a] sm:$0xff] }
 0x6cf   : > { %11749 = vmatmul.mubr.f32.gmra.mxu0 %v9098_v58  ;;  %v9675_v11 = vpop.f32.mrf.mxu1  ;;  %v9110_v59 = vld [vmem:[#allocation5 + $0x1a2] sm:$0xff] }
 0x6d0   : > { %11751 = vmatprep.mubr.f32.mxu0 %v9099_v27  ;;  %v9329_v27 = vadd.f32 %v14820_v7, %v14208_v33 }
 0x6d1   : > { %v9463_v15 = vpop.f32.mrf.mxu0 }
 0x6d2   : > { %v9678_v44 = vpop.f32.mrf.mxu1  ;;  %v9464_v32 = vadd.f32 %v14820_v7, %v9463_v15 }
 0x6d3   : > { %11752 = vmatmul.mubr.f32.gmra.mxu0 %v9100_v19  ;;  %v14946_v49 = vadd.f32 %v9678_v44, %v9454_v17  ;;  %v9465_v41 = vpop.f32.mrf.mxu0 }
 0x6d4   : > { %11754 = vmatprep.mubr.f32.mxu0 %v9101_v51  ;;  %v9680_v36 = vpop.f32.mrf.mxu1  ;;  %v15253_v51 = vld [vmem:[#allocation22_spill] sm:$0xff] }
 0x6d5   : > { %v9334_v41 = vadd.f32 %v14820_v7, %v15253_v51 }
 0x6d6   : > { %v9468_v57 = vpop.f32.mrf.mxu0 }
 0x6d7   : > { %11755 = vmatmul.mubr.f32.gmra.mxu0 %v9102_v45  ;;  %v9683_v12 = vpop.f32.mrf.mxu1  ;;  %v9469_v24 = vadd.f32 %v14820_v7, %v9468_v57 }
 0x6d8   : > { %11757 = vmatprep.mubr.f32.mxu0 %v9103_v4  ;;  %v14949_v16 = vadd.f32 %v9683_v12, %v9459_v2  ;;  %v9470_v37 = vpop.f32.mrf.mxu0  ;;  %v9559_v12 = vadd.f32 %v14782_v60, %v9334_v41 }
 0x6d9   : > { %v9685_v23 = vpop.f32.mrf.mxu1 }
 0x6db   : > { %11758 = vmatmul.mubr.f32.gmra.mxu0 %v9104_v8  ;;  %v9473_v62 = vpop.f32.mrf.mxu0 }
 0x6dc   : > { %11760 = vmatprep.mubr.f32.mxu0 %v9105_v61  ;;  %v9688_v38 = vpop.f32.mrf.mxu1  ;;  %v9474_v11 = vadd.f32 %v14820_v7, %v9473_v62 }
 0x6dd   : > { %v14952_v47 = vadd.f32 %v9688_v38, %v9464_v32  ;;  %v9475_v35 = vpop.f32.mrf.mxu0 }
 0x6de   : > { %v9690_v42 = vpop.f32.mrf.mxu1 }
 0x6df   : > { %11761 = vmatmul.mubr.f32.gmra.mxu0 %v9106_v25 }
 0x6e0   : > { %11763 = vmatprep.mubr.f32.mxu0 %v14902_v39  ;;  %v9478_v6 = vpop.f32.mrf.mxu0 }
 0x6e1   : > { %v9693_v10 = vpop.f32.mrf.mxu1  ;;  %v9479_v36 = vadd.f32 %v14820_v7, %v9478_v6 }
 0x6e2   : > { %v14956_v26 = vadd.f32 %v9693_v10, %v9469_v24  ;;  %v9480_v22 = vpop.f32.mrf.mxu0 }
 0x6e3   : > { %11764 = vmatmul.mubr.f32.gmra.mxu0 %v14909_v3  ;;  %v9695_v58 = vpop.f32.mrf.mxu1  ;;  %v9554_v3 = vadd.f32 %v14562_v48, %v9329_v27 }
 0x6e4   : > { %11766 = vmatprep.mubr.f32.mxu0 %v9109_v9 }
 0x6e5   : > { %v9483_v17 = vpop.f32.mrf.mxu0 }
 0x6e6   : > { %v9698_v15 = vpop.f32.mrf.mxu1  ;;  %v9484_v8 = vadd.f32 %v14820_v7, %v9483_v17 }
 0x6e7   : > { %v14962_v19 = vadd.f32 %v9698_v15, %v9474_v11  ;;  %11767 = vmatmul.mubr.f32.gmra.mxu0 %v9110_v59  ;;  %v9485_v39 = vpop.f32.mrf.mxu0 }
 0x6e8   : > { %v9700_v44 = vpop.f32.mrf.mxu1 }
 0x6ea   : > { %v9778_v2 = vpop.f32.mrf.mxu0 }
 0x6eb   : > { %v9703_v45 = vpop.f32.mrf.mxu1  ;;  %v9779_v57 = vadd.f32 %v9778_v2, %v9554_v3 }
 0x6ec   : > { %v14968_v33 = vadd.f32 %v9703_v45, %v9479_v36  ;;  %v9780_v4 = vpop.f32.mrf.mxu0 }
 0x6ed   : > { %v9705_v37 = vpop.f32.mrf.mxu1 }
 0x6ee   : > { %v9783_v23 = vpop.f32.mrf.mxu0 }
 0x6ef   : > { %v9784_v32 = vadd.f32 %v9783_v23, %v9559_v12 }
 0x6f0   : > { %v9708_v61 = vpop.f32.mrf.mxu1  ;;  %v9785_v62 = vpop.f32.mrf.mxu0 }
 0x6f1   : > { %v14972_v38 = vadd.f32 %v9708_v61, %v9484_v8 }
 0x6f2   : > { %v9710_v48 = vpop.f32.mrf.mxu1 }
 0x6f3   : > { %v9788_v35 = vpop.f32.mrf.mxu0 }
 0x6f4   : > { %v9789_v25 = vadd.f32 %v9788_v35, %v14831_v0  ;;  %v10003_v42 = vpop.f32.mrf.mxu1 }
 0x6f5   : > { %v14975_v24 = vadd.f32 %v10003_v42, %v9779_v57  ;;  %v9790_v6 = vpop.f32.mrf.mxu0 }
 0x6f6   : > { %v10005_v10 = vpop.f32.mrf.mxu1 }
 0x6f7   : > { %v9793_v9 = vpop.f32.mrf.mxu0 }
 0x6f8   : > { %v9794_v60 = vadd.f32 %v9793_v9, %v14837_v46  ;;  %v10008_v22 = vpop.f32.mrf.mxu1 }
 0x6f9   : > { %v14978_v58 = vadd.f32 %v10008_v22, %v9784_v32  ;;  %v9795_v7 = vpop.f32.mrf.mxu0 }
 0x6fa   : > { %v10010_v59 = vpop.f32.mrf.mxu1 }
 0x6fb   : > { %v9798_v27 = vpop.f32.mrf.mxu0 }
 0x6fc   : > { %v9799_v11 = vadd.f32 %v9798_v27, %v14842_v53  ;;  %v10013_v17 = vpop.f32.mrf.mxu1 }
 0x6fd   : > { %v14981_v15 = vadd.f32 %v10013_v17, %v9789_v25  ;;  %v9800_v0 = vpop.f32.mrf.mxu0 }
 0x6fe   : > { %v10015_v39 = vpop.f32.mrf.mxu1 }
 0x6ff   : > { %v9803_v44 = vpop.f32.mrf.mxu0 }
 0x700   : > { %v9804_v51 = vadd.f32 %v9803_v44, %v14849_v34  ;;  %v10018_v41 = vpop.f32.mrf.mxu1 }
 0x701   : > { %v14984_v3 = vadd.f32 %v10018_v41, %v9794_v60  ;;  %v9805_v46 = vpop.f32.mrf.mxu0 }
 0x702   : > { %v10020_v36 = vpop.f32.mrf.mxu1 }
 0x703   : > { %v9808_v2 = vpop.f32.mrf.mxu0 }
 0x704   : > { %v9809_v45 = vadd.f32 %v9808_v2, %v14856_v30  ;;  %v10023_v57 = vpop.f32.mrf.mxu1 }
 0x705   : > { %v14987_v4 = vadd.f32 %v10023_v57, %v9799_v11  ;;  %v9810_v53 = vpop.f32.mrf.mxu0 }
 0x706   : > { %v10025_v12 = vpop.f32.mrf.mxu1 }
 0x707   : > { %v9813_v37 = vpop.f32.mrf.mxu0 }
 0x708   : > { %v9814_v23 = vadd.f32 %v9813_v37, %v14861_v43  ;;  %v10028_v8 = vpop.f32.mrf.mxu1 }
 0x709   : > { %v14990_v32 = vadd.f32 %v10028_v8, %v9804_v51  ;;  %v9815_v34 = vpop.f32.mrf.mxu0 }
 0x70a   : > { %v10030_v61 = vpop.f32.mrf.mxu1 }
 0x70b   : > { %v9818_v62 = vpop.f32.mrf.mxu0 }
 0x70c   : > { %v9819_v48 = vadd.f32 %v9818_v62, %v14866_v1  ;;  %v10033_v35 = vpop.f32.mrf.mxu1 }
 0x70d   : > { %v14993_v25 = vadd.f32 %v10033_v35, %v9809_v45  ;;  %v9820_v30 = vpop.f32.mrf.mxu0 }
 0x70e   : > { %v10035_v42 = vpop.f32.mrf.mxu1 }
 0x70f   : > { %v9823_v6 = vpop.f32.mrf.mxu0 }
 0x710   : > { %v9824_v10 = vadd.f32 %v9823_v6, %v14873_v55  ;;  %v10038_v9 = vpop.f32.mrf.mxu1 }
 0x711   : > { %v14996_v60 = vadd.f32 %v10038_v9, %v9814_v23  ;;  %v9825_v43 = vpop.f32.mrf.mxu0 }
 0x712   : > { %v10040_v22 = vpop.f32.mrf.mxu1 }
 0x713   : > { %v9828_v7 = vpop.f32.mrf.mxu0 }
 0x714   : > { %v9829_v59 = vadd.f32 %v9828_v7, %v14880_v52  ;;  %v10043_v27 = vpop.f32.mrf.mxu1 }
 0x715   : > { %v14999_v11 = vadd.f32 %v10043_v27, %v9819_v48  ;;  %v9830_v1 = vpop.f32.mrf.mxu0 }
 0x716   : > { %v10045_v17 = vpop.f32.mrf.mxu1 }
 0x717   : > { %v9833_v0 = vpop.f32.mrf.mxu0 }
 0x718   : > { %v9834_v39 = vadd.f32 %v9833_v0, %v14885_v31  ;;  %v10048_v44 = vpop.f32.mrf.mxu1 }
 0x719   : > { %v15002_v51 = vadd.f32 %v10048_v44, %v9824_v10  ;;  %v9835_v55 = vpop.f32.mrf.mxu0 }
 0x71a   : > { %v10050_v41 = vpop.f32.mrf.mxu1 }
 0x71b   : > { %v9838_v46 = vpop.f32.mrf.mxu0 }
 0x71c   : > { %v9839_v36 = vadd.f32 %v9838_v46, %v14890_v28  ;;  %v10053_v2 = vpop.f32.mrf.mxu1 }
 0x71d   : > { %v15005_v45 = vadd.f32 %v10053_v2, %v9829_v59  ;;  %v9840_v52 = vpop.f32.mrf.mxu0 }
 0x71e   : > { %v10055_v57 = vpop.f32.mrf.mxu1 }
 0x71f   : > { %v9843_v53 = vpop.f32.mrf.mxu0 }
 0x720   : > { %v9844_v12 = vadd.f32 %v9843_v53, %v14897_v54  ;;  %v10058_v37 = vpop.f32.mrf.mxu1 }
 0x721   : > { %v15008_v23 = vadd.f32 %v10058_v37, %v9834_v39  ;;  %v9845_v31 = vpop.f32.mrf.mxu0 }
 0x722   : > { %v10060_v8 = vpop.f32.mrf.mxu1 }
 0x723   : > { %v9848_v34 = vpop.f32.mrf.mxu0 }
 0x724   : > { %v9849_v61 = vadd.f32 %v9848_v34, %v14906_v40  ;;  %v10063_v62 = vpop.f32.mrf.mxu1 }
 0x725   : > { %v15011_v48 = vadd.f32 %v10063_v62, %v9839_v36  ;;  %v9850_v28 = vpop.f32.mrf.mxu0 }
 0x726   : > { %v10065_v35 = vpop.f32.mrf.mxu1 }
 0x727   : > { %v9853_v30 = vpop.f32.mrf.mxu0 }
 0x728   : > { %v9854_v42 = vadd.f32 %v9853_v30, %v14913_v5  ;;  %v10068_v6 = vpop.f32.mrf.mxu1 }
 0x729   : > { %v15014_v10 = vadd.f32 %v10068_v6, %v9844_v12  ;;  %v9855_v54 = vpop.f32.mrf.mxu0 }
 0x72a   : > { %v10070_v9 = vpop.f32.mrf.mxu1 }
 0x72b   : > { %v9858_v43 = vpop.f32.mrf.mxu0 }
 0x72c   : > { %v9859_v22 = vadd.f32 %v9858_v43, %v14917_v50  ;;  %v10073_v7 = vpop.f32.mrf.mxu1 }
 0x72d   : > { %v15017_v59 = vadd.f32 %v10073_v7, %v9849_v61  ;;  %v9860_v40 = vpop.f32.mrf.mxu0 }
 0x72e   : > { %v10075_v27 = vpop.f32.mrf.mxu1 }
 0x72f   : > { %v9863_v1 = vpop.f32.mrf.mxu0 }
 0x730   : > { %v9864_v17 = vadd.f32 %v9863_v1, %v14921_v56  ;;  %v10078_v0 = vpop.f32.mrf.mxu1 }
 0x731   : > { %v15020_v39 = vadd.f32 %v10078_v0, %v9854_v42  ;;  %v9865_v5 = vpop.f32.mrf.mxu0 }
 0x732   : > { %v10080_v44 = vpop.f32.mrf.mxu1 }
 0x733   : > { %v9868_v55 = vpop.f32.mrf.mxu0 }
 0x734   : > { %v9869_v41 = vadd.f32 %v9868_v55, %v14925_v20  ;;  %v10083_v46 = vpop.f32.mrf.mxu1 }
 0x735   : > { %v15023_v36 = vadd.f32 %v10083_v46, %v9859_v22  ;;  %v9870_v50 = vpop.f32.mrf.mxu0 }
 0x736   : > { %v10085_v2 = vpop.f32.mrf.mxu1 }
 0x737   : > { %v9873_v52 = vpop.f32.mrf.mxu0 }
 0x738   : > { %v9874_v57 = vadd.f32 %v9873_v52, %v14928_v63  ;;  %v10088_v53 = vpop.f32.mrf.mxu1 }
 0x739   : > { %v15026_v12 = vadd.f32 %v10088_v53, %v9864_v17  ;;  %v9875_v56 = vpop.f32.mrf.mxu0 }
 0x73a   : > { %v10090_v37 = vpop.f32.mrf.mxu1 }
 0x73b   : > { %v9878_v31 = vpop.f32.mrf.mxu0 }
 0x73c   : > { %v9879_v8 = vadd.f32 %v9878_v31, %v14931_v18  ;;  %v10093_v34 = vpop.f32.mrf.mxu1 }
 0x73d   : > { %v15029_v61 = vadd.f32 %v10093_v34, %v9869_v41  ;;  %v9880_v20 = vpop.f32.mrf.mxu0 }
 0x73e   : > { %v10095_v62 = vpop.f32.mrf.mxu1 }
 0x73f   : > { %v9883_v28 = vpop.f32.mrf.mxu0 }
 0x740   : > { %v9884_v35 = vadd.f32 %v9883_v28, %v14934_v13  ;;  %v10098_v30 = vpop.f32.mrf.mxu1 }
 0x741   : > { %v15032_v42 = vadd.f32 %v10098_v30, %v9874_v57  ;;  %v9885_v63 = vpop.f32.mrf.mxu0 }
 0x742   : > { %v10100_v6 = vpop.f32.mrf.mxu1 }
 0x743   : > { %v9888_v54 = vpop.f32.mrf.mxu0 }
 0x744   : > { %v9889_v9 = vadd.f32 %v9888_v54, %v14937_v21  ;;  %v10103_v43 = vpop.f32.mrf.mxu1 }
 0x745   : > { %v15035_v22 = vadd.f32 %v10103_v43, %v9879_v8  ;;  %v9890_v18 = vpop.f32.mrf.mxu0 }
 0x746   : > { %v10105_v7 = vpop.f32.mrf.mxu1 }
 0x747   : > { %v9893_v40 = vpop.f32.mrf.mxu0 }
 0x748   : > { %v9894_v27 = vadd.f32 %v9893_v40, %v14940_v29  ;;  %v10108_v1 = vpop.f32.mrf.mxu1 }
 0x749   : > { %v15038_v17 = vadd.f32 %v10108_v1, %v9884_v35  ;;  %v9895_v13 = vpop.f32.mrf.mxu0 }
 0x74a   : > { %v10110_v0 = vpop.f32.mrf.mxu1 }
 0x74b   : > { %v9898_v5 = vpop.f32.mrf.mxu0 }
 0x74c   : > { %v9899_v44 = vadd.f32 %v9898_v5, %v14943_v14  ;;  %v10113_v55 = vpop.f32.mrf.mxu1 }
 0x74d   : > { %v15041_v41 = vadd.f32 %v10113_v55, %v9889_v9  ;;  %v9900_v21 = vpop.f32.mrf.mxu0 }
 0x74e   : > { %v10115_v46 = vpop.f32.mrf.mxu1 }
 0x74f   : > { %v9903_v50 = vpop.f32.mrf.mxu0 }
 0x750   : > { %v9904_v2 = vadd.f32 %v9903_v50, %v14946_v49  ;;  %v10118_v52 = vpop.f32.mrf.mxu1 }
 0x751   : > { %v15044_v57 = vadd.f32 %v10118_v52, %v9894_v27  ;;  %v9905_v29 = vpop.f32.mrf.mxu0 }
 0x752   : > { %v10120_v53 = vpop.f32.mrf.mxu1 }
 0x753   : > { %v9908_v56 = vpop.f32.mrf.mxu0 }
 0x754   : > { %v9909_v37 = vadd.f32 %v9908_v56, %v14949_v16  ;;  %v10123_v31 = vpop.f32.mrf.mxu1 }
 0x755   : > { %v15047_v8 = vadd.f32 %v10123_v31, %v9899_v44  ;;  %v9910_v14 = vpop.f32.mrf.mxu0 }
 0x756   : > { %v10125_v34 = vpop.f32.mrf.mxu1 }
 0x757   : > { %v9913_v20 = vpop.f32.mrf.mxu0 }
 0x758   : > { %v15050_v62 = vadd.f32 %v9913_v20, %v14952_v47  ;;  %v10128_v28 = vpop.f32.mrf.mxu1 }
 0x759   : > { %v15052_v49 = vadd.f32 %v10128_v28, %v9904_v2  ;;  %v9915_v35 = vpop.f32.mrf.mxu0 }
 0x75a   : > { %v10130_v30 = vpop.f32.mrf.mxu1 }
 0x75b   : > { %v9918_v63 = vpop.f32.mrf.mxu0 }
 0x75c   : > { %v15055_v6 = vadd.f32 %v9918_v63, %v14956_v26  ;;  %v10133_v16 = vpop.f32.mrf.mxu1 }
 0x75d   : > { %v15057_v54 = vadd.f32 %v10133_v16, %v9909_v37  ;;  %v9920_v9 = vpop.f32.mrf.mxu0 }
 0x75e   : > { %v10135_v43 = vpop.f32.mrf.mxu1 }
 0x75f   : > { %v9923_v18 = vpop.f32.mrf.mxu0 }
 0x760   : > { %v15060_v7 = vadd.f32 %v9923_v18, %v14962_v19  ;;  %v15062_v47 = vpop.f32.mrf.mxu1 }
 0x761   : > { %v9925_v40 = vpop.f32.mrf.mxu0 }
 0x762   : > { %v10140_v27 = vpop.f32.mrf.mxu1 }
 0x763   : > { %v9928_v1 = vpop.f32.mrf.mxu0 }
 0x764   : > { %v15066_v13 = vadd.f32 %v9928_v1, %v14968_v33  ;;  %v15068_v26 = vpop.f32.mrf.mxu1 }
 0x765   : > { %v9930_v0 = vpop.f32.mrf.mxu0 }
 0x766   : > { %v10145_v5 = vpop.f32.mrf.mxu1 }
 0x767   : > { %v15071_v44 = vpop.f32.mrf.mxu0 }
 0x768   : > { %v15073_v55 = vpop.f32.mrf.mxu1 }
 0x769   : > { %v9935_v19 = vpop.f32.mrf.mxu0 }
 0x76a   : > { %v10150_v21 = vpop.f32.mrf.mxu1 }
 0x76b   : > { %v11723_v33 = vpop.f32.mrf.mxu0 }
 0x76c   : > { %v15080_v46 = vpop.f32.mrf.mxu1  ;;  %v10234_v50 = vadd.f32 %v11723_v33, %v14978_v58 }
 0x76d   : > { %v10228_v2 = vpop.f32.mrf.mxu0 }
 0x76e   : > { %10388 = vst [vmem:[%s15078_s13 + $0x8] sm:$0xff] %v10234_v50  ;;  %v10155_v52 = vpop.f32.mrf.mxu1  ;;  %v10229_v29 = vadd.f32 %v10228_v2, %v14975_v24 }
 0x76f   : > { %v11726_v53 = vpop.f32.mrf.mxu0 }
 0x770   : > { %10387 = vst [vmem:[%s15078_s13] sm:$0xff] %v10229_v29  ;;  %v15086_v56 = vpop.f32.mrf.mxu1  ;;  %v10244_v37 = vadd.f32 %v11726_v53, %v14984_v3 }
 0x771   : > { %v10238_v31 = vpop.f32.mrf.mxu0 }
 0x772   : > { %10390 = vst [vmem:[%s15078_s13 + $0x18] sm:$0xff] %v10244_v37  ;;  %v10239_v14 = vadd.f32 %v10238_v31, %v14981_v15  ;;  %v10160_v58 = vpop.f32.mrf.mxu1  ;;  %v10139_v37 = vadd.f32 %v15062_v47, %v15050_v62  ;;  %v10144_v62 = vadd.f32 %v15068_v26, %v15055_v6 }
 0x773   : > { %v11729_v34 = vpop.f32.mrf.mxu0 }
 0x774   : > { %10389 = vst [vmem:[%s15078_s13 + $0x10] sm:$0xff] %v10239_v14  ;;  %v10254_v20 = vadd.f32 %v11729_v34, %v14990_v32 }
 0x775   : > { %v10248_v24 = vpop.f32.mrf.mxu0 }
 0x776   : > { %10392 = vst [vmem:[%s15078_s13 + $0x28] sm:$0xff] %v10254_v20  ;;  %v10249_v28 = vadd.f32 %v10248_v24, %v14987_v4 }
 0x777   : > { %v11732_v35 = vpop.f32.mrf.mxu0 }
 0x778   : > { %10391 = vst [vmem:[%s15078_s13 + $0x20] sm:$0xff] %v10249_v28  ;;  %v10264_v3 = vadd.f32 %v11732_v35, %v14996_v60 }
 0x779   : > { %v10258_v30 = vpop.f32.mrf.mxu0 }
 0x77a   : > { %10394 = vst [vmem:[%s15078_s13 + $0x38] sm:$0xff] %v10264_v3  ;;  %v10259_v15 = vadd.f32 %v10258_v30, %v14993_v25 }
 0x77b   : > { %v11735_v63 = vpop.f32.mrf.mxu0 }
 0x77c   : > { %10393 = vst [vmem:[%s15078_s13 + $0x30] sm:$0xff] %v10259_v15  ;;  %v10274_v32 = vadd.f32 %v11735_v63, %v15002_v51 }
 0x77d   : > { %v10268_v16 = vpop.f32.mrf.mxu0 }
 0x77e   : > { %10396 = vst [vmem:[%s15078_s13 + $0x48] sm:$0xff] %v10274_v32  ;;  %v10269_v4 = vadd.f32 %v10268_v16, %v14999_v11 }
 0x77f   : > { %v11738_v9 = vpop.f32.mrf.mxu0 }
 0x780   : > { %10395 = vst [vmem:[%s15078_s13 + $0x40] sm:$0xff] %v10269_v4  ;;  %v10284_v60 = vadd.f32 %v11738_v9, %v15008_v23 }
 0x781   : > { %v10278_v43 = vpop.f32.mrf.mxu0 }
 0x782   : > { %10398 = vst [vmem:[%s15078_s13 + $0x58] sm:$0xff] %v10284_v60  ;;  %v10279_v25 = vadd.f32 %v10278_v43, %v15005_v45 }
 0x783   : > { %v11741_v18 = vpop.f32.mrf.mxu0 }
 0x784   : > { %10397 = vst [vmem:[%s15078_s13 + $0x50] sm:$0xff] %v10279_v25  ;;  %v10294_v51 = vadd.f32 %v11741_v18, %v15014_v10 }
 0x785   : > { %v10288_v40 = vpop.f32.mrf.mxu0 }
 0x786   : > { %10400 = vst [vmem:[%s15078_s13 + $0x68] sm:$0xff] %v10294_v51  ;;  %v10289_v11 = vadd.f32 %v10288_v40, %v15011_v48 }
 0x787   : > { %v11744_v27 = vpop.f32.mrf.mxu0 }
 0x788   : > { %10399 = vst [vmem:[%s15078_s13 + $0x60] sm:$0xff] %v10289_v11  ;;  %v10304_v23 = vadd.f32 %v11744_v27, %v15020_v39 }
 0x789   : > { %v10298_v1 = vpop.f32.mrf.mxu0 }
 0x78a   : > { %10402 = vst [vmem:[%s15078_s13 + $0x78] sm:$0xff] %v10304_v23  ;;  %v10299_v45 = vadd.f32 %v10298_v1, %v15017_v59 }
 0x78b   : > { %v11747_v0 = vpop.f32.mrf.mxu0 }
 0x78c   : > { %10401 = vst [vmem:[%s15078_s13 + $0x70] sm:$0xff] %v10299_v45  ;;  %v10314_v10 = vadd.f32 %v11747_v0, %v15026_v12 }
 0x78d   : > { %v10308_v5 = vpop.f32.mrf.mxu0 }
 0x78e   : > { %10404 = vst [vmem:[%s15078_s13 + $0x88] sm:$0xff] %v10314_v10  ;;  %v10309_v48 = vadd.f32 %v10308_v5, %v15023_v36 }
 0x78f   : > { %v11750_v19 = vpop.f32.mrf.mxu0 }
 0x790   : > { %10403 = vst [vmem:[%s15078_s13 + $0x80] sm:$0xff] %v10309_v48  ;;  %v10324_v39 = vadd.f32 %v11750_v19, %v15032_v42 }
 0x791   : > { %v10318_v21 = vpop.f32.mrf.mxu0 }
 0x792   : > { %10406 = vst [vmem:[%s15078_s13 + $0x98] sm:$0xff] %v10324_v39  ;;  %v10319_v59 = vadd.f32 %v10318_v21, %v15029_v61 }
 0x793   : > { %v11753_v33 = vpop.f32.mrf.mxu0 }
 0x794   : > { %10405 = vst [vmem:[%s15078_s13 + $0x90] sm:$0xff] %v10319_v59  ;;  %v10334_v12 = vadd.f32 %v11753_v33, %v15038_v17 }
 0x795   : > { %v10328_v50 = vpop.f32.mrf.mxu0 }
 0x796   : > { %10408 = vst [vmem:[%s15078_s13 + $0xa8] sm:$0xff] %v10334_v12  ;;  %v10329_v36 = vadd.f32 %v10328_v50, %v15035_v22 }
 0x797   : > { %v11756_v2 = vpop.f32.mrf.mxu0 }
 0x798   : > { %10407 = vst [vmem:[%s15078_s13 + $0xa0] sm:$0xff] %v10329_v36  ;;  %v10344_v52 = vadd.f32 %v11756_v2, %v15044_v57 }
 0x799   : > { %v10338_v42 = vpop.f32.mrf.mxu0 }
 0x79a   : > { %10410 = vst [vmem:[%s15078_s13 + $0xb8] sm:$0xff] %v10344_v52  ;;  %v10339_v29 = vadd.f32 %v10338_v42, %v15041_v41  ;;  %v10149_v41 = vadd.f32 %v15073_v55, %v15060_v7  ;;  %v10154_v55 = vadd.f32 %v15080_v46, %v15066_v13 }
 0x79b   : > { %v11759_v61 = vpop.f32.mrf.mxu0 }
 0x79c   : > { %10409 = vst [vmem:[%s15078_s13 + $0xb0] sm:$0xff] %v10339_v29  ;;  %v10354_v53 = vadd.f32 %v11759_v61, %v15052_v49 }
 0x79d   : > { %v10348_v17 = vpop.f32.mrf.mxu0 }
 0x79e   : > { %10412 = vst [vmem:[%s15078_s13 + $0xc8] sm:$0xff] %v10354_v53  ;;  %v10349_v22 = vadd.f32 %v10348_v17, %v15047_v8  ;;  %v9934_v8 = vadd.f32 %v15071_v44, %v14972_v38 }
 0x79f   : > { %v11762_v31 = vpop.f32.mrf.mxu0 }
 0x7a0   : > { %10411 = vst [vmem:[%s15078_s13 + $0xc0] sm:$0xff] %v10349_v22  ;;  %v10364_v57 = vadd.f32 %v11762_v31, %v10139_v37  ;;  %v10159_v20 = vadd.f32 %v15086_v56, %v9934_v8 }
 0x7a1   : > { %v10358_v14 = vpop.f32.mrf.mxu0 }
 0x7a2   : > { %10414 = vst [vmem:[%s15078_s13 + $0xd8] sm:$0xff] %v10364_v57  ;;  %v10359_v49 = vadd.f32 %v10358_v14, %v15057_v54 }
 0x7a3   : > { %v11765_v58 = vpop.f32.mrf.mxu0 }
 0x7a4   : > { %10413 = vst [vmem:[%s15078_s13 + $0xd0] sm:$0xff] %v10359_v49  ;;  %v10374_v47 = vadd.f32 %v11765_v58, %v10149_v41 }
 0x7a5   : > { %v10368_v34 = vpop.f32.mrf.mxu0 }
 0x7a6   : > { %10416 = vst [vmem:[%s15078_s13 + $0xe8] sm:$0xff] %v10374_v47  ;;  %v10369_v24 = vadd.f32 %v10368_v34, %v10144_v62 }
 0x7a7   : > { %v11768_v7 = vpop.f32.mrf.mxu0 }
 0x7a8   : > { %10415 = vst [vmem:[%s15078_s13 + $0xe0] sm:$0xff] %v10369_v24  ;;  %v10384_v54 = vadd.f32 %v11768_v7, %v10159_v20 }
 0x7a9   : > { %v10378_v28 = vpop.f32.mrf.mxu0 }
 0x7aa   : > { %10418 = vst [vmem:[%s15078_s13 + $0xf8] sm:$0xff] %v10384_v54  ;;  %v10379_v35 = vadd.f32 %v10378_v28, %v10154_v55 }
 0x7ac   : > { %10417 = vst [vmem:[%s15078_s13 + $0xf0] sm:$0xff] %v10379_v35 }
 0x7ad PF: > { %s25_s17 = sadd.s32 1, %s12125_s17  }
 0x7ae   : > { %p22_p8 = scmp.ge.s32.totalorder %s25_s17, 4  }
 0x7b0   :  { %24 = sbr.rel (!%p22_p8) target bundleno = 4 (0x4), region = 138 }
 0x7b5   :  { %10440 = vsyncpa [#allocation7], 1 }
 0x7b6   :  { %10442 = vsyncpa [#allocation7 + $0x1], 1 }
 0x7b7   :  { %10443 = vsyncpa [#allocation9], 1 }
 0x7b8   :  { %10444 = vsyncpa [#allocation12], 1 }
 0x7b9   :  { %10445 = vsyncpa [#allocation15], 1 }

</bundles_post_ra>
